<compile_context>
chip_gen: v7x
topology: tpu7x:2x2x1
jax: 0.10.0
libtpu: 0.0.40
codegen_flags: <defaults>
</compile_context>

<pallas_src>
import math
from functools import partial

import jax
import jax.numpy as jnp
from jax.experimental import pallas as pl
from jax.experimental.pallas import tpu as pltpu

# ---- small synthetic hyper-parameters (CAN uses 684/256/256/512/111) --------
H = 8
W = 8
OUT_CH = 16        # params['encoder']['out_channel']
HIDDEN = 32        # params['decoder']['hidden_size']
INPUT_SIZE = 32    # params['decoder']['input_size']
ATT_DIM = 32       # params['attention']['attention_dim'] (== 2 * num_pos_feats)
WORD_NUM = 16      # params['word_num']
COV_CH = 16        # coverage conv channels (512 in the original Attention)
KS = 11            # coverage conv kernel (11x11, padding 5, no bias)
PAD = KS // 2
MAX_STEPS = 200


def _att_decoder_kernel(
    # inputs (all precomputed / folded in the wrapper)
    trans_ref, emb_tbl_ref, h0_ref, w_gru_ref, b_gru_ref, w_hq_ref,
    w_cov_ref, we_ref, cnn_ctx_ref, b_prob_ref,
    # outputs
    alphas_ref, words_ref, nvalid_ref,
    # scratch
    xh_s, asum_s, word_s, stop_s,
):
    f32 = jnp.float32
    hd = h0_ref.shape[1]
    in_sz = emb_tbl_ref.shape[1]
    wn = emb_tbl_ref.shape[0]
    LA = trans_ref.shape[1]              # H*W*ATT_DIM (flat lane-minor)
    max_steps = alphas_ref.shape[0]

    # ---------------- one-time init (single grid invocation) -----------------
    alphas_ref[...] = jnp.zeros_like(alphas_ref)
    asum_s[...] = jnp.zeros_like(asum_s)         # coverage alpha_sum = 0
    nvalid_ref[0] = 0
    stop_s[0] = 0
    # xh_s = [ word_embedding | hidden ] ; <sos> token id = 1
    xh_s[pl.ds(0, 1), pl.ds(0, in_sz)] = emb_tbl_ref[pl.ds(1, 1), :]
    xh_s[pl.ds(0, 1), pl.ds(in_sz, hd)] = h0_ref[...]

    # ---------------- greedy decode loop (the `while i < 200`) ---------------
    @pl.loop(0, max_steps)
    def _step(t):
        # entire step skipped (near-free) once EOS has been produced
        @pl.when(stop_s[0] == 0)
        def _active():
            xh = xh_s[...]                           # (1, IN+HD) = [emb_t | h_{t-1}]
            h_prev = xh[:, in_sz:]

            # word_input_gru (gate order r|z|n) fused with the embedding head:
            # columns [6*HD:] of w_gru hold w_embw @ w_out, so this one dot also
            # yields word_embedding_weight(emb) projected through word_convert.
            g = jnp.dot(xh, w_gru_ref[...], preferred_element_type=f32) + b_gru_ref[...]
            r = jax.nn.sigmoid(g[:, :hd] + g[:, 3 * hd:4 * hd])
            z = jax.nn.sigmoid(g[:, hd:2 * hd] + g[:, 4 * hd:5 * hd])
            n = jnp.tanh(g[:, 2 * hd:3 * hd] + r * g[:, 5 * hd:6 * hd])
            emb_head = g[:, 6 * hd:]                 # (1, WN)
            hidden = (1.0 - z) * n + z * h_prev      # (1, HD)
            xh_s[pl.ds(0, 1), pl.ds(in_sz, hd)] = hidden

            # attention query fused with the state head (w_state @ w_out columns)
            qs = jnp.dot(hidden, w_hq_ref[...], preferred_element_type=f32)
            att_q = qs[:, :LA]                       # (1, H*W*A), query tiled over H*W
            state_head = qs[:, LA:]                  # (1, WN)

            # coverage attention: one dense (H*W -> H*W*A) matmul on alpha_sum
            asum = asum_s[...]                       # (1, H*W)
            cov = jnp.dot(asum, w_cov_ref[...], preferred_element_type=f32)
            score = jnp.tanh(att_q + trans_ref[...] + cov)        # (1, H*W*A)
            # alpha_convert (A->1 per pixel) as a block-diagonal MXU matmul
            energy = jnp.dot(score, we_ref[...], preferred_element_type=f32)  # (1, H*W)
            # reference exponentiates the raw energy (image_mask all ones)
            e_exp = jnp.exp(energy)
            esum = jnp.sum(e_exp, axis=1, keepdims=True)
            alpha = e_exp * pl.reciprocal(esum + 1e-10, approx=True)          # (1, H*W)
            asum_s[...] = asum + alpha

            # context head: word_context_weight(ctx) folded through word_convert
            ctx_head = jnp.dot(alpha, cnn_ctx_ref[...], preferred_element_type=f32)

            # word_prob = word_convert(state + emb + ctx + counting), biases folded
            word_prob = emb_head + state_head + ctx_head + b_prob_ref[...]    # (1, WN)

            # greedy argmax (first max, like torch.max(dim=1)); all-NaN -> wn -> EOS
            ids = jax.lax.broadcasted_iota(jnp.int32, (1, wn), 1)
            mx = jnp.max(word_prob, axis=1, keepdims=True)
            word_arr = jnp.min(jnp.where(word_prob == mx, ids, wn), axis=1,
                               keepdims=True).astype(jnp.int32)               # (1, 1)
            word_s[...] = word_arr                    # vreg -> scalar bridge

            # next-step embedding as a one-hot matmul (no dynamic-row serialization)
            onehot = (ids == word_arr).astype(f32)    # (1, WN)
            xh_s[pl.ds(0, 1), pl.ds(0, in_sz)] = jnp.dot(
                onehot, emb_tbl_ref[...], preferred_element_type=f32)

            w_id = word_s[0, 0]
            emit = jnp.logical_and(w_id != 0, w_id < wn)

            @pl.when(emit)
            def _emit():
                # t == emitted count here because emit is false only on the stop step
                alphas_ref[pl.ds(t, 1), :] = alpha
                words_ref[t] = w_id
                nvalid_ref[0] = nvalid_ref[0] + 1

            @pl.when(jnp.logical_not(emit))
            def _eos():                               # `if word.item() == 0: return`
                stop_s[0] = 1


def position_embedding_sine(h, w, num_pos_feats, temperature=10000.0, eps=1e-6):
    """DETR/CAN PositionEmbeddingSine with normalize=True and an all-ones mask."""
    scale = 2.0 * math.pi
    ones = jnp.ones((h, w), jnp.float32)
    y_embed = jnp.cumsum(ones, axis=0)
    x_embed = jnp.cumsum(ones, axis=1)
    y_embed = y_embed / (y_embed[-1:, :] + eps) * scale
    x_embed = x_embed / (x_embed[:, -1:] + eps) * scale
    dim_t = jnp.arange(num_pos_feats, dtype=jnp.float32)
    dim_t = temperature ** (2.0 * jnp.floor(dim_t / 2.0) / num_pos_feats)
    pos_x = x_embed[:, :, None] / dim_t
    pos_y = y_embed[:, :, None] / dim_t
    pos_x = jnp.stack([jnp.sin(pos_x[:, :, 0::2]), jnp.cos(pos_x[:, :, 1::2])], axis=3)
    pos_y = jnp.stack([jnp.sin(pos_y[:, :, 0::2]), jnp.cos(pos_y[:, :, 1::2])], axis=3)
    return jnp.concatenate([pos_y.reshape(h, w, num_pos_feats),
                            pos_x.reshape(h, w, num_pos_feats)], axis=-1)     # (h, w, 2*npf)


def init_params(key):
    """Deterministic synthetic parameters (shapes follow AttDecoder.__init__)."""
    def linear(k, fin, fout):
        k1, k2 = jax.random.split(k)
        bound = 1.0 / math.sqrt(fin)
        return (jax.random.uniform(k1, (fin, fout), jnp.float32, -bound, bound),
                jax.random.uniform(k2, (1, fout), jnp.float32, -bound, bound))

    keys = jax.random.split(key, 16)
    p = {}
    p['emb_tbl'] = 0.5 * jax.random.normal(keys[0], (WORD_NUM, INPUT_SIZE), jnp.float32)
    p['w_conv'], p['b_conv'] = linear(keys[1], OUT_CH, ATT_DIM)     # 1x1 encoder_feature_conv
    p['w_init'], p['b_init'] = linear(keys[2], OUT_CH, HIDDEN)      # init_weight
    p['w_cc'], p['b_cc'] = linear(keys[3], WORD_NUM, HIDDEN)        # counting_context_weight
    gb = 1.0 / math.sqrt(HIDDEN)                                    # GRUCell (transposed, r|z|n)
    p['w_ih'] = jax.random.uniform(keys[4], (INPUT_SIZE, 3 * HIDDEN), jnp.float32, -gb, gb)
    p['b_ih'] = jax.random.uniform(keys[5], (1, 3 * HIDDEN), jnp.float32, -gb, gb)
    p['w_hh'] = jax.random.uniform(keys[6], (HIDDEN, 3 * HIDDEN), jnp.float32, -gb, gb)
    p['b_hh'] = jax.random.uniform(keys[7], (1, 3 * HIDDEN), jnp.float32, -gb, gb)
    p['w_hq'], p['b_hq'] = linear(keys[8], HIDDEN, ATT_DIM)         # Attention.hidden_weight
    p['w_cov'] = 0.1 * jax.random.normal(keys[9], (KS * KS, COV_CH), jnp.float32)  # 11x11 taps
    p['w_attw'] = 0.1 * jax.random.normal(keys[10], (COV_CH, ATT_DIM), jnp.float32)
    wa, ba = linear(keys[11], ATT_DIM, 1)                           # Attention.alpha_convert
    p['w_alpha'], p['b_alpha'] = wa.reshape(1, ATT_DIM), ba.reshape(1, 1)
    p['w_state'], p['b_state'] = linear(keys[12], HIDDEN, HIDDEN)   # word_state_weight
    p['w_embw'], p['b_embw'] = linear(keys[13], INPUT_SIZE, HIDDEN)  # word_embedding_weight
    p['w_ctxw'], p['b_ctxw'] = linear(keys[14], OUT_CH, HIDDEN)     # word_context_weight
    p['w_out'], p['b_out'] = linear(keys[15], HIDDEN, WORD_NUM)     # word_convert
    return p


@partial(jax.jit, static_argnames=("max_steps",))
def att_decoder(cnn_features_nchw, counting_preds, params, max_steps=MAX_STEPS):
    b, c, h, w = cnn_features_nchw.shape
    assert b == 1  # reference greedy-decodes one sample (`word.item()`)
    a = ATT_DIM
    hd = HIDDEN
    in_sz = INPUT_SIZE
    wn = WORD_NUM
    L = h * w
    LA = L * a
    f32 = jnp.float32

    # ------------- one-time setup (everything before the decode loop) --------
    cnn_flat = jnp.transpose(cnn_features_nchw[0], (1, 2, 0)).reshape(L, c)   # (L, C)
    pos = position_embedding_sine(h, w, a // 2).reshape(L, a)                 # (L, A)
    trans = cnn_flat @ params['w_conv'] + params['b_conv'] + pos              # 1x1 conv + pos
    trans_flat = (trans + params['b_hq']).reshape(1, LA)        # b_hq folded (loop-invariant)
    hidden0 = jnp.tanh(jnp.mean(cnn_flat, axis=0, keepdims=True) @ params['w_init']
                       + params['b_init'])                                    # init_hidden
    cc = counting_preds @ params['w_cc'] + params['b_cc']                     # (1, HD)

    # fused GRU weights + embedding head: [x|h] @ [[Wih,0,We*Wo],[0,Whh,0]]
    w_gru = jnp.zeros((in_sz + hd, 6 * hd + wn), f32)
    w_gru = w_gru.at[:in_sz, :3 * hd].set(params['w_ih'])
    w_gru = w_gru.at[in_sz:, 3 * hd:6 * hd].set(params['w_hh'])
    w_gru = w_gru.at[:in_sz, 6 * hd:].set(params['w_embw'] @ params['w_out'])
    b_gru = jnp.concatenate([params['b_ih'], params['b_hh'],
                             jnp.zeros((1, wn), f32)], axis=1)

    # query weights tiled over H*W (flat lane-minor) + state head (w_state @ w_out)
    w_hq = jnp.concatenate([jnp.tile(params['w_hq'], (1, L)),
                            params['w_state'] @ params['w_out']], axis=1)     # (HD, LA+WN)

    # coverage 11x11 conv ∘ attention_weight as ONE dense (L, L*A) linear map
    w_cov_att = params['w_cov'] @ params['w_attw']                            # (121, A)
    pi = jnp.repeat(jnp.arange(h), w)                                         # (L,) row of pos
    pj = jnp.tile(jnp.arange(w), h)                                           # (L,) col of pos
    di = pi[:, None] - pi[None, :] + PAD                                      # src - dst + PAD
    dj = pj[:, None] - pj[None, :] + PAD
    valid = (di >= 0) & (di < KS) & (dj >= 0) & (dj < KS)
    tap = jnp.clip(di, 0, KS - 1) * KS + jnp.clip(dj, 0, KS - 1)
    w_cov = jnp.where(valid[:, :, None], w_cov_att[tap], 0.0).reshape(L, LA).astype(f32)

    # alpha_convert as a block-diagonal (L*A, L) matmul; b_alpha (per-pixel constant)
    # cancels in the softmax and is dropped.
    we = (jnp.eye(L, dtype=f32)[:, None, :] *
          params['w_alpha'].reshape(1, a, 1)).reshape(LA, L)

    # context head folded: cnn @ w_ctxw @ w_out  (bias folded into b_prob)
    cnn_ctx = (cnn_flat @ params['w_ctxw']) @ params['w_out']                 # (L, WN)

    # all loop-invariant bias terms (incl. counting context) projected through w_out
    b_prob = ((params['b_state'] + params['b_embw'] + params['b_ctxw'] + cc)
              @ params['w_out'] + params['b_out'])                            # (1, WN)

    inputs = [trans_flat, params['emb_tbl'], hidden0, w_gru, b_gru, w_hq,
              w_cov, we, cnn_ctx, b_prob]
    in_specs = [pl.BlockSpec(x.shape, lambda i, nd=x.ndim: (0,) * nd) for x in inputs]

    out_shape = (
        jax.ShapeDtypeStruct((max_steps, L), jnp.float32),    # attention maps, lane-dense
        jax.ShapeDtypeStruct((max_steps,), jnp.int32),        # greedy word ids (SMEM)
        jax.ShapeDtypeStruct((1,), jnp.int32),                # emitted-step count (SMEM)
    )
    out_specs = (
        pl.BlockSpec((max_steps, L), lambda i: (0, 0)),
        pl.BlockSpec(memory_space=pltpu.MemorySpace.SMEM),
        pl.BlockSpec(memory_space=pltpu.MemorySpace.SMEM),
    )
    scratch_shapes = [
        pltpu.VMEM((1, in_sz + hd), jnp.float32),             # [word_embedding | hidden]
        pltpu.VMEM((1, L), jnp.float32),                      # alpha_sum (flat)
        pltpu.VMEM((1, 1), jnp.int32),                        # word id (vreg->scalar bridge)
        pltpu.SMEM((1,), jnp.int32),                          # stop flag
    ]

    grid_spec = pltpu.PrefetchScalarGridSpec(
        num_scalar_prefetch=0,
        grid=(1,),                       # single invocation; decode loop is in-kernel
        in_specs=in_specs,
        out_specs=out_specs,
        scratch_shapes=scratch_shapes,
    )
    alphas_flat, words_raw, nvalid = pl.pallas_call(
        _att_decoder_kernel,
        out_shape=out_shape,
        grid_spec=grid_spec,
        compiler_params=pltpu.CompilerParams(dimension_semantics=("arbitrary",)),
    )(*inputs)

    n_valid = nvalid[0]
    words = jnp.where(jnp.arange(max_steps, dtype=jnp.int32) < n_valid, words_raw, -1)
    alphas = alphas_flat.reshape(max_steps, h, w)
    return words, alphas, n_valid


if __name__ == "__main__":
    key = jax.random.PRNGKey(0)
    k_par, k_cnn, k_cnt = jax.random.split(key, 3)
    params = init_params(k_par)
    # inputs follow the PyTorch convention: cnn_features NCHW, counting_preds (B, word_num)
    cnn_features = jax.random.normal(k_cnn, (1, OUT_CH, H, W), jnp.float32)
    counting_preds = jax.nn.softplus(jax.random.normal(k_cnt, (1, WORD_NUM), jnp.float32))

    words, alphas, n_valid = att_decoder(cnn_features, counting_preds, params)
    jax.block_until_ready((words, alphas, n_valid))
    print("KERNEL_OK")
</pallas_src>

<mosaic_0001>
module attributes {stable_mosaic.version = 11 : i64} {
  func.func @_att_decoder_kernel(%arg0: i32, %arg1: memref<1x2048xf32, #tpu.memory_space<vmem>>, %arg2: memref<16x32xf32, #tpu.memory_space<vmem>>, %arg3: memref<1x32xf32, #tpu.memory_space<vmem>>, %arg4: memref<64x208xf32, #tpu.memory_space<vmem>>, %arg5: memref<1x208xf32, #tpu.memory_space<vmem>>, %arg6: memref<32x2064xf32, #tpu.memory_space<vmem>>, %arg7: memref<64x2048xf32, #tpu.memory_space<vmem>>, %arg8: memref<2048x64xf32, #tpu.memory_space<vmem>>, %arg9: memref<64x16xf32, #tpu.memory_space<vmem>>, %arg10: memref<1x16xf32, #tpu.memory_space<vmem>>, %arg11: memref<200x64xf32, #tpu.memory_space<vmem>>, %arg12: memref<200xi32, #tpu.memory_space<smem>>, %arg13: memref<1xi32, #tpu.memory_space<smem>>, %arg14: memref<1x64xf32, #tpu.memory_space<vmem>>, %arg15: memref<1x64xf32, #tpu.memory_space<vmem>>, %arg16: memref<1x1xi32, #tpu.memory_space<vmem>>, %arg17: memref<1xi32, #tpu.memory_space<smem>>) attributes {dimension_semantics = [#tpu.dimension_semantics<arbitrary>], iteration_bounds = array<i64: 1>, scalar_prefetch = 0 : i64, scratch_operands = 4 : i64, tpu.core_type = #tpu.core_type<tc>, window_params = [{pipeline_mode = #tpu.pipeline_mode<synchronous>, transform_indices = @transform_0, window_bounds = array<i64: 1, 2048>}, {pipeline_mode = #tpu.pipeline_mode<synchronous>, transform_indices = @transform_1, window_bounds = array<i64: 16, 32>}, {pipeline_mode = #tpu.pipeline_mode<synchronous>, transform_indices = @transform_2, window_bounds = array<i64: 1, 32>}, {pipeline_mode = #tpu.pipeline_mode<synchronous>, transform_indices = @transform_3, window_bounds = array<i64: 64, 208>}, {pipeline_mode = #tpu.pipeline_mode<synchronous>, transform_indices = @transform_4, window_bounds = array<i64: 1, 208>}, {pipeline_mode = #tpu.pipeline_mode<synchronous>, transform_indices = @transform_5, window_bounds = array<i64: 32, 2064>}, {pipeline_mode = #tpu.pipeline_mode<synchronous>, transform_indices = @transform_6, window_bounds = array<i64: 64, 2048>}, {pipeline_mode = #tpu.pipeline_mode<synchronous>, transform_indices = @transform_7, window_bounds = array<i64: 2048, 64>}, {pipeline_mode = #tpu.pipeline_mode<synchronous>, transform_indices = @transform_8, window_bounds = array<i64: 64, 16>}, {pipeline_mode = #tpu.pipeline_mode<synchronous>, transform_indices = @transform_9, window_bounds = array<i64: 1, 16>}, {pipeline_mode = #tpu.pipeline_mode<synchronous>, transform_indices = @transform_10, window_bounds = array<i64: 200, 64>}, {transform_indices = @transform_11, window_bounds = array<i64: 200>}, {transform_indices = @transform_12, window_bounds = array<i64: 1>}]} {
    %cst = arith.constant 0.000000e+00 : f32
    %0 = vector.broadcast %cst : f32 to vector<200x64xf32>
    %c0 = arith.constant 0 : index
    %c0_0 = arith.constant 0 : index
    %1 = vector.load %arg11[%c0, %c0_0] : memref<200x64xf32, #tpu.memory_space<vmem>>, vector<200x64xf32>
    tpu.vector_store %arg11[%c0, %c0_0], %0 {strides = array<i32>} : memref<200x64xf32, #tpu.memory_space<vmem>>, vector<200x64xf32>,
    %cst_1 = arith.constant 0.000000e+00 : f32
    %2 = vector.broadcast %cst_1 : f32 to vector<1x64xf32>
    %c0_2 = arith.constant 0 : index
    %c0_3 = arith.constant 0 : index
    %3 = vector.load %arg15[%c0_2, %c0_3] : memref<1x64xf32, #tpu.memory_space<vmem>>, vector<1x64xf32>
    tpu.vector_store %arg15[%c0_2, %c0_3], %2 {strides = array<i32>} : memref<1x64xf32, #tpu.memory_space<vmem>>, vector<1x64xf32>,
    %c0_i32 = arith.constant 0 : i32
    %c0_4 = arith.constant 0 : index
    %4 = memref.load %arg13[%c0_4] : memref<1xi32, #tpu.memory_space<smem>>
    memref.store %c0_i32, %arg13[%c0_4] : memref<1xi32, #tpu.memory_space<smem>>
    %c0_i32_5 = arith.constant 0 : i32
    %c0_6 = arith.constant 0 : index
    %5 = memref.load %arg17[%c0_6] : memref<1xi32, #tpu.memory_space<smem>>
    memref.store %c0_i32_5, %arg17[%c0_6] : memref<1xi32, #tpu.memory_space<smem>>
    %c1 = arith.constant 1 : index
    %c0_7 = arith.constant 0 : index
    %6 = vector.load %arg2[%c1, %c0_7] : memref<16x32xf32, #tpu.memory_space<vmem>>, vector<1x32xf32>
    %c0_8 = arith.constant 0 : index
    %c0_9 = arith.constant 0 : index
    %7 = vector.load %arg14[%c0_8, %c0_9] : memref<1x64xf32, #tpu.memory_space<vmem>>, vector<1x32xf32>
    tpu.vector_store %arg14[%c0_8, %c0_9], %6 {strides = array<i32>} : memref<1x64xf32, #tpu.memory_space<vmem>>, vector<1x32xf32>,
    %c0_10 = arith.constant 0 : index
    %c0_11 = arith.constant 0 : index
    %8 = vector.load %arg3[%c0_10, %c0_11] : memref<1x32xf32, #tpu.memory_space<vmem>>, vector<1x32xf32>
    %c0_12 = arith.constant 0 : index
    %c32 = arith.constant 32 : index
    %9 = vector.load %arg14[%c0_12, %c32] : memref<1x64xf32, #tpu.memory_space<vmem>>, vector<1x32xf32>
    tpu.vector_store %arg14[%c0_12, %c32], %8 {strides = array<i32>} : memref<1x64xf32, #tpu.memory_space<vmem>>, vector<1x32xf32>,
    %c0_i32_13 = arith.constant 0 : i32
    %c200_i32 = arith.constant 200 : i32
    %10 = arith.addi %c0_i32_13, %c200_i32 : i32
    %c1_i32 = arith.constant 1 : i32
    scf.for %arg18 = %c0_i32_13 to %10 step %c1_i32  : i32 {
      %c1_i32_15 = arith.constant 1 : i32
      %11 = arith.muli %arg18, %c1_i32_15 : i32
      %c0_i32_16 = arith.constant 0 : i32
      %12 = arith.addi %c0_i32_16, %11 : i32
      %c0_17 = arith.constant 0 : index
      %13 = memref.load %arg17[%c0_17] : memref<1xi32, #tpu.memory_space<smem>>
      %c0_i32_18 = arith.constant 0 : i32
      %14 = arith.cmpi eq, %13, %c0_i32_18 : i32
      %15 = arith.extui %14 : i1 to i32
      %c0_i32_19 = arith.constant 0 : i32
      %16 = arith.cmpi ne, %15, %c0_i32_19 : i32
      scf.if %16 {
        %c0_20 = arith.constant 0 : index
        %c0_21 = arith.constant 0 : index
        %17 = vector.load %arg14[%c0_20, %c0_21] : memref<1x64xf32, #tpu.memory_space<vmem>>, vector<1x64xf32>
        %18 = vector.extract_strided_slice %17 {offsets = [0, 32], sizes = [1, 32], strides = [1, 1]} : vector<1x64xf32> to vector<1x32xf32>
        %c0_22 = arith.constant 0 : index
        %c0_23 = arith.constant 0 : index
        %19 = vector.load %arg4[%c0_22, %c0_23] : memref<64x208xf32, #tpu.memory_space<vmem>>, vector<64x208xf32>
        %cst_24 = arith.constant dense<0.000000e+00> : vector<1x208xf32>
        %20 = tpu.matmul %17, %19, %cst_24 {dimension_numbers = #tpu.dot_dimension_numbers<[1], [0], [0], [1], [0, 0, 1, 1], [], []>} : vector<1x64xf32>, vector<64x208xf32>, vector<1x208xf32> -> vector<1x208xf32>
        %c0_25 = arith.constant 0 : index
        %c0_26 = arith.constant 0 : index
        %21 = vector.load %arg5[%c0_25, %c0_26] : memref<1x208xf32, #tpu.memory_space<vmem>>, vector<1x208xf32>
        %22 = arith.addf %20, %21 : vector<1x208xf32>
        %23 = vector.extract_strided_slice %22 {offsets = [0, 0], sizes = [1, 32], strides = [1, 1]} : vector<1x208xf32> to vector<1x32xf32>
        %24 = vector.extract_strided_slice %22 {offsets = [0, 96], sizes = [1, 32], strides = [1, 1]} : vector<1x208xf32> to vector<1x32xf32>
        %25 = arith.addf %23, %24 : vector<1x32xf32>
        %26 = arith.negf %25 : vector<1x32xf32>
        %27 = math.exp %26 : vector<1x32xf32>
        %cst_27 = arith.constant 1.000000e+00 : f32
        %28 = vector.broadcast %cst_27 : f32 to vector<1x32xf32>
        %29 = arith.addf %28, %27 : vector<1x32xf32>
        %30 = arith.divf %28, %29 : vector<1x32xf32>
        %31 = vector.extract_strided_slice %22 {offsets = [0, 32], sizes = [1, 32], strides = [1, 1]} : vector<1x208xf32> to vector<1x32xf32>
        %32 = vector.extract_strided_slice %22 {offsets = [0, 128], sizes = [1, 32], strides = [1, 1]} : vector<1x208xf32> to vector<1x32xf32>
        %33 = arith.addf %31, %32 : vector<1x32xf32>
        %34 = arith.negf %33 : vector<1x32xf32>
        %35 = math.exp %34 : vector<1x32xf32>
        %cst_28 = arith.constant 1.000000e+00 : f32
        %36 = vector.broadcast %cst_28 : f32 to vector<1x32xf32>
        %37 = arith.addf %36, %35 : vector<1x32xf32>
        %38 = arith.divf %36, %37 : vector<1x32xf32>
        %39 = vector.extract_strided_slice %22 {offsets = [0, 64], sizes = [1, 32], strides = [1, 1]} : vector<1x208xf32> to vector<1x32xf32>
        %40 = vector.extract_strided_slice %22 {offsets = [0, 160], sizes = [1, 32], strides = [1, 1]} : vector<1x208xf32> to vector<1x32xf32>
        %41 = arith.mulf %30, %40 : vector<1x32xf32>
        %42 = arith.addf %39, %41 : vector<1x32xf32>
        %43 = math.tanh %42 : vector<1x32xf32>
        %44 = vector.extract_strided_slice %22 {offsets = [0, 192], sizes = [1, 16], strides = [1, 1]} : vector<1x208xf32> to vector<1x16xf32>
        %cst_29 = arith.constant 1.000000e+00 : f32
        %45 = vector.broadcast %cst_29 : f32 to vector<1x32xf32>
        %46 = arith.subf %45, %38 : vector<1x32xf32>
        %47 = arith.mulf %46, %43 : vector<1x32xf32>
        %48 = arith.mulf %38, %18 : vector<1x32xf32>
        %49 = arith.addf %47, %48 : vector<1x32xf32>
        %c0_30 = arith.constant 0 : index
        %c32_31 = arith.constant 32 : index
        %50 = vector.load %arg14[%c0_30, %c32_31] : memref<1x64xf32, #tpu.memory_space<vmem>>, vector<1x32xf32>
        tpu.vector_store %arg14[%c0_30, %c32_31], %49 {strides = array<i32>} : memref<1x64xf32, #tpu.memory_space<vmem>>, vector<1x32xf32>,
        %c0_32 = arith.constant 0 : index
        %c0_33 = arith.constant 0 : index
        %51 = vector.load %arg6[%c0_32, %c0_33] : memref<32x2064xf32, #tpu.memory_space<vmem>>, vector<32x2064xf32>
        %cst_34 = arith.constant dense<0.000000e+00> : vector<1x2064xf32>
        %52 = tpu.matmul %49, %51, %cst_34 {dimension_numbers = #tpu.dot_dimension_numbers<[1], [0], [0], [1], [0, 0, 1, 1], [], []>} : vector<1x32xf32>, vector<32x2064xf32>, vector<1x2064xf32> -> vector<1x2064xf32>
        %53 = vector.extract_strided_slice %52 {offsets = [0, 0], sizes = [1, 2048], strides = [1, 1]} : vector<1x2064xf32> to vector<1x2048xf32>
        %54 = vector.extract_strided_slice %52 {offsets = [0, 2048], sizes = [1, 16], strides = [1, 1]} : vector<1x2064xf32> to vector<1x16xf32>
        %c0_35 = arith.constant 0 : index
        %c0_36 = arith.constant 0 : index
        %55 = vector.load %arg15[%c0_35, %c0_36] : memref<1x64xf32, #tpu.memory_space<vmem>>, vector<1x64xf32>
        %c0_37 = arith.constant 0 : index
        %c0_38 = arith.constant 0 : index
        %56 = vector.load %arg7[%c0_37, %c0_38] : memref<64x2048xf32, #tpu.memory_space<vmem>>, vector<64x2048xf32>
        %cst_39 = arith.constant dense<0.000000e+00> : vector<1x2048xf32>
        %57 = tpu.matmul %55, %56, %cst_39 {dimension_numbers = #tpu.dot_dimension_numbers<[1], [0], [0], [1], [0, 0, 1, 1], [], []>} : vector<1x64xf32>, vector<64x2048xf32>, vector<1x2048xf32> -> vector<1x2048xf32>
        %c0_40 = arith.constant 0 : index
        %c0_41 = arith.constant 0 : index
        %58 = vector.load %arg1[%c0_40, %c0_41] : memref<1x2048xf32, #tpu.memory_space<vmem>>, vector<1x2048xf32>
        %59 = arith.addf %53, %58 : vector<1x2048xf32>
        %60 = arith.addf %59, %57 : vector<1x2048xf32>
        %61 = math.tanh %60 : vector<1x2048xf32>
        %c0_42 = arith.constant 0 : index
        %c0_43 = arith.constant 0 : index
        %62 = vector.load %arg8[%c0_42, %c0_43] : memref<2048x64xf32, #tpu.memory_space<vmem>>, vector<2048x64xf32>
        %cst_44 = arith.constant dense<0.000000e+00> : vector<1x64xf32>
        %63 = tpu.matmul %61, %62, %cst_44 {dimension_numbers = #tpu.dot_dimension_numbers<[1], [0], [0], [1], [0, 0, 1, 1], [], []>} : vector<1x2048xf32>, vector<2048x64xf32>, vector<1x64xf32> -> vector<1x64xf32>
        %64 = math.exp %63 : vector<1x64xf32>
        %cst_45 = arith.constant dense<0.000000e+00> : vector<1xf32>
        %65 = vector.multi_reduction <add>, %64, %cst_45 [1] : vector<1x64xf32> to vector<1xf32>
        %66 = vector.shape_cast %65 : vector<1xf32> to vector<1x1xf32>
        %cst_46 = arith.constant 1.000000e-10 : f32
        %67 = vector.broadcast %cst_46 : f32 to vector<1x1xf32>
        %68 = arith.addf %66, %67 : vector<1x1xf32>
        %69 = tpu.reciprocal %68 {approx = true} : vector<1x1xf32> -> vector<1x1xf32>
        %70 = vector.broadcast %69 : vector<1x1xf32> to vector<1x64xf32>
        %71 = arith.mulf %64, %70 : vector<1x64xf32>
        %72 = arith.addf %55, %71 : vector<1x64xf32>
        %c0_47 = arith.constant 0 : index
        %c0_48 = arith.constant 0 : index
        %73 = vector.load %arg15[%c0_47, %c0_48] : memref<1x64xf32, #tpu.memory_space<vmem>>, vector<1x64xf32>
        tpu.vector_store %arg15[%c0_47, %c0_48], %72 {strides = array<i32>} : memref<1x64xf32, #tpu.memory_space<vmem>>, vector<1x64xf32>,
        %c0_49 = arith.constant 0 : index
        %c0_50 = arith.constant 0 : index
        %74 = vector.load %arg9[%c0_49, %c0_50] : memref<64x16xf32, #tpu.memory_space<vmem>>, vector<64x16xf32>
        %cst_51 = arith.constant dense<0.000000e+00> : vector<1x16xf32>
        %75 = tpu.matmul %71, %74, %cst_51 {dimension_numbers = #tpu.dot_dimension_numbers<[1], [0], [0], [1], [0, 0, 1, 1], [], []>} : vector<1x64xf32>, vector<64x16xf32>, vector<1x16xf32> -> vector<1x16xf32>
        %76 = arith.addf %44, %54 : vector<1x16xf32>
        %77 = arith.addf %76, %75 : vector<1x16xf32>
        %c0_52 = arith.constant 0 : index
        %c0_53 = arith.constant 0 : index
        %78 = vector.load %arg10[%c0_52, %c0_53] : memref<1x16xf32, #tpu.memory_space<vmem>>, vector<1x16xf32>
        %79 = arith.addf %77, %78 : vector<1x16xf32>
        %80 = tpu.iota {dimensions = array<i32: 1>} : vector<1x16xi32>
        %cst_54 = arith.constant dense<0xFF800000> : vector<1xf32>
        %81 = vector.multi_reduction <maximumf>, %79, %cst_54 [1] : vector<1x16xf32> to vector<1xf32>
        %82 = vector.shape_cast %81 : vector<1xf32> to vector<1x1xf32>
        %83 = vector.broadcast %82 : vector<1x1xf32> to vector<1x16xf32>
        %84 = arith.cmpf oeq, %79, %83 : vector<1x16xf32>
        %c16_i32 = arith.constant 16 : i32
        %85 = vector.broadcast %c16_i32 : i32 to vector<1x16xi32>
        %86 = arith.select %84, %80, %85 : vector<1x16xi1>, vector<1x16xi32>
        %cst_55 = arith.constant dense<2147483647> : vector<1xi32>
        %87 = vector.multi_reduction <minsi>, %86, %cst_55 [1] : vector<1x16xi32> to vector<1xi32>
        %88 = vector.shape_cast %87 : vector<1xi32> to vector<1x1xi32>
        %c0_56 = arith.constant 0 : index
        %c0_57 = arith.constant 0 : index
        %89 = vector.load %arg16[%c0_56, %c0_57] : memref<1x1xi32, #tpu.memory_space<vmem>>, vector<1x1xi32>
        tpu.vector_store %arg16[%c0_56, %c0_57], %88 {strides = array<i32>} : memref<1x1xi32, #tpu.memory_space<vmem>>, vector<1x1xi32>,
        %90 = vector.broadcast %88 : vector<1x1xi32> to vector<1x16xi32>
        %91 = arith.cmpi eq, %80, %90 : vector<1x16xi32>
        %92 = arith.extui %91 : vector<1x16xi1> to vector<1x16xi32>
        %93 = arith.sitofp %92 : vector<1x16xi32> to vector<1x16xf32>
        %c0_58 = arith.constant 0 : index
        %c0_59 = arith.constant 0 : index
        %94 = vector.load %arg2[%c0_58, %c0_59] : memref<16x32xf32, #tpu.memory_space<vmem>>, vector<16x32xf32>
        %cst_60 = arith.constant dense<0.000000e+00> : vector<1x32xf32>
        %95 = tpu.matmul %93, %94, %cst_60 {dimension_numbers = #tpu.dot_dimension_numbers<[1], [0], [0], [1], [0, 0, 1, 1], [], []>} : vector<1x16xf32>, vector<16x32xf32>, vector<1x32xf32> -> vector<1x32xf32>
        %c0_61 = arith.constant 0 : index
        %c0_62 = arith.constant 0 : index
        %96 = vector.load %arg14[%c0_61, %c0_62] : memref<1x64xf32, #tpu.memory_space<vmem>>, vector<1x32xf32>
        tpu.vector_store %arg14[%c0_61, %c0_62], %95 {strides = array<i32>} : memref<1x64xf32, #tpu.memory_space<vmem>>, vector<1x32xf32>,
        %c0_63 = arith.constant 0 : index
        %c0_64 = arith.constant 0 : index
        %97 = vector.load %arg16[%c0_63, %c0_64] : memref<1x1xi32, #tpu.memory_space<vmem>>, vector<1x1xi32>
        %98 = vector.extract %97[0, 0] : i32 from vector<1x1xi32>
        %c0_i32_65 = arith.constant 0 : i32
        %99 = arith.cmpi ne, %98, %c0_i32_65 : i32
        %c16_i32_66 = arith.constant 16 : i32
        %100 = arith.cmpi slt, %98, %c16_i32_66 : i32
        %101 = arith.andi %99, %100 : i1
        %102 = arith.extui %101 : i1 to i32
        %c0_i32_67 = arith.constant 0 : i32
        %103 = arith.cmpi ne, %102, %c0_i32_67 : i32
        scf.if %103 {
          %107 = arith.index_cast %12 : i32 to index
          %c0_69 = arith.constant 0 : index
          %108 = vector.load %arg11[%107, %c0_69] : memref<200x64xf32, #tpu.memory_space<vmem>>, vector<1x64xf32>
          tpu.vector_store %arg11[%107, %c0_69], %71 {strides = array<i32>} : memref<200x64xf32, #tpu.memory_space<vmem>>, vector<1x64xf32>,
          %109 = arith.index_cast %12 : i32 to index
          %110 = memref.load %arg12[%109] : memref<200xi32, #tpu.memory_space<smem>>
          memref.store %98, %arg12[%109] : memref<200xi32, #tpu.memory_space<smem>>
          %c0_70 = arith.constant 0 : index
          %111 = memref.load %arg13[%c0_70] : memref<1xi32, #tpu.memory_space<smem>>
          %c1_i32_71 = arith.constant 1 : i32
          %112 = arith.addi %111, %c1_i32_71 : i32
          %c0_72 = arith.constant 0 : index
          %113 = memref.load %arg13[%c0_72] : memref<1xi32, #tpu.memory_space<smem>>
          memref.store %112, %arg13[%c0_72] : memref<1xi32, #tpu.memory_space<smem>>
        } else {
        }
        %true = arith.constant true
        %104 = arith.xori %101, %true : i1
        %105 = arith.extui %104 : i1 to i32
        %c0_i32_68 = arith.constant 0 : i32
        %106 = arith.cmpi ne, %105, %c0_i32_68 : i32
        scf.if %106 {
          %c1_i32_69 = arith.constant 1 : i32
          %c0_70 = arith.constant 0 : index
          %107 = memref.load %arg17[%c0_70] : memref<1xi32, #tpu.memory_space<smem>>
          memref.store %c1_i32_69, %arg17[%c0_70] : memref<1xi32, #tpu.memory_space<smem>>
        } else {
        }
      } else {
      }
    }
    %c200_i32_14 = arith.constant 200 : i32
    return
  }
  func.func @transform_0(%arg0: i32) -> (i32, i32) {
    %c0_i32 = arith.constant 0 : i32
    %c0_i32_0 = arith.constant 0 : i32
    %c0_i32_1 = arith.constant 0 : i32
    return %c0_i32, %c0_i32_0 : i32, i32
  }
  func.func @transform_1(%arg0: i32) -> (i32, i32) {
    %c0_i32 = arith.constant 0 : i32
    %c0_i32_0 = arith.constant 0 : i32
    %c0_i32_1 = arith.constant 0 : i32
    return %c0_i32, %c0_i32_0 : i32, i32
  }
  func.func @transform_2(%arg0: i32) -> (i32, i32) {
    %c0_i32 = arith.constant 0 : i32
    %c0_i32_0 = arith.constant 0 : i32
    %c0_i32_1 = arith.constant 0 : i32
    return %c0_i32, %c0_i32_0 : i32, i32
  }
  func.func @transform_3(%arg0: i32) -> (i32, i32) {
    %c0_i32 = arith.constant 0 : i32
    %c0_i32_0 = arith.constant 0 : i32
    %c0_i32_1 = arith.constant 0 : i32
    return %c0_i32, %c0_i32_0 : i32, i32
  }
  func.func @transform_4(%arg0: i32) -> (i32, i32) {
    %c0_i32 = arith.constant 0 : i32
    %c0_i32_0 = arith.constant 0 : i32
    %c0_i32_1 = arith.constant 0 : i32
    return %c0_i32, %c0_i32_0 : i32, i32
  }
  func.func @transform_5(%arg0: i32) -> (i32, i32) {
    %c0_i32 = arith.constant 0 : i32
    %c0_i32_0 = arith.constant 0 : i32
    %c0_i32_1 = arith.constant 0 : i32
    return %c0_i32, %c0_i32_0 : i32, i32
  }
  func.func @transform_6(%arg0: i32) -> (i32, i32) {
    %c0_i32 = arith.constant 0 : i32
    %c0_i32_0 = arith.constant 0 : i32
    %c0_i32_1 = arith.constant 0 : i32
    return %c0_i32, %c0_i32_0 : i32, i32
  }
  func.func @transform_7(%arg0: i32) -> (i32, i32) {
    %c0_i32 = arith.constant 0 : i32
    %c0_i32_0 = arith.constant 0 : i32
    %c0_i32_1 = arith.constant 0 : i32
    return %c0_i32, %c0_i32_0 : i32, i32
  }
  func.func @transform_8(%arg0: i32) -> (i32, i32) {
    %c0_i32 = arith.constant 0 : i32
    %c0_i32_0 = arith.constant 0 : i32
    %c0_i32_1 = arith.constant 0 : i32
    return %c0_i32, %c0_i32_0 : i32, i32
  }
  func.func @transform_9(%arg0: i32) -> (i32, i32) {
    %c0_i32 = arith.constant 0 : i32
    %c0_i32_0 = arith.constant 0 : i32
    %c0_i32_1 = arith.constant 0 : i32
    return %c0_i32, %c0_i32_0 : i32, i32
  }
  func.func @transform_10(%arg0: i32) -> (i32, i32) {
    %c0_i32 = arith.constant 0 : i32
    %c0_i32_0 = arith.constant 0 : i32
    %c0_i32_1 = arith.constant 0 : i32
    return %c0_i32, %c0_i32_0 : i32, i32
  }
  func.func @transform_11(%arg0: i32) -> i32 {
    %c0_i32 = arith.constant 0 : i32
    %c0_i32_0 = arith.constant 0 : i32
    return %c0_i32 : i32
  }
  func.func @transform_12(%arg0: i32) -> i32 {
    %c0_i32 = arith.constant 0 : i32
    %c0_i32_0 = arith.constant 0 : i32
    return %c0_i32 : i32
  }
}

</mosaic_0001>

<bundles_post_ra>
// kernel: tile.15
= control target key start
LH: loop header
LB: loop body
LE: loop exit
PB: predicated region body
PF: predicated region fallthrough
CT: control target
= control target key end

     0   :  { %vm451_vm0 = vcmask 1041409   ;;  %vm455_vm1 = vcmask 1042434   ;;  %vm459_vm2 = vcmask 1043459   ;;  %vm463_vm3 = vcmask 1044484   ;;  %s9081_s27 = smov 96   ;;  %s9082_s14 = smov 64   ;;  %s16995_s0 = inlined_call_operand.vmem [shape: f32[32,64,32], index: 0, kind: input, shape index: {}]   ;;  %s16996_s1 = inlined_call_operand.vmem [shape: f32[32,2048], index: 1, kind: output, shape index: {}]  }
   0x1   :  { %vm467_vm4 = vcmask 1045509   ;;  %vm471_vm5 = vcmask 1046534   ;;  %vm475_vm6 = vcmask 1047559   ;;  %v7370_v0 = vld [vmem:[%s16995_s0 + $0x23] sm:$0x1]   ;;  %vm3_vm7 = vcmask 261120  }
   0x2   :  { %v7371_v1 = vld [vmem:[%s16995_s0 + $0x62] sm:$0x2]   ;;  %v7379_v24 = vld [vmem:[%s16995_s0 + $0x33] sm:$0x1]   ;;  %vm479_vm8 = vcmask 1048320   ;;  %vm2718_vm9 = vcmask 785920  }
   0x3   :  { %v7372_v2 = vld [vmem:[%s16995_s0 + $0xa1] sm:$0x4]   ;;  %v521_v4 = vsel %vm451_vm0, %v7371_v1, %v7370_v0  ;;  %v7380_v25 = vld [vmem:[%s16995_s0 + $0x72] sm:$0x2]   ;;  %s9083_s3 = smov 32   ;;  %vm4957_vm10 = vcmask 523520  }
   0x4   :  { %v7373_v3 = vld [vmem:[%s16995_s0 + $0xe0] sm:$0x8]   ;;  %v525_v8 = vsel %vm455_vm1, %v7372_v2, %v521_v4  ;;  %v7381_v26 = vld [vmem:[%s16995_s0 + $0xb1] sm:$0x4]   ;;  %v556_v29 = vsel %vm451_vm0, %v7380_v25, %v7379_v24 }
   0x5   :  { %v7374_v5 = vld [vmem:[%s16995_s0 + $0x11f] sm:$0x10]   ;;  %v529_v12 = vsel %vm459_vm2, %v7373_v3, %v525_v8  ;;  %v7382_v30 = vld [vmem:[%s16995_s0 + $0xf0] sm:$0x8]   ;;  %v560_v35 = vsel %vm455_vm1, %v7381_v26, %v556_v29 }
   0x6   :  { %v7375_v6 = vld [vmem:[%s16995_s0 + $0x15e] sm:$0x20]   ;;  %v533_v17 = vsel %vm463_vm3, %v7374_v5, %v529_v12  ;;  %v7383_v31 = vld [vmem:[%s16995_s0 + $0x12f] sm:$0x10]   ;;  %v564_v40 = vsel %vm459_vm2, %v7382_v30, %v560_v35 }
   0x7   :  { %v7376_v7 = vld [vmem:[%s16995_s0 + $0x19d] sm:$0x40]   ;;  %v537_v22 = vsel %vm467_vm4, %v7375_v6, %v533_v17  ;;  %v7384_v32 = vld [vmem:[%s16995_s0 + $0x16e] sm:$0x20]   ;;  %v568_v45 = vsel %vm463_vm3, %v7383_v31, %v564_v40 }
   0x8   :  { %v7377_v9 = vld [vmem:[%s16995_s0 + $0x1dc] sm:$0x80]   ;;  %v541_v27 = vsel %vm471_vm5, %v7376_v7, %v537_v22  ;;  %v7385_v36 = vld [vmem:[%s16995_s0 + $0x1ad] sm:$0x40]   ;;  %v572_v50 = vsel %vm467_vm4, %v7384_v32, %v568_v45 }
   0x9   :  { %v7353_v10 = vld [vmem:[%s16995_s0 + $0x3] sm:$0x1]   ;;  %v545_v33 = vsel %vm475_vm6, %v7377_v9, %v541_v27  ;;  %v7386_v37 = vld [vmem:[%s16995_s0 + $0x1ec] sm:$0x80]   ;;  %v576_v55 = vsel %vm471_vm5, %v7385_v36, %v572_v50 }
   0xa   :  { %v7354_v11 = vld [vmem:[%s16995_s0 + $0x42] sm:$0x2]   ;;  %v7361_v38 = vld [vmem:[%s16995_s0 + $0x13] sm:$0x1]   ;;  %546 = vrot.lane.b32.xlu1 %v545_v33, %s9081_s27  ;;  %v580_v61 = vsel %vm475_vm6, %v7386_v37, %v576_v55 }
   0xb   :  { %v452_v13 = vsel %vm451_vm0, %v7354_v11, %v7353_v10  ;;  %v7355_v14 = vld [vmem:[%s16995_s0 + $0x81] sm:$0x4]   ;;  %v7362_v41 = vld [vmem:[%s16995_s0 + $0x52] sm:$0x2]  }
   0xc   :  { %v7356_v15 = vld [vmem:[%s16995_s0 + $0xc0] sm:$0x8]   ;;  %v456_v18 = vsel %vm455_vm1, %v7355_v14, %v452_v13  ;;  %v7363_v42 = vld [vmem:[%s16995_s0 + $0x91] sm:$0x4]   ;;  %v486_v46 = vsel %vm451_vm0, %v7362_v41, %v7361_v38 }
   0xd   :  { %v7357_v16 = vld [vmem:[%s16995_s0 + $0xff] sm:$0x10]   ;;  %v460_v23 = vsel %vm459_vm2, %v7356_v15, %v456_v18  ;;  %v7364_v43 = vld [vmem:[%s16995_s0 + $0xd0] sm:$0x8]   ;;  %v490_v51 = vsel %vm455_vm1, %v7363_v42, %v486_v46 }
   0xe   :  { %v7358_v19 = vld [vmem:[%s16995_s0 + $0x13e] sm:$0x20]   ;;  %v464_v28 = vsel %vm463_vm3, %v7357_v16, %v460_v23  ;;  %v7365_v47 = vld [vmem:[%s16995_s0 + $0x10f] sm:$0x10]   ;;  %v494_v56 = vsel %vm459_vm2, %v7364_v43, %v490_v51  ;;  %581 = vrot.lane.b32.xlu1 %v580_v61, %s9081_s27 }
   0xf   :  { %v7359_v20 = vld [vmem:[%s16995_s0 + $0x17d] sm:$0x40]   ;;  %v468_v34 = vsel %vm467_vm4, %v7358_v19, %v464_v28  ;;  %v7366_v48 = vld [vmem:[%s16995_s0 + $0x14e] sm:$0x20]   ;;  %v498_v62 = vsel %vm463_vm3, %v7365_v47, %v494_v56 }
  0x10   :  { %v7360_v21 = vld [vmem:[%s16995_s0 + $0x1bc] sm:$0x80]   ;;  %v472_v39 = vsel %vm471_vm5, %v7359_v20, %v468_v34  ;;  %v7367_v49 = vld [vmem:[%s16995_s0 + $0x18d] sm:$0x40]   ;;  %v502_v3 = vsel %vm467_vm4, %v7366_v48, %v498_v62 }
  0x11   :  { %v476_v44 = vsel %vm475_vm6, %v7360_v21, %v472_v39  ;;  %v7368_v52 = vld [vmem:[%s16995_s0 + $0x1cc] sm:$0x80]   ;;  %v7388_v5 = vld [vmem:[%s16995_s0 + $0x203] sm:$0x1]   ;;  %v506_v8 = vsel %vm471_vm5, %v7367_v49, %v502_v3 }
  0x12   :  { %477 = vrot.lane.b32.xlu0 %v476_v44, %s9081_s27  ;;  %v7397_v53 = vld [vmem:[%s16995_s0 + $0x213] sm:$0x1]   ;;  %v7389_v6 = vld [vmem:[%s16995_s0 + $0x242] sm:$0x2]   ;;  %v510_v14 = vsel %vm475_vm6, %v7368_v52, %v506_v8 }
  0x13   :  { %v7398_v54 = vld [vmem:[%s16995_s0 + $0x252] sm:$0x2]   ;;  %v7390_v7 = vld [vmem:[%s16995_s0 + $0x281] sm:$0x4]   ;;  %v591_v10 = vsel %vm451_vm0, %v7389_v6, %v7388_v5 }
  0x14   :  { %v626_v57 = vsel %vm451_vm0, %v7398_v54, %v7397_v53  ;;  %v7399_v58 = vld [vmem:[%s16995_s0 + $0x291] sm:$0x4]   ;;  %v7391_v11 = vld [vmem:[%s16995_s0 + $0x2c0] sm:$0x8]   ;;  %v595_v16 = vsel %vm455_vm1, %v7390_v7, %v591_v10 }
  0x15   :  { %v7400_v59 = vld [vmem:[%s16995_s0 + $0x2d0] sm:$0x8]   ;;  %v630_v63 = vsel %vm455_vm1, %v7399_v58, %v626_v57  ;;  %v7392_v12 = vld [vmem:[%s16995_s0 + $0x2ff] sm:$0x10]   ;;  %v599_v21 = vsel %vm459_vm2, %v7391_v11, %v595_v16 }
  0x16   :  { %v7401_v60 = vld [vmem:[%s16995_s0 + $0x30f] sm:$0x10]   ;;  %v634_v4 = vsel %vm459_vm2, %v7400_v59, %v630_v63  ;;  %v7393_v13 = vld [vmem:[%s16995_s0 + $0x33e] sm:$0x20]   ;;  %511 = vrot.lane.b32.xlu0 %v510_v14, %s9081_s27  ;;  %v603_v26 = vsel %vm463_vm3, %v7392_v12, %v599_v21 }
  0x17   :  { %v7402_v0 = vld [vmem:[%s16995_s0 + $0x34e] sm:$0x20]   ;;  %v638_v9 = vsel %vm463_vm3, %v7401_v60, %v634_v4  ;;  %v7394_v17 = vld [vmem:[%s16995_s0 + $0x37d] sm:$0x40]   ;;  %v607_v31 = vsel %vm467_vm4, %v7393_v13, %v603_v26 }
  0x18   :  { %v7403_v1 = vld [vmem:[%s16995_s0 + $0x38d] sm:$0x40]   ;;  %v642_v15 = vsel %vm467_vm4, %v7402_v0, %v638_v9  ;;  %v7395_v18 = vld [vmem:[%s16995_s0 + $0x3bc] sm:$0x80]   ;;  %v611_v36 = vsel %vm471_vm5, %v7394_v17, %v607_v31 }
  0x19   :  { %v7404_v2 = vld [vmem:[%s16995_s0 + $0x3cc] sm:$0x80]   ;;  %v646_v20 = vsel %vm471_vm5, %v7403_v1, %v642_v15  ;;  %v7406_v34 = vld [vmem:[%s16995_s0 + $0x223] sm:$0x1]   ;;  %v615_v42 = vsel %vm475_vm6, %v7395_v18, %v611_v36 }
  0x1a   :  { %v7415_v19 = vld [vmem:[%s16995_s0 + $0x233] sm:$0x1]   ;;  %v650_v25 = vsel %vm475_vm6, %v7404_v2, %v646_v20  ;;  %v7407_v35 = vld [vmem:[%s16995_s0 + $0x262] sm:$0x2]   ;;  %616 = vrot.lane.b32.xlu0 %v615_v42, %s9081_s27 }
  0x1b   :  { %v7416_v22 = vld [vmem:[%s16995_s0 + $0x272] sm:$0x2]   ;;  %651 = vrot.lane.b32.xlu1 %v650_v25, %s9081_s27  ;;  %v661_v38 = vsel %vm451_vm0, %v7407_v35, %v7406_v34  ;;  %v7408_v39 = vld [vmem:[%s16995_s0 + $0x2a1] sm:$0x4]  }
  0x1c   :  { %v7417_v23 = vld [vmem:[%s16995_s0 + $0x2b1] sm:$0x4]   ;;  %v696_v27 = vsel %vm451_vm0, %v7416_v22, %v7415_v19  ;;  %v7409_v40 = vld [vmem:[%s16995_s0 + $0x2e0] sm:$0x8]   ;;  %v665_v44 = vsel %vm455_vm1, %v7408_v39, %v661_v38 }
  0x1d   :  { %v7418_v24 = vld [vmem:[%s16995_s0 + $0x2f0] sm:$0x8]   ;;  %v700_v32 = vsel %vm455_vm1, %v7417_v23, %v696_v27  ;;  %v7410_v41 = vld [vmem:[%s16995_s0 + $0x31f] sm:$0x10]   ;;  %v669_v49 = vsel %vm459_vm2, %v7409_v40, %v665_v44 }
  0x1e   :  { %v7419_v28 = vld [vmem:[%s16995_s0 + $0x32f] sm:$0x10]   ;;  %v704_v37 = vsel %vm459_vm2, %v7418_v24, %v700_v32  ;;  %v7411_v45 = vld [vmem:[%s16995_s0 + $0x35e] sm:$0x20]   ;;  %v673_v54 = vsel %vm463_vm3, %v7410_v41, %v669_v49 }
  0x1f   :  { %v7420_v29 = vld [vmem:[%s16995_s0 + $0x36e] sm:$0x20]   ;;  %v708_v43 = vsel %vm463_vm3, %v7419_v28, %v704_v37  ;;  %v7412_v46 = vld [vmem:[%s16995_s0 + $0x39d] sm:$0x40]   ;;  %v677_v60 = vsel %vm467_vm4, %v7411_v45, %v673_v54 }
  0x20   :  { %v7421_v30 = vld [vmem:[%s16995_s0 + $0x3ad] sm:$0x40]   ;;  %v7413_v47 = vld [vmem:[%s16995_s0 + $0x3dc] sm:$0x80]   ;;  %v712_v48 = vsel %vm467_vm4, %v7420_v29, %v708_v43  ;;  %v681_v1 = vsel %vm471_vm5, %v7412_v46, %v677_v60 }
  0x21   :  { %v7422_v33 = vld [vmem:[%s16995_s0 + $0x3ec] sm:$0x80]   ;;  %v716_v53 = vsel %vm471_vm5, %v7421_v30, %v712_v48  ;;  %v7424_v0 = vld [vmem:[%s16995_s0 + $0x403] sm:$0x1]   ;;  %v685_v6 = vsel %vm475_vm6, %v7413_v47, %v681_v1 }
  0x22   :  { %v7433_v50 = vld [vmem:[%s16995_s0 + $0x413] sm:$0x1]   ;;  %v720_v59 = vsel %vm475_vm6, %v7422_v33, %v716_v53  ;;  %v7425_v3 = vld [vmem:[%s16995_s0 + $0x442] sm:$0x2]   ;;  %686 = vrot.lane.b32.xlu0 %v685_v6, %s9081_s27 }
  0x23   :  { %v7434_v51 = vld [vmem:[%s16995_s0 + $0x452] sm:$0x2]   ;;  %721 = vrot.lane.b32.xlu1 %v720_v59, %s9081_s27  ;;  %v7426_v4 = vld [vmem:[%s16995_s0 + $0x481] sm:$0x4]   ;;  %v731_v8 = vsel %vm451_vm0, %v7425_v3, %v7424_v0 }
  0x24   :  { %v7435_v52 = vld [vmem:[%s16995_s0 + $0x491] sm:$0x4]   ;;  %v766_v55 = vsel %vm451_vm0, %v7434_v51, %v7433_v50  ;;  %v7427_v5 = vld [vmem:[%s16995_s0 + $0x4c0] sm:$0x8]   ;;  %v735_v13 = vsel %vm455_vm1, %v7426_v4, %v731_v8 }
  0x25   :  { %v7436_v56 = vld [vmem:[%s16995_s0 + $0x4d0] sm:$0x8]   ;;  %v770_v61 = vsel %vm455_vm1, %v7435_v52, %v766_v55  ;;  %v7428_v9 = vld [vmem:[%s16995_s0 + $0x4ff] sm:$0x10]   ;;  %v739_v18 = vsel %vm459_vm2, %v7427_v5, %v735_v13 }
  0x26   :  { %v7437_v57 = vld [vmem:[%s16995_s0 + $0x50f] sm:$0x10]   ;;  %v774_v2 = vsel %vm459_vm2, %v7436_v56, %v770_v61  ;;  %v7429_v10 = vld [vmem:[%s16995_s0 + $0x53e] sm:$0x20]   ;;  %v743_v24 = vsel %vm463_vm3, %v7428_v9, %v739_v18 }
  0x27   :  { %v7438_v58 = vld [vmem:[%s16995_s0 + $0x54e] sm:$0x20]   ;;  %v778_v7 = vsel %vm463_vm3, %v7437_v57, %v774_v2  ;;  %v7430_v11 = vld [vmem:[%s16995_s0 + $0x57d] sm:$0x40]   ;;  %v747_v29 = vsel %vm467_vm4, %v7429_v10, %v743_v24 }
  0x28   :  { %v7439_v62 = vld [vmem:[%s16995_s0 + $0x58d] sm:$0x40]   ;;  %v782_v12 = vsel %vm467_vm4, %v7438_v58, %v778_v7  ;;  %v7431_v14 = vld [vmem:[%s16995_s0 + $0x5bc] sm:$0x80]   ;;  %v751_v34 = vsel %vm471_vm5, %v7430_v11, %v747_v29 }
  0x29   :  { %v7440_v63 = vld [vmem:[%s16995_s0 + $0x5cc] sm:$0x80]   ;;  %v786_v17 = vsel %vm471_vm5, %v7439_v62, %v782_v12  ;;  %v7442_v31 = vld [vmem:[%s16995_s0 + $0x423] sm:$0x1]   ;;  %v755_v40 = vsel %vm475_vm6, %v7431_v14, %v751_v34 }
  0x2a   :  { %v7451_v15 = vld [vmem:[%s16995_s0 + $0x433] sm:$0x1]   ;;  %v790_v23 = vsel %vm475_vm6, %v7440_v63, %v786_v17  ;;  %v7443_v32 = vld [vmem:[%s16995_s0 + $0x462] sm:$0x2]   ;;  %756 = vrot.lane.b32.xlu0 %v755_v40, %s9081_s27 }
  0x2b   :  { %v7452_v16 = vld [vmem:[%s16995_s0 + $0x472] sm:$0x2]   ;;  %791 = vrot.lane.b32.xlu1 %v790_v23, %s9081_s27  ;;  %v7444_v33 = vld [vmem:[%s16995_s0 + $0x4a1] sm:$0x4]   ;;  %v801_v36 = vsel %vm451_vm0, %v7443_v32, %v7442_v31 }
  0x2c   :  { %v836_v19 = vsel %vm451_vm0, %v7452_v16, %v7451_v15  ;;  %v7453_v20 = vld [vmem:[%s16995_s0 + $0x4b1] sm:$0x4]   ;;  %v7445_v37 = vld [vmem:[%s16995_s0 + $0x4e0] sm:$0x8]   ;;  %v805_v42 = vsel %vm455_vm1, %v7444_v33, %v801_v36 }
  0x2d   :  { %v7454_v21 = vld [vmem:[%s16995_s0 + $0x4f0] sm:$0x8]   ;;  %v840_v25 = vsel %vm455_vm1, %v7453_v20, %v836_v19  ;;  %v7446_v38 = vld [vmem:[%s16995_s0 + $0x51f] sm:$0x10]   ;;  %v809_v47 = vsel %vm459_vm2, %v7445_v37, %v805_v42  ;;  %v7506_v42 = vld [vmem:[%s16995_s0 + $0x56] sm:$0x2]  }
  0x2e   :  { %v7455_v22 = vld [vmem:[%s16995_s0 + $0x52f] sm:$0x10]   ;;  %v844_v30 = vsel %vm459_vm2, %v7454_v21, %v840_v25  ;;  %v7447_v39 = vld [vmem:[%s16995_s0 + $0x55e] sm:$0x20]   ;;  %v813_v52 = vsel %vm463_vm3, %v7446_v38, %v809_v47  ;;  %v7508_v47 = vld [vmem:[%s16995_s0 + $0xd4] sm:$0x8]  }
  0x2f   :  { %v7456_v26 = vld [vmem:[%s16995_s0 + $0x56e] sm:$0x20]   ;;  %v848_v35 = vsel %vm463_vm3, %v7455_v22, %v844_v30  ;;  %v7448_v43 = vld [vmem:[%s16995_s0 + $0x59d] sm:$0x40]   ;;  %v817_v57 = vsel %vm467_vm4, %v7447_v39, %v813_v52  ;;  %v7510_v52 = vld [vmem:[%s16995_s0 + $0x152] sm:$0x20]  }
  0x30   :  { %v7457_v27 = vld [vmem:[%s16995_s0 + $0x5ad] sm:$0x40]   ;;  %v852_v41 = vsel %vm467_vm4, %v7456_v26, %v848_v35  ;;  %v7449_v44 = vld [vmem:[%s16995_s0 + $0x5dc] sm:$0x80]   ;;  %v821_v62 = vsel %vm471_vm5, %v7448_v43, %v817_v57  ;;  %v7496_v57 = vld [vmem:[%s16995_s0 + $0x7] sm:$0x1]  }
  0x31   :  { %v7458_v28 = vld [vmem:[%s16995_s0 + $0x5ec] sm:$0x80]   ;;  %v856_v46 = vsel %vm471_vm5, %v7457_v27, %v852_v41  ;;  %v7460_v60 = vld [vmem:[%s16995_s0 + $0x603] sm:$0x1]   ;;  %v825_v4 = vsel %vm475_vm6, %v7449_v44, %v821_v62  ;;  %v7505_v41 = vld [vmem:[%s16995_s0 + $0x17] sm:$0x1]  }
  0x32   :  { %v7469_v45 = vld [vmem:[%s16995_s0 + $0x613] sm:$0x1]   ;;  %v860_v51 = vsel %vm475_vm6, %v7458_v28, %v856_v46  ;;  %v7461_v61 = vld [vmem:[%s16995_s0 + $0x642] sm:$0x2]   ;;  %826 = vrot.lane.b32.xlu0 %v825_v4, %s9081_s27  ;;  %v7507_v46 = vld [vmem:[%s16995_s0 + $0x95] sm:$0x4]  }
  0x33   :  { %v7470_v48 = vld [vmem:[%s16995_s0 + $0x652] sm:$0x2]   ;;  %861 = vrot.lane.b32.xlu1 %v860_v51, %s9081_s27  ;;  %v871_v0 = vsel %vm451_vm0, %v7461_v61, %v7460_v60  ;;  %v7462_v1 = vld [vmem:[%s16995_s0 + $0x681] sm:$0x4]  }
  0x34   :  { %v7471_v49 = vld [vmem:[%s16995_s0 + $0x691] sm:$0x4]   ;;  %v906_v53 = vsel %vm451_vm0, %v7470_v48, %v7469_v45  ;;  %v7463_v2 = vld [vmem:[%s16995_s0 + $0x6c0] sm:$0x8]   ;;  %v875_v6 = vsel %vm455_vm1, %v7462_v1, %v871_v0  ;;  %v1046_v45 = vsel %vm451_vm0, %v7506_v42, %v7505_v41  ;;  %v7509_v48 = vld [vmem:[%s16995_s0 + $0x113] sm:$0x10]  }
  0x35   :  { %v7472_v50 = vld [vmem:[%s16995_s0 + $0x6d0] sm:$0x8]   ;;  %v910_v58 = vsel %vm455_vm1, %v7471_v49, %v906_v53  ;;  %v7464_v3 = vld [vmem:[%s16995_s0 + $0x6ff] sm:$0x10]   ;;  %v879_v11 = vsel %vm459_vm2, %v7463_v2, %v875_v6  ;;  %v1050_v51 = vsel %vm455_vm1, %v7507_v46, %v1046_v45  ;;  %v7511_v53 = vld [vmem:[%s16995_s0 + $0x191] sm:$0x40]  }
  0x36   :  { %v7473_v54 = vld [vmem:[%s16995_s0 + $0x70f] sm:$0x10]   ;;  %v914_v63 = vsel %vm459_vm2, %v7472_v50, %v910_v58  ;;  %v7465_v7 = vld [vmem:[%s16995_s0 + $0x73e] sm:$0x20]   ;;  %v883_v16 = vsel %vm463_vm3, %v7464_v3, %v879_v11  ;;  %v7497_v58 = vld [vmem:[%s16995_s0 + $0x46] sm:$0x2]  }
  0x37   :  { %v7474_v55 = vld [vmem:[%s16995_s0 + $0x74e] sm:$0x20]   ;;  %v918_v5 = vsel %vm463_vm3, %v7473_v54, %v914_v63  ;;  %v7466_v8 = vld [vmem:[%s16995_s0 + $0x77d] sm:$0x40]   ;;  %v887_v22 = vsel %vm467_vm4, %v7465_v7, %v883_v16  ;;  %v7512_v54 = vld [vmem:[%s16995_s0 + $0x1d0] sm:$0x80]   ;;  %v1011_v62 = vsel %vm451_vm0, %v7497_v58, %v7496_v57 }
  0x38   :  { %v7475_v56 = vld [vmem:[%s16995_s0 + $0x78d] sm:$0x40]   ;;  %v7467_v9 = vld [vmem:[%s16995_s0 + $0x7bc] sm:$0x80]   ;;  %v922_v10 = vsel %vm467_vm4, %v7474_v55, %v918_v5  ;;  %v891_v27 = vsel %vm471_vm5, %v7466_v8, %v887_v22  ;;  %v7499_v63 = vld [vmem:[%s16995_s0 + $0xc4] sm:$0x8]  }
  0x39   :  { %v7476_v59 = vld [vmem:[%s16995_s0 + $0x7cc] sm:$0x80]   ;;  %v926_v15 = vsel %vm471_vm5, %v7475_v56, %v922_v10  ;;  %v7478_v26 = vld [vmem:[%s16995_s0 + $0x623] sm:$0x1]   ;;  %v895_v32 = vsel %vm475_vm6, %v7467_v9, %v891_v27  ;;  %v1054_v56 = vsel %vm459_vm2, %v7508_v47, %v1050_v51  ;;  %v7500_v0 = vld [vmem:[%s16995_s0 + $0x103] sm:$0x10]  }
  0x3a   :  { %v7487_v12 = vld [vmem:[%s16995_s0 + $0x633] sm:$0x1]   ;;  %v930_v21 = vsel %vm475_vm6, %v7476_v59, %v926_v15  ;;  %v7479_v29 = vld [vmem:[%s16995_s0 + $0x662] sm:$0x2]   ;;  %896 = vrot.lane.b32.xlu0 %v895_v32, %s9081_s27  ;;  %v7498_v59 = vld [vmem:[%s16995_s0 + $0x85] sm:$0x4]   ;;  %v1058_v61 = vsel %vm463_vm3, %v7509_v48, %v1054_v56 }
  0x3b   :  { %v7488_v13 = vld [vmem:[%s16995_s0 + $0x672] sm:$0x2]   ;;  %931 = vrot.lane.b32.xlu1 %v930_v21, %s9081_s27  ;;  %v7480_v30 = vld [vmem:[%s16995_s0 + $0x6a1] sm:$0x4]   ;;  %v941_v34 = vsel %vm451_vm0, %v7479_v29, %v7478_v26  ;;  %v7501_v1 = vld [vmem:[%s16995_s0 + $0x142] sm:$0x20]   ;;  %v1062_v3 = vsel %vm467_vm4, %v7510_v52, %v1058_v61  ;;  %v1015_v4 = vsel %vm455_vm1, %v7498_v59, %v1011_v62 }
  0x3c   :  { %v7489_v14 = vld [vmem:[%s16995_s0 + $0x6b1] sm:$0x4]   ;;  %v976_v17 = vsel %vm451_vm0, %v7488_v13, %v7487_v12  ;;  %v7481_v31 = vld [vmem:[%s16995_s0 + $0x6e0] sm:$0x8]   ;;  %v945_v39 = vsel %vm455_vm1, %v7480_v30, %v941_v34  ;;  %v7502_v5 = vld [vmem:[%s16995_s0 + $0x181] sm:$0x40]   ;;  %v1066_v8 = vsel %vm471_vm5, %v7511_v53, %v1062_v3  ;;  %v1019_v9 = vsel %vm459_vm2, %v7499_v63, %v1015_v4 }
  0x3d   :  { %v7490_v18 = vld [vmem:[%s16995_s0 + $0x6f0] sm:$0x8]   ;;  %v980_v23 = vsel %vm455_vm1, %v7489_v14, %v976_v17  ;;  %v7482_v35 = vld [vmem:[%s16995_s0 + $0x71f] sm:$0x10]   ;;  %v949_v44 = vsel %vm459_vm2, %v7481_v31, %v945_v39  ;;  %v7503_v6 = vld [vmem:[%s16995_s0 + $0x1c0] sm:$0x80]   ;;  %v1070_v13 = vsel %vm475_vm6, %v7512_v54, %v1066_v8  ;;  %v1023_v14 = vsel %vm463_vm3, %v7500_v0, %v1019_v9 }
  0x3e   :  { %v7491_v19 = vld [vmem:[%s16995_s0 + $0x72f] sm:$0x10]   ;;  %v984_v28 = vsel %vm459_vm2, %v7490_v18, %v980_v23  ;;  %v7483_v36 = vld [vmem:[%s16995_s0 + $0x75e] sm:$0x20]   ;;  %v953_v50 = vsel %vm463_vm3, %v7482_v35, %v949_v44  ;;  %v7523_v7 = vld [vmem:[%s16995_s0 + $0x37] sm:$0x1]  }
  0x3f   :  { %v7492_v20 = vld [vmem:[%s16995_s0 + $0x76e] sm:$0x20]   ;;  %v988_v33 = vsel %vm463_vm3, %v7491_v19, %v984_v28  ;;  %v7484_v37 = vld [vmem:[%s16995_s0 + $0x79d] sm:$0x40]   ;;  %v957_v55 = vsel %vm467_vm4, %v7483_v36, %v953_v50  ;;  %v7524_v10 = vld [vmem:[%s16995_s0 + $0x76] sm:$0x2]   ;;  %v1027_v19 = vsel %vm467_vm4, %v7501_v1, %v1023_v14 }
  0x40   :  { %v7493_v24 = vld [vmem:[%s16995_s0 + $0x7ad] sm:$0x40]   ;;  %v992_v38 = vsel %vm467_vm4, %v7492_v20, %v988_v33  ;;  %v7485_v40 = vld [vmem:[%s16995_s0 + $0x7dc] sm:$0x80]   ;;  %v961_v60 = vsel %vm471_vm5, %v7484_v37, %v957_v55  ;;  %v7525_v11 = vld [vmem:[%s16995_s0 + $0xb5] sm:$0x4]   ;;  %v1116_v15 = vsel %vm451_vm0, %v7524_v10, %v7523_v7 }
  0x41   :  { %v7494_v25 = vld [vmem:[%s16995_s0 + $0x7ec] sm:$0x80]   ;;  %v996_v43 = vsel %vm471_vm5, %v7493_v24, %v992_v38  ;;  %v965_v2 = vsel %vm475_vm6, %v7485_v40, %v961_v60  ;;  %v7526_v12 = vld [vmem:[%s16995_s0 + $0xf4] sm:$0x8]   ;;  %v1120_v20 = vsel %vm455_vm1, %v7525_v11, %v1116_v15  ;;  %v7514_v22 = vld [vmem:[%s16995_s0 + $0x27] sm:$0x1]   ;;  %v1031_v24 = vsel %vm471_vm5, %v7502_v5, %v1027_v19 }
  0x42   :  { %v1000_v49 = vsel %vm475_vm6, %v7494_v25, %v996_v43  ;;  %966 = vrot.lane.b32.xlu0 %v965_v2, %s9081_s27  ;;  %v7527_v16 = vld [vmem:[%s16995_s0 + $0x133] sm:$0x10]   ;;  %v7515_v23 = vld [vmem:[%s16995_s0 + $0x66] sm:$0x2]   ;;  %v1124_v25 = vsel %vm459_vm2, %v7526_v12, %v1120_v20  ;;  %v1035_v30 = vsel %vm475_vm6, %v7503_v6, %v1031_v24 }
  0x43   :  { %1001 = vrot.lane.b32.xlu1 %v1000_v49, %s9081_s27  ;;  %v7528_v17 = vld [vmem:[%s16995_s0 + $0x172] sm:$0x20]   ;;  %v1081_v26 = vsel %vm451_vm0, %v7515_v23, %v7514_v22  ;;  %v7516_v27 = vld [vmem:[%s16995_s0 + $0xa5] sm:$0x4]   ;;  %v1128_v31 = vsel %vm463_vm3, %v7527_v16, %v1124_v25 }
  0x44   :  { %v7529_v18 = vld [vmem:[%s16995_s0 + $0x1b1] sm:$0x40]   ;;  %v7517_v28 = vld [vmem:[%s16995_s0 + $0xe4] sm:$0x8]   ;;  %v1085_v32 = vsel %vm455_vm1, %v7516_v27, %v1081_v26  ;;  %v1132_v36 = vsel %vm467_vm4, %v7528_v17, %v1128_v31 }
  0x45   :  { %v7530_v21 = vld [vmem:[%s16995_s0 + $0x1f0] sm:$0x80]   ;;  %v7518_v29 = vld [vmem:[%s16995_s0 + $0x123] sm:$0x10]   ;;  %v1089_v37 = vsel %vm459_vm2, %v7517_v28, %v1085_v32  ;;  %v1136_v41 = vsel %vm471_vm5, %v7529_v18, %v1132_v36 }
  0x46   :  { %v7519_v33 = vld [vmem:[%s16995_s0 + $0x162] sm:$0x20]   ;;  %1036 = vrot.lane.b32.xlu0 %v1035_v30, %s9081_s27  ;;  %v7541_v38 = vld [vmem:[%s16995_s0 + $0x217] sm:$0x1]   ;;  %v1093_v42 = vsel %vm463_vm3, %v7518_v29, %v1089_v37  ;;  %v1140_v47 = vsel %vm475_vm6, %v7530_v21, %v1136_v41 }
  0x47   :  { %1071 = vrot.lane.b32.xlu1 %v1070_v13, %s9081_s27  ;;  %v7520_v34 = vld [vmem:[%s16995_s0 + $0x1a1] sm:$0x40]   ;;  %v7542_v39 = vld [vmem:[%s16995_s0 + $0x256] sm:$0x2]   ;;  %v1097_v48 = vsel %vm467_vm4, %v7519_v33, %v1093_v42 }
  0x48   :  { %v7521_v35 = vld [vmem:[%s16995_s0 + $0x1e0] sm:$0x80]   ;;  %v7543_v40 = vld [vmem:[%s16995_s0 + $0x295] sm:$0x4]   ;;  %v1186_v43 = vsel %vm451_vm0, %v7542_v39, %v7541_v38  ;;  %v1101_v53 = vsel %vm471_vm5, %v7520_v34, %v1097_v48 }
  0x49   :  { %v7544_v44 = vld [vmem:[%s16995_s0 + $0x2d4] sm:$0x8]   ;;  %v1190_v49 = vsel %vm455_vm1, %v7543_v40, %v1186_v43  ;;  %v7532_v52 = vld [vmem:[%s16995_s0 + $0x207] sm:$0x1]   ;;  %v1105_v58 = vsel %vm475_vm6, %v7521_v35, %v1101_v53 }
  0x4a   :  { %v7545_v45 = vld [vmem:[%s16995_s0 + $0x313] sm:$0x10]   ;;  %v1194_v54 = vsel %vm459_vm2, %v7544_v44, %v1190_v49  ;;  %v7533_v55 = vld [vmem:[%s16995_s0 + $0x246] sm:$0x2]   ;;  %1106 = vrot.lane.b32.xlu0 %v1105_v58, %s9081_s27 }
  0x4b   :  { %v7546_v46 = vld [vmem:[%s16995_s0 + $0x352] sm:$0x20]   ;;  %1141 = vrot.lane.b32.xlu1 %v1140_v47, %s9081_s27  ;;  %v7534_v56 = vld [vmem:[%s16995_s0 + $0x285] sm:$0x4]   ;;  %v1198_v59 = vsel %vm463_vm3, %v7545_v45, %v1194_v54  ;;  %v1151_v60 = vsel %vm451_vm0, %v7533_v55, %v7532_v52 }
  0x4c   :  { %v7547_v50 = vld [vmem:[%s16995_s0 + $0x391] sm:$0x40]   ;;  %v7535_v57 = vld [vmem:[%s16995_s0 + $0x2c4] sm:$0x8]   ;;  %v1202_v0 = vsel %vm467_vm4, %v7546_v46, %v1198_v59  ;;  %v1155_v1 = vsel %vm455_vm1, %v7534_v56, %v1151_v60 }
  0x4d   :  { %v7548_v51 = vld [vmem:[%s16995_s0 + $0x3d0] sm:$0x80]   ;;  %v7536_v61 = vld [vmem:[%s16995_s0 + $0x303] sm:$0x10]   ;;  %v1206_v5 = vsel %vm471_vm5, %v7547_v50, %v1202_v0  ;;  %v1159_v6 = vsel %vm459_vm2, %v7535_v57, %v1155_v1 }
  0x4e   :  { %v7537_v62 = vld [vmem:[%s16995_s0 + $0x342] sm:$0x20]   ;;  %v7559_v3 = vld [vmem:[%s16995_s0 + $0x237] sm:$0x1]   ;;  %v1210_v11 = vsel %vm475_vm6, %v7548_v51, %v1206_v5  ;;  %v1163_v12 = vsel %vm463_vm3, %v7536_v61, %v1159_v6 }
  0x4f   :  { %v7538_v63 = vld [vmem:[%s16995_s0 + $0x381] sm:$0x40]   ;;  %v7560_v4 = vld [vmem:[%s16995_s0 + $0x276] sm:$0x2]   ;;  %1211 = vrot.lane.b32.xlu1 %v1210_v11, %s9081_s27  ;;  %v1167_v17 = vsel %vm467_vm4, %v7537_v62, %v1163_v12 }
  0x50   :  { %v7539_v2 = vld [vmem:[%s16995_s0 + $0x3c0] sm:$0x80]   ;;  %v1256_v7 = vsel %vm451_vm0, %v7560_v4, %v7559_v3  ;;  %v7561_v8 = vld [vmem:[%s16995_s0 + $0x2b5] sm:$0x4]   ;;  %v1171_v22 = vsel %vm471_vm5, %v7538_v63, %v1167_v17 }
  0x51   :  { %v7562_v9 = vld [vmem:[%s16995_s0 + $0x2f4] sm:$0x8]   ;;  %v1260_v13 = vsel %vm455_vm1, %v7561_v8, %v1256_v7  ;;  %v7550_v19 = vld [vmem:[%s16995_s0 + $0x227] sm:$0x1]   ;;  %v1175_v28 = vsel %vm475_vm6, %v7539_v2, %v1171_v22 }
  0x52   :  { %v7563_v10 = vld [vmem:[%s16995_s0 + $0x333] sm:$0x10]   ;;  %v1264_v18 = vsel %vm459_vm2, %v7562_v9, %v1260_v13  ;;  %v7551_v20 = vld [vmem:[%s16995_s0 + $0x266] sm:$0x2]   ;;  %1176 = vrot.lane.b32.xlu0 %v1175_v28, %s9081_s27 }
  0x53   :  { %v7564_v14 = vld [vmem:[%s16995_s0 + $0x372] sm:$0x20]   ;;  %v7552_v21 = vld [vmem:[%s16995_s0 + $0x2a5] sm:$0x4]   ;;  %v1268_v23 = vsel %vm463_vm3, %v7563_v10, %v1264_v18  ;;  %v1221_v24 = vsel %vm451_vm0, %v7551_v20, %v7550_v19 }
  0x54   :  { %v7565_v15 = vld [vmem:[%s16995_s0 + $0x3b1] sm:$0x40]   ;;  %v7553_v25 = vld [vmem:[%s16995_s0 + $0x2e4] sm:$0x8]   ;;  %v1272_v29 = vsel %vm467_vm4, %v7564_v14, %v1268_v23  ;;  %v1225_v30 = vsel %vm455_vm1, %v7552_v21, %v1221_v24 }
  0x55   :  { %v7566_v16 = vld [vmem:[%s16995_s0 + $0x3f0] sm:$0x80]   ;;  %v7554_v26 = vld [vmem:[%s16995_s0 + $0x323] sm:$0x10]   ;;  %v1276_v34 = vsel %vm471_vm5, %v7565_v15, %v1272_v29  ;;  %v1229_v35 = vsel %vm459_vm2, %v7553_v25, %v1225_v30 }
  0x56   :  { %v7555_v27 = vld [vmem:[%s16995_s0 + $0x362] sm:$0x20]   ;;  %v7577_v33 = vld [vmem:[%s16995_s0 + $0x417] sm:$0x1]   ;;  %v1280_v39 = vsel %vm475_vm6, %v7566_v16, %v1276_v34  ;;  %v1233_v40 = vsel %vm463_vm3, %v7554_v26, %v1229_v35 }
  0x57   :  { %v7556_v31 = vld [vmem:[%s16995_s0 + $0x3a1] sm:$0x40]   ;;  %v7578_v36 = vld [vmem:[%s16995_s0 + $0x456] sm:$0x2]   ;;  %1281 = vrot.lane.b32.xlu1 %v1280_v39, %s9081_s27  ;;  %v1237_v45 = vsel %vm467_vm4, %v7555_v27, %v1233_v40 }
  0x58   :  { %v7557_v32 = vld [vmem:[%s16995_s0 + $0x3e0] sm:$0x80]   ;;  %v7579_v37 = vld [vmem:[%s16995_s0 + $0x495] sm:$0x4]   ;;  %v1326_v41 = vsel %vm451_vm0, %v7578_v36, %v7577_v33  ;;  %v1241_v50 = vsel %vm471_vm5, %v7556_v31, %v1237_v45 }
  0x59   :  { %v7580_v38 = vld [vmem:[%s16995_s0 + $0x4d4] sm:$0x8]   ;;  %v1330_v46 = vsel %vm455_vm1, %v7579_v37, %v1326_v41  ;;  %v7568_v48 = vld [vmem:[%s16995_s0 + $0x407] sm:$0x1]   ;;  %v1245_v56 = vsel %vm475_vm6, %v7557_v32, %v1241_v50 }
  0x5a   :  { %v7581_v42 = vld [vmem:[%s16995_s0 + $0x513] sm:$0x10]   ;;  %v7569_v49 = vld [vmem:[%s16995_s0 + $0x446] sm:$0x2]   ;;  %v1334_v51 = vsel %vm459_vm2, %v7580_v38, %v1330_v46  ;;  %1246 = vrot.lane.b32.xlu0 %v1245_v56, %s9081_s27 }
  0x5b   :  { %v7582_v43 = vld [vmem:[%s16995_s0 + $0x552] sm:$0x20]   ;;  %v1291_v52 = vsel %vm451_vm0, %v7569_v49, %v7568_v48  ;;  %v7570_v53 = vld [vmem:[%s16995_s0 + $0x485] sm:$0x4]   ;;  %v1338_v57 = vsel %vm463_vm3, %v7581_v42, %v1334_v51 }
  0x5c   :  { %v7583_v44 = vld [vmem:[%s16995_s0 + $0x591] sm:$0x40]   ;;  %v7571_v54 = vld [vmem:[%s16995_s0 + $0x4c4] sm:$0x8]   ;;  %v1295_v58 = vsel %vm455_vm1, %v7570_v53, %v1291_v52  ;;  %v1342_v62 = vsel %vm467_vm4, %v7582_v43, %v1338_v57 }
  0x5d   :  { %v7584_v47 = vld [vmem:[%s16995_s0 + $0x5d0] sm:$0x80]   ;;  %v7572_v55 = vld [vmem:[%s16995_s0 + $0x503] sm:$0x10]   ;;  %v1299_v63 = vsel %vm459_vm2, %v7571_v54, %v1295_v58  ;;  %v1346_v3 = vsel %vm471_vm5, %v7583_v44, %v1342_v62 }
  0x5e   :  { %v7573_v59 = vld [vmem:[%s16995_s0 + $0x542] sm:$0x20]   ;;  %v7595_v0 = vld [vmem:[%s16995_s0 + $0x437] sm:$0x1]   ;;  %v1303_v4 = vsel %vm463_vm3, %v7572_v55, %v1299_v63  ;;  %v1350_v9 = vsel %vm475_vm6, %v7584_v47, %v1346_v3 }
  0x5f   :  { %v7574_v60 = vld [vmem:[%s16995_s0 + $0x581] sm:$0x40]   ;;  %v7596_v1 = vld [vmem:[%s16995_s0 + $0x476] sm:$0x2]   ;;  %v1307_v10 = vsel %vm467_vm4, %v7573_v59, %v1303_v4  ;;  %1351 = vrot.lane.b32.xlu1 %v1350_v9, %s9081_s27 }
  0x60   :  { %v7575_v61 = vld [vmem:[%s16995_s0 + $0x5c0] sm:$0x80]   ;;  %v7597_v2 = vld [vmem:[%s16995_s0 + $0x4b5] sm:$0x4]   ;;  %v1396_v5 = vsel %vm451_vm0, %v7596_v1, %v7595_v0  ;;  %v1311_v15 = vsel %vm471_vm5, %v7574_v60, %v1307_v10 }
  0x61   :  { %v7598_v6 = vld [vmem:[%s16995_s0 + $0x4f4] sm:$0x8]   ;;  %v1400_v11 = vsel %vm455_vm1, %v7597_v2, %v1396_v5  ;;  %v7586_v14 = vld [vmem:[%s16995_s0 + $0x427] sm:$0x1]   ;;  %v1315_v20 = vsel %vm475_vm6, %v7575_v61, %v1311_v15 }
  0x62   :  { %v7599_v7 = vld [vmem:[%s16995_s0 + $0x533] sm:$0x10]   ;;  %v1404_v16 = vsel %vm459_vm2, %v7598_v6, %v1400_v11  ;;  %v7587_v17 = vld [vmem:[%s16995_s0 + $0x466] sm:$0x2]   ;;  %1316 = vrot.lane.b32.xlu0 %v1315_v20, %s9081_s27 }
  0x63   :  { %v7600_v8 = vld [vmem:[%s16995_s0 + $0x572] sm:$0x20]   ;;  %v7588_v18 = vld [vmem:[%s16995_s0 + $0x4a5] sm:$0x4]   ;;  %v1408_v21 = vsel %vm463_vm3, %v7599_v7, %v1404_v16  ;;  %v1361_v22 = vsel %vm451_vm0, %v7587_v17, %v7586_v14 }
  0x64   :  { %v7601_v12 = vld [vmem:[%s16995_s0 + $0x5b1] sm:$0x40]   ;;  %v7589_v19 = vld [vmem:[%s16995_s0 + $0x4e4] sm:$0x8]   ;;  %v1412_v26 = vsel %vm467_vm4, %v7600_v8, %v1408_v21  ;;  %v1365_v27 = vsel %vm455_vm1, %v7588_v18, %v1361_v22 }
  0x65   :  { %v7602_v13 = vld [vmem:[%s16995_s0 + $0x5f0] sm:$0x80]   ;;  %v7590_v23 = vld [vmem:[%s16995_s0 + $0x523] sm:$0x10]   ;;  %v1416_v31 = vsel %vm471_vm5, %v7601_v12, %v1412_v26  ;;  %v1369_v32 = vsel %vm459_vm2, %v7589_v19, %v1365_v27  ;;  %v7649_v26 = vld [vmem:[%s16995_s0 + $0x1b] sm:$0x1]  }
  0x66   :  { %v7591_v24 = vld [vmem:[%s16995_s0 + $0x562] sm:$0x20]   ;;  %v7613_v29 = vld [vmem:[%s16995_s0 + $0x617] sm:$0x1]   ;;  %v1420_v37 = vsel %vm475_vm6, %v7602_v13, %v1416_v31  ;;  %v1373_v38 = vsel %vm463_vm3, %v7590_v23, %v1369_v32  ;;  %v7650_v27 = vld [vmem:[%s16995_s0 + $0x5a] sm:$0x2]  }
  0x67   :  { %v7592_v25 = vld [vmem:[%s16995_s0 + $0x5a1] sm:$0x40]   ;;  %v7614_v30 = vld [vmem:[%s16995_s0 + $0x656] sm:$0x2]   ;;  %1421 = vrot.lane.b32.xlu1 %v1420_v37, %s9081_s27  ;;  %v1377_v43 = vsel %vm467_vm4, %v7591_v24, %v1373_v38  ;;  %v1606_v31 = vsel %vm451_vm0, %v7650_v27, %v7649_v26  ;;  %v7652_v32 = vld [vmem:[%s16995_s0 + $0xd8] sm:$0x8]  }
  0x68   :  { %v7593_v28 = vld [vmem:[%s16995_s0 + $0x5e0] sm:$0x80]   ;;  %v1466_v33 = vsel %vm451_vm0, %v7614_v30, %v7613_v29  ;;  %v7615_v34 = vld [vmem:[%s16995_s0 + $0x695] sm:$0x4]   ;;  %v1381_v48 = vsel %vm471_vm5, %v7592_v25, %v1377_v43  ;;  %v7655_v38 = vld [vmem:[%s16995_s0 + $0x195] sm:$0x40]  }
  0x69   :  { %v7616_v35 = vld [vmem:[%s16995_s0 + $0x6d4] sm:$0x8]   ;;  %v1470_v39 = vsel %vm455_vm1, %v7615_v34, %v1466_v33  ;;  %v7604_v45 = vld [vmem:[%s16995_s0 + $0x607] sm:$0x1]   ;;  %v1385_v54 = vsel %vm475_vm6, %v7593_v28, %v1381_v48  ;;  %v7651_v28 = vld [vmem:[%s16995_s0 + $0x99] sm:$0x4]  }
  0x6a   :  { %v7617_v36 = vld [vmem:[%s16995_s0 + $0x713] sm:$0x10]   ;;  %v1474_v44 = vsel %vm459_vm2, %v7616_v35, %v1470_v39  ;;  %v7605_v46 = vld [vmem:[%s16995_s0 + $0x646] sm:$0x2]   ;;  %1386 = vrot.lane.b32.xlu0 %v1385_v54, %s9081_s27  ;;  %v7653_v33 = vld [vmem:[%s16995_s0 + $0x117] sm:$0x10]   ;;  %v1610_v37 = vsel %vm455_vm1, %v7651_v28, %v1606_v31 }
  0x6b   :  { %v7618_v40 = vld [vmem:[%s16995_s0 + $0x752] sm:$0x20]   ;;  %v7606_v47 = vld [vmem:[%s16995_s0 + $0x685] sm:$0x4]   ;;  %v1478_v49 = vsel %vm463_vm3, %v7617_v36, %v1474_v44  ;;  %v1431_v50 = vsel %vm451_vm0, %v7605_v46, %v7604_v45  ;;  %v7654_v34 = vld [vmem:[%s16995_s0 + $0x156] sm:$0x20]  }
  0x6c   :  { %v7619_v41 = vld [vmem:[%s16995_s0 + $0x791] sm:$0x40]   ;;  %v7607_v51 = vld [vmem:[%s16995_s0 + $0x6c4] sm:$0x8]   ;;  %v1482_v55 = vsel %vm467_vm4, %v7618_v40, %v1478_v49  ;;  %v1435_v56 = vsel %vm455_vm1, %v7606_v47, %v1431_v50  ;;  %v7656_v39 = vld [vmem:[%s16995_s0 + $0x1d4] sm:$0x80]  }
  0x6d   :  { %v7620_v42 = vld [vmem:[%s16995_s0 + $0x7d0] sm:$0x80]   ;;  %v7608_v52 = vld [vmem:[%s16995_s0 + $0x703] sm:$0x10]   ;;  %v1486_v60 = vsel %vm471_vm5, %v7619_v41, %v1482_v55  ;;  %v1439_v61 = vsel %vm459_vm2, %v7607_v51, %v1435_v56  ;;  %v7640_v40 = vld [vmem:[%s16995_s0 + $0xb] sm:$0x1]  }
  0x6e   :  { %v7609_v53 = vld [vmem:[%s16995_s0 + $0x742] sm:$0x20]   ;;  %v7631_v59 = vld [vmem:[%s16995_s0 + $0x637] sm:$0x1]   ;;  %v1490_v1 = vsel %vm475_vm6, %v7620_v42, %v1486_v60  ;;  %v1443_v2 = vsel %vm463_vm3, %v7608_v52, %v1439_v61  ;;  %v1614_v42 = vsel %vm459_vm2, %v7652_v32, %v1610_v37  ;;  %v7641_v43 = vld [vmem:[%s16995_s0 + $0x4a] sm:$0x2]  }
  0x6f   :  { %v7610_v57 = vld [vmem:[%s16995_s0 + $0x781] sm:$0x40]   ;;  %v7632_v62 = vld [vmem:[%s16995_s0 + $0x676] sm:$0x2]   ;;  %1491 = vrot.lane.b32.xlu1 %v1490_v1, %s9081_s27  ;;  %v1447_v7 = vsel %vm467_vm4, %v7609_v53, %v1443_v2  ;;  %v7642_v44 = vld [vmem:[%s16995_s0 + $0x89] sm:$0x4]   ;;  %v1618_v47 = vsel %vm463_vm3, %v7653_v33, %v1614_v42  ;;  %v1571_v48 = vsel %vm451_vm0, %v7641_v43, %v7640_v40 }
  0x70   :  { %v7611_v58 = vld [vmem:[%s16995_s0 + $0x7c0] sm:$0x80]   ;;  %v7633_v63 = vld [vmem:[%s16995_s0 + $0x6b5] sm:$0x4]   ;;  %v1536_v3 = vsel %vm451_vm0, %v7632_v62, %v7631_v59  ;;  %v1451_v12 = vsel %vm471_vm5, %v7610_v57, %v1447_v7  ;;  %v7643_v45 = vld [vmem:[%s16995_s0 + $0xc8] sm:$0x8]   ;;  %v1622_v52 = vsel %vm467_vm4, %v7654_v34, %v1618_v47  ;;  %v1575_v53 = vsel %vm455_vm1, %v7642_v44, %v1571_v48 }
  0x71   :  { %v7634_v0 = vld [vmem:[%s16995_s0 + $0x6f4] sm:$0x8]   ;;  %v1540_v8 = vsel %vm455_vm1, %v7633_v63, %v1536_v3  ;;  %v7622_v10 = vld [vmem:[%s16995_s0 + $0x627] sm:$0x1]   ;;  %v1455_v18 = vsel %vm475_vm6, %v7611_v58, %v1451_v12  ;;  %v7644_v49 = vld [vmem:[%s16995_s0 + $0x107] sm:$0x10]   ;;  %v1626_v57 = vsel %vm471_vm5, %v7655_v38, %v1622_v52  ;;  %v1579_v58 = vsel %vm459_vm2, %v7643_v45, %v1575_v53 }
  0x72   :  { %v7635_v4 = vld [vmem:[%s16995_s0 + $0x733] sm:$0x10]   ;;  %v7623_v11 = vld [vmem:[%s16995_s0 + $0x666] sm:$0x2]   ;;  %v1544_v13 = vsel %vm459_vm2, %v7634_v0, %v1540_v8  ;;  %1456 = vrot.lane.b32.xlu0 %v1455_v18, %s9081_s27  ;;  %v7645_v50 = vld [vmem:[%s16995_s0 + $0x146] sm:$0x20]   ;;  %v1630_v63 = vsel %vm475_vm6, %v7656_v39, %v1626_v57  ;;  %v1583_v0 = vsel %vm463_vm3, %v7644_v49, %v1579_v58 }
  0x73   :  { %v7636_v5 = vld [vmem:[%s16995_s0 + $0x772] sm:$0x20]   ;;  %v1501_v14 = vsel %vm451_vm0, %v7623_v11, %v7622_v10  ;;  %v7624_v15 = vld [vmem:[%s16995_s0 + $0x6a5] sm:$0x4]   ;;  %v1548_v19 = vsel %vm463_vm3, %v7635_v4, %v1544_v13  ;;  %v7646_v51 = vld [vmem:[%s16995_s0 + $0x185] sm:$0x40]  }
  0x74   :  { %v7637_v6 = vld [vmem:[%s16995_s0 + $0x7b1] sm:$0x40]   ;;  %v7625_v16 = vld [vmem:[%s16995_s0 + $0x6e4] sm:$0x8]   ;;  %v1505_v20 = vsel %vm455_vm1, %v7624_v15, %v1501_v14  ;;  %v1552_v24 = vsel %vm467_vm4, %v7636_v5, %v1548_v19  ;;  %v7647_v54 = vld [vmem:[%s16995_s0 + $0x1c4] sm:$0x80]   ;;  %v1587_v5 = vsel %vm467_vm4, %v7645_v50, %v1583_v0 }
  0x75   :  { %v7638_v9 = vld [vmem:[%s16995_s0 + $0x7f0] sm:$0x80]   ;;  %v7626_v17 = vld [vmem:[%s16995_s0 + $0x723] sm:$0x10]   ;;  %v1509_v25 = vsel %vm459_vm2, %v7625_v16, %v1505_v20  ;;  %v1556_v29 = vsel %vm471_vm5, %v7637_v6, %v1552_v24  ;;  %v7667_v55 = vld [vmem:[%s16995_s0 + $0x3b] sm:$0x1]   ;;  %v1591_v10 = vsel %vm471_vm5, %v7646_v51, %v1587_v5 }
  0x76   :  { %v7627_v21 = vld [vmem:[%s16995_s0 + $0x762] sm:$0x20]   ;;  %v1513_v30 = vsel %vm463_vm3, %v7626_v17, %v1509_v25  ;;  %v1560_v35 = vsel %vm475_vm6, %v7638_v9, %v1556_v29  ;;  %v7668_v56 = vld [vmem:[%s16995_s0 + $0x7a] sm:$0x2]   ;;  %v7658_v7 = vld [vmem:[%s16995_s0 + $0x2b] sm:$0x1]   ;;  %v1595_v16 = vsel %vm475_vm6, %v7647_v54, %v1591_v10 }
  0x77   :  { %v7628_v22 = vld [vmem:[%s16995_s0 + $0x7a1] sm:$0x40]   ;;  %v1517_v36 = vsel %vm467_vm4, %v7627_v21, %v1513_v30  ;;  %1561 = vrot.lane.b32.xlu1 %v1560_v35, %s9081_s27  ;;  %v1676_v59 = vsel %vm451_vm0, %v7668_v56, %v7667_v55  ;;  %v7669_v60 = vld [vmem:[%s16995_s0 + $0xb9] sm:$0x4]   ;;  %v7659_v8 = vld [vmem:[%s16995_s0 + $0x6a] sm:$0x2]  }
  0x78   :  { %v7629_v23 = vld [vmem:[%s16995_s0 + $0x7e0] sm:$0x80]   ;;  %v1521_v41 = vsel %vm471_vm5, %v7628_v22, %v1517_v36  ;;  %v7670_v61 = vld [vmem:[%s16995_s0 + $0xf8] sm:$0x8]   ;;  %v1680_v1 = vsel %vm455_vm1, %v7669_v60, %v1676_v59  ;;  %v7660_v9 = vld [vmem:[%s16995_s0 + $0xa9] sm:$0x4]   ;;  %v1641_v12 = vsel %vm451_vm0, %v7659_v8, %v7658_v7 }
  0x79   :  { %v1525_v46 = vsel %vm475_vm6, %v7629_v23, %v1521_v41  ;;  %v7671_v62 = vld [vmem:[%s16995_s0 + $0x137] sm:$0x10]   ;;  %v1684_v6 = vsel %vm459_vm2, %v7670_v61, %v1680_v1  ;;  %v7661_v13 = vld [vmem:[%s16995_s0 + $0xe8] sm:$0x8]   ;;  %v1645_v18 = vsel %vm455_vm1, %v7660_v9, %v1641_v12 }
  0x7a   :  { %1526 = vrot.lane.b32.xlu0 %v1525_v46, %s9081_s27  ;;  %v7672_v2 = vld [vmem:[%s16995_s0 + $0x176] sm:$0x20]   ;;  %v1688_v11 = vsel %vm463_vm3, %v7671_v62, %v1684_v6  ;;  %v7662_v14 = vld [vmem:[%s16995_s0 + $0x127] sm:$0x10]   ;;  %v1649_v23 = vsel %vm459_vm2, %v7661_v13, %v1645_v18 }
  0x7b   :  { %v7673_v3 = vld [vmem:[%s16995_s0 + $0x1b5] sm:$0x40]   ;;  %1631 = vrot.lane.b32.xlu1 %v1630_v63, %s9081_s27  ;;  %v7663_v15 = vld [vmem:[%s16995_s0 + $0x166] sm:$0x20]   ;;  %v1692_v17 = vsel %vm467_vm4, %v7672_v2, %v1688_v11  ;;  %v1653_v28 = vsel %vm463_vm3, %v7662_v14, %v1649_v23 }
  0x7c   :  { %v7674_v4 = vld [vmem:[%s16995_s0 + $0x1f4] sm:$0x80]   ;;  %v7664_v19 = vld [vmem:[%s16995_s0 + $0x1a5] sm:$0x40]   ;;  %v1696_v22 = vsel %vm471_vm5, %v7673_v3, %v1692_v17  ;;  %v1657_v33 = vsel %vm467_vm4, %v7663_v15, %v1653_v28 }
  0x7d   :  { %v7665_v20 = vld [vmem:[%s16995_s0 + $0x1e4] sm:$0x80]   ;;  %v7685_v21 = vld [vmem:[%s16995_s0 + $0x21b] sm:$0x1]   ;;  %v1700_v27 = vsel %vm475_vm6, %v7674_v4, %v1696_v22  ;;  %v1661_v38 = vsel %vm471_vm5, %v7664_v19, %v1657_v33 }
  0x7e   :  { %1596 = vrot.lane.b32.xlu0 %v1595_v16, %s9081_s27  ;;  %v7686_v24 = vld [vmem:[%s16995_s0 + $0x25a] sm:$0x2]   ;;  %v7676_v36 = vld [vmem:[%s16995_s0 + $0x20b] sm:$0x1]   ;;  %v1665_v44 = vsel %vm475_vm6, %v7665_v20, %v1661_v38 }
  0x7f   :  { %v7687_v25 = vld [vmem:[%s16995_s0 + $0x299] sm:$0x4]   ;;  %v1746_v29 = vsel %vm451_vm0, %v7686_v24, %v7685_v21  ;;  %1701 = vrot.lane.b32.xlu1 %v1700_v27, %s9081_s27  ;;  %v7677_v37 = vld [vmem:[%s16995_s0 + $0x24a] sm:$0x2]  }
  0x80   :  { %v7688_v26 = vld [vmem:[%s16995_s0 + $0x2d8] sm:$0x8]   ;;  %v1750_v34 = vsel %vm455_vm1, %v7687_v25, %v1746_v29  ;;  %v1711_v40 = vsel %vm451_vm0, %v7677_v37, %v7676_v36  ;;  %v7678_v41 = vld [vmem:[%s16995_s0 + $0x289] sm:$0x4]  }
  0x81   :  { %v7689_v30 = vld [vmem:[%s16995_s0 + $0x317] sm:$0x10]   ;;  %v1754_v39 = vsel %vm459_vm2, %v7688_v26, %v1750_v34  ;;  %v7679_v42 = vld [vmem:[%s16995_s0 + $0x2c8] sm:$0x8]   ;;  %v1715_v46 = vsel %vm455_vm1, %v7678_v41, %v1711_v40 }
  0x82   :  { %v7690_v31 = vld [vmem:[%s16995_s0 + $0x356] sm:$0x20]   ;;  %v7680_v43 = vld [vmem:[%s16995_s0 + $0x307] sm:$0x10]   ;;  %v1758_v45 = vsel %vm463_vm3, %v7689_v30, %v1754_v39  ;;  %1666 = vrot.lane.b32.xlu0 %v1665_v44, %s9081_s27  ;;  %v1719_v51 = vsel %vm459_vm2, %v7679_v42, %v1715_v46 }
  0x83   :  { %v7691_v32 = vld [vmem:[%s16995_s0 + $0x395] sm:$0x40]   ;;  %v7681_v47 = vld [vmem:[%s16995_s0 + $0x346] sm:$0x20]   ;;  %v1762_v50 = vsel %vm467_vm4, %v7690_v31, %v1758_v45  ;;  %v1723_v56 = vsel %vm463_vm3, %v7680_v43, %v1719_v51 }
  0x84   :  { %v7692_v35 = vld [vmem:[%s16995_s0 + $0x3d4] sm:$0x80]   ;;  %v7682_v48 = vld [vmem:[%s16995_s0 + $0x385] sm:$0x40]   ;;  %v1766_v55 = vsel %vm471_vm5, %v7691_v32, %v1762_v50  ;;  %v1727_v62 = vsel %vm467_vm4, %v7681_v47, %v1723_v56 }
  0x85   :  { %v7683_v49 = vld [vmem:[%s16995_s0 + $0x3c4] sm:$0x80]   ;;  %v7703_v52 = vld [vmem:[%s16995_s0 + $0x23b] sm:$0x1]   ;;  %v1770_v61 = vsel %vm475_vm6, %v7692_v35, %v1766_v55  ;;  %v1731_v3 = vsel %vm471_vm5, %v7682_v48, %v1727_v62 }
  0x86   :  { %v7704_v53 = vld [vmem:[%s16995_s0 + $0x27a] sm:$0x2]   ;;  %v7694_v2 = vld [vmem:[%s16995_s0 + $0x22b] sm:$0x1]   ;;  %1771 = vrot.lane.b32.xlu1 %v1770_v61, %s9081_s27  ;;  %v1735_v8 = vsel %vm475_vm6, %v7683_v49, %v1731_v3 }
  0x87   :  { %v7705_v54 = vld [vmem:[%s16995_s0 + $0x2b9] sm:$0x4]   ;;  %v1816_v57 = vsel %vm451_vm0, %v7704_v53, %v7703_v52  ;;  %v7695_v5 = vld [vmem:[%s16995_s0 + $0x26a] sm:$0x2]   ;;  %1736 = vrot.lane.b32.xlu0 %v1735_v8, %s9081_s27 }
  0x88   :  { %v7706_v58 = vld [vmem:[%s16995_s0 + $0x2f8] sm:$0x8]   ;;  %v1820_v63 = vsel %vm455_vm1, %v7705_v54, %v1816_v57  ;;  %v7696_v6 = vld [vmem:[%s16995_s0 + $0x2a9] sm:$0x4]   ;;  %v1781_v10 = vsel %vm451_vm0, %v7695_v5, %v7694_v2 }
  0x89   :  { %v7707_v59 = vld [vmem:[%s16995_s0 + $0x337] sm:$0x10]   ;;  %v1824_v4 = vsel %vm459_vm2, %v7706_v58, %v1820_v63  ;;  %v7697_v7 = vld [vmem:[%s16995_s0 + $0x2e8] sm:$0x8]   ;;  %v1785_v15 = vsel %vm455_vm1, %v7696_v6, %v1781_v10 }
  0x8a   :  { %v7708_v60 = vld [vmem:[%s16995_s0 + $0x376] sm:$0x20]   ;;  %v1828_v9 = vsel %vm463_vm3, %v7707_v59, %v1824_v4  ;;  %v7698_v11 = vld [vmem:[%s16995_s0 + $0x327] sm:$0x10]   ;;  %v1789_v20 = vsel %vm459_vm2, %v7697_v7, %v1785_v15 }
  0x8b   :  { %v7709_v0 = vld [vmem:[%s16995_s0 + $0x3b5] sm:$0x40]   ;;  %v7699_v12 = vld [vmem:[%s16995_s0 + $0x366] sm:$0x20]   ;;  %v1832_v14 = vsel %vm467_vm4, %v7708_v60, %v1828_v9  ;;  %v1793_v26 = vsel %vm463_vm3, %v7698_v11, %v1789_v20 }
  0x8c   :  { %v7710_v1 = vld [vmem:[%s16995_s0 + $0x3f4] sm:$0x80]   ;;  %v7700_v13 = vld [vmem:[%s16995_s0 + $0x3a5] sm:$0x40]   ;;  %v1836_v19 = vsel %vm471_vm5, %v7709_v0, %v1832_v14  ;;  %v1797_v31 = vsel %vm467_vm4, %v7699_v12, %v1793_v26 }
  0x8d   :  { %v7701_v16 = vld [vmem:[%s16995_s0 + $0x3e4] sm:$0x80]   ;;  %v7721_v17 = vld [vmem:[%s16995_s0 + $0x41b] sm:$0x1]   ;;  %v1840_v25 = vsel %vm475_vm6, %v7710_v1, %v1836_v19  ;;  %v1801_v36 = vsel %vm471_vm5, %v7700_v13, %v1797_v31 }
  0x8e   :  { %v7722_v18 = vld [vmem:[%s16995_s0 + $0x45a] sm:$0x2]   ;;  %1841 = vrot.lane.b32.xlu1 %v1840_v25, %s9081_s27  ;;  %v7712_v33 = vld [vmem:[%s16995_s0 + $0x40b] sm:$0x1]   ;;  %v1805_v42 = vsel %vm475_vm6, %v7701_v16, %v1801_v36 }
  0x8f   :  { %v1886_v21 = vsel %vm451_vm0, %v7722_v18, %v7721_v17  ;;  %v7723_v22 = vld [vmem:[%s16995_s0 + $0x499] sm:$0x4]   ;;  %v7713_v34 = vld [vmem:[%s16995_s0 + $0x44a] sm:$0x2]   ;;  %1806 = vrot.lane.b32.xlu0 %v1805_v42, %s9081_s27 }
  0x90   :  { %v7724_v23 = vld [vmem:[%s16995_s0 + $0x4d8] sm:$0x8]   ;;  %v1890_v27 = vsel %vm455_vm1, %v7723_v22, %v1886_v21  ;;  %v7714_v35 = vld [vmem:[%s16995_s0 + $0x489] sm:$0x4]   ;;  %v1851_v38 = vsel %vm451_vm0, %v7713_v34, %v7712_v33 }
  0x91   :  { %v7725_v24 = vld [vmem:[%s16995_s0 + $0x517] sm:$0x10]   ;;  %v1894_v32 = vsel %vm459_vm2, %v7724_v23, %v1890_v27  ;;  %v7715_v39 = vld [vmem:[%s16995_s0 + $0x4c8] sm:$0x8]   ;;  %v1855_v44 = vsel %vm455_vm1, %v7714_v35, %v1851_v38 }
  0x92   :  { %v7726_v28 = vld [vmem:[%s16995_s0 + $0x556] sm:$0x20]   ;;  %v1898_v37 = vsel %vm463_vm3, %v7725_v24, %v1894_v32  ;;  %v7716_v40 = vld [vmem:[%s16995_s0 + $0x507] sm:$0x10]   ;;  %v1859_v49 = vsel %vm459_vm2, %v7715_v39, %v1855_v44 }
  0x93   :  { %v7727_v29 = vld [vmem:[%s16995_s0 + $0x595] sm:$0x40]   ;;  %v7717_v41 = vld [vmem:[%s16995_s0 + $0x546] sm:$0x20]   ;;  %v1902_v43 = vsel %vm467_vm4, %v7726_v28, %v1898_v37  ;;  %v1863_v54 = vsel %vm463_vm3, %v7716_v40, %v1859_v49 }
  0x94   :  { %v7728_v30 = vld [vmem:[%s16995_s0 + $0x5d4] sm:$0x80]   ;;  %v7718_v45 = vld [vmem:[%s16995_s0 + $0x585] sm:$0x40]   ;;  %v1906_v48 = vsel %vm471_vm5, %v7727_v29, %v1902_v43  ;;  %v1867_v59 = vsel %vm467_vm4, %v7717_v41, %v1863_v54 }
  0x95   :  { %v7719_v46 = vld [vmem:[%s16995_s0 + $0x5c4] sm:$0x80]   ;;  %v7739_v47 = vld [vmem:[%s16995_s0 + $0x43b] sm:$0x1]   ;;  %v1910_v53 = vsel %vm475_vm6, %v7728_v30, %v1906_v48  ;;  %v1871_v0 = vsel %vm471_vm5, %v7718_v45, %v1867_v59  ;;  %v10563_v45 = vpop.permute.xlu1 %546  }
  0x96   :  { %v7740_v50 = vld [vmem:[%s16995_s0 + $0x47a] sm:$0x2]   ;;  %1911 = vrot.lane.b32.xlu1 %v1910_v53, %s9081_s27  ;;  %v7730_v62 = vld [vmem:[%s16995_s0 + $0x42b] sm:$0x1]   ;;  %v1875_v6 = vsel %vm475_vm6, %v7719_v46, %v1871_v0 }
  0x97   :  { %v7741_v51 = vld [vmem:[%s16995_s0 + $0x4b9] sm:$0x4]   ;;  %v1956_v55 = vsel %vm451_vm0, %v7740_v50, %v7739_v47  ;;  %v7731_v63 = vld [vmem:[%s16995_s0 + $0x46a] sm:$0x2]   ;;  %1876 = vrot.lane.b32.xlu0 %v1875_v6, %s9081_s27 }
  0x98   :  { %v7742_v52 = vld [vmem:[%s16995_s0 + $0x4f8] sm:$0x8]   ;;  %v1960_v60 = vsel %vm455_vm1, %v7741_v51, %v1956_v55  ;;  %v1921_v2 = vsel %vm451_vm0, %v7731_v63, %v7730_v62  ;;  %v7732_v3 = vld [vmem:[%s16995_s0 + $0x4a9] sm:$0x4]  }
  0x99   :  { %v7743_v56 = vld [vmem:[%s16995_s0 + $0x537] sm:$0x10]   ;;  %v1964_v1 = vsel %vm459_vm2, %v7742_v52, %v1960_v60  ;;  %v7733_v4 = vld [vmem:[%s16995_s0 + $0x4e8] sm:$0x8]   ;;  %v1925_v8 = vsel %vm455_vm1, %v7732_v3, %v1921_v2 }
  0x9a   :  { %v7744_v57 = vld [vmem:[%s16995_s0 + $0x576] sm:$0x20]   ;;  %v7734_v5 = vld [vmem:[%s16995_s0 + $0x527] sm:$0x10]   ;;  %v1968_v7 = vsel %vm463_vm3, %v7743_v56, %v1964_v1  ;;  %v1929_v13 = vsel %vm459_vm2, %v7733_v4, %v1925_v8 }
  0x9b   :  { %v7745_v58 = vld [vmem:[%s16995_s0 + $0x5b5] sm:$0x40]   ;;  %v7735_v9 = vld [vmem:[%s16995_s0 + $0x566] sm:$0x20]   ;;  %v1972_v12 = vsel %vm467_vm4, %v7744_v57, %v1968_v7  ;;  %v1933_v18 = vsel %vm463_vm3, %v7734_v5, %v1929_v13 }
  0x9c   :  { %v7746_v61 = vld [vmem:[%s16995_s0 + $0x5f4] sm:$0x80]   ;;  %v7736_v10 = vld [vmem:[%s16995_s0 + $0x5a5] sm:$0x40]   ;;  %v1976_v17 = vsel %vm471_vm5, %v7745_v58, %v1972_v12  ;;  %v1937_v24 = vsel %vm467_vm4, %v7735_v9, %v1933_v18  ;;  %v10589_v58 = vpop.permute.xlu0 %477   ;;  %v10627_v12 = vpop.permute.xlu1 %581  }
  0x9d   :  { %v7737_v11 = vld [vmem:[%s16995_s0 + $0x5e4] sm:$0x80]   ;;  %v7757_v14 = vld [vmem:[%s16995_s0 + $0x61b] sm:$0x1]   ;;  %v1980_v23 = vsel %vm475_vm6, %v7746_v61, %v1976_v17  ;;  %v1941_v29 = vsel %vm471_vm5, %v7736_v10, %v1937_v24  ;;  %v7796_v17 = vld [vmem:[%s16995_s0 + $0xdc] sm:$0x8]  }
  0x9e   :  { %v7758_v15 = vld [vmem:[%s16995_s0 + $0x65a] sm:$0x2]   ;;  %v7748_v28 = vld [vmem:[%s16995_s0 + $0x60b] sm:$0x1]   ;;  %1981 = vrot.lane.b32.xlu1 %v1980_v23, %s9081_s27  ;;  %v1945_v34 = vsel %vm475_vm6, %v7737_v11, %v1941_v29  ;;  %v7793_v11 = vld [vmem:[%s16995_s0 + $0x1f] sm:$0x1]  }
  0x9f   :  { %v7759_v16 = vld [vmem:[%s16995_s0 + $0x699] sm:$0x4]   ;;  %v2026_v19 = vsel %vm451_vm0, %v7758_v15, %v7757_v14  ;;  %v7749_v31 = vld [vmem:[%s16995_s0 + $0x64a] sm:$0x2]   ;;  %1946 = vrot.lane.b32.xlu0 %v1945_v34, %s9081_s27  ;;  %v7794_v15 = vld [vmem:[%s16995_s0 + $0x5e] sm:$0x2]  }
  0xa0   :  { %v7760_v20 = vld [vmem:[%s16995_s0 + $0x6d8] sm:$0x8]   ;;  %v2030_v25 = vsel %vm455_vm1, %v7759_v16, %v2026_v19  ;;  %v7750_v32 = vld [vmem:[%s16995_s0 + $0x689] sm:$0x4]   ;;  %v1991_v36 = vsel %vm451_vm0, %v7749_v31, %v7748_v28  ;;  %v7795_v16 = vld [vmem:[%s16995_s0 + $0x9d] sm:$0x4]   ;;  %v10665_v29 = vpop.permute.xlu0 %511  }
  0xa1   :  { %v7761_v21 = vld [vmem:[%s16995_s0 + $0x717] sm:$0x10]   ;;  %v2034_v30 = vsel %vm459_vm2, %v7760_v20, %v2030_v25  ;;  %v7751_v33 = vld [vmem:[%s16995_s0 + $0x6c8] sm:$0x8]   ;;  %v1995_v41 = vsel %vm455_vm1, %v7750_v32, %v1991_v36  ;;  %v2166_v20 = vsel %vm451_vm0, %v7794_v15, %v7793_v11  ;;  %v7799_v23 = vld [vmem:[%s16995_s0 + $0x199] sm:$0x40]  }
  0xa2   :  { %v7762_v22 = vld [vmem:[%s16995_s0 + $0x756] sm:$0x20]   ;;  %v2038_v35 = vsel %vm463_vm3, %v7761_v21, %v2034_v30  ;;  %v7752_v37 = vld [vmem:[%s16995_s0 + $0x707] sm:$0x10]   ;;  %v1999_v47 = vsel %vm459_vm2, %v7751_v33, %v1995_v41  ;;  %v7797_v21 = vld [vmem:[%s16995_s0 + $0x11b] sm:$0x10]   ;;  %v2170_v25 = vsel %vm455_vm1, %v7795_v16, %v2166_v20 }
  0xa3   :  { %v7763_v26 = vld [vmem:[%s16995_s0 + $0x795] sm:$0x40]   ;;  %v7753_v38 = vld [vmem:[%s16995_s0 + $0x746] sm:$0x20]   ;;  %v2042_v40 = vsel %vm467_vm4, %v7762_v22, %v2038_v35  ;;  %v2003_v53 = vsel %vm463_vm3, %v7752_v37, %v1999_v47  ;;  %v7798_v22 = vld [vmem:[%s16995_s0 + $0x15a] sm:$0x20]   ;;  %v2174_v31 = vsel %vm459_vm2, %v7796_v17, %v2170_v25 }
  0xa4   :  { %v7764_v27 = vld [vmem:[%s16995_s0 + $0x7d4] sm:$0x80]   ;;  %v7754_v39 = vld [vmem:[%s16995_s0 + $0x785] sm:$0x40]   ;;  %v2046_v46 = vsel %vm471_vm5, %v7763_v26, %v2042_v40  ;;  %v2007_v59 = vsel %vm467_vm4, %v7753_v38, %v2003_v53  ;;  %v7800_v26 = vld [vmem:[%s16995_s0 + $0x1d8] sm:$0x80]   ;;  %v2178_v37 = vsel %vm463_vm3, %v7797_v21, %v2174_v31 }
  0xa5   :  { %v7755_v42 = vld [vmem:[%s16995_s0 + $0x7c4] sm:$0x80]   ;;  %v7775_v43 = vld [vmem:[%s16995_s0 + $0x63b] sm:$0x1]   ;;  %v2050_v52 = vsel %vm475_vm6, %v7764_v27, %v2046_v46  ;;  %v2011_v0 = vsel %vm471_vm5, %v7754_v39, %v2007_v59  ;;  %v7784_v27 = vld [vmem:[%s16995_s0 + $0xf] sm:$0x1]  }
  0xa6   :  { %v7776_v44 = vld [vmem:[%s16995_s0 + $0x67a] sm:$0x2]   ;;  %2051 = vrot.lane.b32.xlu1 %v2050_v52, %s9081_s27  ;;  %v7766_v61 = vld [vmem:[%s16995_s0 + $0x62b] sm:$0x1]   ;;  %v2015_v6 = vsel %vm475_vm6, %v7755_v42, %v2011_v0  ;;  %v7785_v28 = vld [vmem:[%s16995_s0 + $0x4e] sm:$0x2]   ;;  %v10691_v42 = vpop.permute.xlu1 %651  }
  0xa7   :  { %v2096_v48 = vsel %vm451_vm0, %v7776_v44, %v7775_v43  ;;  %v7777_v49 = vld [vmem:[%s16995_s0 + $0x6b9] sm:$0x4]   ;;  %v7767_v62 = vld [vmem:[%s16995_s0 + $0x66a] sm:$0x2]   ;;  %2016 = vrot.lane.b32.xlu0 %v2015_v6, %s9081_s27  ;;  %v2131_v32 = vsel %vm451_vm0, %v7785_v28, %v7784_v27  ;;  %v7786_v33 = vld [vmem:[%s16995_s0 + $0x8d] sm:$0x4]   ;;  %v2182_v43 = vsel %vm467_vm4, %v7798_v22, %v2178_v37 }
  0xa8   :  { %v7778_v50 = vld [vmem:[%s16995_s0 + $0x6f8] sm:$0x8]   ;;  %v2100_v54 = vsel %vm455_vm1, %v7777_v49, %v2096_v48  ;;  %v7768_v63 = vld [vmem:[%s16995_s0 + $0x6a9] sm:$0x4]   ;;  %v2061_v2 = vsel %vm451_vm0, %v7767_v62, %v7766_v61  ;;  %v7787_v34 = vld [vmem:[%s16995_s0 + $0xcc] sm:$0x8]   ;;  %v2135_v38 = vsel %vm455_vm1, %v7786_v33, %v2131_v32  ;;  %v2186_v49 = vsel %vm471_vm5, %v7799_v23, %v2182_v43  ;;  %v10729_v62 = vpop.permute.xlu0 %616  }
  0xa9   :  { %v7779_v51 = vld [vmem:[%s16995_s0 + $0x737] sm:$0x10]   ;;  %v2104_v60 = vsel %vm459_vm2, %v7778_v50, %v2100_v54  ;;  %v7769_v3 = vld [vmem:[%s16995_s0 + $0x6e8] sm:$0x8]   ;;  %v2065_v8 = vsel %vm455_vm1, %v7768_v63, %v2061_v2  ;;  %v7788_v35 = vld [vmem:[%s16995_s0 + $0x10b] sm:$0x10]   ;;  %v2139_v44 = vsel %vm459_vm2, %v7787_v34, %v2135_v38 }
  0xaa   :  { %v7780_v55 = vld [vmem:[%s16995_s0 + $0x776] sm:$0x20]   ;;  %v2108_v1 = vsel %vm463_vm3, %v7779_v51, %v2104_v60  ;;  %v7770_v4 = vld [vmem:[%s16995_s0 + $0x727] sm:$0x10]   ;;  %v2069_v14 = vsel %vm459_vm2, %v7769_v3, %v2065_v8  ;;  %v7789_v39 = vld [vmem:[%s16995_s0 + $0x14a] sm:$0x20]   ;;  %v2143_v50 = vsel %vm463_vm3, %v7788_v35, %v2139_v44  ;;  %v10767_v16 = vpop.permute.xlu1 %721  }
  0xab   :  { %v7781_v56 = vld [vmem:[%s16995_s0 + $0x7b5] sm:$0x40]   ;;  %v7771_v5 = vld [vmem:[%s16995_s0 + $0x766] sm:$0x20]   ;;  %v2112_v7 = vsel %vm467_vm4, %v7780_v55, %v2108_v1  ;;  %v2073_v19 = vsel %vm463_vm3, %v7770_v4, %v2069_v14  ;;  %v7790_v40 = vld [vmem:[%s16995_s0 + $0x189] sm:$0x40]   ;;  %v2190_v55 = vsel %vm475_vm6, %v7800_v26, %v2186_v49 }
  0xac   :  { %v7782_v57 = vld [vmem:[%s16995_s0 + $0x7f4] sm:$0x80]   ;;  %v7772_v9 = vld [vmem:[%s16995_s0 + $0x7a5] sm:$0x40]   ;;  %v2116_v13 = vsel %vm471_vm5, %v7781_v56, %v2112_v7  ;;  %v2077_v24 = vsel %vm467_vm4, %v7771_v5, %v2073_v19  ;;  %v7791_v41 = vld [vmem:[%s16995_s0 + $0x1c8] sm:$0x80]   ;;  %v2147_v56 = vsel %vm467_vm4, %v7789_v39, %v2143_v50 }
  0xad   :  { %v7773_v10 = vld [vmem:[%s16995_s0 + $0x7e4] sm:$0x80]   ;;  %v2120_v18 = vsel %vm475_vm6, %v7782_v57, %v2116_v13  ;;  %v2081_v30 = vsel %vm471_vm5, %v7772_v9, %v2077_v24  ;;  %v7811_v46 = vld [vmem:[%s16995_s0 + $0x3f] sm:$0x1]   ;;  %v7802_v61 = vld [vmem:[%s16995_s0 + $0x2f] sm:$0x1]   ;;  %v2151_v63 = vsel %vm471_vm5, %v7790_v40, %v2147_v56 }
  0xae   :  { %2121 = vrot.lane.b32.xlu1 %v2120_v18, %s9081_s27  ;;  %v2085_v36 = vsel %vm475_vm6, %v7773_v10, %v2081_v30  ;;  %v7812_v47 = vld [vmem:[%s16995_s0 + $0x7e] sm:$0x2]   ;;  %v7803_v1 = vld [vmem:[%s16995_s0 + $0x6e] sm:$0x2]   ;;  %v2155_v4 = vsel %vm475_vm6, %v7791_v41, %v2151_v63  ;;  %v10793_v30 = vpop.permute.xlu0 %686   ;;  %v10831_v50 = vpop.permute.xlu1 %791  }
  0xaf   :  { %2086 = vrot.lane.b32.xlu0 %v2085_v36, %s9081_s27  ;;  %v7813_v48 = vld [vmem:[%s16995_s0 + $0xbd] sm:$0x4]   ;;  %v2236_v51 = vsel %vm451_vm0, %v7812_v47, %v7811_v46  ;;  %v7804_v2 = vld [vmem:[%s16995_s0 + $0xad] sm:$0x4]   ;;  %v2201_v6 = vsel %vm451_vm0, %v7803_v1, %v7802_v61 }
  0xb0   :  { %v7814_v52 = vld [vmem:[%s16995_s0 + $0xfc] sm:$0x8]   ;;  %v2240_v57 = vsel %vm455_vm1, %v7813_v48, %v2236_v51  ;;  %v7805_v3 = vld [vmem:[%s16995_s0 + $0xec] sm:$0x8]   ;;  %v2205_v11 = vsel %vm455_vm1, %v7804_v2, %v2201_v6 }
  0xb1   :  { %v7815_v53 = vld [vmem:[%s16995_s0 + $0x13b] sm:$0x10]   ;;  %v2244_v0 = vsel %vm459_vm2, %v7814_v52, %v2240_v57  ;;  %v7806_v7 = vld [vmem:[%s16995_s0 + $0x12b] sm:$0x10]   ;;  %v2209_v18 = vsel %vm459_vm2, %v7805_v3, %v2205_v11 }
  0xb2   :  { %v7816_v54 = vld [vmem:[%s16995_s0 + $0x17a] sm:$0x20]   ;;  %2191 = vrot.lane.b32.xlu1 %v2190_v55, %s9081_s27  ;;  %v2248_v5 = vsel %vm463_vm3, %v7815_v53, %v2244_v0  ;;  %v7807_v8 = vld [vmem:[%s16995_s0 + $0x16a] sm:$0x20]   ;;  %v2213_v24 = vsel %vm463_vm3, %v7806_v7, %v2209_v18 }
  0xb3   :  { %v7817_v59 = vld [vmem:[%s16995_s0 + $0x1b9] sm:$0x40]   ;;  %v7808_v9 = vld [vmem:[%s16995_s0 + $0x1a9] sm:$0x40]   ;;  %2156 = vrot.lane.b32.xlu0 %v2155_v4, %s9081_s27  ;;  %v2252_v10 = vsel %vm467_vm4, %v7816_v54, %v2248_v5  ;;  %v2217_v31 = vsel %vm467_vm4, %v7807_v8, %v2213_v24  ;;  %v10869_v5 = vpop.permute.xlu0 %756  }
  0xb4   :  { %v7818_v60 = vld [vmem:[%s16995_s0 + $0x1f8] sm:$0x80]   ;;  %v7809_v13 = vld [vmem:[%s16995_s0 + $0x1e8] sm:$0x80]   ;;  %v2256_v17 = vsel %vm471_vm5, %v7817_v59, %v2252_v10  ;;  %v2221_v36 = vsel %vm471_vm5, %v7808_v9, %v2217_v31 }
  0xb5   :  { %v7829_v14 = vld [vmem:[%s16995_s0 + $0x21f] sm:$0x1]   ;;  %v2260_v23 = vsel %vm475_vm6, %v7818_v60, %v2256_v17  ;;  %v7820_v33 = vld [vmem:[%s16995_s0 + $0x20f] sm:$0x1]   ;;  %v2225_v43 = vsel %vm475_vm6, %v7809_v13, %v2221_v36 }
  0xb6   :  { %v7830_v15 = vld [vmem:[%s16995_s0 + $0x25e] sm:$0x2]   ;;  %2261 = vrot.lane.b32.xlu1 %v2260_v23, %s9081_s27  ;;  %v7821_v34 = vld [vmem:[%s16995_s0 + $0x24e] sm:$0x2]  }
  0xb7   :  { %v2306_v19 = vsel %vm451_vm0, %v7830_v15, %v7829_v14  ;;  %v7831_v20 = vld [vmem:[%s16995_s0 + $0x29d] sm:$0x4]   ;;  %v7822_v35 = vld [vmem:[%s16995_s0 + $0x28d] sm:$0x4]   ;;  %v2271_v38 = vsel %vm451_vm0, %v7821_v34, %v7820_v33  ;;  %2226 = vrot.lane.b32.xlu0 %v2225_v43, %s9081_s27 }
  0xb8   :  { %v7832_v21 = vld [vmem:[%s16995_s0 + $0x2dc] sm:$0x8]   ;;  %v2310_v25 = vsel %vm455_vm1, %v7831_v20, %v2306_v19  ;;  %v7823_v39 = vld [vmem:[%s16995_s0 + $0x2cc] sm:$0x8]   ;;  %v2275_v46 = vsel %vm455_vm1, %v7822_v35, %v2271_v38  ;;  %v10895_v20 = vpop.permute.xlu1 %861  }
  0xb9   :  { %v7833_v22 = vld [vmem:[%s16995_s0 + $0x31b] sm:$0x10]   ;;  %v2314_v32 = vsel %vm459_vm2, %v7832_v21, %v2310_v25  ;;  %v7824_v40 = vld [vmem:[%s16995_s0 + $0x30b] sm:$0x10]   ;;  %v2279_v52 = vsel %vm459_vm2, %v7823_v39, %v2275_v46 }
  0xba   :  { %v7834_v26 = vld [vmem:[%s16995_s0 + $0x35a] sm:$0x20]   ;;  %v2318_v37 = vsel %vm463_vm3, %v7833_v22, %v2314_v32  ;;  %v7825_v41 = vld [vmem:[%s16995_s0 + $0x34a] sm:$0x20]   ;;  %v2283_v57 = vsel %vm463_vm3, %v7824_v40, %v2279_v52  ;;  %v10933_v40 = vpop.permute.xlu0 %826  }
  0xbb   :  { %v7835_v27 = vld [vmem:[%s16995_s0 + $0x399] sm:$0x40]   ;;  %v2322_v44 = vsel %vm467_vm4, %v7834_v26, %v2318_v37  ;;  %v7826_v47 = vld [vmem:[%s16995_s0 + $0x389] sm:$0x40]   ;;  %v2287_v0 = vsel %vm467_vm4, %v7825_v41, %v2283_v57  ;;  %16997 = vst [vmem:[#allocation0_spill] sm:$0xff] %v10933_v40 }
  0xbc   :  { %v7836_v28 = vld [vmem:[%s16995_s0 + $0x3d8] sm:$0x80]   ;;  %v7827_v48 = vld [vmem:[%s16995_s0 + $0x3c8] sm:$0x80]   ;;  %v2326_v51 = vsel %vm471_vm5, %v7835_v27, %v2322_v44  ;;  %v2291_v6 = vsel %vm471_vm5, %v7826_v47, %v2287_v0 }
  0xbd   :  { %v7847_v49 = vld [vmem:[%s16995_s0 + $0x23f] sm:$0x1]   ;;  %v2330_v56 = vsel %vm475_vm6, %v7836_v28, %v2326_v51  ;;  %v7838_v3 = vld [vmem:[%s16995_s0 + $0x22f] sm:$0x1]   ;;  %v2295_v13 = vsel %vm475_vm6, %v7827_v48, %v2291_v6 }
  0xbe   :  { %v7848_v53 = vld [vmem:[%s16995_s0 + $0x27e] sm:$0x2]   ;;  %2331 = vrot.lane.b32.xlu1 %v2330_v56, %s9081_s27  ;;  %v7839_v4 = vld [vmem:[%s16995_s0 + $0x26e] sm:$0x2]   ;;  %2296 = vrot.lane.b32.xlu0 %v2295_v13, %s9081_s27  ;;  %v10997_v13 = vpop.permute.xlu0 %896  }
  0xbf   :  { %v7849_v54 = vld [vmem:[%s16995_s0 + $0x2bd] sm:$0x4]   ;;  %v2376_v59 = vsel %vm451_vm0, %v7848_v53, %v7847_v49  ;;  %v2341_v8 = vsel %vm451_vm0, %v7839_v4, %v7838_v3  ;;  %v7840_v9 = vld [vmem:[%s16995_s0 + $0x2ad] sm:$0x4]   ;;  %16999 = vst [vmem:[#allocation2_spill] sm:$0xff] %v10997_v13 }
  0xc0   :  { %v7850_v55 = vld [vmem:[%s16995_s0 + $0x2fc] sm:$0x8]   ;;  %v2380_v1 = vsel %vm455_vm1, %v7849_v54, %v2376_v59  ;;  %v7841_v10 = vld [vmem:[%s16995_s0 + $0x2ec] sm:$0x8]   ;;  %v2345_v15 = vsel %vm455_vm1, %v7840_v9, %v2341_v8 }
  0xc1   :  { %v7851_v60 = vld [vmem:[%s16995_s0 + $0x33b] sm:$0x10]   ;;  %v2384_v7 = vsel %vm459_vm2, %v7850_v55, %v2380_v1  ;;  %v7842_v11 = vld [vmem:[%s16995_s0 + $0x32b] sm:$0x10]   ;;  %v2349_v22 = vsel %vm459_vm2, %v7841_v10, %v2345_v15 }
  0xc2   :  { %v7852_v61 = vld [vmem:[%s16995_s0 + $0x37a] sm:$0x20]   ;;  %v2388_v14 = vsel %vm463_vm3, %v7851_v60, %v2384_v7  ;;  %v7843_v17 = vld [vmem:[%s16995_s0 + $0x36a] sm:$0x20]   ;;  %v2353_v27 = vsel %vm463_vm3, %v7842_v11, %v2349_v22 }
  0xc3   :  { %v7853_v63 = vld [vmem:[%s16995_s0 + $0x3b9] sm:$0x40]   ;;  %v7844_v18 = vld [vmem:[%s16995_s0 + $0x3a9] sm:$0x40]   ;;  %v2392_v21 = vsel %vm467_vm4, %v7852_v61, %v2388_v14  ;;  %v2357_v35 = vsel %vm467_vm4, %v7843_v17, %v2353_v27  ;;  %v10971_v61 = vpop.permute.xlu1 %931  }
  0xc4   :  { %v7854_v2 = vld [vmem:[%s16995_s0 + $0x3f8] sm:$0x80]   ;;  %v7845_v19 = vld [vmem:[%s16995_s0 + $0x3e8] sm:$0x80]   ;;  %v2396_v26 = vsel %vm471_vm5, %v7853_v63, %v2392_v21  ;;  %v2361_v41 = vsel %vm471_vm5, %v7844_v18, %v2357_v35  ;;  %16998 = vst [vmem:[#allocation1_spill] sm:$0xff] %v10971_v61 }
  0xc5   :  { %v7865_v23 = vld [vmem:[%s16995_s0 + $0x41f] sm:$0x1]   ;;  %v2400_v34 = vsel %vm475_vm6, %v7854_v2, %v2396_v26  ;;  %v7856_v39 = vld [vmem:[%s16995_s0 + $0x40f] sm:$0x1]   ;;  %v2365_v48 = vsel %vm475_vm6, %v7845_v19, %v2361_v41 }
  0xc6   :  { %v7866_v24 = vld [vmem:[%s16995_s0 + $0x45e] sm:$0x2]   ;;  %2401 = vrot.lane.b32.xlu1 %v2400_v34, %s9081_s27  ;;  %v7857_v44 = vld [vmem:[%s16995_s0 + $0x44e] sm:$0x2]   ;;  %2366 = vrot.lane.b32.xlu0 %v2365_v48, %s9081_s27 }
  0xc7   :  { %v7867_v25 = vld [vmem:[%s16995_s0 + $0x49d] sm:$0x4]   ;;  %v2446_v28 = vsel %vm451_vm0, %v7866_v24, %v7865_v23  ;;  %v7858_v46 = vld [vmem:[%s16995_s0 + $0x48d] sm:$0x4]   ;;  %v2411_v51 = vsel %vm451_vm0, %v7857_v44, %v7856_v39  ;;  %v11035_v35 = vpop.permute.xlu1 %1001  }
  0xc8   :  { %v7868_v31 = vld [vmem:[%s16995_s0 + $0x4dc] sm:$0x8]   ;;  %v2450_v36 = vsel %vm455_vm1, %v7867_v25, %v2446_v28  ;;  %v7859_v47 = vld [vmem:[%s16995_s0 + $0x4cc] sm:$0x8]   ;;  %v2415_v56 = vsel %vm455_vm1, %v7858_v46, %v2411_v51  ;;  %17000 = vst [vmem:[#allocation3_spill] sm:$0xff] %v11035_v35 }
  0xc9   :  { %v7869_v32 = vld [vmem:[%s16995_s0 + $0x51b] sm:$0x10]   ;;  %v2454_v43 = vsel %vm459_vm2, %v7868_v31, %v2450_v36  ;;  %v7860_v52 = vld [vmem:[%s16995_s0 + $0x50b] sm:$0x10]   ;;  %v2419_v0 = vsel %vm459_vm2, %v7859_v47, %v2415_v56  ;;  %v11073_v56 = vpop.permute.xlu0 %966  }
  0xca   :  { %v7870_v33 = vld [vmem:[%s16995_s0 + $0x55a] sm:$0x20]   ;;  %v2458_v49 = vsel %vm463_vm3, %v7869_v32, %v2454_v43  ;;  %v7861_v53 = vld [vmem:[%s16995_s0 + $0x54a] sm:$0x20]   ;;  %v2423_v7 = vsel %vm463_vm3, %v7860_v52, %v2419_v0  ;;  %17001 = vst [vmem:[#allocation4_spill] sm:$0xff] %v11073_v56 }
  0xcb   :  { %v7871_v37 = vld [vmem:[%s16995_s0 + $0x599] sm:$0x40]   ;;  %v7862_v54 = vld [vmem:[%s16995_s0 + $0x589] sm:$0x40]   ;;  %v2462_v55 = vsel %vm467_vm4, %v7870_v33, %v2458_v49  ;;  %v2427_v14 = vsel %vm467_vm4, %v7861_v53, %v2423_v7 }
  0xcc   :  { %v7872_v38 = vld [vmem:[%s16995_s0 + $0x5d8] sm:$0x80]   ;;  %v7863_v57 = vld [vmem:[%s16995_s0 + $0x5c8] sm:$0x80]   ;;  %v2466_v63 = vsel %vm471_vm5, %v7871_v37, %v2462_v55  ;;  %v2431_v21 = vsel %vm471_vm5, %v7862_v54, %v2427_v14 }
  0xcd   :  { %v7883_v59 = vld [vmem:[%s16995_s0 + $0x43f] sm:$0x1]   ;;  %v2470_v6 = vsel %vm475_vm6, %v7872_v38, %v2466_v63  ;;  %v7874_v17 = vld [vmem:[%s16995_s0 + $0x42f] sm:$0x1]   ;;  %v2435_v27 = vsel %vm475_vm6, %v7863_v57, %v2431_v21 }
  0xce   :  { %v7884_v60 = vld [vmem:[%s16995_s0 + $0x47e] sm:$0x2]   ;;  %2471 = vrot.lane.b32.xlu1 %v2470_v6, %s9081_s27  ;;  %v7875_v18 = vld [vmem:[%s16995_s0 + $0x46e] sm:$0x2]   ;;  %2436 = vrot.lane.b32.xlu0 %v2435_v27, %s9081_s27 }
  0xcf   :  { %v2516_v1 = vsel %vm451_vm0, %v7884_v60, %v7883_v59  ;;  %v7885_v2 = vld [vmem:[%s16995_s0 + $0x4bd] sm:$0x4]   ;;  %v7876_v19 = vld [vmem:[%s16995_s0 + $0x4ad] sm:$0x4]   ;;  %v2481_v23 = vsel %vm451_vm0, %v7875_v18, %v7874_v17 }
  0xd0   :  { %v7886_v3 = vld [vmem:[%s16995_s0 + $0x4fc] sm:$0x8]   ;;  %v2520_v8 = vsel %vm455_vm1, %v7885_v2, %v2516_v1  ;;  %v7877_v24 = vld [vmem:[%s16995_s0 + $0x4ec] sm:$0x8]   ;;  %v2485_v31 = vsel %vm455_vm1, %v7876_v19, %v2481_v23 }
  0xd1   :  { %v7887_v4 = vld [vmem:[%s16995_s0 + $0x53b] sm:$0x10]   ;;  %v2524_v15 = vsel %vm459_vm2, %v7886_v3, %v2520_v8  ;;  %v7878_v25 = vld [vmem:[%s16995_s0 + $0x52b] sm:$0x10]   ;;  %v2489_v37 = vsel %vm459_vm2, %v7877_v24, %v2485_v31 }
  0xd2   :  { %v7888_v9 = vld [vmem:[%s16995_s0 + $0x57a] sm:$0x20]   ;;  %v2528_v22 = vsel %vm463_vm3, %v7887_v4, %v2524_v15  ;;  %v7879_v26 = vld [vmem:[%s16995_s0 + $0x56a] sm:$0x20]   ;;  %v2493_v44 = vsel %vm463_vm3, %v7878_v25, %v2489_v37 }
  0xd3   :  { %v7889_v10 = vld [vmem:[%s16995_s0 + $0x5b9] sm:$0x40]   ;;  %v2532_v28 = vsel %vm467_vm4, %v7888_v9, %v2528_v22  ;;  %v7880_v32 = vld [vmem:[%s16995_s0 + $0x5a9] sm:$0x40]   ;;  %v2497_v51 = vsel %vm467_vm4, %v7879_v26, %v2493_v44  ;;  %v11099_v9 = vpop.permute.xlu1 %1071  }
  0xd4   :  { %v7890_v11 = vld [vmem:[%s16995_s0 + $0x5f8] sm:$0x80]   ;;  %v7881_v33 = vld [vmem:[%s16995_s0 + $0x5e8] sm:$0x80]   ;;  %v2536_v36 = vsel %vm471_vm5, %v7889_v10, %v2532_v28  ;;  %v2501_v57 = vsel %vm471_vm5, %v7880_v32, %v2497_v51 }
  0xd5   :  { %v7901_v34 = vld [vmem:[%s16995_s0 + $0x61f] sm:$0x1]   ;;  %v2540_v43 = vsel %vm475_vm6, %v7890_v11, %v2536_v36  ;;  %v7892_v54 = vld [vmem:[%s16995_s0 + $0x60f] sm:$0x1]   ;;  %v2505_v2 = vsel %vm475_vm6, %v7881_v33, %v2501_v57  ;;  %v11137_v33 = vpop.permute.xlu0 %1036  }
  0xd6   :  { %v7902_v38 = vld [vmem:[%s16995_s0 + $0x65e] sm:$0x2]   ;;  %2541 = vrot.lane.b32.xlu1 %v2540_v43, %s9081_s27  ;;  %v7893_v55 = vld [vmem:[%s16995_s0 + $0x64e] sm:$0x2]   ;;  %2506 = vrot.lane.b32.xlu0 %v2505_v2, %s9081_s27 }
  0xd7   :  { %v7903_v39 = vld [vmem:[%s16995_s0 + $0x69d] sm:$0x4]   ;;  %v2586_v46 = vsel %vm451_vm0, %v7902_v38, %v7901_v34  ;;  %v2551_v60 = vsel %vm451_vm0, %v7893_v55, %v7892_v54  ;;  %v7894_v63 = vld [vmem:[%s16995_s0 + $0x68d] sm:$0x4]   ;;  %v11172_v54 = vpop.permute.xlu1 %1141  }
  0xd8   :  { %v7904_v41 = vld [vmem:[%s16995_s0 + $0x6dc] sm:$0x8]   ;;  %v2590_v52 = vsel %vm455_vm1, %v7903_v39, %v2586_v46  ;;  %v7895_v0 = vld [vmem:[%s16995_s0 + $0x6cc] sm:$0x8]   ;;  %v2555_v4 = vsel %vm455_vm1, %v7894_v63, %v2551_v60  ;;  %v7938_v60 = vld [vmem:[%s16995_s0 + $0x90] sm:$0x4]  }
  0xd9   :  { %v7905_v47 = vld [vmem:[%s16995_s0 + $0x71b] sm:$0x10]   ;;  %v2594_v59 = vsel %vm459_vm2, %v7904_v41, %v2590_v52  ;;  %v7896_v1 = vld [vmem:[%s16995_s0 + $0x70b] sm:$0x10]   ;;  %v2559_v11 = vsel %vm459_vm2, %v7895_v0, %v2555_v4  ;;  %v7939_v63 = vld [vmem:[%s16995_s0 + $0xcf] sm:$0x8]  }
  0xda   :  { %v7906_v48 = vld [vmem:[%s16995_s0 + $0x75a] sm:$0x20]   ;;  %v2598_v3 = vsel %vm463_vm3, %v7905_v47, %v2594_v59  ;;  %v7897_v6 = vld [vmem:[%s16995_s0 + $0x74a] sm:$0x20]   ;;  %v2563_v19 = vsel %vm463_vm3, %v7896_v1, %v2559_v11  ;;  %v7937_v59 = vld [vmem:[%s16995_s0 + $0x51] sm:$0x2]  }
  0xdb   :  { %v7907_v49 = vld [vmem:[%s16995_s0 + $0x799] sm:$0x40]   ;;  %v7898_v7 = vld [vmem:[%s16995_s0 + $0x789] sm:$0x40]   ;;  %v2602_v10 = vsel %vm467_vm4, %v7906_v48, %v2598_v3  ;;  %v2567_v26 = vsel %vm467_vm4, %v7897_v6, %v2563_v19  ;;  %v7940_v3 = vld [vmem:[%s16995_s0 + $0x10e] sm:$0x10]  }
  0xdc   :  { %v7908_v53 = vld [vmem:[%s16995_s0 + $0x7d8] sm:$0x80]   ;;  %v7899_v8 = vld [vmem:[%s16995_s0 + $0x7c8] sm:$0x80]   ;;  %v2606_v18 = vsel %vm471_vm5, %v7907_v49, %v2602_v10  ;;  %v2571_v34 = vsel %vm471_vm5, %v7898_v7, %v2567_v26  ;;  %v7941_v4 = vld [vmem:[%s16995_s0 + $0x14d] sm:$0x20]   ;;  %v11197_v7 = vpop.permute.xlu0 %1106  }
  0xdd   :  { %v7919_v14 = vld [vmem:[%s16995_s0 + $0x63f] sm:$0x1]   ;;  %v2610_v25 = vsel %vm475_vm6, %v7908_v53, %v2606_v18  ;;  %v7910_v32 = vld [vmem:[%s16995_s0 + $0x62f] sm:$0x1]   ;;  %v2575_v41 = vsel %vm475_vm6, %v7899_v8, %v2571_v34  ;;  %v7936_v53 = vld [vmem:[%s16995_s0 + $0x12] sm:$0x1]  }
  0xde   :  { %v7920_v15 = vld [vmem:[%s16995_s0 + $0x67e] sm:$0x2]   ;;  %2611 = vrot.lane.b32.xlu1 %v2610_v25, %s9081_s27  ;;  %v7911_v37 = vld [vmem:[%s16995_s0 + $0x66e] sm:$0x2]   ;;  %2576 = vrot.lane.b32.xlu0 %v2575_v41, %s9081_s27  ;;  %v2725_v2 = vsel %vm451_vm0, %v7937_v59, %v7936_v53 }
  0xdf   :  { %v7921_v17 = vld [vmem:[%s16995_s0 + $0x6bd] sm:$0x4]   ;;  %v2656_v21 = vsel %vm451_vm0, %v7920_v15, %v7919_v14  ;;  %v7912_v38 = vld [vmem:[%s16995_s0 + $0x6ad] sm:$0x4]   ;;  %v2621_v44 = vsel %vm451_vm0, %v7911_v37, %v7910_v32  ;;  %v7942_v6 = vld [vmem:[%s16995_s0 + $0x18c] sm:$0x40]   ;;  %v2729_v10 = vsel %vm455_vm1, %v7938_v60, %v2725_v2  ;;  %v11235_v32 = vpop.permute.xlu1 %1211  }
  0xe0   :  { %v7922_v22 = vld [vmem:[%s16995_s0 + $0x6fc] sm:$0x8]   ;;  %v2660_v27 = vsel %vm455_vm1, %v7921_v17, %v2656_v21  ;;  %v7913_v39 = vld [vmem:[%s16995_s0 + $0x6ec] sm:$0x8]   ;;  %v2625_v51 = vsel %vm455_vm1, %v7912_v38, %v2621_v44  ;;  %v7943_v11 = vld [vmem:[%s16995_s0 + $0x1cb] sm:$0x80]   ;;  %v2733_v18 = vsel %vm459_vm2, %v7939_v63, %v2729_v10  ;;  %v11273_v59 = vpop.permute.xlu0 %1176  }
  0xe1   :  { %v7923_v23 = vld [vmem:[%s16995_s0 + $0x73b] sm:$0x10]   ;;  %v2664_v36 = vsel %vm459_vm2, %v7922_v22, %v2660_v27  ;;  %v7914_v46 = vld [vmem:[%s16995_s0 + $0x72b] sm:$0x10]   ;;  %v2629_v57 = vsel %vm459_vm2, %v7913_v39, %v2625_v51  ;;  %v7928_v14 = vld [vmem:[%s16995_s0 + $0x2] sm:$0x1]   ;;  %v2737_v25 = vsel %vm463_vm3, %v7940_v3, %v2733_v18 }
  0xe2   :  { %v7924_v24 = vld [vmem:[%s16995_s0 + $0x77a] sm:$0x20]   ;;  %v2668_v43 = vsel %vm463_vm3, %v7923_v23, %v2664_v36  ;;  %v7915_v47 = vld [vmem:[%s16995_s0 + $0x76a] sm:$0x20]   ;;  %v2633_v1 = vsel %vm463_vm3, %v7914_v46, %v2629_v57  ;;  %v7929_v15 = vld [vmem:[%s16995_s0 + $0x41] sm:$0x2]   ;;  %v2741_v34 = vsel %vm467_vm4, %v7941_v4, %v2737_v25 }
  0xe3   :  { %v7925_v28 = vld [vmem:[%s16995_s0 + $0x7b9] sm:$0x40]   ;;  %v7916_v48 = vld [vmem:[%s16995_s0 + $0x7a9] sm:$0x40]   ;;  %v2672_v49 = vsel %vm467_vm4, %v7924_v24, %v2668_v43  ;;  %v2637_v8 = vsel %vm467_vm4, %v7915_v47, %v2633_v1  ;;  %v2691_v19 = vsel %vm451_vm0, %v7929_v15, %v7928_v14  ;;  %v7930_v21 = vld [vmem:[%s16995_s0 + $0x80] sm:$0x4]   ;;  %v2745_v41 = vsel %vm471_vm5, %v7942_v6, %v2741_v34  ;;  %v11299_v14 = vpop.permute.xlu1 %1281  }
  0xe4   :  { %v7926_v31 = vld [vmem:[%s16995_s0 + $0x7f8] sm:$0x80]   ;;  %v7917_v52 = vld [vmem:[%s16995_s0 + $0x7e8] sm:$0x80]   ;;  %v2676_v55 = vsel %vm471_vm5, %v7925_v28, %v2672_v49  ;;  %v2641_v17 = vsel %vm471_vm5, %v7916_v48, %v2637_v8  ;;  %v7931_v22 = vld [vmem:[%s16995_s0 + $0xbf] sm:$0x8]   ;;  %v2695_v26 = vsel %vm455_vm1, %v7930_v21, %v2691_v19  ;;  %v2749_v49 = vsel %vm475_vm6, %v7943_v11, %v2745_v41 }
  0xe5   :  { %v2680_v0 = vsel %vm475_vm6, %v7926_v31, %v2676_v55  ;;  %v7932_v23 = vld [vmem:[%s16995_s0 + $0xfe] sm:$0x10]   ;;  %v2645_v24 = vsel %vm475_vm6, %v7917_v52, %v2641_v17  ;;  %v2699_v36 = vsel %vm459_vm2, %v7931_v22, %v2695_v26  ;;  %v7954_v37 = vld [vmem:[%s16995_s0 + $0x32] sm:$0x1]  }
  0xe6   :  { %2681 = vrot.lane.b32.xlu1 %v2680_v0, %s9081_s27  ;;  %v7933_v27 = vld [vmem:[%s16995_s0 + $0x13d] sm:$0x20]   ;;  %2646 = vrot.lane.b32.xlu0 %v2645_v24, %s9081_s27  ;;  %v7955_v38 = vld [vmem:[%s16995_s0 + $0x71] sm:$0x2]   ;;  %v2703_v43 = vsel %vm463_vm3, %v7932_v23, %v2699_v36 }
  0xe7   :  { %v7934_v28 = vld [vmem:[%s16995_s0 + $0x17c] sm:$0x40]   ;;  %v7956_v39 = vld [vmem:[%s16995_s0 + $0xb0] sm:$0x4]   ;;  %v2795_v44 = vsel %vm451_vm0, %v7955_v38, %v7954_v37  ;;  %v2707_v51 = vsel %vm467_vm4, %v7933_v27, %v2703_v43 }
  0xe8   :  { %v7935_v31 = vld [vmem:[%s16995_s0 + $0x1bb] sm:$0x80]   ;;  %v7957_v46 = vld [vmem:[%s16995_s0 + $0xef] sm:$0x8]   ;;  %v2799_v52 = vsel %vm455_vm1, %v7956_v39, %v2795_v44  ;;  %v2711_v60 = vsel %vm471_vm5, %v7934_v28, %v2707_v51  ;;  %v11337_v39 = vpop.permute.xlu0 %1246  }
  0xe9   :  { %v7958_v47 = vld [vmem:[%s16995_s0 + $0x12e] sm:$0x10]   ;;  %v7945_v57 = vld [vmem:[%s16995_s0 + $0x22] sm:$0x1]   ;;  %v2803_v63 = vsel %vm459_vm2, %v7957_v46, %v2799_v52  ;;  %v2715_v3 = vsel %vm475_vm6, %v7935_v31, %v2711_v60 }
  0xea   :  { %v7959_v48 = vld [vmem:[%s16995_s0 + $0x16d] sm:$0x20]   ;;  %2750 = vrot.lane.b32.xlu1 %v2749_v49, %s9082_s14  ;;  %v7946_v0 = vld [vmem:[%s16995_s0 + $0x61] sm:$0x2]   ;;  %v2807_v4 = vsel %vm463_vm3, %v7958_v47, %v2803_v63  ;;  %2716 = vrot.lane.b32.xlu0 %v2715_v3, %s9082_s14  ;;  %v11375_v3 = vpop.permute.xlu1 %1351  }
  0xeb   :  { %v7960_v53 = vld [vmem:[%s16995_s0 + $0x1ac] sm:$0x40]   ;;  %v7947_v1 = vld [vmem:[%s16995_s0 + $0xa0] sm:$0x4]   ;;  %v2760_v6 = vsel %vm451_vm0, %v7946_v0, %v7945_v57  ;;  %v2811_v15 = vsel %vm467_vm4, %v7959_v48, %v2807_v4 }
  0xec   :  { %v7961_v55 = vld [vmem:[%s16995_s0 + $0x1eb] sm:$0x80]   ;;  %v7948_v2 = vld [vmem:[%s16995_s0 + $0xdf] sm:$0x8]   ;;  %v2764_v17 = vsel %vm455_vm1, %v7947_v1, %v2760_v6  ;;  %v2815_v22 = vsel %vm471_vm5, %v7960_v53, %v2811_v15 }
  0xed   :  { %v7949_v8 = vld [vmem:[%s16995_s0 + $0x11e] sm:$0x10]   ;;  %v7972_v19 = vld [vmem:[%s16995_s0 + $0x212] sm:$0x1]   ;;  %v2768_v23 = vsel %vm459_vm2, %v7948_v2, %v2764_v17  ;;  %v2819_v28 = vsel %vm475_vm6, %v7961_v55, %v2815_v22 }
  0xee   :  { %v7950_v10 = vld [vmem:[%s16995_s0 + $0x15d] sm:$0x20]   ;;  %v7973_v21 = vld [vmem:[%s16995_s0 + $0x251] sm:$0x2]   ;;  %v2772_v31 = vsel %vm463_vm3, %v7949_v8, %v2768_v23  ;;  %2820 = vrot.lane.b32.xlu1 %v2819_v28, %s9082_s14  ;;  %v11401_v23 = vpop.permute.xlu0 %1316  }
  0xef   :  { %v7951_v11 = vld [vmem:[%s16995_s0 + $0x19c] sm:$0x40]   ;;  %v2865_v24 = vsel %vm451_vm0, %v7973_v21, %v7972_v19  ;;  %v7974_v25 = vld [vmem:[%s16995_s0 + $0x290] sm:$0x4]   ;;  %v2776_v41 = vsel %vm467_vm4, %v7950_v10, %v2772_v31 }
  0xf0   :  { %v7952_v18 = vld [vmem:[%s16995_s0 + $0x1db] sm:$0x80]   ;;  %v7975_v26 = vld [vmem:[%s16995_s0 + $0x2cf] sm:$0x8]   ;;  %v2869_v34 = vsel %vm455_vm1, %v7974_v25, %v2865_v24  ;;  %v2780_v48 = vsel %vm471_vm5, %v7951_v11, %v2776_v41 }
  0xf1   :  { %v7976_v27 = vld [vmem:[%s16995_s0 + $0x30e] sm:$0x10]   ;;  %v2873_v43 = vsel %vm459_vm2, %v7975_v26, %v2869_v34  ;;  %v7963_v44 = vld [vmem:[%s16995_s0 + $0x202] sm:$0x1]   ;;  %v2784_v57 = vsel %vm475_vm6, %v7952_v18, %v2780_v48 }
  0xf2   :  { %v7977_v36 = vld [vmem:[%s16995_s0 + $0x34d] sm:$0x20]   ;;  %v7964_v46 = vld [vmem:[%s16995_s0 + $0x241] sm:$0x2]   ;;  %v2877_v49 = vsel %vm463_vm3, %v7976_v27, %v2873_v43  ;;  %2785 = vrot.lane.b32.xlu0 %v2784_v57, %s9082_s14 }
  0xf3   :  { %v7978_v37 = vld [vmem:[%s16995_s0 + $0x38c] sm:$0x40]   ;;  %v7965_v47 = vld [vmem:[%s16995_s0 + $0x280] sm:$0x4]   ;;  %v2830_v51 = vsel %vm451_vm0, %v7964_v46, %v7963_v44  ;;  %v2881_v60 = vsel %vm467_vm4, %v7977_v36, %v2877_v49 }
  0xf4   :  { %v7979_v38 = vld [vmem:[%s16995_s0 + $0x3cb] sm:$0x80]   ;;  %v7966_v52 = vld [vmem:[%s16995_s0 + $0x2bf] sm:$0x8]   ;;  %v2834_v63 = vsel %vm455_vm1, %v7965_v47, %v2830_v51  ;;  %v2885_v4 = vsel %vm471_vm5, %v7978_v37, %v2881_v60  ;;  %v11439_v51 = vpop.permute.xlu1 %1421  }
  0xf5   :  { %v7967_v53 = vld [vmem:[%s16995_s0 + $0x2fe] sm:$0x10]   ;;  %v7990_v2 = vld [vmem:[%s16995_s0 + $0x232] sm:$0x1]   ;;  %v2838_v6 = vsel %vm459_vm2, %v7966_v52, %v2834_v63  ;;  %v2889_v15 = vsel %vm475_vm6, %v7979_v38, %v2885_v4 }
  0xf6   :  { %v7968_v55 = vld [vmem:[%s16995_s0 + $0x33d] sm:$0x20]   ;;  %v7991_v8 = vld [vmem:[%s16995_s0 + $0x271] sm:$0x2]   ;;  %v2842_v17 = vsel %vm463_vm3, %v7967_v53, %v2838_v6  ;;  %2890 = vrot.lane.b32.xlu1 %v2889_v15, %s9082_s14 }
  0xf7   :  { %v7969_v0 = vld [vmem:[%s16995_s0 + $0x37c] sm:$0x40]   ;;  %v7992_v10 = vld [vmem:[%s16995_s0 + $0x2b0] sm:$0x4]   ;;  %v2935_v18 = vsel %vm451_vm0, %v7991_v8, %v7990_v2  ;;  %v2846_v24 = vsel %vm467_vm4, %v7968_v55, %v2842_v17 }
  0xf8   :  { %v7970_v1 = vld [vmem:[%s16995_s0 + $0x3bb] sm:$0x80]   ;;  %v7993_v11 = vld [vmem:[%s16995_s0 + $0x2ef] sm:$0x8]   ;;  %v2939_v25 = vsel %vm455_vm1, %v7992_v10, %v2935_v18  ;;  %v2850_v31 = vsel %vm471_vm5, %v7969_v0, %v2846_v24 }
  0xf9   :  { %v7994_v19 = vld [vmem:[%s16995_s0 + $0x32e] sm:$0x10]   ;;  %v7981_v27 = vld [vmem:[%s16995_s0 + $0x222] sm:$0x1]   ;;  %v2943_v34 = vsel %vm459_vm2, %v7993_v11, %v2939_v25  ;;  %v2854_v43 = vsel %vm475_vm6, %v7970_v1, %v2850_v31 }
  0xfa   :  { %v7995_v21 = vld [vmem:[%s16995_s0 + $0x36d] sm:$0x20]   ;;  %v7982_v28 = vld [vmem:[%s16995_s0 + $0x261] sm:$0x2]   ;;  %v2947_v44 = vsel %vm463_vm3, %v7994_v19, %v2943_v34  ;;  %2855 = vrot.lane.b32.xlu0 %v2854_v43, %s9082_s14  ;;  %v11477_v19 = vpop.permute.xlu0 %1386  }
  0xfb   :  { %v7996_v22 = vld [vmem:[%s16995_s0 + $0x3ac] sm:$0x40]   ;;  %v2900_v36 = vsel %vm451_vm0, %v7982_v28, %v7981_v27  ;;  %v7983_v37 = vld [vmem:[%s16995_s0 + $0x2a0] sm:$0x4]   ;;  %v2951_v52 = vsel %vm467_vm4, %v7995_v21, %v2947_v44  ;;  %17002 = vst [vmem:[#allocation5_spill] sm:$0xff] %v11477_v19 }
  0xfc   :  { %v7997_v26 = vld [vmem:[%s16995_s0 + $0x3eb] sm:$0x80]   ;;  %v7984_v38 = vld [vmem:[%s16995_s0 + $0x2df] sm:$0x8]   ;;  %v2904_v46 = vsel %vm455_vm1, %v7983_v37, %v2900_v36  ;;  %v2955_v63 = vsel %vm471_vm5, %v7996_v22, %v2951_v52 }
  0xfd   :  { %v7985_v41 = vld [vmem:[%s16995_s0 + $0x31e] sm:$0x10]   ;;  %v2908_v53 = vsel %vm459_vm2, %v7984_v38, %v2904_v46  ;;  %v8008_v55 = vld [vmem:[%s16995_s0 + $0x412] sm:$0x1]   ;;  %v2959_v8 = vsel %vm475_vm6, %v7997_v26, %v2955_v63  ;;  %v11503_v38 = vpop.permute.xlu1 %1491  }
  0xfe   :  { %v7986_v47 = vld [vmem:[%s16995_s0 + $0x35d] sm:$0x20]   ;;  %v8009_v57 = vld [vmem:[%s16995_s0 + $0x451] sm:$0x2]   ;;  %v2912_v0 = vsel %vm463_vm3, %v7985_v41, %v2908_v53  ;;  %2960 = vrot.lane.b32.xlu1 %v2959_v8, %s9082_s14  ;;  %17003 = vst [vmem:[#allocation6_spill] sm:$0xff] %v11503_v38 }
  0xff   :  { %v7987_v48 = vld [vmem:[%s16995_s0 + $0x39c] sm:$0x40]   ;;  %v8010_v60 = vld [vmem:[%s16995_s0 + $0x490] sm:$0x4]   ;;  %v3005_v1 = vsel %vm451_vm0, %v8009_v57, %v8008_v55  ;;  %v2916_v10 = vsel %vm467_vm4, %v7986_v47, %v2912_v0 }
 0x100   :  { %v7988_v49 = vld [vmem:[%s16995_s0 + $0x3db] sm:$0x80]   ;;  %v8011_v2 = vld [vmem:[%s16995_s0 + $0x4cf] sm:$0x8]   ;;  %v3009_v11 = vsel %vm455_vm1, %v8010_v60, %v3005_v1  ;;  %v2920_v21 = vsel %vm471_vm5, %v7987_v48, %v2916_v10 }
 0x101   :  { %v8012_v4 = vld [vmem:[%s16995_s0 + $0x50e] sm:$0x10]   ;;  %v7999_v18 = vld [vmem:[%s16995_s0 + $0x402] sm:$0x1]   ;;  %v3013_v22 = vsel %vm459_vm2, %v8011_v2, %v3009_v11  ;;  %v2924_v27 = vsel %vm475_vm6, %v7988_v49, %v2920_v21 }
 0x102   :  { %v8013_v6 = vld [vmem:[%s16995_s0 + $0x54d] sm:$0x20]   ;;  %v8000_v24 = vld [vmem:[%s16995_s0 + $0x441] sm:$0x2]   ;;  %v3017_v28 = vsel %vm463_vm3, %v8012_v4, %v3013_v22  ;;  %2925 = vrot.lane.b32.xlu0 %v2924_v27, %s9082_s14 }
 0x103   :  { %v8014_v15 = vld [vmem:[%s16995_s0 + $0x58c] sm:$0x40]   ;;  %v8001_v25 = vld [vmem:[%s16995_s0 + $0x480] sm:$0x4]   ;;  %v2970_v31 = vsel %vm451_vm0, %v8000_v24, %v7999_v18  ;;  %v3021_v41 = vsel %vm467_vm4, %v8013_v6, %v3017_v28  ;;  %v11541_v6 = vpop.permute.xlu0 %1456  }
 0x104   :  { %v8015_v17 = vld [vmem:[%s16995_s0 + $0x5cb] sm:$0x80]   ;;  %v8002_v26 = vld [vmem:[%s16995_s0 + $0x4bf] sm:$0x8]   ;;  %v2974_v43 = vsel %vm455_vm1, %v8001_v25, %v2970_v31  ;;  %v3025_v48 = vsel %vm471_vm5, %v8014_v15, %v3021_v41  ;;  %17004 = vst [vmem:[#allocation7_spill] sm:$0xff] %v11541_v6  ;;  %v11579_v41 = vpop.permute.xlu1 %1561  }
 0x105   :  { %v8003_v34 = vld [vmem:[%s16995_s0 + $0x4fe] sm:$0x10]   ;;  %v8026_v46 = vld [vmem:[%s16995_s0 + $0x432] sm:$0x1]   ;;  %v2978_v49 = vsel %vm459_vm2, %v8002_v26, %v2974_v43  ;;  %v3029_v60 = vsel %vm475_vm6, %v8015_v17, %v3025_v48  ;;  %17005 = vst [vmem:[#allocation8_spill] sm:$0xff] %v11579_v41 }
 0x106   :  { %v8004_v36 = vld [vmem:[%s16995_s0 + $0x53d] sm:$0x20]   ;;  %v8027_v47 = vld [vmem:[%s16995_s0 + $0x471] sm:$0x2]   ;;  %v2982_v63 = vsel %vm463_vm3, %v8003_v34, %v2978_v49  ;;  %3030 = vrot.lane.b32.xlu1 %v3029_v60, %s9082_s14 }
 0x107   :  { %v8005_v37 = vld [vmem:[%s16995_s0 + $0x57c] sm:$0x40]   ;;  %v3075_v52 = vsel %vm451_vm0, %v8027_v47, %v8026_v46  ;;  %v8028_v53 = vld [vmem:[%s16995_s0 + $0x4b0] sm:$0x4]   ;;  %v2986_v8 = vsel %vm467_vm4, %v8004_v36, %v2982_v63  ;;  %v11605_v63 = vpop.permute.xlu0 %1526  }
 0x108   :  { %v8006_v44 = vld [vmem:[%s16995_s0 + $0x5bb] sm:$0x80]   ;;  %v8029_v55 = vld [vmem:[%s16995_s0 + $0x4ef] sm:$0x8]   ;;  %v3079_v0 = vsel %vm455_vm1, %v8028_v53, %v3075_v52  ;;  %v2990_v18 = vsel %vm471_vm5, %v8005_v37, %v2986_v8  ;;  %17006 = vst [vmem:[#allocation9_spill] sm:$0xff] %v11605_v63 }
 0x109   :  { %v8030_v57 = vld [vmem:[%s16995_s0 + $0x52e] sm:$0x10]   ;;  %v3083_v10 = vsel %vm459_vm2, %v8029_v55, %v3079_v0  ;;  %v8017_v11 = vld [vmem:[%s16995_s0 + $0x422] sm:$0x1]   ;;  %v2994_v27 = vsel %vm475_vm6, %v8006_v44, %v2990_v18 }
 0x10a   :  { %v8031_v1 = vld [vmem:[%s16995_s0 + $0x56d] sm:$0x20]   ;;  %v8018_v15 = vld [vmem:[%s16995_s0 + $0x461] sm:$0x2]   ;;  %v3087_v21 = vsel %vm463_vm3, %v8030_v57, %v3083_v10  ;;  %2995 = vrot.lane.b32.xlu0 %v2994_v27, %s9082_s14 }
 0x10b   :  { %v8032_v2 = vld [vmem:[%s16995_s0 + $0x5ac] sm:$0x40]   ;;  %v8019_v17 = vld [vmem:[%s16995_s0 + $0x4a0] sm:$0x4]   ;;  %v3040_v22 = vsel %vm451_vm0, %v8018_v15, %v8017_v11  ;;  %v3091_v28 = vsel %vm467_vm4, %v8031_v1, %v3087_v21 }
 0x10c   :  { %v8033_v4 = vld [vmem:[%s16995_s0 + $0x5eb] sm:$0x80]   ;;  %v8020_v24 = vld [vmem:[%s16995_s0 + $0x4df] sm:$0x8]   ;;  %v3044_v31 = vsel %vm455_vm1, %v8019_v17, %v3040_v22  ;;  %v3095_v43 = vsel %vm471_vm5, %v8032_v2, %v3091_v28 }
 0x10d   :  { %v8021_v25 = vld [vmem:[%s16995_s0 + $0x51e] sm:$0x10]   ;;  %v8044_v37 = vld [vmem:[%s16995_s0 + $0x612] sm:$0x1]   ;;  %v3048_v44 = vsel %vm459_vm2, %v8020_v24, %v3044_v31  ;;  %v3099_v49 = vsel %vm475_vm6, %v8033_v4, %v3095_v43  ;;  %v11643_v31 = vpop.permute.xlu1 %1631  }
 0x10e   :  { %v8022_v26 = vld [vmem:[%s16995_s0 + $0x55d] sm:$0x20]   ;;  %v8045_v46 = vld [vmem:[%s16995_s0 + $0x651] sm:$0x2]   ;;  %v3052_v52 = vsel %vm463_vm3, %v8021_v25, %v3048_v44  ;;  %3100 = vrot.lane.b32.xlu1 %v3099_v49, %s9082_s14 }
 0x10f   :  { %v8023_v34 = vld [vmem:[%s16995_s0 + $0x59c] sm:$0x40]   ;;  %v8046_v47 = vld [vmem:[%s16995_s0 + $0x690] sm:$0x4]   ;;  %v3145_v53 = vsel %vm451_vm0, %v8045_v46, %v8044_v37  ;;  %v3056_v0 = vsel %vm467_vm4, %v8022_v26, %v3052_v52 }
 0x110   :  { %v8024_v36 = vld [vmem:[%s16995_s0 + $0x5db] sm:$0x80]   ;;  %v8047_v48 = vld [vmem:[%s16995_s0 + $0x6cf] sm:$0x8]   ;;  %v3149_v1 = vsel %vm455_vm1, %v8046_v47, %v3145_v53  ;;  %v3060_v10 = vsel %vm471_vm5, %v8023_v34, %v3056_v0 }
 0x111   :  { %v8048_v55 = vld [vmem:[%s16995_s0 + $0x70e] sm:$0x10]   ;;  %v8035_v4 = vld [vmem:[%s16995_s0 + $0x602] sm:$0x1]   ;;  %v3153_v11 = vsel %vm459_vm2, %v8047_v48, %v3149_v1  ;;  %v3064_v22 = vsel %vm475_vm6, %v8024_v36, %v3060_v10 }
 0x112   :  { %v8049_v57 = vld [vmem:[%s16995_s0 + $0x74d] sm:$0x20]   ;;  %v8036_v8 = vld [vmem:[%s16995_s0 + $0x641] sm:$0x2]   ;;  %v3157_v24 = vsel %vm463_vm3, %v8048_v55, %v3153_v11  ;;  %3065 = vrot.lane.b32.xlu0 %v3064_v22, %s9082_s14 }
 0x113   :  { %v8050_v60 = vld [vmem:[%s16995_s0 + $0x78c] sm:$0x40]   ;;  %v3110_v15 = vsel %vm451_vm0, %v8036_v8, %v8035_v4  ;;  %v8037_v17 = vld [vmem:[%s16995_s0 + $0x680] sm:$0x4]   ;;  %v3161_v34 = vsel %vm467_vm4, %v8049_v57, %v3157_v24  ;;  %v11681_v4 = vpop.permute.xlu0 %1596  }
 0x114   :  { %v8051_v2 = vld [vmem:[%s16995_s0 + $0x7cb] sm:$0x80]   ;;  %v8038_v18 = vld [vmem:[%s16995_s0 + $0x6bf] sm:$0x8]   ;;  %v3114_v25 = vsel %vm455_vm1, %v8037_v17, %v3110_v15  ;;  %v3165_v46 = vsel %vm471_vm5, %v8050_v60, %v3161_v34 }
 0x115   :  { %v8039_v21 = vld [vmem:[%s16995_s0 + $0x6fe] sm:$0x10]   ;;  %v3118_v36 = vsel %vm459_vm2, %v8038_v18, %v3114_v25  ;;  %v8062_v37 = vld [vmem:[%s16995_s0 + $0x632] sm:$0x1]   ;;  %v3169_v55 = vsel %vm475_vm6, %v8051_v2, %v3165_v46 }
 0x116   :  { %v8040_v26 = vld [vmem:[%s16995_s0 + $0x73d] sm:$0x20]   ;;  %v8063_v43 = vld [vmem:[%s16995_s0 + $0x671] sm:$0x2]   ;;  %v3122_v47 = vsel %vm463_vm3, %v8039_v21, %v3118_v36  ;;  %3170 = vrot.lane.b32.xlu1 %v3169_v55, %s9082_s14 }
 0x117   :  { %v8041_v27 = vld [vmem:[%s16995_s0 + $0x77c] sm:$0x40]   ;;  %v8064_v44 = vld [vmem:[%s16995_s0 + $0x6b0] sm:$0x4]   ;;  %v3215_v48 = vsel %vm451_vm0, %v8063_v43, %v8062_v37  ;;  %v3126_v57 = vsel %vm467_vm4, %v8040_v26, %v3122_v47  ;;  %v8080_v37 = vld [vmem:[%s16995_s0 + $0x16] sm:$0x1]  }
 0x118   :  { %v8042_v28 = vld [vmem:[%s16995_s0 + $0x7bb] sm:$0x80]   ;;  %v8065_v49 = vld [vmem:[%s16995_s0 + $0x6ef] sm:$0x8]   ;;  %v3219_v60 = vsel %vm455_vm1, %v8064_v44, %v3215_v48  ;;  %v3130_v8 = vsel %vm471_vm5, %v8041_v27, %v3126_v57  ;;  %v11707_v27 = vpop.permute.xlu1 %1701   ;;  %v8081_v43 = vld [vmem:[%s16995_s0 + $0x55] sm:$0x2]  }
 0x119   :  { %v8066_v52 = vld [vmem:[%s16995_s0 + $0x72e] sm:$0x10]   ;;  %v8053_v2 = vld [vmem:[%s16995_s0 + $0x622] sm:$0x1]   ;;  %v3223_v10 = vsel %vm459_vm2, %v8065_v49, %v3219_v60  ;;  %v3134_v18 = vsel %vm475_vm6, %v8042_v28, %v3130_v8  ;;  %v3285_v47 = vsel %vm451_vm0, %v8081_v43, %v8080_v37  ;;  %v8082_v48 = vld [vmem:[%s16995_s0 + $0x94] sm:$0x4]  }
 0x11a   :  { %v8067_v53 = vld [vmem:[%s16995_s0 + $0x76d] sm:$0x20]   ;;  %v8054_v11 = vld [vmem:[%s16995_s0 + $0x661] sm:$0x2]   ;;  %v3227_v21 = vsel %vm463_vm3, %v8066_v52, %v3223_v10  ;;  %3135 = vrot.lane.b32.xlu0 %v3134_v18, %s9082_s14  ;;  %v8083_v49 = vld [vmem:[%s16995_s0 + $0xd3] sm:$0x8]   ;;  %v3289_v57 = vsel %vm455_vm1, %v8082_v48, %v3285_v47 }
 0x11b   :  { %v8068_v0 = vld [vmem:[%s16995_s0 + $0x7ac] sm:$0x40]   ;;  %v8055_v15 = vld [vmem:[%s16995_s0 + $0x6a0] sm:$0x4]   ;;  %v3180_v22 = vsel %vm451_vm0, %v8054_v11, %v8053_v2  ;;  %v3231_v28 = vsel %vm467_vm4, %v8067_v53, %v3227_v21  ;;  %v8084_v52 = vld [vmem:[%s16995_s0 + $0x112] sm:$0x10]   ;;  %v11745_v2 = vpop.permute.xlu0 %1666   ;;  %v3293_v10 = vsel %vm459_vm2, %v8083_v49, %v3289_v57 }
 0x11c   :  { %v8069_v1 = vld [vmem:[%s16995_s0 + $0x7eb] sm:$0x80]   ;;  %v8056_v17 = vld [vmem:[%s16995_s0 + $0x6df] sm:$0x8]   ;;  %v3184_v34 = vsel %vm455_vm1, %v8055_v15, %v3180_v22  ;;  %v3235_v44 = vsel %vm471_vm5, %v8068_v0, %v3231_v28  ;;  %v8085_v60 = vld [vmem:[%s16995_s0 + $0x151] sm:$0x20]   ;;  %v3297_v21 = vsel %vm463_vm3, %v8084_v52, %v3293_v10 }
 0x11d   :  { %v8057_v24 = vld [vmem:[%s16995_s0 + $0x71e] sm:$0x10]   ;;  %v3188_v46 = vsel %vm459_vm2, %v8056_v17, %v3184_v34  ;;  %v3239_v53 = vsel %vm475_vm6, %v8069_v1, %v3235_v44  ;;  %v8086_v0 = vld [vmem:[%s16995_s0 + $0x190] sm:$0x40]   ;;  %v8071_v11 = vld [vmem:[%s16995_s0 + $0x6] sm:$0x1]   ;;  %v3301_v34 = vsel %vm467_vm4, %v8085_v60, %v3297_v21 }
 0x11e   :  { %v8058_v25 = vld [vmem:[%s16995_s0 + $0x75d] sm:$0x20]   ;;  %v3192_v55 = vsel %vm463_vm3, %v8057_v24, %v3188_v46  ;;  %v8087_v1 = vld [vmem:[%s16995_s0 + $0x1cf] sm:$0x80]   ;;  %3240 = vrot.lane.b32.xlu1 %v3239_v53, %s9082_s14  ;;  %v8072_v15 = vld [vmem:[%s16995_s0 + $0x45] sm:$0x2]   ;;  %v11783_v46 = vpop.permute.xlu1 %1771   ;;  %v3305_v47 = vsel %vm471_vm5, %v8086_v0, %v3301_v34 }
 0x11f   :  { %v8059_v26 = vld [vmem:[%s16995_s0 + $0x79c] sm:$0x40]   ;;  %v3196_v8 = vsel %vm467_vm4, %v8058_v25, %v3192_v55  ;;  %v8073_v17 = vld [vmem:[%s16995_s0 + $0x84] sm:$0x4]   ;;  %v3250_v22 = vsel %vm451_vm0, %v8072_v15, %v8071_v11  ;;  %v8098_v44 = vld [vmem:[%s16995_s0 + $0x36] sm:$0x1]   ;;  %v3309_v55 = vsel %vm475_vm6, %v8087_v1, %v3305_v47  ;;  %v11809_v10 = vpop.permute.xlu0 %1736  }
 0x120   :  { %v8060_v36 = vld [vmem:[%s16995_s0 + $0x7db] sm:$0x80]   ;;  %v3200_v18 = vsel %vm471_vm5, %v8059_v26, %v3196_v8  ;;  %v8074_v24 = vld [vmem:[%s16995_s0 + $0xc3] sm:$0x8]   ;;  %v8099_v49 = vld [vmem:[%s16995_s0 + $0x75] sm:$0x2]  }
 0x121   :  { %v8075_v25 = vld [vmem:[%s16995_s0 + $0x102] sm:$0x10]   ;;  %v3204_v28 = vsel %vm475_vm6, %v8060_v36, %v3200_v18  ;;  %v3254_v36 = vsel %vm455_vm1, %v8073_v17, %v3250_v22  ;;  %v8100_v52 = vld [vmem:[%s16995_s0 + $0xb4] sm:$0x4]   ;;  %v3355_v60 = vsel %vm451_vm0, %v8099_v49, %v8098_v44 }
 0x122   :  { %v8076_v26 = vld [vmem:[%s16995_s0 + $0x141] sm:$0x20]   ;;  %3205 = vrot.lane.b32.xlu0 %v3204_v28, %s9082_s14  ;;  %v3258_v48 = vsel %vm459_vm2, %v8074_v24, %v3254_v36  ;;  %v8101_v53 = vld [vmem:[%s16995_s0 + $0xf3] sm:$0x8]   ;;  %3310 = vrot.lane.b32.xlu1 %v3309_v55, %s9082_s14  ;;  %v3359_v15 = vsel %vm455_vm1, %v8100_v52, %v3355_v60  ;;  %v11847_v49 = vpop.permute.xlu1 %1841  }
 0x123   :  { %v8077_v37 = vld [vmem:[%s16995_s0 + $0x180] sm:$0x40]   ;;  %v3262_v57 = vsel %vm463_vm3, %v8075_v25, %v3258_v48  ;;  %v8102_v0 = vld [vmem:[%s16995_s0 + $0x132] sm:$0x10]   ;;  %v3363_v24 = vsel %vm459_vm2, %v8101_v53, %v3359_v15 }
 0x124   :  { %v8078_v43 = vld [vmem:[%s16995_s0 + $0x1bf] sm:$0x80]   ;;  %v8103_v1 = vld [vmem:[%s16995_s0 + $0x171] sm:$0x20]   ;;  %v3266_v11 = vsel %vm467_vm4, %v8076_v26, %v3262_v57 }
 0x125   :  { %v8104_v8 = vld [vmem:[%s16995_s0 + $0x1b0] sm:$0x40]   ;;  %v8089_v18 = vld [vmem:[%s16995_s0 + $0x26] sm:$0x1]   ;;  %v3270_v22 = vsel %vm471_vm5, %v8077_v37, %v3266_v11  ;;  %v3367_v37 = vsel %vm463_vm3, %v8102_v0, %v3363_v24 }
 0x126   :  { %v8105_v17 = vld [vmem:[%s16995_s0 + $0x1ef] sm:$0x80]   ;;  %v8090_v21 = vld [vmem:[%s16995_s0 + $0x65] sm:$0x2]   ;;  %v3274_v36 = vsel %vm475_vm6, %v8078_v43, %v3270_v22  ;;  %v3371_v52 = vsel %vm467_vm4, %v8103_v1, %v3367_v37 }
 0x127   :  { %v3320_v25 = vsel %vm451_vm0, %v8090_v21, %v8089_v18  ;;  %v8091_v26 = vld [vmem:[%s16995_s0 + $0xa4] sm:$0x4]   ;;  %3275 = vrot.lane.b32.xlu0 %v3274_v36, %s9082_s14  ;;  %v8116_v55 = vld [vmem:[%s16995_s0 + $0x216] sm:$0x1]   ;;  %v3375_v0 = vsel %vm471_vm5, %v8104_v8, %v3371_v52 }
 0x128   :  { %v8092_v28 = vld [vmem:[%s16995_s0 + $0xe3] sm:$0x8]   ;;  %v3324_v43 = vsel %vm455_vm1, %v8091_v26, %v3320_v25  ;;  %v8117_v57 = vld [vmem:[%s16995_s0 + $0x255] sm:$0x2]   ;;  %v3379_v17 = vsel %vm475_vm6, %v8105_v17, %v3375_v0 }
 0x129   :  { %v8093_v34 = vld [vmem:[%s16995_s0 + $0x122] sm:$0x10]   ;;  %v3328_v53 = vsel %vm459_vm2, %v8092_v28, %v3324_v43  ;;  %v8118_v60 = vld [vmem:[%s16995_s0 + $0x294] sm:$0x4]   ;;  %v3425_v8 = vsel %vm451_vm0, %v8117_v57, %v8116_v55  ;;  %v11885_v28 = vpop.permute.xlu0 %1806   ;;  %3380 = vrot.lane.b32.xlu1 %v3379_v17, %s9082_s14 }
 0x12a   :  { %v8094_v44 = vld [vmem:[%s16995_s0 + $0x161] sm:$0x20]   ;;  %v3332_v1 = vsel %vm463_vm3, %v8093_v34, %v3328_v53  ;;  %v8119_v11 = vld [vmem:[%s16995_s0 + $0x2d3] sm:$0x8]   ;;  %v3429_v22 = vsel %vm455_vm1, %v8118_v60, %v3425_v8  ;;  %v11911_v60 = vpop.permute.xlu1 %1911  }
 0x12b   :  { %v8095_v47 = vld [vmem:[%s16995_s0 + $0x1a0] sm:$0x40]   ;;  %v8120_v15 = vld [vmem:[%s16995_s0 + $0x312] sm:$0x10]   ;;  %v3336_v21 = vsel %vm467_vm4, %v8094_v44, %v3332_v1  ;;  %v3433_v36 = vsel %vm459_vm2, %v8119_v11, %v3429_v22 }
 0x12c   :  { %v8096_v48 = vld [vmem:[%s16995_s0 + $0x1df] sm:$0x80]   ;;  %v8121_v18 = vld [vmem:[%s16995_s0 + $0x351] sm:$0x20]   ;;  %v3340_v34 = vsel %vm471_vm5, %v8095_v47, %v3336_v21 }
 0x12d   :  { %v8122_v24 = vld [vmem:[%s16995_s0 + $0x390] sm:$0x40]   ;;  %v8107_v26 = vld [vmem:[%s16995_s0 + $0x206] sm:$0x1]   ;;  %v3344_v47 = vsel %vm475_vm6, %v8096_v48, %v3340_v34  ;;  %v3437_v48 = vsel %vm463_vm3, %v8120_v15, %v3433_v36 }
 0x12e   :  { %v8123_v25 = vld [vmem:[%s16995_s0 + $0x3cf] sm:$0x80]   ;;  %v8108_v37 = vld [vmem:[%s16995_s0 + $0x245] sm:$0x2]   ;;  %3345 = vrot.lane.b32.xlu0 %v3344_v47, %s9082_s14  ;;  %v3441_v0 = vsel %vm467_vm4, %v8121_v18, %v3437_v48  ;;  %v11949_v47 = vpop.permute.xlu0 %1876  }
 0x12f   :  { %v8109_v43 = vld [vmem:[%s16995_s0 + $0x284] sm:$0x4]   ;;  %v3390_v52 = vsel %vm451_vm0, %v8108_v37, %v8107_v26  ;;  %v8134_v11 = vld [vmem:[%s16995_s0 + $0x236] sm:$0x1]   ;;  %v3445_v18 = vsel %vm471_vm5, %v8122_v24, %v3441_v0 }
 0x130   :  { %v8110_v44 = vld [vmem:[%s16995_s0 + $0x2c3] sm:$0x8]   ;;  %v3394_v1 = vsel %vm455_vm1, %v8109_v43, %v3390_v52  ;;  %v8135_v15 = vld [vmem:[%s16995_s0 + $0x275] sm:$0x2]   ;;  %v3449_v25 = vsel %vm475_vm6, %v8123_v25, %v3445_v18 }
 0x131   :  { %v8111_v53 = vld [vmem:[%s16995_s0 + $0x302] sm:$0x10]   ;;  %v3398_v17 = vsel %vm459_vm2, %v8110_v44, %v3394_v1  ;;  %v3495_v21 = vsel %vm451_vm0, %v8135_v15, %v8134_v11  ;;  %v8136_v22 = vld [vmem:[%s16995_s0 + $0x2b4] sm:$0x4]   ;;  %3450 = vrot.lane.b32.xlu1 %v3449_v25, %s9082_s14 }
 0x132   :  { %v8112_v55 = vld [vmem:[%s16995_s0 + $0x341] sm:$0x20]   ;;  %v8137_v24 = vld [vmem:[%s16995_s0 + $0x2f3] sm:$0x8]   ;;  %v3402_v34 = vsel %vm463_vm3, %v8111_v53, %v3398_v17  ;;  %v3499_v36 = vsel %vm455_vm1, %v8136_v22, %v3495_v21 }
 0x133   :  { %v8113_v57 = vld [vmem:[%s16995_s0 + $0x380] sm:$0x40]   ;;  %v8138_v26 = vld [vmem:[%s16995_s0 + $0x332] sm:$0x10]   ;;  %v3406_v48 = vsel %vm467_vm4, %v8112_v55, %v3402_v34  ;;  %v3503_v52 = vsel %vm459_vm2, %v8137_v24, %v3499_v36  ;;  %v11987_v34 = vpop.permute.xlu1 %1981  }
 0x134   :  { %v8114_v8 = vld [vmem:[%s16995_s0 + $0x3bf] sm:$0x80]   ;;  %v8139_v37 = vld [vmem:[%s16995_s0 + $0x371] sm:$0x20]   ;;  %v3410_v57 = vsel %vm471_vm5, %v8113_v57, %v3406_v48  ;;  %v3507_v1 = vsel %vm463_vm3, %v8138_v26, %v3503_v52  ;;  %17007 = vst [vmem:[#allocation10_spill] sm:$0xff] %v11987_v34 }
 0x135   :  { %v8140_v43 = vld [vmem:[%s16995_s0 + $0x3b0] sm:$0x40]   ;;  %v8125_v53 = vld [vmem:[%s16995_s0 + $0x226] sm:$0x1]   ;;  %v3414_v8 = vsel %vm475_vm6, %v8114_v8, %v3410_v57  ;;  %v3511_v21 = vsel %vm467_vm4, %v8139_v37, %v3507_v1 }
 0x136   :  { %v8141_v44 = vld [vmem:[%s16995_s0 + $0x3ef] sm:$0x80]   ;;  %v8126_v55 = vld [vmem:[%s16995_s0 + $0x265] sm:$0x2]   ;;  %3415 = vrot.lane.b32.xlu0 %v3414_v8, %s9082_s14  ;;  %v3515_v36 = vsel %vm471_vm5, %v8140_v43, %v3511_v21 }
 0x137   :  { %v8127_v0 = vld [vmem:[%s16995_s0 + $0x2a4] sm:$0x4]   ;;  %v3460_v11 = vsel %vm451_vm0, %v8126_v55, %v8125_v53  ;;  %v8152_v25 = vld [vmem:[%s16995_s0 + $0x416] sm:$0x1]   ;;  %v3519_v44 = vsel %vm475_vm6, %v8141_v44, %v3515_v36 }
 0x138   :  { %v8128_v15 = vld [vmem:[%s16995_s0 + $0x2e3] sm:$0x8]   ;;  %v3464_v22 = vsel %vm455_vm1, %v8127_v0, %v3460_v11  ;;  %v8153_v43 = vld [vmem:[%s16995_s0 + $0x455] sm:$0x2]   ;;  %v12013_v11 = vpop.permute.xlu0 %1946   ;;  %3520 = vrot.lane.b32.xlu1 %v3519_v44, %s9082_s14 }
 0x139   :  { %v8129_v18 = vld [vmem:[%s16995_s0 + $0x322] sm:$0x10]   ;;  %v3468_v37 = vsel %vm459_vm2, %v8128_v15, %v3464_v22  ;;  %v8154_v48 = vld [vmem:[%s16995_s0 + $0x494] sm:$0x4]   ;;  %v3565_v55 = vsel %vm451_vm0, %v8153_v43, %v8152_v25  ;;  %17008 = vst [vmem:[#allocation11_spill] sm:$0xff] %v12013_v11 }
 0x13a   :  { %v8130_v17 = vld [vmem:[%s16995_s0 + $0x361] sm:$0x20]   ;;  %v8155_v52 = vld [vmem:[%s16995_s0 + $0x4d3] sm:$0x8]   ;;  %v3472_v53 = vsel %vm463_vm3, %v8129_v18, %v3468_v37  ;;  %v3569_v18 = vsel %vm455_vm1, %v8154_v48, %v3565_v55 }
 0x13b   :  { %v8131_v24 = vld [vmem:[%s16995_s0 + $0x3a0] sm:$0x40]   ;;  %v8156_v0 = vld [vmem:[%s16995_s0 + $0x512] sm:$0x10]   ;;  %v3476_v15 = vsel %vm467_vm4, %v8130_v17, %v3472_v53 }
 0x13c   :  { %v8132_v26 = vld [vmem:[%s16995_s0 + $0x3df] sm:$0x80]   ;;  %v8157_v57 = vld [vmem:[%s16995_s0 + $0x551] sm:$0x20]   ;;  %v3480_v22 = vsel %vm471_vm5, %v8131_v24, %v3476_v15  ;;  %v3573_v24 = vsel %vm459_vm2, %v8155_v52, %v3569_v18 }
 0x13d   :  { %v8158_v1 = vld [vmem:[%s16995_s0 + $0x590] sm:$0x40]   ;;  %v8143_v8 = vld [vmem:[%s16995_s0 + $0x406] sm:$0x1]   ;;  %v3484_v26 = vsel %vm475_vm6, %v8132_v26, %v3480_v22  ;;  %v3577_v48 = vsel %vm463_vm3, %v8156_v0, %v3573_v24  ;;  %v12051_v0 = vpop.permute.xlu1 %2051  }
 0x13e   :  { %v8159_v17 = vld [vmem:[%s16995_s0 + $0x5cf] sm:$0x80]   ;;  %v8144_v21 = vld [vmem:[%s16995_s0 + $0x445] sm:$0x2]   ;;  %17009 = vst [vmem:[#allocation12_spill] sm:$0xff] %v12051_v0  ;;  %3485 = vrot.lane.b32.xlu0 %v3484_v26, %s9082_s14  ;;  %v3581_v57 = vsel %vm467_vm4, %v8157_v57, %v3577_v48 }
 0x13f   :  { %v3530_v25 = vsel %vm451_vm0, %v8144_v21, %v8143_v8  ;;  %v8145_v36 = vld [vmem:[%s16995_s0 + $0x484] sm:$0x4]   ;;  %v8170_v18 = vld [vmem:[%s16995_s0 + $0x436] sm:$0x1]   ;;  %v3585_v1 = vsel %vm471_vm5, %v8158_v1, %v3581_v57  ;;  %v12089_v57 = vpop.permute.xlu0 %2016  }
 0x140   :  { %v8146_v37 = vld [vmem:[%s16995_s0 + $0x4c3] sm:$0x8]   ;;  %v3534_v52 = vsel %vm455_vm1, %v8145_v36, %v3530_v25  ;;  %v8171_v8 = vld [vmem:[%s16995_s0 + $0x475] sm:$0x2]   ;;  %v3589_v17 = vsel %vm475_vm6, %v8159_v17, %v3585_v1  ;;  %17010 = vst [vmem:[#allocation13_spill] sm:$0xff] %v12089_v57 }
 0x141   :  { %v8147_v43 = vld [vmem:[%s16995_s0 + $0x502] sm:$0x10]   ;;  %v3538_v15 = vsel %vm459_vm2, %v8146_v37, %v3534_v52  ;;  %v8172_v21 = vld [vmem:[%s16995_s0 + $0x4b4] sm:$0x4]   ;;  %v3635_v24 = vsel %vm451_vm0, %v8171_v8, %v8170_v18  ;;  %3590 = vrot.lane.b32.xlu1 %v3589_v17, %s9082_s14  ;;  %v12115_v17 = vpop.permute.xlu1 %2121  }
 0x142   :  { %v8148_v44 = vld [vmem:[%s16995_s0 + $0x541] sm:$0x20]   ;;  %v3542_v22 = vsel %vm463_vm3, %v8147_v43, %v3538_v15  ;;  %v8173_v25 = vld [vmem:[%s16995_s0 + $0x4f3] sm:$0x8]   ;;  %v3639_v26 = vsel %vm455_vm1, %v8172_v21, %v3635_v24  ;;  %17011 = vst [vmem:[#allocation14_spill] sm:$0xff] %v12115_v17 }
 0x143   :  { %v8149_v53 = vld [vmem:[%s16995_s0 + $0x580] sm:$0x40]   ;;  %v8174_v36 = vld [vmem:[%s16995_s0 + $0x532] sm:$0x10]   ;;  %v3546_v43 = vsel %vm467_vm4, %v8148_v44, %v3542_v22  ;;  %v3643_v15 = vsel %vm459_vm2, %v8173_v25, %v3639_v26 }
 0x144   :  { %v8150_v55 = vld [vmem:[%s16995_s0 + $0x5bf] sm:$0x80]   ;;  %v8175_v37 = vld [vmem:[%s16995_s0 + $0x571] sm:$0x20]   ;;  %v3550_v53 = vsel %vm471_vm5, %v8149_v53, %v3546_v43  ;;  %v3647_v1 = vsel %vm463_vm3, %v8174_v36, %v3643_v15 }
 0x145   :  { %v8176_v48 = vld [vmem:[%s16995_s0 + $0x5b0] sm:$0x40]   ;;  %v8161_v44 = vld [vmem:[%s16995_s0 + $0x426] sm:$0x1]   ;;  %v3554_v55 = vsel %vm475_vm6, %v8150_v55, %v3550_v53  ;;  %v3651_v37 = vsel %vm467_vm4, %v8175_v37, %v3647_v1 }
 0x146   :  { %v8177_v52 = vld [vmem:[%s16995_s0 + $0x5ef] sm:$0x80]   ;;  %v8162_v18 = vld [vmem:[%s16995_s0 + $0x465] sm:$0x2]   ;;  %3555 = vrot.lane.b32.xlu0 %v3554_v55, %s9082_s14  ;;  %v3655_v48 = vsel %vm471_vm5, %v8176_v48, %v3651_v37 }
 0x147   :  { %v8163_v8 = vld [vmem:[%s16995_s0 + $0x4a4] sm:$0x4]   ;;  %v3600_v22 = vsel %vm451_vm0, %v8162_v18, %v8161_v44  ;;  %v8188_v44 = vld [vmem:[%s16995_s0 + $0x616] sm:$0x1]   ;;  %v3659_v52 = vsel %vm475_vm6, %v8177_v52, %v3655_v48 }
 0x148   :  { %v8164_v21 = vld [vmem:[%s16995_s0 + $0x4e3] sm:$0x8]   ;;  %v3604_v43 = vsel %vm455_vm1, %v8163_v8, %v3600_v22  ;;  %v8189_v53 = vld [vmem:[%s16995_s0 + $0x655] sm:$0x2]   ;;  %3660 = vrot.lane.b32.xlu1 %v3659_v52, %s9082_s14 }
 0x149   :  { %v8165_v24 = vld [vmem:[%s16995_s0 + $0x522] sm:$0x10]   ;;  %v3608_v15 = vsel %vm459_vm2, %v8164_v21, %v3604_v43  ;;  %v3705_v18 = vsel %vm451_vm0, %v8189_v53, %v8188_v44  ;;  %v8190_v8 = vld [vmem:[%s16995_s0 + $0x694] sm:$0x4]   ;;  %v12153_v44 = vpop.permute.xlu0 %2086  }
 0x14a   :  { %v8166_v25 = vld [vmem:[%s16995_s0 + $0x561] sm:$0x20]   ;;  %v8191_v21 = vld [vmem:[%s16995_s0 + $0x6d3] sm:$0x8]   ;;  %v3612_v1 = vsel %vm463_vm3, %v8165_v24, %v3608_v15  ;;  %v3709_v22 = vsel %vm455_vm1, %v8190_v8, %v3705_v18  ;;  %17012 = vst [vmem:[#allocation15_spill] sm:$0xff] %v12153_v44 }
 0x14b   :  { %v8167_v36 = vld [vmem:[%s16995_s0 + $0x5a0] sm:$0x40]   ;;  %v8192_v55 = vld [vmem:[%s16995_s0 + $0x712] sm:$0x10]   ;;  %v3616_v25 = vsel %vm467_vm4, %v8166_v25, %v3612_v1  ;;  %v3713_v53 = vsel %vm459_vm2, %v8191_v21, %v3709_v22 }
 0x14c   :  { %v8168_v26 = vld [vmem:[%s16995_s0 + $0x5df] sm:$0x80]   ;;  %v8193_v24 = vld [vmem:[%s16995_s0 + $0x751] sm:$0x20]   ;;  %v3620_v36 = vsel %vm471_vm5, %v8167_v36, %v3616_v25  ;;  %v3717_v8 = vsel %vm463_vm3, %v8192_v55, %v3713_v53 }
 0x14d   :  { %v8194_v37 = vld [vmem:[%s16995_s0 + $0x790] sm:$0x40]   ;;  %v8179_v48 = vld [vmem:[%s16995_s0 + $0x606] sm:$0x1]   ;;  %v3624_v26 = vsel %vm475_vm6, %v8168_v26, %v3620_v36  ;;  %v3721_v22 = vsel %vm467_vm4, %v8193_v24, %v3717_v8 }
 0x14e   :  { %v8195_v43 = vld [vmem:[%s16995_s0 + $0x7cf] sm:$0x80]   ;;  %v8180_v15 = vld [vmem:[%s16995_s0 + $0x645] sm:$0x2]   ;;  %3625 = vrot.lane.b32.xlu0 %v3624_v26, %s9082_s14  ;;  %v3725_v37 = vsel %vm471_vm5, %v8194_v37, %v3721_v22 }
 0x14f   :  { %v8181_v18 = vld [vmem:[%s16995_s0 + $0x684] sm:$0x4]   ;;  %v3670_v21 = vsel %vm451_vm0, %v8180_v15, %v8179_v48  ;;  %v8206_v48 = vld [vmem:[%s16995_s0 + $0x636] sm:$0x1]   ;;  %v12191_v15 = vpop.permute.xlu1 %2191   ;;  %v3729_v43 = vsel %vm475_vm6, %v8195_v43, %v3725_v37 }
 0x150   :  { %v8182_v55 = vld [vmem:[%s16995_s0 + $0x6c3] sm:$0x8]   ;;  %v3674_v24 = vsel %vm455_vm1, %v8181_v18, %v3670_v21  ;;  %v8207_v36 = vld [vmem:[%s16995_s0 + $0x675] sm:$0x2]   ;;  %3730 = vrot.lane.b32.xlu1 %v3729_v43, %s9082_s14 }
 0x151   :  { %v8183_v52 = vld [vmem:[%s16995_s0 + $0x702] sm:$0x10]   ;;  %v3678_v18 = vsel %vm459_vm2, %v8182_v55, %v3674_v24  ;;  %v8208_v8 = vld [vmem:[%s16995_s0 + $0x6b4] sm:$0x4]  }
 0x152   :  { %v8184_v1 = vld [vmem:[%s16995_s0 + $0x741] sm:$0x20]   ;;  %v8209_v21 = vld [vmem:[%s16995_s0 + $0x6f3] sm:$0x8]   ;;  %v3682_v55 = vsel %vm463_vm3, %v8183_v52, %v3678_v18  ;;  %v3775_v52 = vsel %vm451_vm0, %v8207_v36, %v8206_v48  ;;  %v12217_v48 = vpop.permute.xlu0 %2156  }
 0x153   :  { %v8185_v25 = vld [vmem:[%s16995_s0 + $0x780] sm:$0x40]   ;;  %v8210_v26 = vld [vmem:[%s16995_s0 + $0x732] sm:$0x10]   ;;  %v3686_v1 = vsel %vm467_vm4, %v8184_v1, %v3682_v55  ;;  %v3779_v37 = vsel %vm455_vm1, %v8208_v8, %v3775_v52 }
 0x154   :  { %v8186_v53 = vld [vmem:[%s16995_s0 + $0x7bf] sm:$0x80]   ;;  %v8211_v22 = vld [vmem:[%s16995_s0 + $0x771] sm:$0x20]   ;;  %v3690_v25 = vsel %vm471_vm5, %v8185_v25, %v3686_v1  ;;  %v3783_v21 = vsel %vm459_vm2, %v8209_v21, %v3779_v37 }
 0x155   :  { %v8212_v24 = vld [vmem:[%s16995_s0 + $0x7b0] sm:$0x40]   ;;  %v8197_v36 = vld [vmem:[%s16995_s0 + $0x626] sm:$0x1]   ;;  %v3694_v53 = vsel %vm475_vm6, %v8186_v53, %v3690_v25  ;;  %v3787_v26 = vsel %vm463_vm3, %v8210_v26, %v3783_v21  ;;  %v12255_v21 = vpop.permute.xlu1 %2261  }
 0x156   :  { %v8213_v18 = vld [vmem:[%s16995_s0 + $0x7ef] sm:$0x80]   ;;  %v8198_v8 = vld [vmem:[%s16995_s0 + $0x665] sm:$0x2]   ;;  %3695 = vrot.lane.b32.xlu0 %v3694_v53, %s9082_s14  ;;  %v3791_v22 = vsel %vm467_vm4, %v8211_v22, %v3787_v26  ;;  %v8226_v53 = vld [vmem:[%s16995_s0 + $0x98] sm:$0x4]  }
 0x157   :  { %v3740_v43 = vsel %vm451_vm0, %v8198_v8, %v8197_v36  ;;  %v8199_v55 = vld [vmem:[%s16995_s0 + $0x6a4] sm:$0x4]   ;;  %v3795_v24 = vsel %vm471_vm5, %v8212_v24, %v3791_v22  ;;  %v8228_v22 = vld [vmem:[%s16995_s0 + $0x116] sm:$0x10]  }
 0x158   :  { %v8200_v52 = vld [vmem:[%s16995_s0 + $0x6e3] sm:$0x8]   ;;  %v3744_v37 = vsel %vm455_vm1, %v8199_v55, %v3740_v43  ;;  %v8224_v55 = vld [vmem:[%s16995_s0 + $0x1a] sm:$0x1]   ;;  %v3799_v18 = vsel %vm475_vm6, %v8213_v18, %v3795_v24  ;;  %v8215_v24 = vld [vmem:[%s16995_s0 + $0xa] sm:$0x1]  }
 0x159   :  { %v8201_v1 = vld [vmem:[%s16995_s0 + $0x722] sm:$0x10]   ;;  %v3748_v43 = vsel %vm459_vm2, %v8200_v52, %v3744_v37  ;;  %v8225_v52 = vld [vmem:[%s16995_s0 + $0x59] sm:$0x2]   ;;  %3800 = vrot.lane.b32.xlu1 %v3799_v18, %s9082_s14  ;;  %v8217_v18 = vld [vmem:[%s16995_s0 + $0x88] sm:$0x4]  }
 0x15a   :  { %v8202_v36 = vld [vmem:[%s16995_s0 + $0x761] sm:$0x20]   ;;  %v3752_v1 = vsel %vm463_vm3, %v8201_v1, %v3748_v43  ;;  %v3845_v26 = vsel %vm451_vm0, %v8225_v52, %v8224_v55  ;;  %v8227_v37 = vld [vmem:[%s16995_s0 + $0xd7] sm:$0x8]  }
 0x15b   :  { %v8203_v8 = vld [vmem:[%s16995_s0 + $0x7a0] sm:$0x40]   ;;  %v8229_v43 = vld [vmem:[%s16995_s0 + $0x155] sm:$0x20]   ;;  %v3756_v36 = vsel %vm467_vm4, %v8202_v36, %v3752_v1  ;;  %v3849_v55 = vsel %vm455_vm1, %v8226_v53, %v3845_v26  ;;  %v12293_v1 = vpop.permute.xlu0 %2226  }
 0x15c   :  { %v8204_v25 = vld [vmem:[%s16995_s0 + $0x7df] sm:$0x80]   ;;  %v8230_v52 = vld [vmem:[%s16995_s0 + $0x194] sm:$0x40]   ;;  %v3760_v8 = vsel %vm471_vm5, %v8203_v8, %v3756_v36  ;;  %v3853_v26 = vsel %vm459_vm2, %v8227_v37, %v3849_v55  ;;  %v8216_v37 = vld [vmem:[%s16995_s0 + $0x49] sm:$0x2]  }
 0x15d   :  { %v8231_v53 = vld [vmem:[%s16995_s0 + $0x1d3] sm:$0x80]   ;;  %v8218_v36 = vld [vmem:[%s16995_s0 + $0xc7] sm:$0x8]   ;;  %v3764_v25 = vsel %vm475_vm6, %v8204_v25, %v3760_v8  ;;  %v3857_v22 = vsel %vm463_vm3, %v8228_v22, %v3853_v26  ;;  %v3810_v55 = vsel %vm451_vm0, %v8216_v37, %v8215_v24  ;;  %v12319_v37 = vpop.permute.xlu1 %2331  }
 0x15e   :  { %v8219_v24 = vld [vmem:[%s16995_s0 + $0x106] sm:$0x10]   ;;  %3765 = vrot.lane.b32.xlu0 %v3764_v25, %s9082_s14  ;;  %v3861_v43 = vsel %vm467_vm4, %v8229_v43, %v3857_v22  ;;  %v3814_v18 = vsel %vm455_vm1, %v8217_v18, %v3810_v55  ;;  %v8242_v22 = vld [vmem:[%s16995_s0 + $0x3a] sm:$0x1]  }
 0x15f   :  { %v8220_v8 = vld [vmem:[%s16995_s0 + $0x145] sm:$0x20]   ;;  %v8243_v55 = vld [vmem:[%s16995_s0 + $0x79] sm:$0x2]   ;;  %v3865_v52 = vsel %vm471_vm5, %v8230_v52, %v3861_v43  ;;  %v3818_v36 = vsel %vm459_vm2, %v8218_v36, %v3814_v18  ;;  %v12357_v44 = vpop.permute.xlu0 %2296  }
 0x160   :  { %v8221_v26 = vld [vmem:[%s16995_s0 + $0x184] sm:$0x40]   ;;  %v3915_v43 = vsel %vm451_vm0, %v8243_v55, %v8242_v22  ;;  %v8244_v18 = vld [vmem:[%s16995_s0 + $0xb8] sm:$0x4]   ;;  %v3869_v53 = vsel %vm475_vm6, %v8231_v53, %v3865_v52  ;;  %v3822_v24 = vsel %vm463_vm3, %v8219_v24, %v3818_v36 }
 0x161   :  { %v8222_v25 = vld [vmem:[%s16995_s0 + $0x1c3] sm:$0x80]   ;;  %v8245_v22 = vld [vmem:[%s16995_s0 + $0xf7] sm:$0x8]   ;;  %v3919_v52 = vsel %vm455_vm1, %v8244_v18, %v3915_v43  ;;  %3870 = vrot.lane.b32.xlu1 %v3869_v53, %s9082_s14  ;;  %v3826_v8 = vsel %vm467_vm4, %v8220_v8, %v3822_v24  ;;  %v12395_v63 = vpop.permute.xlu1 %2401  }
 0x162   :  { %v8246_v55 = vld [vmem:[%s16995_s0 + $0x136] sm:$0x10]   ;;  %v3923_v22 = vsel %vm459_vm2, %v8245_v22, %v3919_v52  ;;  %v8233_v53 = vld [vmem:[%s16995_s0 + $0x2a] sm:$0x1]   ;;  %v3830_v26 = vsel %vm471_vm5, %v8221_v26, %v3826_v8 }
 0x163   :  { %v8247_v36 = vld [vmem:[%s16995_s0 + $0x175] sm:$0x20]   ;;  %v8234_v24 = vld [vmem:[%s16995_s0 + $0x69] sm:$0x2]   ;;  %v3927_v55 = vsel %vm463_vm3, %v8246_v55, %v3923_v22  ;;  %v3834_v25 = vsel %vm475_vm6, %v8222_v25, %v3830_v26  ;;  %v12421_v56 = vpop.permute.xlu0 %2366  }
 0x164   :  { %v8248_v43 = vld [vmem:[%s16995_s0 + $0x1b4] sm:$0x40]   ;;  %v8235_v52 = vld [vmem:[%s16995_s0 + $0xa8] sm:$0x4]   ;;  %v3880_v8 = vsel %vm451_vm0, %v8234_v24, %v8233_v53  ;;  %v3931_v36 = vsel %vm467_vm4, %v8247_v36, %v3927_v55  ;;  %3835 = vrot.lane.b32.xlu0 %v3834_v25, %s9082_s14 }
 0x165   :  { %v8249_v18 = vld [vmem:[%s16995_s0 + $0x1f3] sm:$0x80]   ;;  %v8236_v22 = vld [vmem:[%s16995_s0 + $0xe7] sm:$0x8]   ;;  %v3884_v52 = vsel %vm455_vm1, %v8235_v52, %v3880_v8  ;;  %v3935_v43 = vsel %vm471_vm5, %v8248_v43, %v3931_v36  ;;  %v12459_v17 = vpop.permute.xlu1 %2471  }
 0x166   :  { %v8237_v53 = vld [vmem:[%s16995_s0 + $0x126] sm:$0x10]   ;;  %v8260_v8 = vld [vmem:[%s16995_s0 + $0x21a] sm:$0x1]   ;;  %v3888_v22 = vsel %vm459_vm2, %v8236_v22, %v3884_v52  ;;  %v3939_v18 = vsel %vm475_vm6, %v8249_v18, %v3935_v43 }
 0x167   :  { %v8238_v24 = vld [vmem:[%s16995_s0 + $0x165] sm:$0x20]   ;;  %v8261_v25 = vld [vmem:[%s16995_s0 + $0x259] sm:$0x2]   ;;  %v3892_v53 = vsel %vm463_vm3, %v8237_v53, %v3888_v22  ;;  %3940 = vrot.lane.b32.xlu1 %v3939_v18, %s9082_s14  ;;  %v12497_v41 = vpop.permute.xlu0 %2436  }
 0x168   :  { %v8239_v26 = vld [vmem:[%s16995_s0 + $0x1a4] sm:$0x40]   ;;  %v8262_v36 = vld [vmem:[%s16995_s0 + $0x298] sm:$0x4]   ;;  %v3985_v8 = vsel %vm451_vm0, %v8261_v25, %v8260_v8  ;;  %v3896_v24 = vsel %vm467_vm4, %v8238_v24, %v3892_v53 }
 0x169   :  { %v8240_v55 = vld [vmem:[%s16995_s0 + $0x1e3] sm:$0x80]   ;;  %v8263_v52 = vld [vmem:[%s16995_s0 + $0x2d7] sm:$0x8]   ;;  %v3989_v36 = vsel %vm455_vm1, %v8262_v36, %v3985_v8  ;;  %v3900_v26 = vsel %vm471_vm5, %v8239_v26, %v3896_v24  ;;  %v12523_v35 = vpop.permute.xlu1 %2541  }
 0x16a   :  { %v8264_v43 = vld [vmem:[%s16995_s0 + $0x316] sm:$0x10]   ;;  %v8251_v53 = vld [vmem:[%s16995_s0 + $0x20a] sm:$0x1]   ;;  %v3993_v52 = vsel %vm459_vm2, %v8263_v52, %v3989_v36  ;;  %v3904_v55 = vsel %vm475_vm6, %v8240_v55, %v3900_v26  ;;  %17013 = vst [vmem:[#allocation16_spill] sm:$0xff] %v12523_v35 }
 0x16b   :  { %v8265_v22 = vld [vmem:[%s16995_s0 + $0x355] sm:$0x20]   ;;  %v8252_v8 = vld [vmem:[%s16995_s0 + $0x249] sm:$0x2]   ;;  %v3997_v43 = vsel %vm463_vm3, %v8264_v43, %v3993_v52  ;;  %3905 = vrot.lane.b32.xlu0 %v3904_v55, %s9082_s14  ;;  %v12561_v57 = vpop.permute.xlu0 %2506  }
 0x16c   :  { %v8266_v25 = vld [vmem:[%s16995_s0 + $0x394] sm:$0x40]   ;;  %v3950_v24 = vsel %vm451_vm0, %v8252_v8, %v8251_v53  ;;  %v8253_v36 = vld [vmem:[%s16995_s0 + $0x288] sm:$0x4]   ;;  %v4001_v22 = vsel %vm467_vm4, %v8265_v22, %v3997_v43  ;;  %17014 = vst [vmem:[#allocation17_spill] sm:$0xff] %v12561_v57 }
 0x16d   :  { %v8267_v18 = vld [vmem:[%s16995_s0 + $0x3d3] sm:$0x80]   ;;  %v8254_v53 = vld [vmem:[%s16995_s0 + $0x2c7] sm:$0x8]   ;;  %v3954_v26 = vsel %vm455_vm1, %v8253_v36, %v3950_v24  ;;  %v4005_v25 = vsel %vm471_vm5, %v8266_v25, %v4001_v22  ;;  %v12599_v6 = vpop.permute.xlu1 %2611  }
 0x16e   :  { %v8255_v8 = vld [vmem:[%s16995_s0 + $0x306] sm:$0x10]   ;;  %v3958_v53 = vsel %vm459_vm2, %v8254_v53, %v3954_v26  ;;  %v8278_v55 = vld [vmem:[%s16995_s0 + $0x23a] sm:$0x1]   ;;  %v4009_v18 = vsel %vm475_vm6, %v8267_v18, %v4005_v25  ;;  %17015 = vst [vmem:[#allocation18_spill] sm:$0xff] %v12599_v6 }
 0x16f   :  { %v8256_v52 = vld [vmem:[%s16995_s0 + $0x345] sm:$0x20]   ;;  %v8279_v43 = vld [vmem:[%s16995_s0 + $0x279] sm:$0x2]   ;;  %v3962_v8 = vsel %vm463_vm3, %v8255_v8, %v3958_v53  ;;  %4010 = vrot.lane.b32.xlu1 %v4009_v18, %s9082_s14  ;;  %v12625_v13 = vpop.permute.xlu0 %2576  }
 0x170   :  { %v8257_v24 = vld [vmem:[%s16995_s0 + $0x384] sm:$0x40]   ;;  %v8280_v26 = vld [vmem:[%s16995_s0 + $0x2b8] sm:$0x4]   ;;  %v4055_v22 = vsel %vm451_vm0, %v8279_v43, %v8278_v55  ;;  %v3966_v52 = vsel %vm467_vm4, %v8256_v52, %v3962_v8  ;;  %17016 = vst [vmem:[#allocation19_spill] sm:$0xff] %v12625_v13 }
 0x171   :  { %v8258_v36 = vld [vmem:[%s16995_s0 + $0x3c3] sm:$0x80]   ;;  %v8281_v53 = vld [vmem:[%s16995_s0 + $0x2f7] sm:$0x8]   ;;  %v4059_v26 = vsel %vm455_vm1, %v8280_v26, %v4055_v22  ;;  %v3970_v24 = vsel %vm471_vm5, %v8257_v24, %v3966_v52  ;;  %v12663_v13 = vpop.permute.xlu1 %2681  }
 0x172   :  { %v8282_v55 = vld [vmem:[%s16995_s0 + $0x336] sm:$0x10]   ;;  %v8269_v22 = vld [vmem:[%s16995_s0 + $0x22a] sm:$0x1]   ;;  %v4063_v53 = vsel %vm459_vm2, %v8281_v53, %v4059_v26  ;;  %v3974_v36 = vsel %vm475_vm6, %v8258_v36, %v3970_v24  ;;  %17017 = vst [vmem:[#allocation20_spill] sm:$0xff] %v12663_v13 }
 0x173   :  { %v8283_v43 = vld [vmem:[%s16995_s0 + $0x375] sm:$0x20]   ;;  %v8270_v18 = vld [vmem:[%s16995_s0 + $0x269] sm:$0x2]   ;;  %v4067_v55 = vsel %vm463_vm3, %v8282_v55, %v4063_v53  ;;  %3975 = vrot.lane.b32.xlu0 %v3974_v36, %s9082_s14  ;;  %v12701_v13 = vpop.permute.xlu0 %2646  }
 0x174   :  { %v8284_v25 = vld [vmem:[%s16995_s0 + $0x3b4] sm:$0x40]   ;;  %v8271_v52 = vld [vmem:[%s16995_s0 + $0x2a8] sm:$0x4]   ;;  %v4020_v22 = vsel %vm451_vm0, %v8270_v18, %v8269_v22  ;;  %v4071_v43 = vsel %vm467_vm4, %v8283_v43, %v4067_v55  ;;  %17018 = vst [vmem:[#allocation21_spill] sm:$0xff] %v12701_v13 }
 0x175   :  { %v8285_v8 = vld [vmem:[%s16995_s0 + $0x3f3] sm:$0x80]   ;;  %v8272_v26 = vld [vmem:[%s16995_s0 + $0x2e7] sm:$0x8]   ;;  %v4024_v52 = vsel %vm455_vm1, %v8271_v52, %v4020_v22  ;;  %v4075_v25 = vsel %vm471_vm5, %v8284_v25, %v4071_v43  ;;  %v12739_v13 = vpop.permute.xlu1 %2750  }
 0x176   :  { %v8273_v24 = vld [vmem:[%s16995_s0 + $0x326] sm:$0x10]   ;;  %v8296_v55 = vld [vmem:[%s16995_s0 + $0x41a] sm:$0x1]   ;;  %v4028_v26 = vsel %vm459_vm2, %v8272_v26, %v4024_v52  ;;  %v4079_v8 = vsel %vm475_vm6, %v8285_v8, %v4075_v25 }
 0x177   :  { %v8274_v53 = vld [vmem:[%s16995_s0 + $0x365] sm:$0x20]   ;;  %v8297_v22 = vld [vmem:[%s16995_s0 + $0x459] sm:$0x2]   ;;  %v4032_v24 = vsel %vm463_vm3, %v8273_v24, %v4028_v26  ;;  %4080 = vrot.lane.b32.xlu1 %v4079_v8, %s9082_s14  ;;  %v12765_v6 = vpop.permute.xlu0 %2716  }
 0x178   :  { %v8275_v18 = vld [vmem:[%s16995_s0 + $0x3a4] sm:$0x40]   ;;  %v4125_v43 = vsel %vm451_vm0, %v8297_v22, %v8296_v55  ;;  %v8298_v52 = vld [vmem:[%s16995_s0 + $0x498] sm:$0x4]   ;;  %v4036_v53 = vsel %vm467_vm4, %v8274_v53, %v4032_v24 }
 0x179   :  { %v8276_v36 = vld [vmem:[%s16995_s0 + $0x3e3] sm:$0x80]   ;;  %v8299_v55 = vld [vmem:[%s16995_s0 + $0x4d7] sm:$0x8]   ;;  %v4129_v25 = vsel %vm455_vm1, %v8298_v52, %v4125_v43  ;;  %v4040_v18 = vsel %vm471_vm5, %v8275_v18, %v4036_v53  ;;  %v12803_v0 = vpop.permute.xlu1 %2820  }
 0x17a   :  { %v8300_v22 = vld [vmem:[%s16995_s0 + $0x516] sm:$0x10]   ;;  %v4133_v55 = vsel %vm459_vm2, %v8299_v55, %v4129_v25  ;;  %v8287_v8 = vld [vmem:[%s16995_s0 + $0x40a] sm:$0x1]   ;;  %v4044_v36 = vsel %vm475_vm6, %v8276_v36, %v4040_v18 }
 0x17b   :  { %v8301_v26 = vld [vmem:[%s16995_s0 + $0x555] sm:$0x20]   ;;  %v8288_v24 = vld [vmem:[%s16995_s0 + $0x449] sm:$0x2]   ;;  %v4137_v22 = vsel %vm463_vm3, %v8300_v22, %v4133_v55  ;;  %4045 = vrot.lane.b32.xlu0 %v4044_v36, %s9082_s14  ;;  %v12841_v38 = vpop.permute.xlu0 %2785  }
 0x17c   :  { %v8302_v43 = vld [vmem:[%s16995_s0 + $0x594] sm:$0x40]   ;;  %v8289_v25 = vld [vmem:[%s16995_s0 + $0x488] sm:$0x4]   ;;  %v4090_v53 = vsel %vm451_vm0, %v8288_v24, %v8287_v8  ;;  %v4141_v26 = vsel %vm467_vm4, %v8301_v26, %v4137_v22 }
 0x17d   :  { %v8303_v52 = vld [vmem:[%s16995_s0 + $0x5d3] sm:$0x80]   ;;  %v8290_v55 = vld [vmem:[%s16995_s0 + $0x4c7] sm:$0x8]   ;;  %v4094_v25 = vsel %vm455_vm1, %v8289_v25, %v4090_v53  ;;  %v4145_v43 = vsel %vm471_vm5, %v8302_v43, %v4141_v26  ;;  %v12867_v61 = vpop.permute.xlu1 %2890  }
 0x17e   :  { %v8291_v8 = vld [vmem:[%s16995_s0 + $0x506] sm:$0x10]   ;;  %v8314_v53 = vld [vmem:[%s16995_s0 + $0x43a] sm:$0x1]   ;;  %v4098_v55 = vsel %vm459_vm2, %v8290_v55, %v4094_v25  ;;  %v4149_v52 = vsel %vm475_vm6, %v8303_v52, %v4145_v43 }
 0x17f   :  { %v8292_v24 = vld [vmem:[%s16995_s0 + $0x545] sm:$0x20]   ;;  %v8315_v36 = vld [vmem:[%s16995_s0 + $0x479] sm:$0x2]   ;;  %v4102_v8 = vsel %vm463_vm3, %v8291_v8, %v4098_v55  ;;  %4150 = vrot.lane.b32.xlu1 %v4149_v52, %s9082_s14  ;;  %v12905_v57 = vpop.permute.xlu0 %2855  }
 0x180   :  { %v8293_v18 = vld [vmem:[%s16995_s0 + $0x584] sm:$0x40]   ;;  %v8316_v26 = vld [vmem:[%s16995_s0 + $0x4b8] sm:$0x4]   ;;  %v4195_v53 = vsel %vm451_vm0, %v8315_v36, %v8314_v53  ;;  %v4106_v24 = vsel %vm467_vm4, %v8292_v24, %v4102_v8 }
 0x181   :  { %v8294_v22 = vld [vmem:[%s16995_s0 + $0x5c3] sm:$0x80]   ;;  %v8317_v25 = vld [vmem:[%s16995_s0 + $0x4f7] sm:$0x8]   ;;  %v4199_v26 = vsel %vm455_vm1, %v8316_v26, %v4195_v53  ;;  %v4110_v18 = vsel %vm471_vm5, %v8293_v18, %v4106_v24  ;;  %v12943_v11 = vpop.permute.xlu1 %2960  }
 0x182   :  { %v8318_v43 = vld [vmem:[%s16995_s0 + $0x536] sm:$0x10]   ;;  %v8305_v8 = vld [vmem:[%s16995_s0 + $0x42a] sm:$0x1]   ;;  %v4203_v25 = vsel %vm459_vm2, %v8317_v25, %v4199_v26  ;;  %v4114_v22 = vsel %vm475_vm6, %v8294_v22, %v4110_v18 }
 0x183   :  { %v8319_v55 = vld [vmem:[%s16995_s0 + $0x575] sm:$0x20]   ;;  %v8306_v53 = vld [vmem:[%s16995_s0 + $0x469] sm:$0x2]   ;;  %v4207_v43 = vsel %vm463_vm3, %v8318_v43, %v4203_v25  ;;  %4115 = vrot.lane.b32.xlu0 %v4114_v22, %s9082_s14  ;;  %v12969_v19 = vpop.permute.xlu0 %2925  }
 0x184   :  { %v8320_v36 = vld [vmem:[%s16995_s0 + $0x5b4] sm:$0x40]   ;;  %v4160_v24 = vsel %vm451_vm0, %v8306_v53, %v8305_v8  ;;  %v8307_v26 = vld [vmem:[%s16995_s0 + $0x4a8] sm:$0x4]   ;;  %v4211_v55 = vsel %vm467_vm4, %v8319_v55, %v4207_v43 }
 0x185   :  { %v8321_v52 = vld [vmem:[%s16995_s0 + $0x5f3] sm:$0x80]   ;;  %v8308_v8 = vld [vmem:[%s16995_s0 + $0x4e7] sm:$0x8]   ;;  %v4164_v18 = vsel %vm455_vm1, %v8307_v26, %v4160_v24  ;;  %v4215_v36 = vsel %vm471_vm5, %v8320_v36, %v4211_v55  ;;  %v13007_v40 = vpop.permute.xlu1 %3030  }
 0x186   :  { %v8309_v53 = vld [vmem:[%s16995_s0 + $0x526] sm:$0x10]   ;;  %v4168_v8 = vsel %vm459_vm2, %v8308_v8, %v4164_v18  ;;  %v8332_v22 = vld [vmem:[%s16995_s0 + $0x61a] sm:$0x1]   ;;  %v4219_v52 = vsel %vm475_vm6, %v8321_v52, %v4215_v36 }
 0x187   :  { %v8310_v25 = vld [vmem:[%s16995_s0 + $0x565] sm:$0x20]   ;;  %v8333_v43 = vld [vmem:[%s16995_s0 + $0x659] sm:$0x2]   ;;  %v4172_v53 = vsel %vm463_vm3, %v8309_v53, %v4168_v8  ;;  %4220 = vrot.lane.b32.xlu1 %v4219_v52, %s9082_s14  ;;  %v13045_v35 = vpop.permute.xlu0 %2995  }
 0x188   :  { %v8311_v24 = vld [vmem:[%s16995_s0 + $0x5a4] sm:$0x40]   ;;  %v8334_v18 = vld [vmem:[%s16995_s0 + $0x698] sm:$0x4]   ;;  %v4265_v55 = vsel %vm451_vm0, %v8333_v43, %v8332_v22  ;;  %v4176_v25 = vsel %vm467_vm4, %v8310_v25, %v4172_v53 }
 0x189   :  { %v8312_v26 = vld [vmem:[%s16995_s0 + $0x5e3] sm:$0x80]   ;;  %v8335_v8 = vld [vmem:[%s16995_s0 + $0x6d7] sm:$0x8]   ;;  %v4269_v18 = vsel %vm455_vm1, %v8334_v18, %v4265_v55  ;;  %v4180_v24 = vsel %vm471_vm5, %v8311_v24, %v4176_v25  ;;  %v13071_v34 = vpop.permute.xlu1 %3100  }
 0x18a   :  { %v8336_v22 = vld [vmem:[%s16995_s0 + $0x716] sm:$0x10]   ;;  %v8323_v55 = vld [vmem:[%s16995_s0 + $0x60a] sm:$0x1]   ;;  %v4273_v8 = vsel %vm459_vm2, %v8335_v8, %v4269_v18  ;;  %v4184_v26 = vsel %vm475_vm6, %v8312_v26, %v4180_v24  ;;  %17019 = vst [vmem:[#allocation22_spill] sm:$0xff] %v13071_v34 }
 0x18b   :  { %v8337_v43 = vld [vmem:[%s16995_s0 + $0x755] sm:$0x20]   ;;  %v8324_v52 = vld [vmem:[%s16995_s0 + $0x649] sm:$0x2]   ;;  %v4277_v22 = vsel %vm463_vm3, %v8336_v22, %v4273_v8  ;;  %4185 = vrot.lane.b32.xlu0 %v4184_v26, %s9082_s14  ;;  %v13109_v34 = vpop.permute.xlu0 %3065  }
 0x18c   :  { %v8338_v36 = vld [vmem:[%s16995_s0 + $0x794] sm:$0x40]   ;;  %v8325_v25 = vld [vmem:[%s16995_s0 + $0x688] sm:$0x4]   ;;  %v4230_v55 = vsel %vm451_vm0, %v8324_v52, %v8323_v55  ;;  %v4281_v43 = vsel %vm467_vm4, %v8337_v43, %v4277_v22 }
 0x18d   :  { %v8339_v53 = vld [vmem:[%s16995_s0 + $0x7d3] sm:$0x80]   ;;  %v8326_v18 = vld [vmem:[%s16995_s0 + $0x6c7] sm:$0x8]   ;;  %v4234_v25 = vsel %vm455_vm1, %v8325_v25, %v4230_v55  ;;  %v4285_v36 = vsel %vm471_vm5, %v8338_v36, %v4281_v43 }
 0x18e   :  { %v8327_v24 = vld [vmem:[%s16995_s0 + $0x706] sm:$0x10]   ;;  %v8350_v22 = vld [vmem:[%s16995_s0 + $0x63a] sm:$0x1]   ;;  %v4238_v18 = vsel %vm459_vm2, %v8326_v18, %v4234_v25  ;;  %v4289_v53 = vsel %vm475_vm6, %v8339_v53, %v4285_v36 }
 0x18f   :  { %v8328_v8 = vld [vmem:[%s16995_s0 + $0x745] sm:$0x20]   ;;  %v8351_v55 = vld [vmem:[%s16995_s0 + $0x679] sm:$0x2]   ;;  %v4242_v24 = vsel %vm463_vm3, %v8327_v24, %v4238_v18  ;;  %4290 = vrot.lane.b32.xlu1 %v4289_v53, %s9082_s14 }
 0x190   :  { %v8329_v52 = vld [vmem:[%s16995_s0 + $0x784] sm:$0x40]   ;;  %v4335_v43 = vsel %vm451_vm0, %v8351_v55, %v8350_v22  ;;  %v8352_v25 = vld [vmem:[%s16995_s0 + $0x6b8] sm:$0x4]   ;;  %v4246_v8 = vsel %vm467_vm4, %v8328_v8, %v4242_v24 }
 0x191   :  { %v8330_v26 = vld [vmem:[%s16995_s0 + $0x7c3] sm:$0x80]   ;;  %v8353_v22 = vld [vmem:[%s16995_s0 + $0x6f7] sm:$0x8]   ;;  %v4339_v36 = vsel %vm455_vm1, %v8352_v25, %v4335_v43  ;;  %v4250_v52 = vsel %vm471_vm5, %v8329_v52, %v4246_v8 }
 0x192   :  { %v8354_v55 = vld [vmem:[%s16995_s0 + $0x736] sm:$0x10]   ;;  %v4343_v22 = vsel %vm459_vm2, %v8353_v22, %v4339_v36  ;;  %v8341_v53 = vld [vmem:[%s16995_s0 + $0x62a] sm:$0x1]   ;;  %v4254_v26 = vsel %vm475_vm6, %v8330_v26, %v4250_v52 }
 0x193   :  { %v8355_v18 = vld [vmem:[%s16995_s0 + $0x775] sm:$0x20]   ;;  %v8342_v24 = vld [vmem:[%s16995_s0 + $0x669] sm:$0x2]   ;;  %v4347_v55 = vsel %vm463_vm3, %v8354_v55, %v4343_v22  ;;  %4255 = vrot.lane.b32.xlu0 %v4254_v26, %s9082_s14  ;;  %v8369_v26 = vld [vmem:[%s16995_s0 + $0x5d] sm:$0x2]  }
 0x194   :  { %v8356_v43 = vld [vmem:[%s16995_s0 + $0x7b4] sm:$0x40]   ;;  %v8343_v36 = vld [vmem:[%s16995_s0 + $0x6a8] sm:$0x4]   ;;  %v4300_v8 = vsel %vm451_vm0, %v8342_v24, %v8341_v53  ;;  %v4351_v18 = vsel %vm467_vm4, %v8355_v18, %v4347_v55 }
 0x195   :  { %v8357_v25 = vld [vmem:[%s16995_s0 + $0x7f3] sm:$0x80]   ;;  %v8344_v22 = vld [vmem:[%s16995_s0 + $0x6e7] sm:$0x8]   ;;  %v4304_v36 = vsel %vm455_vm1, %v8343_v36, %v4300_v8  ;;  %v8368_v8 = vld [vmem:[%s16995_s0 + $0x1e] sm:$0x1]   ;;  %v4355_v43 = vsel %vm471_vm5, %v8356_v43, %v4351_v18 }
 0x196   :  { %v8345_v53 = vld [vmem:[%s16995_s0 + $0x726] sm:$0x10]   ;;  %v4308_v22 = vsel %vm459_vm2, %v8344_v22, %v4304_v36  ;;  %v8370_v18 = vld [vmem:[%s16995_s0 + $0x9c] sm:$0x4]   ;;  %v4359_v25 = vsel %vm475_vm6, %v8357_v25, %v4355_v43  ;;  %v4405_v8 = vsel %vm451_vm0, %v8369_v26, %v8368_v8 }
 0x197   :  { %v8346_v24 = vld [vmem:[%s16995_s0 + $0x765] sm:$0x20]   ;;  %v8371_v36 = vld [vmem:[%s16995_s0 + $0xdb] sm:$0x8]   ;;  %v4312_v53 = vsel %vm463_vm3, %v8345_v53, %v4308_v22  ;;  %4360 = vrot.lane.b32.xlu1 %v4359_v25, %s9082_s14  ;;  %v4409_v18 = vsel %vm455_vm1, %v8370_v18, %v4405_v8  ;;  %v8360_v8 = vld [vmem:[%s16995_s0 + $0x4d] sm:$0x2]  }
 0x198   :  { %v8347_v52 = vld [vmem:[%s16995_s0 + $0x7a4] sm:$0x40]   ;;  %v8372_v43 = vld [vmem:[%s16995_s0 + $0x11a] sm:$0x10]   ;;  %v4316_v24 = vsel %vm467_vm4, %v8346_v24, %v4312_v53  ;;  %v8359_v53 = vld [vmem:[%s16995_s0 + $0xe] sm:$0x1]   ;;  %v4413_v36 = vsel %vm459_vm2, %v8371_v36, %v4409_v18 }
 0x199   :  { %v8348_v55 = vld [vmem:[%s16995_s0 + $0x7e3] sm:$0x80]   ;;  %v8373_v22 = vld [vmem:[%s16995_s0 + $0x159] sm:$0x20]   ;;  %v4320_v52 = vsel %vm471_vm5, %v8347_v52, %v4316_v24  ;;  %v4370_v24 = vsel %vm451_vm0, %v8360_v8, %v8359_v53  ;;  %v8361_v18 = vld [vmem:[%s16995_s0 + $0x8c] sm:$0x4]   ;;  %v4417_v43 = vsel %vm463_vm3, %v8372_v43, %v4413_v36 }
 0x19a   :  { %v8374_v26 = vld [vmem:[%s16995_s0 + $0x198] sm:$0x40]   ;;  %v8362_v53 = vld [vmem:[%s16995_s0 + $0xcb] sm:$0x8]   ;;  %v4324_v55 = vsel %vm475_vm6, %v8348_v55, %v4320_v52  ;;  %v4374_v52 = vsel %vm455_vm1, %v8361_v18, %v4370_v24  ;;  %v4421_v22 = vsel %vm467_vm4, %v8373_v22, %v4417_v43 }
 0x19b   :  { %v8375_v25 = vld [vmem:[%s16995_s0 + $0x1d7] sm:$0x80]   ;;  %v8363_v8 = vld [vmem:[%s16995_s0 + $0x10a] sm:$0x10]   ;;  %4325 = vrot.lane.b32.xlu0 %v4324_v55, %s9082_s14  ;;  %v4378_v53 = vsel %vm459_vm2, %v8362_v53, %v4374_v52  ;;  %v4425_v26 = vsel %vm471_vm5, %v8374_v26, %v4421_v22 }
 0x19c   :  { %v8364_v36 = vld [vmem:[%s16995_s0 + $0x149] sm:$0x20]   ;;  %v8386_v55 = vld [vmem:[%s16995_s0 + $0x3e] sm:$0x1]   ;;  %v4382_v8 = vsel %vm463_vm3, %v8363_v8, %v4378_v53  ;;  %v4429_v25 = vsel %vm475_vm6, %v8375_v25, %v4425_v26 }
 0x19d   :  { %v8365_v24 = vld [vmem:[%s16995_s0 + $0x188] sm:$0x40]   ;;  %v8387_v43 = vld [vmem:[%s16995_s0 + $0x7d] sm:$0x2]   ;;  %v4386_v36 = vsel %vm467_vm4, %v8364_v36, %v4382_v8  ;;  %4430 = vrot.lane.b32.xlu1 %v4429_v25, %s9082_s14 }
 0x19e   :  { %v8366_v18 = vld [vmem:[%s16995_s0 + $0x1c7] sm:$0x80]   ;;  %v8388_v52 = vld [vmem:[%s16995_s0 + $0xbc] sm:$0x4]   ;;  %v4475_v22 = vsel %vm451_vm0, %v8387_v43, %v8386_v55  ;;  %v4390_v24 = vsel %vm471_vm5, %v8365_v24, %v4386_v36 }
 0x19f   :  { %v8389_v53 = vld [vmem:[%s16995_s0 + $0xfb] sm:$0x8]   ;;  %v4479_v52 = vsel %vm455_vm1, %v8388_v52, %v4475_v22  ;;  %v8377_v22 = vld [vmem:[%s16995_s0 + $0x2e] sm:$0x1]   ;;  %v4394_v18 = vsel %vm475_vm6, %v8366_v18, %v4390_v24 }
 0x1a0   :  { %v8390_v55 = vld [vmem:[%s16995_s0 + $0x13a] sm:$0x10]   ;;  %v4483_v53 = vsel %vm459_vm2, %v8389_v53, %v4479_v52  ;;  %v8378_v25 = vld [vmem:[%s16995_s0 + $0x6d] sm:$0x2]   ;;  %4395 = vrot.lane.b32.xlu0 %v4394_v18, %s9082_s14 }
 0x1a1   :  { %v8391_v43 = vld [vmem:[%s16995_s0 + $0x179] sm:$0x20]   ;;  %v8379_v36 = vld [vmem:[%s16995_s0 + $0xac] sm:$0x4]   ;;  %v4487_v55 = vsel %vm463_vm3, %v8390_v55, %v4483_v53  ;;  %v4440_v22 = vsel %vm451_vm0, %v8378_v25, %v8377_v22 }
 0x1a2   :  { %v8392_v26 = vld [vmem:[%s16995_s0 + $0x1b8] sm:$0x40]   ;;  %v8380_v52 = vld [vmem:[%s16995_s0 + $0xeb] sm:$0x8]   ;;  %v4491_v43 = vsel %vm467_vm4, %v8391_v43, %v4487_v55  ;;  %v4444_v36 = vsel %vm455_vm1, %v8379_v36, %v4440_v22 }
 0x1a3   :  { %v8393_v8 = vld [vmem:[%s16995_s0 + $0x1f7] sm:$0x80]   ;;  %v8381_v24 = vld [vmem:[%s16995_s0 + $0x12a] sm:$0x10]   ;;  %v4495_v26 = vsel %vm471_vm5, %v8392_v26, %v4491_v43  ;;  %v4448_v52 = vsel %vm459_vm2, %v8380_v52, %v4444_v36 }
 0x1a4   :  { %v8382_v53 = vld [vmem:[%s16995_s0 + $0x169] sm:$0x20]   ;;  %v8404_v55 = vld [vmem:[%s16995_s0 + $0x21e] sm:$0x1]   ;;  %v4499_v8 = vsel %vm475_vm6, %v8393_v8, %v4495_v26  ;;  %v4452_v24 = vsel %vm463_vm3, %v8381_v24, %v4448_v52 }
 0x1a5   :  { %v8383_v25 = vld [vmem:[%s16995_s0 + $0x1a8] sm:$0x40]   ;;  %v8405_v22 = vld [vmem:[%s16995_s0 + $0x25d] sm:$0x2]   ;;  %4500 = vrot.lane.b32.xlu1 %v4499_v8, %s9082_s14  ;;  %v4456_v53 = vsel %vm467_vm4, %v8382_v53, %v4452_v24 }
 0x1a6   :  { %v8384_v18 = vld [vmem:[%s16995_s0 + $0x1e7] sm:$0x80]   ;;  %v4545_v43 = vsel %vm451_vm0, %v8405_v22, %v8404_v55  ;;  %v8406_v36 = vld [vmem:[%s16995_s0 + $0x29c] sm:$0x4]   ;;  %v4460_v25 = vsel %vm471_vm5, %v8383_v25, %v4456_v53 }
 0x1a7   :  { %v8407_v55 = vld [vmem:[%s16995_s0 + $0x2db] sm:$0x8]   ;;  %v4549_v26 = vsel %vm455_vm1, %v8406_v36, %v4545_v43  ;;  %v8395_v8 = vld [vmem:[%s16995_s0 + $0x20e] sm:$0x1]   ;;  %v4464_v18 = vsel %vm475_vm6, %v8384_v18, %v4460_v25 }
 0x1a8   :  { %v8408_v22 = vld [vmem:[%s16995_s0 + $0x31a] sm:$0x10]   ;;  %v4553_v55 = vsel %vm459_vm2, %v8407_v55, %v4549_v26  ;;  %v8396_v24 = vld [vmem:[%s16995_s0 + $0x24d] sm:$0x2]   ;;  %4465 = vrot.lane.b32.xlu0 %v4464_v18, %s9082_s14 }
 0x1a9   :  { %v8409_v52 = vld [vmem:[%s16995_s0 + $0x359] sm:$0x20]   ;;  %v8397_v26 = vld [vmem:[%s16995_s0 + $0x28c] sm:$0x4]   ;;  %v4557_v22 = vsel %vm463_vm3, %v8408_v22, %v4553_v55  ;;  %v4510_v53 = vsel %vm451_vm0, %v8396_v24, %v8395_v8 }
 0x1aa   :  { %v8410_v43 = vld [vmem:[%s16995_s0 + $0x398] sm:$0x40]   ;;  %v8398_v55 = vld [vmem:[%s16995_s0 + $0x2cb] sm:$0x8]   ;;  %v4561_v52 = vsel %vm467_vm4, %v8409_v52, %v4557_v22  ;;  %v4514_v26 = vsel %vm455_vm1, %v8397_v26, %v4510_v53 }
 0x1ab   :  { %v8411_v36 = vld [vmem:[%s16995_s0 + $0x3d7] sm:$0x80]   ;;  %v8399_v8 = vld [vmem:[%s16995_s0 + $0x30a] sm:$0x10]   ;;  %v4565_v43 = vsel %vm471_vm5, %v8410_v43, %v4561_v52  ;;  %v4518_v55 = vsel %vm459_vm2, %v8398_v55, %v4514_v26 }
 0x1ac   :  { %v8400_v24 = vld [vmem:[%s16995_s0 + $0x349] sm:$0x20]   ;;  %v8422_v53 = vld [vmem:[%s16995_s0 + $0x23e] sm:$0x1]   ;;  %v4569_v36 = vsel %vm475_vm6, %v8411_v36, %v4565_v43  ;;  %v4522_v8 = vsel %vm463_vm3, %v8399_v8, %v4518_v55 }
 0x1ad   :  { %v8401_v25 = vld [vmem:[%s16995_s0 + $0x388] sm:$0x40]   ;;  %v8423_v18 = vld [vmem:[%s16995_s0 + $0x27d] sm:$0x2]   ;;  %4570 = vrot.lane.b32.xlu1 %v4569_v36, %s9082_s14  ;;  %v4526_v24 = vsel %vm467_vm4, %v8400_v24, %v4522_v8 }
 0x1ae   :  { %v8402_v22 = vld [vmem:[%s16995_s0 + $0x3c7] sm:$0x80]   ;;  %v8424_v52 = vld [vmem:[%s16995_s0 + $0x2bc] sm:$0x4]   ;;  %v4615_v53 = vsel %vm451_vm0, %v8423_v18, %v8422_v53  ;;  %v4530_v25 = vsel %vm471_vm5, %v8401_v25, %v4526_v24 }
 0x1af   :  { %v8425_v26 = vld [vmem:[%s16995_s0 + $0x2fb] sm:$0x8]   ;;  %v4619_v52 = vsel %vm455_vm1, %v8424_v52, %v4615_v53  ;;  %v8413_v8 = vld [vmem:[%s16995_s0 + $0x22e] sm:$0x1]   ;;  %v4534_v22 = vsel %vm475_vm6, %v8402_v22, %v4530_v25 }
 0x1b0   :  { %v8426_v43 = vld [vmem:[%s16995_s0 + $0x33a] sm:$0x10]   ;;  %v8414_v53 = vld [vmem:[%s16995_s0 + $0x26d] sm:$0x2]   ;;  %v4623_v26 = vsel %vm459_vm2, %v8425_v26, %v4619_v52  ;;  %4535 = vrot.lane.b32.xlu0 %v4534_v22, %s9082_s14 }
 0x1b1   :  { %v8427_v55 = vld [vmem:[%s16995_s0 + $0x379] sm:$0x20]   ;;  %v4580_v24 = vsel %vm451_vm0, %v8414_v53, %v8413_v8  ;;  %v8415_v52 = vld [vmem:[%s16995_s0 + $0x2ac] sm:$0x4]   ;;  %v4627_v43 = vsel %vm463_vm3, %v8426_v43, %v4623_v26 }
 0x1b2   :  { %v8428_v18 = vld [vmem:[%s16995_s0 + $0x3b8] sm:$0x40]   ;;  %v8416_v8 = vld [vmem:[%s16995_s0 + $0x2eb] sm:$0x8]   ;;  %v4584_v25 = vsel %vm455_vm1, %v8415_v52, %v4580_v24  ;;  %v4631_v55 = vsel %vm467_vm4, %v8427_v55, %v4627_v43 }
 0x1b3   :  { %v8429_v36 = vld [vmem:[%s16995_s0 + $0x3f7] sm:$0x80]   ;;  %v8417_v53 = vld [vmem:[%s16995_s0 + $0x32a] sm:$0x10]   ;;  %v4588_v8 = vsel %vm459_vm2, %v8416_v8, %v4584_v25  ;;  %v4635_v18 = vsel %vm471_vm5, %v8428_v18, %v4631_v55 }
 0x1b4   :  { %v8418_v26 = vld [vmem:[%s16995_s0 + $0x369] sm:$0x20]   ;;  %v8440_v22 = vld [vmem:[%s16995_s0 + $0x41e] sm:$0x1]   ;;  %v4592_v53 = vsel %vm463_vm3, %v8417_v53, %v4588_v8  ;;  %v4639_v36 = vsel %vm475_vm6, %v8429_v36, %v4635_v18 }
 0x1b5   :  { %v8419_v24 = vld [vmem:[%s16995_s0 + $0x3a8] sm:$0x40]   ;;  %v8441_v43 = vld [vmem:[%s16995_s0 + $0x45d] sm:$0x2]   ;;  %v4596_v26 = vsel %vm467_vm4, %v8418_v26, %v4592_v53  ;;  %4640 = vrot.lane.b32.xlu1 %v4639_v36, %s9082_s14 }
 0x1b6   :  { %v8420_v52 = vld [vmem:[%s16995_s0 + $0x3e7] sm:$0x80]   ;;  %v8442_v25 = vld [vmem:[%s16995_s0 + $0x49c] sm:$0x4]   ;;  %v4685_v55 = vsel %vm451_vm0, %v8441_v43, %v8440_v22  ;;  %v4600_v24 = vsel %vm471_vm5, %v8419_v24, %v4596_v26 }
 0x1b7   :  { %v8443_v8 = vld [vmem:[%s16995_s0 + $0x4db] sm:$0x8]   ;;  %v4689_v25 = vsel %vm455_vm1, %v8442_v25, %v4685_v55  ;;  %v8431_v55 = vld [vmem:[%s16995_s0 + $0x40e] sm:$0x1]   ;;  %v4604_v52 = vsel %vm475_vm6, %v8420_v52, %v4600_v24 }
 0x1b8   :  { %v8444_v22 = vld [vmem:[%s16995_s0 + $0x51a] sm:$0x10]   ;;  %v4693_v8 = vsel %vm459_vm2, %v8443_v8, %v4689_v25  ;;  %v8432_v36 = vld [vmem:[%s16995_s0 + $0x44d] sm:$0x2]   ;;  %4605 = vrot.lane.b32.xlu0 %v4604_v52, %s9082_s14 }
 0x1b9   :  { %v8445_v43 = vld [vmem:[%s16995_s0 + $0x559] sm:$0x20]   ;;  %v8433_v26 = vld [vmem:[%s16995_s0 + $0x48c] sm:$0x4]   ;;  %v4697_v22 = vsel %vm463_vm3, %v8444_v22, %v4693_v8  ;;  %v4650_v55 = vsel %vm451_vm0, %v8432_v36, %v8431_v55 }
 0x1ba   :  { %v8446_v18 = vld [vmem:[%s16995_s0 + $0x598] sm:$0x40]   ;;  %v8434_v25 = vld [vmem:[%s16995_s0 + $0x4cb] sm:$0x8]   ;;  %v4701_v43 = vsel %vm467_vm4, %v8445_v43, %v4697_v22  ;;  %v4654_v26 = vsel %vm455_vm1, %v8433_v26, %v4650_v55  ;;  %v2_v22 = vld [vmem:[%s16995_s0] ss:$4 sm:$0xff]   ;;  %v13144_v55 = vpop.permute.xlu1 %3170  }
 0x1bb   :  { %v8447_v53 = vld [vmem:[%s16995_s0 + $0x5d7] sm:$0x80]   ;;  %v8435_v24 = vld [vmem:[%s16995_s0 + $0x50a] sm:$0x10]   ;;  %17020 = vst [vmem:[#allocation23_spill] sm:$0xff] %v13144_v55  ;;  %v4705_v18 = vsel %vm471_vm5, %v8446_v18, %v4701_v43  ;;  %v4658_v25 = vsel %vm459_vm2, %v8434_v25, %v4654_v26 }
 0x1bc   :  { %v8436_v8 = vld [vmem:[%s16995_s0 + $0x549] sm:$0x20]   ;;  %5 = vst.msk [vmem:[%s16996_s1] ss:$8 sm:$0xf0] %vm3_vm7, %v2_v22   ;;  %v4709_v53 = vsel %vm475_vm6, %v8447_v53, %v4705_v18  ;;  %v4662_v24 = vsel %vm463_vm3, %v8435_v24, %v4658_v25 }
 0x1bd   :  { %v8437_v36 = vld [vmem:[%s16995_s0 + $0x588] sm:$0x40]   ;;  %v7167_v43 = vld [vmem:[%s16995_s0 + $0x40] ss:$4 sm:$0xff]   ;;  %4710 = vrot.lane.b32.xlu1 %v4709_v53, %s9082_s14  ;;  %v4666_v8 = vsel %vm467_vm4, %v8436_v8, %v4662_v24  ;;  %v8459_v53 = vld [vmem:[%s16995_s0 + $0x47d] sm:$0x2]  }
 0x1be   :  { %v8438_v52 = vld [vmem:[%s16995_s0 + $0x5c7] sm:$0x80]   ;;  %v7173_v26 = vld [vmem:[%s16995_s0 + $0x80] ss:$4 sm:$0xff]   ;;  %v4670_v36 = vsel %vm471_vm5, %v8437_v36, %v4666_v8 }
 0x1bf   :  { %v7179_v55 = vld [vmem:[%s16995_s0 + $0xc0] ss:$4 sm:$0xff]   ;;  %4 = vst.msk [vmem:[%s16996_s1] ss:$8 sm:$0xf] %vm3_vm7, %v2_v22   ;;  %v4674_v52 = vsel %vm475_vm6, %v8438_v52, %v4670_v36 }
 0x1c0   :  { %7169 = vst.msk [vmem:[%s16996_s1 + $0x1] ss:$8 sm:$0xf0] %vm3_vm7, %v7167_v43   ;;  %7175 = vst.msk [vmem:[%s16996_s1 + $0x2] ss:$8 sm:$0xf0] %vm3_vm7, %v7173_v26   ;;  %4675 = vrot.lane.b32.xlu0 %v4674_v52, %s9082_s14 }
 0x1c1   :  { %7181 = vst.msk [vmem:[%s16996_s1 + $0x3] ss:$8 sm:$0xf0] %vm3_vm7, %v7179_v55   ;;  %v7185_v22 = vld [vmem:[%s16995_s0 + $0x100] ss:$4 sm:$0xff]  }
 0x1c2   :  { %v7191_v18 = vld [vmem:[%s16995_s0 + $0x140] ss:$4 sm:$0xff]   ;;  %7168 = vst.msk [vmem:[%s16996_s1 + $0x1] ss:$8 sm:$0xf] %vm3_vm7, %v7167_v43  }
 0x1c3   :  { %v7197_v25 = vld [vmem:[%s16995_s0 + $0x180] ss:$4 sm:$0xff]   ;;  %7174 = vst.msk [vmem:[%s16996_s1 + $0x2] ss:$8 sm:$0xf] %vm3_vm7, %v7173_v26  }
 0x1c4   :  { %7180 = vst.msk [vmem:[%s16996_s1 + $0x3] ss:$8 sm:$0xf] %vm3_vm7, %v7179_v55   ;;  %v13200_v55 = vpop.permute.xlu0 %3135   ;;  %7187 = vst.msk [vmem:[%s16996_s1 + $0x4] ss:$8 sm:$0xf0] %vm3_vm7, %v7185_v22  }
 0x1c5   :  { %7193 = vst.msk [vmem:[%s16996_s1 + $0x5] ss:$8 sm:$0xf0] %vm3_vm7, %v7191_v18   ;;  %7199 = vst.msk [vmem:[%s16996_s1 + $0x6] ss:$8 sm:$0xf0] %vm3_vm7, %v7197_v25  }
 0x1c6   :  { %v7203_v43 = vld [vmem:[%s16995_s0 + $0x1c0] ss:$4 sm:$0xff]   ;;  %7186 = vst.msk [vmem:[%s16996_s1 + $0x4] ss:$8 sm:$0xf] %vm3_vm7, %v7185_v22  }
 0x1c7   :  { %7192 = vst.msk [vmem:[%s16996_s1 + $0x5] ss:$8 sm:$0xf] %vm3_vm7, %v7191_v18   ;;  %7198 = vst.msk [vmem:[%s16996_s1 + $0x6] ss:$8 sm:$0xf] %vm3_vm7, %v7197_v25  }
 0x1c8   :  { %v8458_v26 = vld [vmem:[%s16995_s0 + $0x43e] sm:$0x1]   ;;  %7205 = vst.msk [vmem:[%s16996_s1 + $0x7] ss:$8 sm:$0xf0] %vm3_vm7, %v7203_v43   ;;  %v13352_v52 = vpop.permute.xlu0 %3205  }
 0x1c9   :  { %7204 = vst.msk [vmem:[%s16996_s1 + $0x7] ss:$8 sm:$0xf] %vm3_vm7, %v7203_v43   ;;  %v4755_v24 = vsel %vm451_vm0, %v8459_v53, %v8458_v26  ;;  %v8460_v22 = vld [vmem:[%s16995_s0 + $0x4bc] sm:$0x4]  }
 0x1ca   :  { %v8461_v18 = vld [vmem:[%s16995_s0 + $0x4fb] sm:$0x8]   ;;  %7369 = vst.msk [vmem:[%s16996_s1 + $0x20] sm:$0xff] %vm479_vm8, %v10665_v29   ;;  %7513 = vst.msk [vmem:[%s16996_s1 + $0x28] sm:$0xff] %vm479_vm8, %v11099_v9   ;;  %v8452_v43 = vld [vmem:[%s16995_s0 + $0x4eb] sm:$0x8]  }
 0x1cb   :  { %v8462_v25 = vld [vmem:[%s16995_s0 + $0x53a] sm:$0x10]   ;;  %7657 = vst.msk [vmem:[%s16996_s1 + $0x30] sm:$0xff] %vm479_vm8, %v11643_v31   ;;  %7801 = vst.msk [vmem:[%s16996_s1 + $0x38] sm:$0xff] %vm479_vm8, %v12191_v15   ;;  %v13307_v31 = vpop.permute.xlu1 %3240   ;;  %v8451_v15 = vld [vmem:[%s16995_s0 + $0x4ac] sm:$0x4]  }
 0x1cc   :  { %480 = vst.msk [vmem:[%s16996_s1] sm:$0xff] %vm479_vm8, %v10589_v58   ;;  %7504 = vst.msk [vmem:[%s16996_s1 + $0x8] sm:$0xff] %vm479_vm8, %v11137_v33   ;;  %v4759_v58 = vsel %vm455_vm1, %v8460_v22, %v4755_v24  ;;  %v8463_v29 = vld [vmem:[%s16995_s0 + $0x579] sm:$0x20]   ;;  %v8453_v26 = vld [vmem:[%s16995_s0 + $0x52a] sm:$0x10]  }
 0x1cd   :  { %7648 = vst.msk [vmem:[%s16996_s1 + $0x10] sm:$0xff] %vm479_vm8, %v11681_v4   ;;  %7792 = vst.msk [vmem:[%s16996_s1 + $0x18] sm:$0xff] %vm479_vm8, %v12217_v48   ;;  %v8464_v9 = vld [vmem:[%s16995_s0 + $0x5b8] sm:$0x40]   ;;  %v8450_v4 = vld [vmem:[%s16995_s0 + $0x46d] sm:$0x2]  }
 0x1ce   :  { %v8465_v33 = vld [vmem:[%s16995_s0 + $0x5f7] sm:$0x80]   ;;  %7944 = vst.msk [vmem:[%s16996_s1 + $0x20] sm:$0xff] %vm2718_vm9, %v12739_v13   ;;  %2719 = vst.msk [vmem:[%s16996_s1] sm:$0xff] %vm2718_vm9, %v12765_v6   ;;  %v4763_v13 = vsel %vm459_vm2, %v8461_v18, %v4759_v58  ;;  %v8449_v6 = vld [vmem:[%s16995_s0 + $0x42e] sm:$0x1]  }
 0x1cf   :  { %v4767_v48 = vsel %vm463_vm3, %v8462_v25, %v4763_v13  ;;  %v4720_v8 = vsel %vm451_vm0, %v8450_v4, %v8449_v6  ;;  %v8454_v53 = vld [vmem:[%s16995_s0 + $0x569] sm:$0x20]   ;;  %v7164_v25 = vld [vmem:[%s16995_s0 + $0x20] ss:$4 sm:$0xff]  }
 0x1d0   :  { %v4771_v36 = vsel %vm467_vm4, %v8463_v29, %v4767_v48  ;;  %v4724_v24 = vsel %vm455_vm1, %v8451_v15, %v4720_v8  ;;  %v8455_v22 = vld [vmem:[%s16995_s0 + $0x5a8] sm:$0x40]   ;;  %7166 = vst.msk [vmem:[%s16996_s1 + $0x40] ss:$8 sm:$0xf0] %vm3_vm7, %v7164_v25  }
 0x1d1   :  { %v8456_v18 = vld [vmem:[%s16995_s0 + $0x5e7] sm:$0x80]   ;;  %v4775_v58 = vsel %vm471_vm5, %v8464_v9, %v4771_v36  ;;  %v4728_v29 = vsel %vm459_vm2, %v8452_v43, %v4724_v24  ;;  %v7170_v9 = vld [vmem:[%s16995_s0 + $0x60] ss:$4 sm:$0xff]   ;;  %v3311_v43 = vpop.permute.xlu1 %3310   ;;  %v8476_v36 = vld [vmem:[%s16995_s0 + $0x61e] sm:$0x1]  }
 0x1d2   :  { %v7176_v13 = vld [vmem:[%s16995_s0 + $0xa0] ss:$4 sm:$0xff]   ;;  %7165 = vst.msk [vmem:[%s16996_s1 + $0x40] ss:$8 sm:$0xf] %vm3_vm7, %v7164_v25   ;;  %v4779_v33 = vsel %vm475_vm6, %v8465_v33, %v4775_v58  ;;  %v4732_v4 = vsel %vm463_vm3, %v8453_v26, %v4728_v29 }
 0x1d3   :  { %v7182_v6 = vld [vmem:[%s16995_s0 + $0xe0] ss:$4 sm:$0xff]   ;;  %7172 = vst.msk [vmem:[%s16996_s1 + $0x41] ss:$8 sm:$0xf0] %vm3_vm7, %v7170_v9   ;;  %4780 = vrot.lane.b32.xlu1 %v4779_v33, %s9082_s14  ;;  %v4736_v26 = vsel %vm467_vm4, %v8454_v53, %v4732_v4 }
 0x1d4   :  { %7178 = vst.msk [vmem:[%s16996_s1 + $0x42] ss:$8 sm:$0xf0] %vm3_vm7, %v7176_v13   ;;  %7184 = vst.msk [vmem:[%s16996_s1 + $0x43] ss:$8 sm:$0xf0] %vm3_vm7, %v7182_v6   ;;  %v4740_v22 = vsel %vm471_vm5, %v8455_v22, %v4736_v26 }
 0x1d5   :  { %v7188_v15 = vld [vmem:[%s16995_s0 + $0x120] ss:$4 sm:$0xff]   ;;  %7171 = vst.msk [vmem:[%s16996_s1 + $0x41] ss:$8 sm:$0xf] %vm3_vm7, %v7170_v9   ;;  %v4744_v18 = vsel %vm475_vm6, %v8456_v18, %v4740_v22 }
 0x1d6   :  { %v7194_v48 = vld [vmem:[%s16995_s0 + $0x160] ss:$4 sm:$0xff]   ;;  %7177 = vst.msk [vmem:[%s16996_s1 + $0x42] ss:$8 sm:$0xf] %vm3_vm7, %v7176_v13   ;;  %4745 = vrot.lane.b32.xlu0 %v4744_v18, %s9082_s14 }
 0x1d7   :  { %v7200_v8 = vld [vmem:[%s16995_s0 + $0x1a0] ss:$4 sm:$0xff]   ;;  %7183 = vst.msk [vmem:[%s16996_s1 + $0x43] ss:$8 sm:$0xf] %vm3_vm7, %v7182_v6  }
 0x1d8   :  { %7190 = vst.msk [vmem:[%s16996_s1 + $0x44] ss:$8 sm:$0xf0] %vm3_vm7, %v7188_v15   ;;  %7196 = vst.msk [vmem:[%s16996_s1 + $0x45] ss:$8 sm:$0xf0] %vm3_vm7, %v7194_v48  }
 0x1d9   :  { %7202 = vst.msk [vmem:[%s16996_s1 + $0x46] ss:$8 sm:$0xf0] %vm3_vm7, %v7200_v8   ;;  %v7206_v53 = vld [vmem:[%s16995_s0 + $0x1e0] ss:$4 sm:$0xff]  }
 0x1da   :  { %7189 = vst.msk [vmem:[%s16996_s1 + $0x44] ss:$8 sm:$0xf] %vm3_vm7, %v7188_v15   ;;  %7195 = vst.msk [vmem:[%s16996_s1 + $0x45] ss:$8 sm:$0xf] %vm3_vm7, %v7194_v48  }
 0x1db   :  { %7201 = vst.msk [vmem:[%s16996_s1 + $0x46] ss:$8 sm:$0xf] %vm3_vm7, %v7200_v8   ;;  %v8477_v24 = vld [vmem:[%s16995_s0 + $0x65d] sm:$0x2]  }
 0x1dc   :  { %8088 = vst.msk [vmem:[%s16996_s1 + $0x28] sm:$0xff] %vm2718_vm9, %v3311_v43   ;;  %v4825_v25 = vsel %vm451_vm0, %v8477_v24, %v8476_v36  ;;  %v8478_v58 = vld [vmem:[%s16995_s0 + $0x69c] sm:$0x4]   ;;  %v8470_v6 = vld [vmem:[%s16995_s0 + $0x6cb] sm:$0x8]  }
 0x1dd   :  { %7208 = vst.msk [vmem:[%s16996_s1 + $0x47] ss:$8 sm:$0xf0] %vm3_vm7, %v7206_v53   ;;  %7207 = vst.msk [vmem:[%s16996_s1 + $0x47] ss:$8 sm:$0xf] %vm3_vm7, %v7206_v53   ;;  %v3381_v53 = vpop.permute.xlu1 %3380  }
 0x1de   :  { %v8479_v29 = vld [vmem:[%s16995_s0 + $0x6db] sm:$0x8]   ;;  %7387 = vst.msk [vmem:[%s16996_s1 + $0x60] sm:$0xff] %vm479_vm8, %v10627_v12   ;;  %7531 = vst.msk [vmem:[%s16996_s1 + $0x68] sm:$0xff] %vm479_vm8, %v11172_v54   ;;  %v8471_v33 = vld [vmem:[%s16995_s0 + $0x70a] sm:$0x10]  }
 0x1df   :  { %v8480_v9 = vld [vmem:[%s16995_s0 + $0x71a] sm:$0x10]   ;;  %7675 = vst.msk [vmem:[%s16996_s1 + $0x70] sm:$0xff] %vm479_vm8, %v11707_v27   ;;  %7819 = vst.msk [vmem:[%s16996_s1 + $0x78] sm:$0xff] %vm479_vm8, %v12255_v21   ;;  %v3276_v27 = vpop.permute.xlu0 %3275   ;;  %v8469_v21 = vld [vmem:[%s16995_s0 + $0x68c] sm:$0x4]  }
 0x1e0   :  { %7378 = vst.msk [vmem:[%s16996_s1 + $0x40] sm:$0xff] %vm479_vm8, %v10563_v45   ;;  %7522 = vst.msk [vmem:[%s16996_s1 + $0x48] sm:$0xff] %vm479_vm8, %v11197_v7   ;;  %v4829_v45 = vsel %vm455_vm1, %v8478_v58, %v4825_v25  ;;  %v8481_v12 = vld [vmem:[%s16995_s0 + $0x759] sm:$0x20]   ;;  %v8472_v4 = vld [vmem:[%s16995_s0 + $0x749] sm:$0x20]  }
 0x1e1   :  { %7666 = vst.msk [vmem:[%s16996_s1 + $0x50] sm:$0xff] %vm479_vm8, %v11745_v2   ;;  %7810 = vst.msk [vmem:[%s16996_s1 + $0x58] sm:$0xff] %vm479_vm8, %v12293_v1   ;;  %v8482_v54 = vld [vmem:[%s16995_s0 + $0x798] sm:$0x40]   ;;  %v8467_v2 = vld [vmem:[%s16995_s0 + $0x60e] sm:$0x1]  }
 0x1e2   :  { %v8483_v7 = vld [vmem:[%s16995_s0 + $0x7d7] sm:$0x80]   ;;  %7962 = vst.msk [vmem:[%s16996_s1 + $0x60] sm:$0xff] %vm2718_vm9, %v12803_v0   ;;  %7953 = vst.msk [vmem:[%s16996_s1 + $0x40] sm:$0xff] %vm2718_vm9, %v12841_v38   ;;  %v4833_v38 = vsel %vm459_vm2, %v8479_v29, %v4829_v45  ;;  %v8468_v0 = vld [vmem:[%s16995_s0 + $0x64d] sm:$0x2]  }
 0x1e3   :  { %8079 = vst.msk [vmem:[%s16996_s1 + $0x8] sm:$0xff] %vm2718_vm9, %v3276_v27   ;;  %v4837_v1 = vsel %vm463_vm3, %v8480_v9, %v4833_v38  ;;  %v4790_v13 = vsel %vm451_vm0, %v8468_v0, %v8467_v2  ;;  %v8473_v8 = vld [vmem:[%s16995_s0 + $0x788] sm:$0x40]   ;;  %v7209_v26 = vld [vmem:[%s16995_s0 + $0x200] ss:$4 sm:$0xff]   ;;  %8106 = vst.msk [vmem:[%s16996_s1 + $0x68] sm:$0xff] %vm2718_vm9, %v3381_v53  }
 0x1e4   :  { %v4841_v15 = vsel %vm467_vm4, %v8481_v12, %v4837_v1  ;;  %v4794_v48 = vsel %vm455_vm1, %v8469_v21, %v4790_v13  ;;  %v8474_v43 = vld [vmem:[%s16995_s0 + $0x7c7] sm:$0x80]   ;;  %7211 = vst.msk [vmem:[%s16996_s1 + $0x80] ss:$8 sm:$0xf0] %vm3_vm7, %v7209_v26  }
 0x1e5   :  { %v4845_v36 = vsel %vm471_vm5, %v8482_v54, %v4841_v15  ;;  %v4798_v24 = vsel %vm459_vm2, %v8470_v6, %v4794_v48  ;;  %v7215_v22 = vld [vmem:[%s16995_s0 + $0x240] ss:$4 sm:$0xff]   ;;  %7210 = vst.msk [vmem:[%s16996_s1 + $0x80] ss:$8 sm:$0xf] %vm3_vm7, %v7209_v26   ;;  %v3346_v54 = vpop.permute.xlu0 %3345  }
 0x1e6   :  { %v7221_v25 = vld [vmem:[%s16995_s0 + $0x280] ss:$4 sm:$0xff]   ;;  %v4849_v29 = vsel %vm475_vm6, %v8483_v7, %v4845_v36  ;;  %v4802_v9 = vsel %vm463_vm3, %v8471_v33, %v4798_v24  ;;  %7217 = vst.msk [vmem:[%s16996_s1 + $0x81] ss:$8 sm:$0xf0] %vm3_vm7, %v7215_v22  }
 0x1e7   :  { %v7227_v58 = vld [vmem:[%s16995_s0 + $0x2c0] ss:$4 sm:$0xff]   ;;  %7223 = vst.msk [vmem:[%s16996_s1 + $0x82] ss:$8 sm:$0xf0] %vm3_vm7, %v7221_v25   ;;  %4850 = vrot.lane.b32.xlu1 %v4849_v29, %s9082_s14  ;;  %v4806_v7 = vsel %vm467_vm4, %v8472_v4, %v4802_v9 }
 0x1e8   :  { %7229 = vst.msk [vmem:[%s16996_s1 + $0x83] ss:$8 sm:$0xf0] %vm3_vm7, %v7227_v58   ;;  %v7233_v18 = vld [vmem:[%s16995_s0 + $0x300] ss:$4 sm:$0xff]   ;;  %v4810_v0 = vsel %vm471_vm5, %v8473_v8, %v4806_v7 }
 0x1e9   :  { %v7239_v45 = vld [vmem:[%s16995_s0 + $0x340] ss:$4 sm:$0xff]   ;;  %7216 = vst.msk [vmem:[%s16996_s1 + $0x81] ss:$8 sm:$0xf] %vm3_vm7, %v7215_v22   ;;  %v4814_v33 = vsel %vm475_vm6, %v8474_v43, %v4810_v0  ;;  %v3416_v22 = vpop.permute.xlu0 %3415  }
 0x1ea   :  { %v7245_v12 = vld [vmem:[%s16995_s0 + $0x380] ss:$4 sm:$0xff]   ;;  %7222 = vst.msk [vmem:[%s16996_s1 + $0x82] ss:$8 sm:$0xf] %vm3_vm7, %v7221_v25   ;;  %4815 = vrot.lane.b32.xlu0 %v4814_v33, %s9082_s14 }
 0x1eb   :  { %7228 = vst.msk [vmem:[%s16996_s1 + $0x83] ss:$8 sm:$0xf] %vm3_vm7, %v7227_v58   ;;  %7235 = vst.msk [vmem:[%s16996_s1 + $0x84] ss:$8 sm:$0xf0] %vm3_vm7, %v7233_v18  }
 0x1ec   :  { %7241 = vst.msk [vmem:[%s16996_s1 + $0x85] ss:$8 sm:$0xf0] %vm3_vm7, %v7239_v45   ;;  %7247 = vst.msk [vmem:[%s16996_s1 + $0x86] ss:$8 sm:$0xf0] %vm3_vm7, %v7245_v12  }
 0x1ed   :  { %v7251_v27 = vld [vmem:[%s16995_s0 + $0x3c0] ss:$4 sm:$0xff]   ;;  %7234 = vst.msk [vmem:[%s16996_s1 + $0x84] ss:$8 sm:$0xf] %vm3_vm7, %v7233_v18  }
 0x1ee   :  { %7240 = vst.msk [vmem:[%s16996_s1 + $0x85] ss:$8 sm:$0xf] %vm3_vm7, %v7239_v45   ;;  %7246 = vst.msk [vmem:[%s16996_s1 + $0x86] ss:$8 sm:$0xf] %vm3_vm7, %v7245_v12  }
 0x1ef   :  { %v8494_v38 = vld [vmem:[%s16995_s0 + $0x63e] sm:$0x1]   ;;  %8097 = vst.msk [vmem:[%s16996_s1 + $0x48] sm:$0xff] %vm2718_vm9, %v3346_v54   ;;  %v8488_v15 = vld [vmem:[%s16995_s0 + $0x6eb] sm:$0x8]  }
 0x1f0   :  { %v8495_v2 = vld [vmem:[%s16995_s0 + $0x67d] sm:$0x2]   ;;  %7253 = vst.msk [vmem:[%s16996_s1 + $0x87] ss:$8 sm:$0xf0] %vm3_vm7, %v7251_v27  }
 0x1f1   :  { %7252 = vst.msk [vmem:[%s16996_s1 + $0x87] ss:$8 sm:$0xf] %vm3_vm7, %v7251_v27   ;;  %v4895_v21 = vsel %vm451_vm0, %v8495_v2, %v8494_v38  ;;  %v8496_v1 = vld [vmem:[%s16995_s0 + $0x6bc] sm:$0x4]  }
 0x1f2   :  { %v8497_v13 = vld [vmem:[%s16995_s0 + $0x6fb] sm:$0x8]   ;;  %7405 = vst.msk [vmem:[%s16996_s1 + $0xa0] sm:$0xff] %vm479_vm8, %v10691_v42   ;;  %7549 = vst.msk [vmem:[%s16996_s1 + $0xa8] sm:$0xff] %vm479_vm8, %v11235_v32   ;;  %v4899_v42 = vsel %vm455_vm1, %v8496_v1, %v4895_v21  ;;  %v8489_v48 = vld [vmem:[%s16995_s0 + $0x72a] sm:$0x10]  }
 0x1f3   :  { %v8498_v6 = vld [vmem:[%s16995_s0 + $0x73a] sm:$0x10]   ;;  %7693 = vst.msk [vmem:[%s16996_s1 + $0xb0] sm:$0xff] %vm479_vm8, %v11783_v46   ;;  %7837 = vst.msk [vmem:[%s16996_s1 + $0xb8] sm:$0xff] %vm479_vm8, %v12319_v37   ;;  %v3451_v46 = vpop.permute.xlu1 %3450   ;;  %v8490_v8 = vld [vmem:[%s16995_s0 + $0x769] sm:$0x20]  }
 0x1f4   :  { %7396 = vst.msk [vmem:[%s16996_s1 + $0x80] sm:$0xff] %vm479_vm8, %v10729_v62   ;;  %7540 = vst.msk [vmem:[%s16996_s1 + $0x88] sm:$0xff] %vm479_vm8, %v11273_v59   ;;  %v8499_v62 = vld [vmem:[%s16995_s0 + $0x779] sm:$0x20]   ;;  %v8491_v53 = vld [vmem:[%s16995_s0 + $0x7a8] sm:$0x40]  }
 0x1f5   :  { %7684 = vst.msk [vmem:[%s16996_s1 + $0x90] sm:$0xff] %vm479_vm8, %v11809_v10   ;;  %7828 = vst.msk [vmem:[%s16996_s1 + $0x98] sm:$0xff] %vm479_vm8, %v12357_v44   ;;  %v8500_v32 = vld [vmem:[%s16995_s0 + $0x7b8] sm:$0x40]   ;;  %v8485_v10 = vld [vmem:[%s16995_s0 + $0x62e] sm:$0x1]  }
 0x1f6   :  { %v8501_v59 = vld [vmem:[%s16995_s0 + $0x7f7] sm:$0x80]   ;;  %7980 = vst.msk [vmem:[%s16996_s1 + $0xa0] sm:$0xff] %vm2718_vm9, %v12867_v61   ;;  %7971 = vst.msk [vmem:[%s16996_s1 + $0x80] sm:$0xff] %vm2718_vm9, %v12905_v57   ;;  %v4903_v61 = vsel %vm459_vm2, %v8497_v13, %v4899_v42  ;;  %v8486_v57 = vld [vmem:[%s16995_s0 + $0x66d] sm:$0x2]  }
 0x1f7   :  { %v8487_v44 = vld [vmem:[%s16995_s0 + $0x6ac] sm:$0x4]   ;;  %8124 = vst.msk [vmem:[%s16996_s1 + $0xa8] sm:$0xff] %vm2718_vm9, %v3451_v46   ;;  %v4907_v37 = vsel %vm463_vm3, %v8498_v6, %v4903_v61  ;;  %v4860_v4 = vsel %vm451_vm0, %v8486_v57, %v8485_v10  ;;  %v7212_v24 = vld [vmem:[%s16995_s0 + $0x220] ss:$4 sm:$0xff]   ;;  %8115 = vst.msk [vmem:[%s16996_s1 + $0x88] sm:$0xff] %vm2718_vm9, %v3416_v22   ;;  %v3521_v38 = vpop.permute.xlu1 %3520  }
 0x1f8   :  { %v4911_v43 = vsel %vm467_vm4, %v8499_v62, %v4907_v37  ;;  %v4864_v26 = vsel %vm455_vm1, %v8487_v44, %v4860_v4  ;;  %v8492_v36 = vld [vmem:[%s16995_s0 + $0x7e7] sm:$0x80]   ;;  %7214 = vst.msk [vmem:[%s16996_s1 + $0xc0] ss:$8 sm:$0xf0] %vm3_vm7, %v7212_v24  }
 0x1f9   :  { %v4915_v25 = vsel %vm471_vm5, %v8500_v32, %v4911_v43  ;;  %v4868_v58 = vsel %vm459_vm2, %v8488_v15, %v4864_v26  ;;  %v7218_v29 = vld [vmem:[%s16995_s0 + $0x260] ss:$4 sm:$0xff]   ;;  %7213 = vst.msk [vmem:[%s16996_s1 + $0xc0] ss:$8 sm:$0xf] %vm3_vm7, %v7212_v24  }
 0x1fa   :  { %v7224_v9 = vld [vmem:[%s16995_s0 + $0x2a0] ss:$4 sm:$0xff]   ;;  %v4919_v45 = vsel %vm475_vm6, %v8501_v59, %v4915_v25  ;;  %v4872_v12 = vsel %vm463_vm3, %v8489_v48, %v4868_v58  ;;  %7220 = vst.msk [vmem:[%s16996_s1 + $0xc1] ss:$8 sm:$0xf0] %vm3_vm7, %v7218_v29  }
 0x1fb   :  { %v7230_v18 = vld [vmem:[%s16995_s0 + $0x2e0] ss:$4 sm:$0xff]   ;;  %7226 = vst.msk [vmem:[%s16996_s1 + $0xc2] ss:$8 sm:$0xf0] %vm3_vm7, %v7224_v9   ;;  %4920 = vrot.lane.b32.xlu1 %v4919_v45, %s9082_s14  ;;  %v4876_v2 = vsel %vm467_vm4, %v8490_v8, %v4872_v12  ;;  %v3591_v4 = vpop.permute.xlu1 %3590  }
 0x1fc   :  { %7232 = vst.msk [vmem:[%s16996_s1 + $0xc3] ss:$8 sm:$0xf0] %vm3_vm7, %v7230_v18   ;;  %v7236_v54 = vld [vmem:[%s16995_s0 + $0x320] ss:$4 sm:$0xff]   ;;  %v4880_v1 = vsel %vm471_vm5, %v8491_v53, %v4876_v2 }
 0x1fd   :  { %v7242_v7 = vld [vmem:[%s16995_s0 + $0x360] ss:$4 sm:$0xff]   ;;  %7219 = vst.msk [vmem:[%s16996_s1 + $0xc1] ss:$8 sm:$0xf] %vm3_vm7, %v7218_v29   ;;  %v4884_v42 = vsel %vm475_vm6, %v8492_v36, %v4880_v1 }
 0x1fe   :  { %v7248_v27 = vld [vmem:[%s16995_s0 + $0x3a0] ss:$4 sm:$0xff]   ;;  %7225 = vst.msk [vmem:[%s16996_s1 + $0xc2] ss:$8 sm:$0xf] %vm3_vm7, %v7224_v9   ;;  %4885 = vrot.lane.b32.xlu0 %v4884_v42, %s9082_s14 }
 0x1ff   :  { %7231 = vst.msk [vmem:[%s16996_s1 + $0xc3] ss:$8 sm:$0xf] %vm3_vm7, %v7230_v18   ;;  %7238 = vst.msk [vmem:[%s16996_s1 + $0xc4] ss:$8 sm:$0xf0] %vm3_vm7, %v7236_v54  }
 0x200   :  { %7244 = vst.msk [vmem:[%s16996_s1 + $0xc5] ss:$8 sm:$0xf0] %vm3_vm7, %v7242_v7   ;;  %7250 = vst.msk [vmem:[%s16996_s1 + $0xc6] ss:$8 sm:$0xf0] %vm3_vm7, %v7248_v27  }
 0x201   :  { %v7254_v0 = vld [vmem:[%s16995_s0 + $0x3e0] ss:$4 sm:$0xff]   ;;  %7237 = vst.msk [vmem:[%s16996_s1 + $0xc4] ss:$8 sm:$0xf] %vm3_vm7, %v7236_v54  }
 0x202   :  { %7243 = vst.msk [vmem:[%s16996_s1 + $0xc5] ss:$8 sm:$0xf] %vm3_vm7, %v7242_v7   ;;  %7249 = vst.msk [vmem:[%s16996_s1 + $0xc6] ss:$8 sm:$0xf] %vm3_vm7, %v7248_v27  }
 0x203   :  { %v8511_v21 = vld [vmem:[%s16995_s0 + $0x11] sm:$0x1]   ;;  %7256 = vst.msk [vmem:[%s16996_s1 + $0xc7] ss:$8 sm:$0xf0] %vm3_vm7, %v7254_v0  }
 0x204   :  { %7255 = vst.msk [vmem:[%s16996_s1 + $0xc7] ss:$8 sm:$0xf] %vm3_vm7, %v7254_v0   ;;  %v8512_v13 = vld [vmem:[%s16995_s0 + $0x50] sm:$0x2]  }
 0x205   :  { %v8513_v6 = vld [vmem:[%s16995_s0 + $0x8f] sm:$0x4]   ;;  %7423 = vst.msk [vmem:[%s16996_s1 + $0xe0] sm:$0xff] %vm479_vm8, %v10767_v16   ;;  %7567 = vst.msk [vmem:[%s16996_s1 + $0xe8] sm:$0xff] %vm479_vm8, %v11299_v14   ;;  %v4964_v16 = vsel %vm451_vm0, %v8512_v13, %v8511_v21  ;;  %v8505_v32 = vld [vmem:[%s16995_s0 + $0x7f] sm:$0x4]  }
 0x206   :  { %v8514_v33 = vld [vmem:[%s16995_s0 + $0xce] sm:$0x8]   ;;  %7711 = vst.msk [vmem:[%s16996_s1 + $0xf0] sm:$0xff] %vm479_vm8, %v11847_v49   ;;  %7855 = vst.msk [vmem:[%s16996_s1 + $0xf8] sm:$0xff] %vm479_vm8, %v12395_v63   ;;  %v8503_v49 = vld [vmem:[%s16995_s0 + $0x1] sm:$0x1]  }
 0x207   :  { %7414 = vst.msk [vmem:[%s16996_s1 + $0xc0] sm:$0xff] %vm479_vm8, %v10793_v30   ;;  %7558 = vst.msk [vmem:[%s16996_s1 + $0xc8] sm:$0xff] %vm479_vm8, %v11337_v39   ;;  %v8515_v30 = vld [vmem:[%s16995_s0 + $0x10d] sm:$0x10]   ;;  %v3486_v39 = vpop.permute.xlu0 %3485   ;;  %v8506_v59 = vld [vmem:[%s16995_s0 + $0xbe] sm:$0x8]  }
 0x208   :  { %7702 = vst.msk [vmem:[%s16996_s1 + $0xd0] sm:$0xff] %vm479_vm8, %v11885_v28   ;;  %7846 = vst.msk [vmem:[%s16996_s1 + $0xd8] sm:$0xff] %vm479_vm8, %v12421_v56   ;;  %v8516_v56 = vld [vmem:[%s16995_s0 + $0x14c] sm:$0x20]   ;;  %v8504_v28 = vld [vmem:[%s16995_s0 + $0x40] sm:$0x2]  }
 0x209   :  { %v8517_v14 = vld [vmem:[%s16995_s0 + $0x18b] sm:$0x40]   ;;  %7998 = vst.msk [vmem:[%s16996_s1 + $0xe0] sm:$0xff] %vm2718_vm9, %v12943_v11   ;;  %7989 = vst.msk [vmem:[%s16996_s1 + $0xc0] sm:$0xff] %vm2718_vm9, %v12969_v19   ;;  %v4968_v19 = vsel %vm455_vm1, %v8513_v6, %v4964_v16  ;;  %v4930_v62 = vsel %vm451_vm0, %v8504_v28, %v8503_v49  ;;  %v8507_v46 = vld [vmem:[%s16995_s0 + $0xfd] sm:$0x10]  }
 0x20a   :  { %v8518_v63 = vld [vmem:[%s16995_s0 + $0x1ca] sm:$0x80]   ;;  %8142 = vst.msk [vmem:[%s16996_s1 + $0xe8] sm:$0xff] %vm2718_vm9, %v3521_v38   ;;  %8133 = vst.msk [vmem:[%s16996_s1 + $0xc8] sm:$0xff] %vm2718_vm9, %v3486_v39   ;;  %v4972_v11 = vsel %vm459_vm2, %v8514_v33, %v4968_v19  ;;  %v4934_v10 = vsel %vm455_vm1, %v8505_v32, %v4930_v62  ;;  %v8508_v57 = vld [vmem:[%s16995_s0 + $0x13c] sm:$0x20]  }
 0x20b   :  { %v4976_v61 = vsel %vm463_vm3, %v8515_v30, %v4972_v11  ;;  %v8509_v44 = vld [vmem:[%s16995_s0 + $0x17b] sm:$0x40]   ;;  %v4938_v48 = vsel %vm459_vm2, %v8506_v59, %v4934_v10  ;;  %v7257_v8 = vld [vmem:[%s16995_s0 + $0x400] ss:$4 sm:$0xff]   ;;  %v3556_v58 = vpop.permute.xlu0 %3555   ;;  %v8529_v12 = vld [vmem:[%s16995_s0 + $0x31] sm:$0x1]  }
 0x20c   :  { %v8510_v37 = vld [vmem:[%s16995_s0 + $0x1ba] sm:$0x80]   ;;  %v4980_v15 = vsel %vm467_vm4, %v8516_v56, %v4976_v61  ;;  %v7263_v43 = vld [vmem:[%s16995_s0 + $0x440] ss:$4 sm:$0xff]   ;;  %v4942_v36 = vsel %vm463_vm3, %v8507_v46, %v4938_v48  ;;  %v8530_v7 = vld [vmem:[%s16995_s0 + $0x70] sm:$0x2]  }
 0x20d   :  { %v7269_v26 = vld [vmem:[%s16995_s0 + $0x480] ss:$4 sm:$0xff]   ;;  %v4984_v53 = vsel %vm471_vm5, %v8517_v14, %v4980_v15  ;;  %7259 = vst.msk [vmem:[%s16996_s1 + $0x100] ss:$8 sm:$0xf0] %vm3_vm7, %v7257_v8   ;;  %v4946_v9 = vsel %vm467_vm4, %v8508_v57, %v4942_v36 }
 0x20e   :  { %7265 = vst.msk [vmem:[%s16996_s1 + $0x101] ss:$8 sm:$0xf0] %vm3_vm7, %v7263_v43   ;;  %7271 = vst.msk [vmem:[%s16996_s1 + $0x102] ss:$8 sm:$0xf0] %vm3_vm7, %v7269_v26   ;;  %v4988_v29 = vsel %vm475_vm6, %v8518_v63, %v4984_v53  ;;  %v4950_v54 = vsel %vm471_vm5, %v8509_v44, %v4946_v9 }
 0x20f   :  { %v7275_v24 = vld [vmem:[%s16995_s0 + $0x4c0] ss:$4 sm:$0xff]   ;;  %7258 = vst.msk [vmem:[%s16996_s1 + $0x100] ss:$8 sm:$0xf] %vm3_vm7, %v7257_v8   ;;  %4989 = vrot.lane.b32.xlu1 %v4988_v29, %s9083_s3  ;;  %v4954_v2 = vsel %vm475_vm6, %v8510_v37, %v4950_v54  ;;  %v3626_v56 = vpop.permute.xlu0 %3625  }
 0x210   :  { %v7281_v22 = vld [vmem:[%s16995_s0 + $0x500] ss:$4 sm:$0xff]   ;;  %7264 = vst.msk [vmem:[%s16996_s1 + $0x101] ss:$8 sm:$0xf] %vm3_vm7, %v7263_v43   ;;  %4955 = vrot.lane.b32.xlu0 %v4954_v2, %s9083_s3 }
 0x211   :  { %v7287_v25 = vld [vmem:[%s16995_s0 + $0x540] ss:$4 sm:$0xff]   ;;  %7270 = vst.msk [vmem:[%s16996_s1 + $0x102] ss:$8 sm:$0xf] %vm3_vm7, %v7269_v26  }
 0x212   :  { %7277 = vst.msk [vmem:[%s16996_s1 + $0x103] ss:$8 sm:$0xf0] %vm3_vm7, %v7275_v24   ;;  %7283 = vst.msk [vmem:[%s16996_s1 + $0x104] ss:$8 sm:$0xf0] %vm3_vm7, %v7281_v22  }
 0x213   :  { %7289 = vst.msk [vmem:[%s16996_s1 + $0x105] ss:$8 sm:$0xf0] %vm3_vm7, %v7287_v25   ;;  %v7293_v18 = vld [vmem:[%s16995_s0 + $0x580] ss:$4 sm:$0xff]   ;;  %v14361_v9 = vpop.permute.xlu0 %3695  }
 0x214   :  { %v7299_v45 = vld [vmem:[%s16995_s0 + $0x5c0] ss:$4 sm:$0xff]   ;;  %7276 = vst.msk [vmem:[%s16996_s1 + $0x103] ss:$8 sm:$0xf] %vm3_vm7, %v7275_v24  }
 0x215   :  { %7282 = vst.msk [vmem:[%s16996_s1 + $0x104] ss:$8 sm:$0xf] %vm3_vm7, %v7281_v22   ;;  %7288 = vst.msk [vmem:[%s16996_s1 + $0x105] ss:$8 sm:$0xf] %vm3_vm7, %v7287_v25  }
 0x216   :  { %7295 = vst.msk [vmem:[%s16996_s1 + $0x106] ss:$8 sm:$0xf0] %vm3_vm7, %v7293_v18   ;;  %7301 = vst.msk [vmem:[%s16996_s1 + $0x107] ss:$8 sm:$0xf0] %vm3_vm7, %v7299_v45  }
 0x217   :  { %7294 = vst.msk [vmem:[%s16996_s1 + $0x106] ss:$8 sm:$0xf] %vm3_vm7, %v7293_v18   ;;  %7300 = vst.msk [vmem:[%s16996_s1 + $0x107] ss:$8 sm:$0xf] %vm3_vm7, %v7299_v45  }
 0x218   :  { %v8531_v27 = vld [vmem:[%s16995_s0 + $0xaf] sm:$0x4]   ;;  %7441 = vst.msk [vmem:[%s16996_s1 + $0x120] sm:$0xff] %vm479_vm8, %v10831_v50   ;;  %7585 = vst.msk [vmem:[%s16996_s1 + $0x128] sm:$0xff] %vm479_vm8, %v11375_v3   ;;  %v5034_v50 = vsel %vm451_vm0, %v8530_v7, %v8529_v12  ;;  %v8522_v21 = vld [vmem:[%s16995_s0 + $0x9f] sm:$0x4]  }
 0x219   :  { %v8532_v38 = vld [vmem:[%s16995_s0 + $0xee] sm:$0x8]   ;;  %7729 = vst.msk [vmem:[%s16996_s1 + $0x130] sm:$0xff] %vm479_vm8, %v11911_v60   ;;  %7873 = vst.msk [vmem:[%s16996_s1 + $0x138] sm:$0xff] %vm479_vm8, %v12459_v17   ;;  %v8520_v60 = vld [vmem:[%s16995_s0 + $0x21] sm:$0x1]  }
 0x21a   :  { %7432 = vst.msk [vmem:[%s16996_s1 + $0x100] sm:$0xff] %vm479_vm8, %v10869_v5   ;;  %7576 = vst.msk [vmem:[%s16996_s1 + $0x108] sm:$0xff] %vm479_vm8, %v11401_v23   ;;  %v8533_v5 = vld [vmem:[%s16995_s0 + $0x12d] sm:$0x10]   ;;  %v8523_v1 = vld [vmem:[%s16995_s0 + $0xde] sm:$0x8]  }
 0x21b   :  { %7720 = vst.msk [vmem:[%s16996_s1 + $0x110] sm:$0xff] %vm479_vm8, %v11949_v47   ;;  %7864 = vst.msk [vmem:[%s16996_s1 + $0x118] sm:$0xff] %vm479_vm8, %v12497_v41   ;;  %v8534_v3 = vld [vmem:[%s16995_s0 + $0x16c] sm:$0x20]   ;;  %v14147_v41 = vpop.permute.xlu1 %3660   ;;  %v8521_v47 = vld [vmem:[%s16995_s0 + $0x60] sm:$0x2]  }
 0x21c   :  { %v8535_v23 = vld [vmem:[%s16995_s0 + $0x1ab] sm:$0x40]   ;;  %8016 = vst.msk [vmem:[%s16996_s1 + $0x120] sm:$0xff] %vm2718_vm9, %v13007_v40   ;;  %8007 = vst.msk [vmem:[%s16996_s1 + $0x100] sm:$0xff] %vm2718_vm9, %v13045_v35   ;;  %v5038_v40 = vsel %vm455_vm1, %v8531_v27, %v5034_v50  ;;  %v4999_v0 = vsel %vm451_vm0, %v8521_v47, %v8520_v60  ;;  %v8524_v13 = vld [vmem:[%s16995_s0 + $0x11d] sm:$0x10]  }
 0x21d   :  { %v8536_v35 = vld [vmem:[%s16995_s0 + $0x1ea] sm:$0x80]   ;;  %8160 = vst.msk [vmem:[%s16996_s1 + $0x128] sm:$0xff] %vm2718_vm9, %v3591_v4   ;;  %8151 = vst.msk [vmem:[%s16996_s1 + $0x108] sm:$0xff] %vm2718_vm9, %v3556_v58   ;;  %v5042_v17 = vsel %vm459_vm2, %v8532_v38, %v5038_v40  ;;  %v5003_v33 = vsel %vm455_vm1, %v8522_v21, %v4999_v0  ;;  %v8525_v42 = vld [vmem:[%s16995_s0 + $0x15c] sm:$0x20]  }
 0x21e   :  { %v5046_v6 = vsel %vm463_vm3, %v8533_v5, %v5042_v17  ;;  %v8526_v16 = vld [vmem:[%s16995_s0 + $0x19b] sm:$0x40]   ;;  %v5007_v39 = vsel %vm459_vm2, %v8523_v1, %v5003_v33  ;;  %v7260_v19 = vld [vmem:[%s16995_s0 + $0x420] ss:$4 sm:$0xff]   ;;  %v8547_v37 = vld [vmem:[%s16995_s0 + $0x211] sm:$0x1]  }
 0x21f   :  { %v8527_v30 = vld [vmem:[%s16995_s0 + $0x1da] sm:$0x80]   ;;  %v5050_v14 = vsel %vm467_vm4, %v8534_v3, %v5046_v6  ;;  %v7266_v63 = vld [vmem:[%s16995_s0 + $0x460] ss:$4 sm:$0xff]   ;;  %v5011_v11 = vsel %vm463_vm3, %v8524_v13, %v5007_v39  ;;  %v14246_v46 = vpop.permute.xlu1 %3730   ;;  %v8548_v15 = vld [vmem:[%s16995_s0 + $0x250] sm:$0x2]  }
 0x220   :  { %v7272_v49 = vld [vmem:[%s16995_s0 + $0x4a0] ss:$4 sm:$0xff]   ;;  %v5054_v28 = vsel %vm471_vm5, %v8535_v23, %v5050_v14  ;;  %7262 = vst.msk [vmem:[%s16996_s1 + $0x140] ss:$8 sm:$0xf0] %vm3_vm7, %v7260_v19   ;;  %v5015_v10 = vsel %vm467_vm4, %v8525_v42, %v5011_v11  ;;  %v5104_v22 = vsel %vm451_vm0, %v8548_v15, %v8547_v37 }
 0x221   :  { %7268 = vst.msk [vmem:[%s16996_s1 + $0x141] ss:$8 sm:$0xf0] %vm3_vm7, %v7266_v63   ;;  %7274 = vst.msk [vmem:[%s16996_s1 + $0x142] ss:$8 sm:$0xf0] %vm3_vm7, %v7272_v49   ;;  %v5058_v61 = vsel %vm475_vm6, %v8536_v35, %v5054_v28  ;;  %v5019_v4 = vsel %vm471_vm5, %v8526_v16, %v5015_v10  ;;  %v14463_v16 = vpop.permute.xlu0 %3765  }
 0x222   :  { %v7278_v62 = vld [vmem:[%s16995_s0 + $0x4e0] ss:$4 sm:$0xff]   ;;  %7261 = vst.msk [vmem:[%s16996_s1 + $0x140] ss:$8 sm:$0xf] %vm3_vm7, %v7260_v19   ;;  %5059 = vrot.lane.b32.xlu1 %v5058_v61, %s9083_s3  ;;  %v5023_v43 = vsel %vm475_vm6, %v8527_v30, %v5019_v4 }
 0x223   :  { %v7284_v32 = vld [vmem:[%s16995_s0 + $0x520] ss:$4 sm:$0xff]   ;;  %7267 = vst.msk [vmem:[%s16996_s1 + $0x141] ss:$8 sm:$0xf] %vm3_vm7, %v7266_v63   ;;  %5024 = vrot.lane.b32.xlu0 %v5023_v43, %s9083_s3  ;;  %v14415_v35 = vpop.permute.xlu1 %3800  }
 0x224   :  { %v7290_v59 = vld [vmem:[%s16995_s0 + $0x560] ss:$4 sm:$0xff]   ;;  %7273 = vst.msk [vmem:[%s16996_s1 + $0x142] ss:$8 sm:$0xf] %vm3_vm7, %v7272_v49  }
 0x225   :  { %7280 = vst.msk [vmem:[%s16996_s1 + $0x143] ss:$8 sm:$0xf0] %vm3_vm7, %v7278_v62   ;;  %7286 = vst.msk [vmem:[%s16996_s1 + $0x144] ss:$8 sm:$0xf0] %vm3_vm7, %v7284_v32  }
 0x226   :  { %7292 = vst.msk [vmem:[%s16996_s1 + $0x145] ss:$8 sm:$0xf0] %vm3_vm7, %v7290_v59   ;;  %v7296_v57 = vld [vmem:[%s16995_s0 + $0x5a0] ss:$4 sm:$0xff]  }
 0x227   :  { %v7302_v44 = vld [vmem:[%s16995_s0 + $0x5e0] ss:$4 sm:$0xff]   ;;  %7279 = vst.msk [vmem:[%s16996_s1 + $0x143] ss:$8 sm:$0xf] %vm3_vm7, %v7278_v62  }
 0x228   :  { %7285 = vst.msk [vmem:[%s16996_s1 + $0x144] ss:$8 sm:$0xf] %vm3_vm7, %v7284_v32   ;;  %7291 = vst.msk [vmem:[%s16996_s1 + $0x145] ss:$8 sm:$0xf] %vm3_vm7, %v7290_v59  }
 0x229   :  { %7298 = vst.msk [vmem:[%s16996_s1 + $0x146] ss:$8 sm:$0xf0] %vm3_vm7, %v7296_v57   ;;  %7304 = vst.msk [vmem:[%s16996_s1 + $0x147] ss:$8 sm:$0xf0] %vm3_vm7, %v7302_v44  }
 0x22a   :  { %7297 = vst.msk [vmem:[%s16996_s1 + $0x146] ss:$8 sm:$0xf] %vm3_vm7, %v7296_v57   ;;  %7303 = vst.msk [vmem:[%s16996_s1 + $0x147] ss:$8 sm:$0xf] %vm3_vm7, %v7302_v44  }
 0x22b   :  { %v8549_v48 = vld [vmem:[%s16995_s0 + $0x28f] sm:$0x4]   ;;  %7459 = vst.msk [vmem:[%s16996_s1 + $0x160] sm:$0xff] %vm479_vm8, %v10895_v20   ;;  %7603 = vst.msk [vmem:[%s16996_s1 + $0x168] sm:$0xff] %vm479_vm8, %v11439_v51   ;;  %v17022_v51 = vld [vmem:[#allocation16_spill] sm:$0xff] }
 0x22c   :  { %v8550_v8 = vld [vmem:[%s16995_s0 + $0x2ce] sm:$0x8]   ;;  %7891 = vst.msk [vmem:[%s16996_s1 + $0x178] sm:$0xff] %vm479_vm8, %v17022_v51   ;;  %v17023_v26 = vld [vmem:[#allocation0_spill] sm:$0xff]  ;;  %v17024_v53 = vld [vmem:[#allocation5_spill] sm:$0xff] }
 0x22d   :  { %v17021_v20 = vld [vmem:[#allocation10_spill] sm:$0xff]  ;;  %7450 = vst.msk [vmem:[%s16996_s1 + $0x140] sm:$0xff] %vm479_vm8, %v17023_v26   ;;  %7594 = vst.msk [vmem:[%s16996_s1 + $0x148] sm:$0xff] %vm479_vm8, %v17024_v53   ;;  %v17025_v36 = vld [vmem:[#allocation11_spill] sm:$0xff] }
 0x22e   :  { %7747 = vst.msk [vmem:[%s16996_s1 + $0x170] sm:$0xff] %vm479_vm8, %v17021_v20   ;;  %7738 = vst.msk [vmem:[%s16996_s1 + $0x150] sm:$0xff] %vm479_vm8, %v17025_v36   ;;  %v17026_v24 = vld [vmem:[#allocation17_spill] sm:$0xff]  ;;  %v8551_v25 = vld [vmem:[%s16995_s0 + $0x30d] sm:$0x10]   ;;  %v3871_v20 = vpop.permute.xlu1 %3870  }
 0x22f   :  { %7882 = vst.msk [vmem:[%s16996_s1 + $0x158] sm:$0xff] %vm479_vm8, %v17026_v24   ;;  %v8552_v58 = vld [vmem:[%s16995_s0 + $0x34c] sm:$0x20]   ;;  %v8538_v12 = vld [vmem:[%s16995_s0 + $0x201] sm:$0x1]   ;;  %v17028_v32 = vld [vmem:[#allocation1_spill] sm:$0xff] }
 0x230   :  { %v8553_v29 = vld [vmem:[%s16995_s0 + $0x38b] sm:$0x40]   ;;  %8025 = vst.msk [vmem:[%s16996_s1 + $0x140] sm:$0xff] %vm2718_vm9, %v13109_v34   ;;  %v5108_v34 = vsel %vm455_vm1, %v8549_v48, %v5104_v22  ;;  %v8539_v54 = vld [vmem:[%s16995_s0 + $0x240] sm:$0x2]   ;;  %8178 = vst.msk [vmem:[%s16996_s1 + $0x168] sm:$0xff] %vm2718_vm9, %v14147_v41  }
 0x231   :  { %v17027_v18 = vld [vmem:[#allocation22_spill] sm:$0xff]  ;;  %8169 = vst.msk [vmem:[%s16996_s1 + $0x148] sm:$0xff] %vm2718_vm9, %v3626_v56   ;;  %v5112_v7 = vsel %vm459_vm2, %v8550_v8, %v5108_v34  ;;  %v5069_v27 = vsel %vm451_vm0, %v8539_v54, %v8538_v12  ;;  %v8540_v38 = vld [vmem:[%s16995_s0 + $0x27f] sm:$0x4]   ;;  %v17033_v44 = vld [vmem:[#allocation7_spill] sm:$0xff]  ;;  %v3836_v12 = vpop.permute.xlu0 %3835  }
 0x232   :  { %8034 = vst.msk [vmem:[%s16996_s1 + $0x160] sm:$0xff] %vm2718_vm9, %v17027_v18   ;;  %v8554_v45 = vld [vmem:[%s16995_s0 + $0x3ca] sm:$0x80]   ;;  %v8541_v2 = vld [vmem:[%s16995_s0 + $0x2be] sm:$0x8]   ;;  %v5116_v5 = vsel %vm463_vm3, %v8551_v25, %v5112_v7  ;;  %v5073_v3 = vsel %vm455_vm1, %v8540_v38, %v5069_v27  ;;  %v17034_v37 = vld [vmem:[#allocation13_spill] sm:$0xff] }
 0x233   :  { %v8542_v50 = vld [vmem:[%s16995_s0 + $0x2fd] sm:$0x10]   ;;  %v5120_v60 = vsel %vm467_vm4, %v8552_v58, %v5116_v5  ;;  %v5077_v47 = vsel %vm459_vm2, %v8541_v2, %v5073_v3  ;;  %v7305_v17 = vld [vmem:[%s16995_s0 + $0x600] ss:$4 sm:$0xff]   ;;  %v8565_v19 = vld [vmem:[%s16995_s0 + $0x231] sm:$0x1]  }
 0x234   :  { %v8543_v23 = vld [vmem:[%s16995_s0 + $0x33c] sm:$0x20]   ;;  %v7311_v0 = vld [vmem:[%s16995_s0 + $0x640] ss:$4 sm:$0xff]   ;;  %v5124_v1 = vsel %vm471_vm5, %v8553_v29, %v5120_v60  ;;  %v5081_v13 = vsel %vm463_vm3, %v8542_v50, %v5077_v47  ;;  %v8566_v49 = vld [vmem:[%s16995_s0 + $0x270] sm:$0x2]  }
 0x235   :  { %v8544_v41 = vld [vmem:[%s16995_s0 + $0x37b] sm:$0x40]   ;;  %v7317_v21 = vld [vmem:[%s16995_s0 + $0x680] ss:$4 sm:$0xff]   ;;  %v5128_v30 = vsel %vm475_vm6, %v8554_v45, %v5124_v1  ;;  %v5085_v56 = vsel %vm467_vm4, %v8543_v23, %v5081_v13  ;;  %v8567_v28 = vld [vmem:[%s16995_s0 + $0x2af] sm:$0x4]   ;;  %v5174_v15 = vsel %vm451_vm0, %v8566_v49, %v8565_v19 }
 0x236   :  { %v8545_v40 = vld [vmem:[%s16995_s0 + $0x3ba] sm:$0x80]   ;;  %7307 = vst.msk [vmem:[%s16996_s1 + $0x180] ss:$8 sm:$0xf0] %vm3_vm7, %v7305_v17   ;;  %5129 = vrot.lane.b32.xlu1 %v5128_v30, %s9083_s3  ;;  %v5089_v63 = vsel %vm471_vm5, %v8544_v41, %v5085_v56  ;;  %v17029_v59 = vld [vmem:[#allocation6_spill] sm:$0xff] }
 0x237   :  { %7313 = vst.msk [vmem:[%s16996_s1 + $0x181] ss:$8 sm:$0xf0] %vm3_vm7, %v7311_v0   ;;  %7319 = vst.msk [vmem:[%s16996_s1 + $0x182] ss:$8 sm:$0xf0] %vm3_vm7, %v7317_v21   ;;  %v5093_v62 = vsel %vm475_vm6, %v8545_v40, %v5089_v63  ;;  %v3941_v40 = vpop.permute.xlu1 %3940  }
 0x238   :  { %v7323_v6 = vld [vmem:[%s16995_s0 + $0x6c0] ss:$4 sm:$0xff]   ;;  %7306 = vst.msk [vmem:[%s16996_s1 + $0x180] ss:$8 sm:$0xf] %vm3_vm7, %v7305_v17   ;;  %5094 = vrot.lane.b32.xlu0 %v5093_v62, %s9083_s3 }
 0x239   :  { %v7329_v33 = vld [vmem:[%s16995_s0 + $0x700] ss:$4 sm:$0xff]   ;;  %7312 = vst.msk [vmem:[%s16996_s1 + $0x181] ss:$8 sm:$0xf] %vm3_vm7, %v7311_v0  }
 0x23a   :  { %v7335_v42 = vld [vmem:[%s16995_s0 + $0x740] ss:$4 sm:$0xff]   ;;  %7318 = vst.msk [vmem:[%s16996_s1 + $0x182] ss:$8 sm:$0xf] %vm3_vm7, %v7317_v21  }
 0x23b   :  { %7325 = vst.msk [vmem:[%s16996_s1 + $0x183] ss:$8 sm:$0xf0] %vm3_vm7, %v7323_v6   ;;  %7331 = vst.msk [vmem:[%s16996_s1 + $0x184] ss:$8 sm:$0xf0] %vm3_vm7, %v7329_v33  }
 0x23c   :  { %7337 = vst.msk [vmem:[%s16996_s1 + $0x185] ss:$8 sm:$0xf0] %vm3_vm7, %v7335_v42   ;;  %v7341_v14 = vld [vmem:[%s16995_s0 + $0x780] ss:$4 sm:$0xff]  }
 0x23d   :  { %v7347_v39 = vld [vmem:[%s16995_s0 + $0x7c0] ss:$4 sm:$0xff]   ;;  %7324 = vst.msk [vmem:[%s16996_s1 + $0x183] ss:$8 sm:$0xf] %vm3_vm7, %v7323_v6  }
 0x23e   :  { %7330 = vst.msk [vmem:[%s16996_s1 + $0x184] ss:$8 sm:$0xf] %vm3_vm7, %v7329_v33   ;;  %7336 = vst.msk [vmem:[%s16996_s1 + $0x185] ss:$8 sm:$0xf] %vm3_vm7, %v7335_v42  }
 0x23f   :  { %7343 = vst.msk [vmem:[%s16996_s1 + $0x186] ss:$8 sm:$0xf0] %vm3_vm7, %v7341_v14   ;;  %7349 = vst.msk [vmem:[%s16996_s1 + $0x187] ss:$8 sm:$0xf0] %vm3_vm7, %v7347_v39  }
 0x240   :  { %7342 = vst.msk [vmem:[%s16996_s1 + $0x186] ss:$8 sm:$0xf] %vm3_vm7, %v7341_v14   ;;  %7348 = vst.msk [vmem:[%s16996_s1 + $0x187] ss:$8 sm:$0xf] %vm3_vm7, %v7347_v39  }
 0x241   :  { %v8568_v11 = vld [vmem:[%s16995_s0 + $0x2ee] sm:$0x8]   ;;  %7477 = vst.msk [vmem:[%s16996_s1 + $0x1a0] sm:$0xff] %vm479_vm8, %v17028_v32   ;;  %7621 = vst.msk [vmem:[%s16996_s1 + $0x1a8] sm:$0xff] %vm479_vm8, %v17029_v59   ;;  %v17030_v61 = vld [vmem:[#allocation12_spill] sm:$0xff] }
 0x242   :  { %7765 = vst.msk [vmem:[%s16996_s1 + $0x1b0] sm:$0xff] %vm479_vm8, %v17030_v61   ;;  %v17031_v10 = vld [vmem:[#allocation18_spill] sm:$0xff]  ;;  %7612 = vst.msk [vmem:[%s16996_s1 + $0x188] sm:$0xff] %vm479_vm8, %v17033_v44   ;;  %v17035_v4 = vld [vmem:[#allocation19_spill] sm:$0xff]  ;;  %v3906_v61 = vpop.permute.xlu0 %3905  }
 0x243   :  { %7909 = vst.msk [vmem:[%s16996_s1 + $0x1b8] sm:$0xff] %vm479_vm8, %v17031_v10   ;;  %v17032_v57 = vld [vmem:[#allocation2_spill] sm:$0xff]  ;;  %7756 = vst.msk [vmem:[%s16996_s1 + $0x190] sm:$0xff] %vm479_vm8, %v17034_v37   ;;  %v17036_v51 = vld [vmem:[#allocation23_spill] sm:$0xff] }
 0x244   :  { %7468 = vst.msk [vmem:[%s16996_s1 + $0x180] sm:$0xff] %vm479_vm8, %v17032_v57   ;;  %7900 = vst.msk [vmem:[%s16996_s1 + $0x198] sm:$0xff] %vm479_vm8, %v17035_v4   ;;  %v8569_v48 = vld [vmem:[%s16995_s0 + $0x32d] sm:$0x10]   ;;  %v8556_v53 = vld [vmem:[%s16995_s0 + $0x221] sm:$0x1]  }
 0x245   :  { %v8570_v8 = vld [vmem:[%s16995_s0 + $0x36c] sm:$0x20]   ;;  %8052 = vst.msk [vmem:[%s16996_s1 + $0x1a0] sm:$0xff] %vm2718_vm9, %v17036_v51   ;;  %8043 = vst.msk [vmem:[%s16996_s1 + $0x180] sm:$0xff] %vm2718_vm9, %v13200_v55   ;;  %v5178_v55 = vsel %vm455_vm1, %v8567_v28, %v5174_v15  ;;  %v8557_v36 = vld [vmem:[%s16995_s0 + $0x260] sm:$0x2]   ;;  %v4011_v51 = vpop.permute.xlu1 %4010  }
 0x246   :  { %v8571_v43 = vld [vmem:[%s16995_s0 + $0x3ab] sm:$0x40]   ;;  %8196 = vst.msk [vmem:[%s16996_s1 + $0x1a8] sm:$0xff] %vm2718_vm9, %v14246_v46   ;;  %8187 = vst.msk [vmem:[%s16996_s1 + $0x188] sm:$0xff] %vm2718_vm9, %v14361_v9   ;;  %v5182_v46 = vsel %vm459_vm2, %v8568_v11, %v5178_v55  ;;  %v5139_v24 = vsel %vm451_vm0, %v8557_v36, %v8556_v53  ;;  %v8558_v22 = vld [vmem:[%s16995_s0 + $0x29f] sm:$0x4]  }
 0x247   :  { %v8572_v26 = vld [vmem:[%s16995_s0 + $0x3ea] sm:$0x80]   ;;  %8232 = vst.msk [vmem:[%s16996_s1 + $0x30] sm:$0xff] %vm2718_vm9, %v3871_v20   ;;  %v8559_v25 = vld [vmem:[%s16995_s0 + $0x2de] sm:$0x8]   ;;  %v5186_v29 = vsel %vm463_vm3, %v8569_v48, %v5182_v46  ;;  %v5143_v9 = vsel %vm455_vm1, %v8558_v22, %v5139_v24  ;;  %8223 = vst.msk [vmem:[%s16996_s1 + $0x10] sm:$0xff] %vm2718_vm9, %v3836_v12  }
 0x248   :  { %v8560_v58 = vld [vmem:[%s16995_s0 + $0x31d] sm:$0x10]   ;;  %v5190_v54 = vsel %vm467_vm4, %v8570_v8, %v5186_v29  ;;  %v5147_v7 = vsel %vm459_vm2, %v8559_v25, %v5143_v9  ;;  %v7308_v27 = vld [vmem:[%s16995_s0 + $0x620] ss:$4 sm:$0xff]   ;;  %v8583_v21 = vld [vmem:[%s16995_s0 + $0x411] sm:$0x1]  }
 0x249   :  { %v8561_v18 = vld [vmem:[%s16995_s0 + $0x35c] sm:$0x20]   ;;  %v7314_v38 = vld [vmem:[%s16995_s0 + $0x660] ss:$4 sm:$0xff]   ;;  %v5194_v50 = vsel %vm471_vm5, %v8571_v43, %v5190_v54  ;;  %v5151_v5 = vsel %vm463_vm3, %v8560_v58, %v5147_v7  ;;  %8250 = vst.msk [vmem:[%s16996_s1 + $0x70] sm:$0xff] %vm2718_vm9, %v3941_v40   ;;  %8241 = vst.msk [vmem:[%s16996_s1 + $0x50] sm:$0xff] %vm2718_vm9, %v3906_v61  }
 0x24a   :  { %v8562_v34 = vld [vmem:[%s16995_s0 + $0x39b] sm:$0x40]   ;;  %v7320_v2 = vld [vmem:[%s16995_s0 + $0x6a0] ss:$4 sm:$0xff]   ;;  %v5198_v60 = vsel %vm475_vm6, %v8572_v26, %v5194_v50  ;;  %v5155_v47 = vsel %vm467_vm4, %v8561_v18, %v5151_v5  ;;  %v8584_v13 = vld [vmem:[%s16995_s0 + $0x450] sm:$0x2]   ;;  %v3976_v18 = vpop.permute.xlu0 %3975  }
 0x24b   :  { %v8563_v45 = vld [vmem:[%s16995_s0 + $0x3da] sm:$0x80]   ;;  %7310 = vst.msk [vmem:[%s16996_s1 + $0x1c0] ss:$8 sm:$0xf0] %vm3_vm7, %v7308_v27   ;;  %5199 = vrot.lane.b32.xlu1 %v5198_v60, %s9083_s3  ;;  %v5159_v1 = vsel %vm471_vm5, %v8562_v34, %v5155_v47  ;;  %v17037_v30 = vld [vmem:[#allocation3_spill] sm:$0xff]  ;;  %v5244_v11 = vsel %vm451_vm0, %v8584_v13, %v8583_v21 }
 0x24c   :  { %7316 = vst.msk [vmem:[%s16996_s1 + $0x1c1] ss:$8 sm:$0xf0] %vm3_vm7, %v7314_v38   ;;  %7322 = vst.msk [vmem:[%s16996_s1 + $0x1c2] ss:$8 sm:$0xf0] %vm3_vm7, %v7320_v2   ;;  %v5163_v42 = vsel %vm475_vm6, %v8563_v45, %v5159_v1 }
 0x24d   :  { %v7326_v3 = vld [vmem:[%s16995_s0 + $0x6e0] ss:$4 sm:$0xff]   ;;  %7309 = vst.msk [vmem:[%s16996_s1 + $0x1c0] ss:$8 sm:$0xf] %vm3_vm7, %v7308_v27   ;;  %5164 = vrot.lane.b32.xlu0 %v5163_v42, %s9083_s3 }
 0x24e   :  { %v7332_v23 = vld [vmem:[%s16995_s0 + $0x720] ss:$4 sm:$0xff]   ;;  %7315 = vst.msk [vmem:[%s16996_s1 + $0x1c1] ss:$8 sm:$0xf] %vm3_vm7, %v7314_v38  }
 0x24f   :  { %v7338_v41 = vld [vmem:[%s16995_s0 + $0x760] ss:$4 sm:$0xff]   ;;  %7321 = vst.msk [vmem:[%s16996_s1 + $0x1c2] ss:$8 sm:$0xf] %vm3_vm7, %v7320_v2  }
 0x250   :  { %7328 = vst.msk [vmem:[%s16996_s1 + $0x1c3] ss:$8 sm:$0xf0] %vm3_vm7, %v7326_v3   ;;  %7334 = vst.msk [vmem:[%s16996_s1 + $0x1c4] ss:$8 sm:$0xf0] %vm3_vm7, %v7332_v23  }
 0x251   :  { %7340 = vst.msk [vmem:[%s16996_s1 + $0x1c5] ss:$8 sm:$0xf0] %vm3_vm7, %v7338_v41   ;;  %v7344_v17 = vld [vmem:[%s16995_s0 + $0x7a0] ss:$4 sm:$0xff]  }
 0x252   :  { %v7350_v0 = vld [vmem:[%s16995_s0 + $0x7e0] ss:$4 sm:$0xff]   ;;  %7327 = vst.msk [vmem:[%s16996_s1 + $0x1c3] ss:$8 sm:$0xf] %vm3_vm7, %v7326_v3  }
 0x253   :  { %7333 = vst.msk [vmem:[%s16996_s1 + $0x1c4] ss:$8 sm:$0xf] %vm3_vm7, %v7332_v23   ;;  %7339 = vst.msk [vmem:[%s16996_s1 + $0x1c5] ss:$8 sm:$0xf] %vm3_vm7, %v7338_v41  }
 0x254   :  { %7346 = vst.msk [vmem:[%s16996_s1 + $0x1c6] ss:$8 sm:$0xf0] %vm3_vm7, %v7344_v17   ;;  %7352 = vst.msk [vmem:[%s16996_s1 + $0x1c7] ss:$8 sm:$0xf0] %vm3_vm7, %v7350_v0  }
 0x255   :  { %7345 = vst.msk [vmem:[%s16996_s1 + $0x1c6] ss:$8 sm:$0xf] %vm3_vm7, %v7344_v17   ;;  %7351 = vst.msk [vmem:[%s16996_s1 + $0x1c7] ss:$8 sm:$0xf] %vm3_vm7, %v7350_v0   ;;  %v4081_v0 = vpop.permute.xlu1 %4080  }
 0x256   :  { %v8585_v6 = vld [vmem:[%s16995_s0 + $0x48f] sm:$0x4]   ;;  %7495 = vst.msk [vmem:[%s16996_s1 + $0x1e0] sm:$0xff] %vm479_vm8, %v17037_v30   ;;  %v17038_v56 = vld [vmem:[#allocation8_spill] sm:$0xff]  ;;  %v17042_v63 = vld [vmem:[#allocation9_spill] sm:$0xff] }
 0x257   :  { %v8586_v33 = vld [vmem:[%s16995_s0 + $0x4ce] sm:$0x8]   ;;  %7639 = vst.msk [vmem:[%s16996_s1 + $0x1e8] sm:$0xff] %vm479_vm8, %v17038_v56   ;;  %v17040_v39 = vld [vmem:[#allocation20_spill] sm:$0xff]  ;;  %7630 = vst.msk [vmem:[%s16996_s1 + $0x1c8] sm:$0xff] %vm479_vm8, %v17042_v63  }
 0x258   :  { %v17039_v14 = vld [vmem:[#allocation14_spill] sm:$0xff]  ;;  %7927 = vst.msk [vmem:[%s16996_s1 + $0x1f8] sm:$0xff] %vm479_vm8, %v17040_v39   ;;  %v17041_v19 = vld [vmem:[#allocation4_spill] sm:$0xff]  ;;  %v17043_v49 = vld [vmem:[#allocation15_spill] sm:$0xff] }
 0x259   :  { %7783 = vst.msk [vmem:[%s16996_s1 + $0x1f0] sm:$0xff] %vm479_vm8, %v17039_v14   ;;  %7486 = vst.msk [vmem:[%s16996_s1 + $0x1c0] sm:$0xff] %vm479_vm8, %v17041_v19   ;;  %v17044_v28 = vld [vmem:[#allocation21_spill] sm:$0xff]  ;;  %v8587_v62 = vld [vmem:[%s16995_s0 + $0x50d] sm:$0x10]  }
 0x25a   :  { %7774 = vst.msk [vmem:[%s16996_s1 + $0x1d0] sm:$0xff] %vm479_vm8, %v17043_v49   ;;  %7918 = vst.msk [vmem:[%s16996_s1 + $0x1d8] sm:$0xff] %vm479_vm8, %v17044_v28   ;;  %v8588_v32 = vld [vmem:[%s16995_s0 + $0x54c] sm:$0x20]   ;;  %v8574_v10 = vld [vmem:[%s16995_s0 + $0x401] sm:$0x1]  }
 0x25b   :  { %v8589_v59 = vld [vmem:[%s16995_s0 + $0x58b] sm:$0x40]   ;;  %8070 = vst.msk [vmem:[%s16996_s1 + $0x1e0] sm:$0xff] %vm2718_vm9, %v13307_v31   ;;  %8061 = vst.msk [vmem:[%s16996_s1 + $0x1c0] sm:$0xff] %vm2718_vm9, %v13352_v52   ;;  %v5248_v31 = vsel %vm455_vm1, %v8585_v6, %v5244_v11  ;;  %v8575_v57 = vld [vmem:[%s16995_s0 + $0x440] sm:$0x2]  }
 0x25c   :  { %v8590_v52 = vld [vmem:[%s16995_s0 + $0x5ca] sm:$0x80]   ;;  %8214 = vst.msk [vmem:[%s16996_s1 + $0x1e8] sm:$0xff] %vm2718_vm9, %v14415_v35   ;;  %8205 = vst.msk [vmem:[%s16996_s1 + $0x1c8] sm:$0xff] %vm2718_vm9, %v14463_v16   ;;  %v5252_v35 = vsel %vm459_vm2, %v8586_v33, %v5248_v31  ;;  %v5209_v16 = vsel %vm451_vm0, %v8575_v57, %v8574_v10  ;;  %v8576_v44 = vld [vmem:[%s16995_s0 + $0x47f] sm:$0x4]  }
 0x25d   :  { %v8577_v37 = vld [vmem:[%s16995_s0 + $0x4be] sm:$0x8]   ;;  %v5256_v15 = vsel %vm463_vm3, %v8587_v62, %v5252_v35  ;;  %v5213_v48 = vsel %vm455_vm1, %v8576_v44, %v5209_v16  ;;  %v8601_v53 = vld [vmem:[%s16995_s0 + $0x431] sm:$0x1]   ;;  %8268 = vst.msk [vmem:[%s16996_s1 + $0xb0] sm:$0xff] %vm2718_vm9, %v4011_v51   ;;  %8259 = vst.msk [vmem:[%s16996_s1 + $0x90] sm:$0xff] %vm2718_vm9, %v3976_v18  }
 0x25e   :  { %v8578_v4 = vld [vmem:[%s16995_s0 + $0x4fd] sm:$0x10]   ;;  %v5260_v55 = vsel %vm467_vm4, %v8588_v32, %v5256_v15  ;;  %v5217_v26 = vsel %vm459_vm2, %v8577_v37, %v5213_v48  ;;  %v8602_v36 = vld [vmem:[%s16995_s0 + $0x470] sm:$0x2]   ;;  %8286 = vst.msk [vmem:[%s16996_s1 + $0xf0] sm:$0xff] %vm2718_vm9, %v4081_v0   ;;  %v4151_v48 = vpop.permute.xlu1 %4150  }
 0x25f   :  { %v8579_v8 = vld [vmem:[%s16995_s0 + $0x53c] sm:$0x20]   ;;  %v8603_v46 = vld [vmem:[%s16995_s0 + $0x4af] sm:$0x4]   ;;  %v5264_v24 = vsel %vm471_vm5, %v8589_v59, %v5260_v55  ;;  %v5221_v22 = vsel %vm463_vm3, %v8578_v4, %v5217_v26  ;;  %v5314_v25 = vsel %vm451_vm0, %v8602_v36, %v8601_v53  ;;  %v4046_v59 = vpop.permute.xlu0 %4045   ;;  %8304 = vst.msk [vmem:[%s16996_s1 + $0x130] sm:$0xff] %vm2718_vm9, %v4151_v48  }
 0x260   :  { %v8580_v43 = vld [vmem:[%s16995_s0 + $0x57b] sm:$0x40]   ;;  %v8604_v58 = vld [vmem:[%s16995_s0 + $0x4ee] sm:$0x8]   ;;  %v5268_v34 = vsel %vm475_vm6, %v8590_v52, %v5264_v24  ;;  %v5225_v45 = vsel %vm467_vm4, %v8579_v8, %v5221_v22  ;;  %v5318_v12 = vsel %vm455_vm1, %v8603_v46, %v5314_v25  ;;  %8277 = vst.msk [vmem:[%s16996_s1 + $0xd0] sm:$0xff] %vm2718_vm9, %v4046_v59  }
 0x261   :  { %v8581_v20 = vld [vmem:[%s16995_s0 + $0x5ba] sm:$0x80]   ;;  %v8605_v29 = vld [vmem:[%s16995_s0 + $0x52d] sm:$0x10]   ;;  %5269 = vrot.lane.b32.xlu1 %v5268_v34, %s9083_s3  ;;  %v5229_v38 = vsel %vm471_vm5, %v8580_v43, %v5225_v45  ;;  %v5322_v2 = vsel %vm459_vm2, %v8604_v58, %v5318_v12  ;;  %v8661_v59 = vld [vmem:[%s16995_s0 + $0x18f] sm:$0x40]  }
 0x262   :  { %v8606_v9 = vld [vmem:[%s16995_s0 + $0x56c] sm:$0x20]   ;;  %v8592_v27 = vld [vmem:[%s16995_s0 + $0x421] sm:$0x1]   ;;  %v5233_v23 = vsel %vm475_vm6, %v8581_v20, %v5229_v38  ;;  %v5326_v41 = vsel %vm463_vm3, %v8605_v29, %v5322_v2  ;;  %v8651_v48 = vld [vmem:[%s16995_s0 + $0x140] sm:$0x20]  }
 0x263   :  { %v8607_v54 = vld [vmem:[%s16995_s0 + $0x5ab] sm:$0x40]   ;;  %v8593_v50 = vld [vmem:[%s16995_s0 + $0x460] sm:$0x2]   ;;  %5234 = vrot.lane.b32.xlu0 %v5233_v23, %s9083_s3  ;;  %v5330_v21 = vsel %vm467_vm4, %v8606_v9, %v5326_v41  ;;  %v4116_v45 = vpop.permute.xlu0 %4115  }
 0x264   :  { %v8608_v7 = vld [vmem:[%s16995_s0 + $0x5ea] sm:$0x80]   ;;  %v8594_v5 = vld [vmem:[%s16995_s0 + $0x49f] sm:$0x4]   ;;  %v5279_v40 = vsel %vm451_vm0, %v8593_v50, %v8592_v27  ;;  %v5334_v42 = vsel %vm471_vm5, %v8607_v54, %v5330_v21  ;;  %8295 = vst.msk [vmem:[%s16996_s1 + $0x110] sm:$0xff] %vm2718_vm9, %v4116_v45  }
 0x265   :  { %v8595_v3 = vld [vmem:[%s16995_s0 + $0x4de] sm:$0x8]   ;;  %v5283_v1 = vsel %vm455_vm1, %v8594_v5, %v5279_v40  ;;  %v8619_v6 = vld [vmem:[%s16995_s0 + $0x611] sm:$0x1]   ;;  %v5338_v63 = vsel %vm475_vm6, %v8608_v7, %v5334_v42  ;;  %v8656_v42 = vld [vmem:[%s16995_s0 + $0x54] sm:$0x2]  }
 0x266   :  { %v8596_v60 = vld [vmem:[%s16995_s0 + $0x51d] sm:$0x10]   ;;  %v8620_v33 = vld [vmem:[%s16995_s0 + $0x650] sm:$0x2]   ;;  %v5287_v30 = vsel %vm459_vm2, %v8595_v3, %v5283_v1  ;;  %5339 = vrot.lane.b32.xlu1 %v5338_v63, %s9083_s3  ;;  %v4221_v1 = vpop.permute.xlu1 %4220   ;;  %v8659_v63 = vld [vmem:[%s16995_s0 + $0x111] sm:$0x10]  }
 0x267   :  { %v8597_v47 = vld [vmem:[%s16995_s0 + $0x55c] sm:$0x20]   ;;  %v5384_v56 = vsel %vm451_vm0, %v8620_v33, %v8619_v6  ;;  %v8621_v14 = vld [vmem:[%s16995_s0 + $0x68f] sm:$0x4]   ;;  %v5291_v49 = vsel %vm463_vm3, %v8596_v60, %v5287_v30  ;;  %v8655_v33 = vld [vmem:[%s16995_s0 + $0x15] sm:$0x1]  }
 0x268   :  { %v8598_v17 = vld [vmem:[%s16995_s0 + $0x59b] sm:$0x40]   ;;  %v8622_v39 = vld [vmem:[%s16995_s0 + $0x6ce] sm:$0x8]   ;;  %v5388_v28 = vsel %vm455_vm1, %v8621_v14, %v5384_v56  ;;  %v5295_v61 = vsel %vm467_vm4, %v8597_v47, %v5291_v49  ;;  %v8657_v30 = vld [vmem:[%s16995_s0 + $0x93] sm:$0x4]  }
 0x269   :  { %v8599_v13 = vld [vmem:[%s16995_s0 + $0x5da] sm:$0x80]   ;;  %v8623_v19 = vld [vmem:[%s16995_s0 + $0x70d] sm:$0x10]   ;;  %v5392_v31 = vsel %vm459_vm2, %v8622_v39, %v5388_v28  ;;  %v5299_v35 = vsel %vm471_vm5, %v8598_v17, %v5295_v61  ;;  %8322 = vst.msk [vmem:[%s16996_s1 + $0x170] sm:$0xff] %vm2718_vm9, %v4221_v1   ;;  %v5524_v39 = vsel %vm451_vm0, %v8656_v42, %v8655_v33  ;;  %v4186_v28 = vpop.permute.xlu0 %4185  }
 0x26a   :  { %v8624_v11 = vld [vmem:[%s16995_s0 + $0x74c] sm:$0x20]   ;;  %v8610_v52 = vld [vmem:[%s16995_s0 + $0x601] sm:$0x1]   ;;  %v5396_v16 = vsel %vm463_vm3, %v8623_v19, %v5392_v31  ;;  %v5303_v8 = vsel %vm475_vm6, %v8599_v13, %v5299_v35  ;;  %v8658_v19 = vld [vmem:[%s16995_s0 + $0xd2] sm:$0x8]  }
 0x26b   :  { %v8625_v62 = vld [vmem:[%s16995_s0 + $0x78b] sm:$0x40]   ;;  %v8611_v10 = vld [vmem:[%s16995_s0 + $0x640] sm:$0x2]   ;;  %v5400_v43 = vsel %vm467_vm4, %v8624_v11, %v5396_v16  ;;  %5304 = vrot.lane.b32.xlu0 %v5303_v8, %s9083_s3  ;;  %v8660_v49 = vld [vmem:[%s16995_s0 + $0x150] sm:$0x20]  }
 0x26c   :  { %v8626_v32 = vld [vmem:[%s16995_s0 + $0x7ca] sm:$0x80]   ;;  %v8612_v57 = vld [vmem:[%s16995_s0 + $0x67f] sm:$0x4]   ;;  %v5349_v44 = vsel %vm451_vm0, %v8611_v10, %v8610_v52  ;;  %v5404_v53 = vsel %vm471_vm5, %v8625_v62, %v5400_v43  ;;  %v8662_v61 = vld [vmem:[%s16995_s0 + $0x1ce] sm:$0x80]   ;;  %v4291_v43 = vpop.permute.xlu1 %4290  }
 0x26d   :  { %v8613_v37 = vld [vmem:[%s16995_s0 + $0x6be] sm:$0x8]   ;;  %v5353_v20 = vsel %vm455_vm1, %v8612_v57, %v5349_v44  ;;  %v8637_v26 = vld [vmem:[%s16995_s0 + $0x631] sm:$0x1]   ;;  %v5408_v25 = vsel %vm475_vm6, %v8626_v32, %v5404_v53  ;;  %v5528_v32 = vsel %vm455_vm1, %v8657_v30, %v5524_v39  ;;  %v8646_v31 = vld [vmem:[%s16995_s0 + $0x5] sm:$0x1]  }
 0x26e   :  { %v8614_v4 = vld [vmem:[%s16995_s0 + $0x6fd] sm:$0x10]   ;;  %v5357_v36 = vsel %vm459_vm2, %v8613_v37, %v5353_v20  ;;  %v8638_v46 = vld [vmem:[%s16995_s0 + $0x670] sm:$0x2]   ;;  %5409 = vrot.lane.b32.xlu1 %v5408_v25, %s9083_s3  ;;  %8313 = vst.msk [vmem:[%s16996_s1 + $0x150] sm:$0xff] %vm2718_vm9, %v4186_v28   ;;  %v5532_v10 = vsel %vm459_vm2, %v8658_v19, %v5528_v32 }
 0x26f   :  { %v8615_v15 = vld [vmem:[%s16995_s0 + $0x73c] sm:$0x20]   ;;  %v8639_v24 = vld [vmem:[%s16995_s0 + $0x6af] sm:$0x4]   ;;  %v5361_v58 = vsel %vm463_vm3, %v8614_v4, %v5357_v36  ;;  %v5454_v29 = vsel %vm451_vm0, %v8638_v46, %v8637_v26  ;;  %v8647_v57 = vld [vmem:[%s16995_s0 + $0x44] sm:$0x2]   ;;  %v5536_v37 = vsel %vm463_vm3, %v8659_v63, %v5532_v10 }
 0x270   :  { %v8616_v51 = vld [vmem:[%s16995_s0 + $0x77b] sm:$0x40]   ;;  %v8640_v22 = vld [vmem:[%s16995_s0 + $0x6ee] sm:$0x8]   ;;  %v5365_v12 = vsel %vm467_vm4, %v8615_v15, %v5361_v58  ;;  %v5458_v54 = vsel %vm455_vm1, %v8639_v24, %v5454_v29  ;;  %v8648_v35 = vld [vmem:[%s16995_s0 + $0x83] sm:$0x4]   ;;  %v5489_v4 = vsel %vm451_vm0, %v8647_v57, %v8646_v31  ;;  %v5540_v20 = vsel %vm467_vm4, %v8660_v49, %v5536_v37 }
 0x271   :  { %v8617_v55 = vld [vmem:[%s16995_s0 + $0x7ba] sm:$0x80]   ;;  %v8641_v9 = vld [vmem:[%s16995_s0 + $0x72d] sm:$0x10]   ;;  %v5369_v2 = vsel %vm471_vm5, %v8616_v51, %v5365_v12  ;;  %v5462_v50 = vsel %vm459_vm2, %v8640_v22, %v5458_v54  ;;  %v8649_v16 = vld [vmem:[%s16995_s0 + $0xc2] sm:$0x8]   ;;  %v5493_v51 = vsel %vm455_vm1, %v8648_v35, %v5489_v4  ;;  %v5544_v36 = vsel %vm471_vm5, %v8661_v59, %v5540_v20  ;;  %v4256_v54 = vpop.permute.xlu0 %4255  }
 0x272   :  { %v8642_v18 = vld [vmem:[%s16995_s0 + $0x76c] sm:$0x20]   ;;  %v8628_v27 = vld [vmem:[%s16995_s0 + $0x621] sm:$0x1]   ;;  %v5373_v40 = vsel %vm475_vm6, %v8617_v55, %v5369_v2  ;;  %v5466_v60 = vsel %vm463_vm3, %v8641_v9, %v5462_v50  ;;  %v8650_v15 = vld [vmem:[%s16995_s0 + $0x101] sm:$0x10]   ;;  %v5497_v46 = vsel %vm459_vm2, %v8649_v16, %v5493_v51  ;;  %v5548_v29 = vsel %vm475_vm6, %v8662_v61, %v5544_v36 }
 0x273   :  { %v8643_v34 = vld [vmem:[%s16995_s0 + $0x7ab] sm:$0x40]   ;;  %v8629_v38 = vld [vmem:[%s16995_s0 + $0x660] sm:$0x2]   ;;  %5374 = vrot.lane.b32.xlu0 %v5373_v40, %s9083_s3  ;;  %v5470_v13 = vsel %vm467_vm4, %v8642_v18, %v5466_v60  ;;  %v8652_v8 = vld [vmem:[%s16995_s0 + $0x17f] sm:$0x40]   ;;  %v5501_v9 = vsel %vm463_vm3, %v8650_v15, %v5497_v46 }
 0x274   :  { %v8644_v7 = vld [vmem:[%s16995_s0 + $0x7ea] sm:$0x80]   ;;  %v5419_v5 = vsel %vm451_vm0, %v8629_v38, %v8628_v27  ;;  %v8630_v3 = vld [vmem:[%s16995_s0 + $0x69f] sm:$0x4]   ;;  %v5474_v56 = vsel %vm471_vm5, %v8643_v34, %v5470_v13  ;;  %v8653_v55 = vld [vmem:[%s16995_s0 + $0x1be] sm:$0x80]  }
 0x275   :  { %v8631_v23 = vld [vmem:[%s16995_s0 + $0x6de] sm:$0x8]   ;;  %v5423_v47 = vsel %vm455_vm1, %v8630_v3, %v5419_v5  ;;  %v5478_v11 = vsel %vm475_vm6, %v8644_v7, %v5474_v56  ;;  %v8673_v26 = vld [vmem:[%s16995_s0 + $0x35] sm:$0x1]   ;;  %8340 = vst.msk [vmem:[%s16996_s1 + $0x1b0] sm:$0xff] %vm2718_vm9, %v4291_v43   ;;  %v5505_v7 = vsel %vm467_vm4, %v8651_v48, %v5501_v9  ;;  %8331 = vst.msk [vmem:[%s16996_s1 + $0x190] sm:$0xff] %vm2718_vm9, %v4256_v54  }
 0x276   :  { %v8632_v41 = vld [vmem:[%s16995_s0 + $0x71d] sm:$0x10]   ;;  %v5427_v6 = vsel %vm459_vm2, %v8631_v23, %v5423_v47  ;;  %5479 = vrot.lane.b32.xlu1 %v5478_v11, %s9083_s3  ;;  %v8674_v53 = vld [vmem:[%s16995_s0 + $0x74] sm:$0x2]   ;;  %v8664_v38 = vld [vmem:[%s16995_s0 + $0x25] sm:$0x1]   ;;  %v5509_v5 = vsel %vm471_vm5, %v8652_v8, %v5505_v7  ;;  %v4361_v47 = vpop.permute.xlu1 %4360  }
 0x277   :  { %v8633_v17 = vld [vmem:[%s16995_s0 + $0x75c] sm:$0x20]   ;;  %v5431_v14 = vsel %vm463_vm3, %v8632_v41, %v5427_v6  ;;  %v5594_v24 = vsel %vm451_vm0, %v8674_v53, %v8673_v26  ;;  %v8675_v22 = vld [vmem:[%s16995_s0 + $0xb3] sm:$0x4]   ;;  %v8665_v2 = vld [vmem:[%s16995_s0 + $0x64] sm:$0x2]  }
 0x278   :  { %v8634_v0 = vld [vmem:[%s16995_s0 + $0x79b] sm:$0x40]   ;;  %v5435_v62 = vsel %vm467_vm4, %v8633_v17, %v5431_v14  ;;  %v8676_v25 = vld [vmem:[%s16995_s0 + $0xf2] sm:$0x8]   ;;  %v5598_v18 = vsel %vm455_vm1, %v8675_v22, %v5594_v24  ;;  %v8666_v50 = vld [vmem:[%s16995_s0 + $0xa3] sm:$0x4]   ;;  %v5559_v23 = vsel %vm451_vm0, %v8665_v2, %v8664_v38  ;;  %v5513_v17 = vsel %vm475_vm6, %v8653_v55, %v5509_v5 }
 0x279   :  { %v8635_v21 = vld [vmem:[%s16995_s0 + $0x7da] sm:$0x80]   ;;  %v5439_v52 = vsel %vm471_vm5, %v8634_v0, %v5435_v62  ;;  %v8677_v58 = vld [vmem:[%s16995_s0 + $0x131] sm:$0x10]   ;;  %v5602_v27 = vsel %vm459_vm2, %v8676_v25, %v5598_v18  ;;  %v8667_v41 = vld [vmem:[%s16995_s0 + $0xe2] sm:$0x8]   ;;  %v4326_v62 = vpop.permute.xlu0 %4325  }
 0x27a   :  { %v5443_v44 = vsel %vm475_vm6, %v8635_v21, %v5439_v52  ;;  %v8678_v34 = vld [vmem:[%s16995_s0 + $0x170] sm:$0x20]   ;;  %5549 = vrot.lane.b32.xlu1 %v5548_v29, %s9083_s3  ;;  %v5606_v3 = vsel %vm463_vm3, %v8677_v58, %v5602_v27  ;;  %v8668_v40 = vld [vmem:[%s16995_s0 + $0x121] sm:$0x10]   ;;  %v5563_v21 = vsel %vm455_vm1, %v8666_v50, %v5559_v23  ;;  %8358 = vst.msk [vmem:[%s16996_s1 + $0x1f0] sm:$0xff] %vm2718_vm9, %v4361_v47   ;;  %v4431_v51 = vpop.permute.xlu1 %4430  }
 0x27b   :  { %5444 = vrot.lane.b32.xlu0 %v5443_v44, %s9083_s3  ;;  %v8679_v45 = vld [vmem:[%s16995_s0 + $0x1af] sm:$0x40]   ;;  %v8669_v60 = vld [vmem:[%s16995_s0 + $0x160] sm:$0x20]   ;;  %v5610_v0 = vsel %vm467_vm4, %v8678_v34, %v5606_v3  ;;  %v5567_v42 = vsel %vm459_vm2, %v8667_v41, %v5563_v21  ;;  %8349 = vst.msk [vmem:[%s16996_s1 + $0x1d0] sm:$0xff] %vm2718_vm9, %v4326_v62  }
 0x27c   :  { %v8680_v12 = vld [vmem:[%s16995_s0 + $0x1ee] sm:$0x80]   ;;  %v8670_v1 = vld [vmem:[%s16995_s0 + $0x19f] sm:$0x40]   ;;  %v5614_v33 = vsel %vm471_vm5, %v8679_v45, %v5610_v0  ;;  %v5571_v19 = vsel %vm463_vm3, %v8668_v40, %v5567_v42  ;;  %8376 = vst.msk [vmem:[%s16996_s1 + $0x38] sm:$0xff] %vm2718_vm9, %v4431_v51  }
 0x27d   :  { %v8671_v13 = vld [vmem:[%s16995_s0 + $0x1de] sm:$0x80]   ;;  %v8691_v6 = vld [vmem:[%s16995_s0 + $0x215] sm:$0x1]   ;;  %v5618_v39 = vsel %vm475_vm6, %v8680_v12, %v5614_v33  ;;  %v5575_v32 = vsel %vm467_vm4, %v8669_v60, %v5571_v19  ;;  %v4396_v18 = vpop.permute.xlu0 %4395  }
 0x27e   :  { %v8692_v30 = vld [vmem:[%s16995_s0 + $0x254] sm:$0x2]   ;;  %5619 = vrot.lane.b32.xlu1 %v5618_v39, %s9083_s3  ;;  %v8682_v31 = vld [vmem:[%s16995_s0 + $0x205] sm:$0x1]   ;;  %v5579_v10 = vsel %vm471_vm5, %v8670_v1, %v5575_v32  ;;  %8367 = vst.msk [vmem:[%s16996_s1 + $0x18] sm:$0xff] %vm2718_vm9, %v4396_v18   ;;  %v4501_v0 = vpop.permute.xlu1 %4500  }
 0x27f   :  { %5514 = vrot.lane.b32.xlu0 %v5513_v17, %s9083_s3  ;;  %v8693_v56 = vld [vmem:[%s16995_s0 + $0x293] sm:$0x4]   ;;  %v5664_v63 = vsel %vm451_vm0, %v8692_v30, %v8691_v6  ;;  %v8683_v52 = vld [vmem:[%s16995_s0 + $0x244] sm:$0x2]   ;;  %v5583_v4 = vsel %vm475_vm6, %v8671_v13, %v5579_v10  ;;  %8394 = vst.msk [vmem:[%s16996_s1 + $0x78] sm:$0xff] %vm2718_vm9, %v4501_v0  }
 0x280   :  { %v8694_v14 = vld [vmem:[%s16995_s0 + $0x2d2] sm:$0x8]   ;;  %v5668_v59 = vsel %vm455_vm1, %v8693_v56, %v5664_v63  ;;  %v5629_v35 = vsel %vm451_vm0, %v8683_v52, %v8682_v31  ;;  %v8684_v16 = vld [vmem:[%s16995_s0 + $0x283] sm:$0x4]  }
 0x281   :  { %v8695_v49 = vld [vmem:[%s16995_s0 + $0x311] sm:$0x10]   ;;  %v5672_v57 = vsel %vm459_vm2, %v8694_v14, %v5668_v59  ;;  %v8685_v44 = vld [vmem:[%s16995_s0 + $0x2c2] sm:$0x8]   ;;  %v5633_v48 = vsel %vm455_vm1, %v8684_v16, %v5629_v35  ;;  %v4466_v59 = vpop.permute.xlu0 %4465  }
 0x282   :  { %v8696_v28 = vld [vmem:[%s16995_s0 + $0x350] sm:$0x20]   ;;  %v8686_v37 = vld [vmem:[%s16995_s0 + $0x301] sm:$0x10]   ;;  %v5676_v15 = vsel %vm463_vm3, %v8695_v49, %v5672_v57  ;;  %v5637_v26 = vsel %vm459_vm2, %v8685_v44, %v5633_v48  ;;  %8385 = vst.msk [vmem:[%s16996_s1 + $0x58] sm:$0xff] %vm2718_vm9, %v4466_v59   ;;  %v4571_v48 = vpop.permute.xlu1 %4570  }
 0x283   :  { %v8697_v11 = vld [vmem:[%s16995_s0 + $0x38f] sm:$0x40]   ;;  %v8687_v8 = vld [vmem:[%s16995_s0 + $0x340] sm:$0x20]   ;;  %5584 = vrot.lane.b32.xlu0 %v5583_v4, %s9083_s3  ;;  %v5680_v55 = vsel %vm467_vm4, %v8696_v28, %v5676_v15  ;;  %v5641_v22 = vsel %vm463_vm3, %v8686_v37, %v5637_v26  ;;  %8412 = vst.msk [vmem:[%s16996_s1 + $0xb8] sm:$0xff] %vm2718_vm9, %v4571_v48  }
 0x284   :  { %v8698_v61 = vld [vmem:[%s16995_s0 + $0x3ce] sm:$0x80]   ;;  %v8688_v43 = vld [vmem:[%s16995_s0 + $0x37f] sm:$0x40]   ;;  %v5684_v24 = vsel %vm471_vm5, %v8697_v11, %v5680_v55  ;;  %v5645_v45 = vsel %vm467_vm4, %v8687_v8, %v5641_v22 }
 0x285   :  { %v8689_v20 = vld [vmem:[%s16995_s0 + $0x3be] sm:$0x80]   ;;  %v8709_v53 = vld [vmem:[%s16995_s0 + $0x235] sm:$0x1]   ;;  %v5688_v34 = vsel %vm475_vm6, %v8698_v61, %v5684_v24  ;;  %v5649_v38 = vsel %vm471_vm5, %v8688_v43, %v5645_v45  ;;  %v4536_v45 = vpop.permute.xlu0 %4535  }
 0x286   :  { %v8710_v36 = vld [vmem:[%s16995_s0 + $0x274] sm:$0x2]   ;;  %v8700_v27 = vld [vmem:[%s16995_s0 + $0x225] sm:$0x1]   ;;  %5689 = vrot.lane.b32.xlu1 %v5688_v34, %s9083_s3  ;;  %v5653_v23 = vsel %vm475_vm6, %v8689_v20, %v5649_v38  ;;  %8403 = vst.msk [vmem:[%s16996_s1 + $0x98] sm:$0xff] %vm2718_vm9, %v4536_v45  }
 0x287   :  { %v8711_v46 = vld [vmem:[%s16995_s0 + $0x2b3] sm:$0x4]   ;;  %v5734_v25 = vsel %vm451_vm0, %v8710_v36, %v8709_v53  ;;  %v8701_v50 = vld [vmem:[%s16995_s0 + $0x264] sm:$0x2]   ;;  %5654 = vrot.lane.b32.xlu0 %v5653_v23, %s9083_s3 }
 0x288   :  { %v8712_v58 = vld [vmem:[%s16995_s0 + $0x2f2] sm:$0x8]   ;;  %v5738_v12 = vsel %vm455_vm1, %v8711_v46, %v5734_v25  ;;  %v8702_v5 = vld [vmem:[%s16995_s0 + $0x2a3] sm:$0x4]   ;;  %v5699_v40 = vsel %vm451_vm0, %v8701_v50, %v8700_v27 }
 0x289   :  { %v8713_v29 = vld [vmem:[%s16995_s0 + $0x331] sm:$0x10]   ;;  %v5742_v2 = vsel %vm459_vm2, %v8712_v58, %v5738_v12  ;;  %v8703_v3 = vld [vmem:[%s16995_s0 + $0x2e2] sm:$0x8]   ;;  %v5703_v1 = vsel %vm455_vm1, %v8702_v5, %v5699_v40 }
 0x28a   :  { %v8714_v9 = vld [vmem:[%s16995_s0 + $0x370] sm:$0x20]   ;;  %v5746_v41 = vsel %vm463_vm3, %v8713_v29, %v5742_v2  ;;  %v8704_v60 = vld [vmem:[%s16995_s0 + $0x321] sm:$0x10]   ;;  %v5707_v30 = vsel %vm459_vm2, %v8703_v3, %v5703_v1  ;;  %v4641_v1 = vpop.permute.xlu1 %4640  }
 0x28b   :  { %v8715_v54 = vld [vmem:[%s16995_s0 + $0x3af] sm:$0x40]   ;;  %v8705_v47 = vld [vmem:[%s16995_s0 + $0x360] sm:$0x20]   ;;  %v5750_v21 = vsel %vm467_vm4, %v8714_v9, %v5746_v41  ;;  %v5711_v49 = vsel %vm463_vm3, %v8704_v60, %v5707_v30  ;;  %8430 = vst.msk [vmem:[%s16996_s1 + $0xf8] sm:$0xff] %vm2718_vm9, %v4641_v1  }
 0x28c   :  { %v8716_v7 = vld [vmem:[%s16995_s0 + $0x3ee] sm:$0x80]   ;;  %v8706_v17 = vld [vmem:[%s16995_s0 + $0x39f] sm:$0x40]   ;;  %v5754_v42 = vsel %vm471_vm5, %v8715_v54, %v5750_v21  ;;  %v5715_v61 = vsel %vm467_vm4, %v8705_v47, %v5711_v49 }
 0x28d   :  { %v8707_v13 = vld [vmem:[%s16995_s0 + $0x3de] sm:$0x80]   ;;  %v8727_v6 = vld [vmem:[%s16995_s0 + $0x415] sm:$0x1]   ;;  %v5758_v63 = vsel %vm475_vm6, %v8716_v7, %v5754_v42  ;;  %v5719_v35 = vsel %vm471_vm5, %v8706_v17, %v5715_v61 }
 0x28e   :  { %v8728_v33 = vld [vmem:[%s16995_s0 + $0x454] sm:$0x2]   ;;  %5759 = vrot.lane.b32.xlu1 %v5758_v63, %s9083_s3  ;;  %v8718_v52 = vld [vmem:[%s16995_s0 + $0x405] sm:$0x1]   ;;  %v5723_v8 = vsel %vm475_vm6, %v8707_v13, %v5719_v35 }
 0x28f   :  { %v5804_v56 = vsel %vm451_vm0, %v8728_v33, %v8727_v6  ;;  %v8729_v14 = vld [vmem:[%s16995_s0 + $0x493] sm:$0x4]   ;;  %v8719_v10 = vld [vmem:[%s16995_s0 + $0x444] sm:$0x2]   ;;  %5724 = vrot.lane.b32.xlu0 %v5723_v8, %s9083_s3 }
 0x290   :  { %v8730_v39 = vld [vmem:[%s16995_s0 + $0x4d2] sm:$0x8]   ;;  %v5808_v28 = vsel %vm455_vm1, %v8729_v14, %v5804_v56  ;;  %v8720_v57 = vld [vmem:[%s16995_s0 + $0x483] sm:$0x4]   ;;  %v5769_v44 = vsel %vm451_vm0, %v8719_v10, %v8718_v52 }
 0x291   :  { %v8731_v19 = vld [vmem:[%s16995_s0 + $0x511] sm:$0x10]   ;;  %v5812_v31 = vsel %vm459_vm2, %v8730_v39, %v5808_v28  ;;  %v8721_v37 = vld [vmem:[%s16995_s0 + $0x4c2] sm:$0x8]   ;;  %v5773_v20 = vsel %vm455_vm1, %v8720_v57, %v5769_v44  ;;  %v4606_v28 = vpop.permute.xlu0 %4605  }
 0x292   :  { %v8732_v11 = vld [vmem:[%s16995_s0 + $0x550] sm:$0x20]   ;;  %v5816_v16 = vsel %vm463_vm3, %v8731_v19, %v5812_v31  ;;  %v8722_v4 = vld [vmem:[%s16995_s0 + $0x501] sm:$0x10]   ;;  %v5777_v36 = vsel %vm459_vm2, %v8721_v37, %v5773_v20  ;;  %8421 = vst.msk [vmem:[%s16996_s1 + $0xd8] sm:$0xff] %vm2718_vm9, %v4606_v28  }
 0x293   :  { %v8733_v62 = vld [vmem:[%s16995_s0 + $0x58f] sm:$0x40]   ;;  %v8723_v15 = vld [vmem:[%s16995_s0 + $0x540] sm:$0x20]   ;;  %v5820_v43 = vsel %vm467_vm4, %v8732_v11, %v5816_v16  ;;  %v5781_v58 = vsel %vm463_vm3, %v8722_v4, %v5777_v36  ;;  %v8805_v28 = vld [vmem:[%s16995_s0 + $0x193] sm:$0x40]  }
 0x294   :  { %v8734_v32 = vld [vmem:[%s16995_s0 + $0x5ce] sm:$0x80]   ;;  %v8724_v51 = vld [vmem:[%s16995_s0 + $0x57f] sm:$0x40]   ;;  %v5824_v53 = vsel %vm471_vm5, %v8733_v62, %v5820_v43  ;;  %v5785_v12 = vsel %vm467_vm4, %v8723_v15, %v5781_v58  ;;  %v4711_v43 = vpop.permute.xlu1 %4710  }
 0x295   :  { %v8725_v55 = vld [vmem:[%s16995_s0 + $0x5be] sm:$0x80]   ;;  %v8745_v26 = vld [vmem:[%s16995_s0 + $0x435] sm:$0x1]   ;;  %v5828_v25 = vsel %vm475_vm6, %v8734_v32, %v5824_v53  ;;  %v5789_v2 = vsel %vm471_vm5, %v8724_v51, %v5785_v12  ;;  %8448 = vst.msk [vmem:[%s16996_s1 + $0x138] sm:$0xff] %vm2718_vm9, %v4711_v43  }
 0x296   :  { %v8746_v46 = vld [vmem:[%s16995_s0 + $0x474] sm:$0x2]   ;;  %5829 = vrot.lane.b32.xlu1 %v5828_v25, %s9083_s3  ;;  %v8736_v27 = vld [vmem:[%s16995_s0 + $0x425] sm:$0x1]   ;;  %v5793_v40 = vsel %vm475_vm6, %v8725_v55, %v5789_v2  ;;  %v8797_v43 = vld [vmem:[%s16995_s0 + $0x1c2] sm:$0x80]  }
 0x297   :  { %v8747_v24 = vld [vmem:[%s16995_s0 + $0x4b3] sm:$0x4]   ;;  %v5874_v29 = vsel %vm451_vm0, %v8746_v46, %v8745_v26  ;;  %v8737_v38 = vld [vmem:[%s16995_s0 + $0x464] sm:$0x2]   ;;  %5794 = vrot.lane.b32.xlu0 %v5793_v40, %s9083_s3 }
 0x298   :  { %v8748_v22 = vld [vmem:[%s16995_s0 + $0x4f2] sm:$0x8]   ;;  %v5878_v54 = vsel %vm455_vm1, %v8747_v24, %v5874_v29  ;;  %v5839_v5 = vsel %vm451_vm0, %v8737_v38, %v8736_v27  ;;  %v8738_v3 = vld [vmem:[%s16995_s0 + $0x4a3] sm:$0x4]  }
 0x299   :  { %v8749_v9 = vld [vmem:[%s16995_s0 + $0x531] sm:$0x10]   ;;  %v5882_v50 = vsel %vm459_vm2, %v8748_v22, %v5878_v54  ;;  %v8739_v23 = vld [vmem:[%s16995_s0 + $0x4e2] sm:$0x8]   ;;  %v5843_v47 = vsel %vm455_vm1, %v8738_v3, %v5839_v5  ;;  %v4676_v54 = vpop.permute.xlu0 %4675  }
 0x29a   :  { %v8750_v18 = vld [vmem:[%s16995_s0 + $0x570] sm:$0x20]   ;;  %v8740_v41 = vld [vmem:[%s16995_s0 + $0x521] sm:$0x10]   ;;  %v5886_v60 = vsel %vm463_vm3, %v8749_v9, %v5882_v50  ;;  %v5847_v6 = vsel %vm459_vm2, %v8739_v23, %v5843_v47  ;;  %8439 = vst.msk [vmem:[%s16996_s1 + $0x118] sm:$0xff] %vm2718_vm9, %v4676_v54  }
 0x29b   :  { %v8751_v34 = vld [vmem:[%s16995_s0 + $0x5af] sm:$0x40]   ;;  %v8741_v17 = vld [vmem:[%s16995_s0 + $0x560] sm:$0x20]   ;;  %v5890_v13 = vsel %vm467_vm4, %v8750_v18, %v5886_v60  ;;  %v5851_v14 = vsel %vm463_vm3, %v8740_v41, %v5847_v6  ;;  %v8808_v54 = vld [vmem:[%s16995_s0 + $0x29] sm:$0x1]  }
 0x29c   :  { %v8752_v7 = vld [vmem:[%s16995_s0 + $0x5ee] sm:$0x80]   ;;  %v8742_v0 = vld [vmem:[%s16995_s0 + $0x59f] sm:$0x40]   ;;  %v5894_v56 = vsel %vm471_vm5, %v8751_v34, %v5890_v13  ;;  %v5855_v62 = vsel %vm467_vm4, %v8741_v17, %v5851_v14  ;;  %v8799_v13 = vld [vmem:[%s16995_s0 + $0x19] sm:$0x1]  }
 0x29d   :  { %v8743_v21 = vld [vmem:[%s16995_s0 + $0x5de] sm:$0x80]   ;;  %v8763_v33 = vld [vmem:[%s16995_s0 + $0x615] sm:$0x1]   ;;  %v5898_v11 = vsel %vm475_vm6, %v8752_v7, %v5894_v56  ;;  %v5859_v52 = vsel %vm471_vm5, %v8742_v0, %v5855_v62  ;;  %v8802_v56 = vld [vmem:[%s16995_s0 + $0xd6] sm:$0x8]  }
 0x29e   :  { %v8764_v42 = vld [vmem:[%s16995_s0 + $0x654] sm:$0x2]   ;;  %v8754_v31 = vld [vmem:[%s16995_s0 + $0x605] sm:$0x1]   ;;  %5899 = vrot.lane.b32.xlu1 %v5898_v11, %s9083_s3  ;;  %v5863_v44 = vsel %vm475_vm6, %v8743_v21, %v5859_v52  ;;  %v4781_v11 = vpop.permute.xlu1 %4780  }
 0x29f   :  { %v8765_v30 = vld [vmem:[%s16995_s0 + $0x693] sm:$0x4]   ;;  %v5944_v39 = vsel %vm451_vm0, %v8764_v42, %v8763_v33  ;;  %v8755_v57 = vld [vmem:[%s16995_s0 + $0x644] sm:$0x2]   ;;  %5864 = vrot.lane.b32.xlu0 %v5863_v44, %s9083_s3  ;;  %v8800_v42 = vld [vmem:[%s16995_s0 + $0x58] sm:$0x2]  }
 0x2a0   :  { %v8766_v19 = vld [vmem:[%s16995_s0 + $0x6d2] sm:$0x8]   ;;  %v5948_v32 = vsel %vm455_vm1, %v8765_v30, %v5944_v39  ;;  %v8756_v35 = vld [vmem:[%s16995_s0 + $0x683] sm:$0x4]   ;;  %v5909_v4 = vsel %vm451_vm0, %v8755_v57, %v8754_v31  ;;  %v8801_v30 = vld [vmem:[%s16995_s0 + $0x97] sm:$0x4]  }
 0x2a1   :  { %v8767_v63 = vld [vmem:[%s16995_s0 + $0x711] sm:$0x10]   ;;  %v5952_v10 = vsel %vm459_vm2, %v8766_v19, %v5948_v32  ;;  %v8757_v16 = vld [vmem:[%s16995_s0 + $0x6c2] sm:$0x8]   ;;  %v5913_v51 = vsel %vm455_vm1, %v8756_v35, %v5909_v4  ;;  %v6084_v19 = vsel %vm451_vm0, %v8800_v42, %v8799_v13  ;;  %v8791_v31 = vld [vmem:[%s16995_s0 + $0x48] sm:$0x2]  }
 0x2a2   :  { %v8768_v49 = vld [vmem:[%s16995_s0 + $0x750] sm:$0x20]   ;;  %v5956_v37 = vsel %vm463_vm3, %v8767_v63, %v5952_v10  ;;  %v8758_v15 = vld [vmem:[%s16995_s0 + $0x701] sm:$0x10]   ;;  %v5917_v46 = vsel %vm459_vm2, %v8757_v16, %v5913_v51  ;;  %v8803_v63 = vld [vmem:[%s16995_s0 + $0x115] sm:$0x10]   ;;  %v6088_v32 = vsel %vm455_vm1, %v8801_v30, %v6084_v19 }
 0x2a3   :  { %v8769_v59 = vld [vmem:[%s16995_s0 + $0x78f] sm:$0x40]   ;;  %v8759_v48 = vld [vmem:[%s16995_s0 + $0x740] sm:$0x20]   ;;  %v5960_v20 = vsel %vm467_vm4, %v8768_v49, %v5956_v37  ;;  %v5921_v9 = vsel %vm463_vm3, %v8758_v15, %v5917_v46  ;;  %v8804_v49 = vld [vmem:[%s16995_s0 + $0x154] sm:$0x20]   ;;  %v6092_v10 = vsel %vm459_vm2, %v8802_v56, %v6088_v32 }
 0x2a4   :  { %v8770_v61 = vld [vmem:[%s16995_s0 + $0x7ce] sm:$0x80]   ;;  %v8760_v8 = vld [vmem:[%s16995_s0 + $0x77f] sm:$0x40]   ;;  %v5964_v36 = vsel %vm471_vm5, %v8769_v59, %v5960_v20  ;;  %v5925_v7 = vsel %vm467_vm4, %v8759_v48, %v5921_v9  ;;  %v8806_v59 = vld [vmem:[%s16995_s0 + $0x1d2] sm:$0x80]   ;;  %v6096_v4 = vsel %vm463_vm3, %v8803_v63, %v6092_v10  ;;  %v4746_v20 = vpop.permute.xlu0 %4745  }
 0x2a5   :  { %v8761_v55 = vld [vmem:[%s16995_s0 + $0x7be] sm:$0x80]   ;;  %v8781_v26 = vld [vmem:[%s16995_s0 + $0x635] sm:$0x1]   ;;  %v5968_v29 = vsel %vm475_vm6, %v8770_v61, %v5964_v36  ;;  %v5929_v5 = vsel %vm471_vm5, %v8760_v8, %v5925_v7  ;;  %v8790_v61 = vld [vmem:[%s16995_s0 + $0x9] sm:$0x1]   ;;  %v6100_v51 = vsel %vm467_vm4, %v8804_v49, %v6096_v4 }
 0x2a6   :  { %v8782_v53 = vld [vmem:[%s16995_s0 + $0x674] sm:$0x2]   ;;  %5969 = vrot.lane.b32.xlu1 %v5968_v29, %s9083_s3  ;;  %v8772_v38 = vld [vmem:[%s16995_s0 + $0x625] sm:$0x1]   ;;  %v5933_v47 = vsel %vm475_vm6, %v8761_v55, %v5929_v5  ;;  %8466 = vst.msk [vmem:[%s16996_s1 + $0x178] sm:$0xff] %vm2718_vm9, %v4781_v11   ;;  %v6049_v57 = vsel %vm451_vm0, %v8791_v31, %v8790_v61  ;;  %v6104_v46 = vsel %vm471_vm5, %v8805_v28, %v6100_v51 }
 0x2a7   :  { %v6014_v24 = vsel %vm451_vm0, %v8782_v53, %v8781_v26  ;;  %v8783_v22 = vld [vmem:[%s16995_s0 + $0x6b3] sm:$0x4]   ;;  %v8773_v2 = vld [vmem:[%s16995_s0 + $0x664] sm:$0x2]   ;;  %5934 = vrot.lane.b32.xlu0 %v5933_v47, %s9083_s3  ;;  %v8792_v35 = vld [vmem:[%s16995_s0 + $0x87] sm:$0x4]   ;;  %v6108_v9 = vsel %vm475_vm6, %v8806_v59, %v6104_v46  ;;  %v4851_v47 = vpop.permute.xlu1 %4850  }
 0x2a8   :  { %v8784_v25 = vld [vmem:[%s16995_s0 + $0x6f2] sm:$0x8]   ;;  %v6018_v18 = vsel %vm455_vm1, %v8783_v22, %v6014_v24  ;;  %v8774_v50 = vld [vmem:[%s16995_s0 + $0x6a3] sm:$0x4]   ;;  %v5979_v23 = vsel %vm451_vm0, %v8773_v2, %v8772_v38  ;;  %v8793_v16 = vld [vmem:[%s16995_s0 + $0xc6] sm:$0x8]   ;;  %v6053_v15 = vsel %vm455_vm1, %v8792_v35, %v6049_v57 }
 0x2a9   :  { %v8785_v58 = vld [vmem:[%s16995_s0 + $0x731] sm:$0x10]   ;;  %v6022_v27 = vsel %vm459_vm2, %v8784_v25, %v6018_v18  ;;  %v8775_v41 = vld [vmem:[%s16995_s0 + $0x6e2] sm:$0x8]   ;;  %v5983_v0 = vsel %vm455_vm1, %v8774_v50, %v5979_v23  ;;  %v8794_v44 = vld [vmem:[%s16995_s0 + $0x105] sm:$0x10]   ;;  %v6057_v55 = vsel %vm459_vm2, %v8793_v16, %v6053_v15 }
 0x2aa   :  { %v8786_v34 = vld [vmem:[%s16995_s0 + $0x770] sm:$0x20]   ;;  %v6026_v3 = vsel %vm463_vm3, %v8785_v58, %v6022_v27  ;;  %v8776_v40 = vld [vmem:[%s16995_s0 + $0x721] sm:$0x10]   ;;  %v5987_v33 = vsel %vm459_vm2, %v8775_v41, %v5983_v0  ;;  %v8795_v48 = vld [vmem:[%s16995_s0 + $0x144] sm:$0x20]   ;;  %v6061_v24 = vsel %vm463_vm3, %v8794_v44, %v6057_v55 }
 0x2ab   :  { %v8787_v45 = vld [vmem:[%s16995_s0 + $0x7af] sm:$0x40]   ;;  %v8777_v60 = vld [vmem:[%s16995_s0 + $0x760] sm:$0x20]   ;;  %v6030_v17 = vsel %vm467_vm4, %v8786_v34, %v6026_v3  ;;  %v5991_v39 = vsel %vm463_vm3, %v8776_v40, %v5987_v33  ;;  %v8796_v8 = vld [vmem:[%s16995_s0 + $0x183] sm:$0x40]   ;;  %v6065_v18 = vsel %vm467_vm4, %v8795_v48, %v6061_v24 }
 0x2ac   :  { %v8788_v12 = vld [vmem:[%s16995_s0 + $0x7ee] sm:$0x80]   ;;  %v8778_v21 = vld [vmem:[%s16995_s0 + $0x79f] sm:$0x40]   ;;  %v6034_v6 = vsel %vm471_vm5, %v8787_v45, %v6030_v17  ;;  %v5995_v62 = vsel %vm467_vm4, %v8777_v60, %v5991_v39  ;;  %v8817_v26 = vld [vmem:[%s16995_s0 + $0x39] sm:$0x1]   ;;  %v6069_v7 = vsel %vm471_vm5, %v8796_v8, %v6065_v18 }
 0x2ad   :  { %v8779_v1 = vld [vmem:[%s16995_s0 + $0x7de] sm:$0x80]   ;;  %v6038_v14 = vsel %vm475_vm6, %v8788_v12, %v6034_v6  ;;  %v5999_v52 = vsel %vm471_vm5, %v8778_v21, %v5995_v62  ;;  %v8818_v53 = vld [vmem:[%s16995_s0 + $0x78] sm:$0x2]   ;;  %8457 = vst.msk [vmem:[%s16996_s1 + $0x158] sm:$0xff] %vm2718_vm9, %v4746_v20   ;;  %v6073_v5 = vsel %vm475_vm6, %v8797_v43, %v6069_v7  ;;  %8484 = vst.msk [vmem:[%s16996_s1 + $0x1b8] sm:$0xff] %vm2718_vm9, %v4851_v47   ;;  %v4816_v62 = vpop.permute.xlu0 %4815  }
 0x2ae   :  { %6039 = vrot.lane.b32.xlu1 %v6038_v14, %s9083_s3  ;;  %v6003_v37 = vsel %vm475_vm6, %v8779_v1, %v5999_v52  ;;  %v8819_v36 = vld [vmem:[%s16995_s0 + $0xb7] sm:$0x4]   ;;  %v6154_v22 = vsel %vm451_vm0, %v8818_v53, %v8817_v26  ;;  %v8809_v38 = vld [vmem:[%s16995_s0 + $0x68] sm:$0x2]   ;;  %8475 = vst.msk [vmem:[%s16996_s1 + $0x198] sm:$0xff] %vm2718_vm9, %v4816_v62  }
 0x2af   :  { %6004 = vrot.lane.b32.xlu0 %v6003_v37, %s9083_s3  ;;  %v8820_v25 = vld [vmem:[%s16995_s0 + $0xf6] sm:$0x8]   ;;  %v6158_v34 = vsel %vm455_vm1, %v8819_v36, %v6154_v22  ;;  %v8810_v2 = vld [vmem:[%s16995_s0 + $0xa7] sm:$0x4]   ;;  %v6119_v23 = vsel %vm451_vm0, %v8809_v38, %v8808_v54 }
 0x2b0   :  { %v8821_v58 = vld [vmem:[%s16995_s0 + $0x135] sm:$0x10]   ;;  %v6162_v27 = vsel %vm459_vm2, %v8820_v25, %v6158_v34  ;;  %v8811_v50 = vld [vmem:[%s16995_s0 + $0xe6] sm:$0x8]   ;;  %v6123_v0 = vsel %vm455_vm1, %v8810_v2, %v6119_v23 }
 0x2b1   :  { %v8822_v29 = vld [vmem:[%s16995_s0 + $0x174] sm:$0x20]   ;;  %v6166_v3 = vsel %vm463_vm3, %v8821_v58, %v6162_v27  ;;  %v8812_v41 = vld [vmem:[%s16995_s0 + $0x125] sm:$0x10]   ;;  %v6127_v33 = vsel %vm459_vm2, %v8811_v50, %v6123_v0 }
 0x2b2   :  { %v8823_v45 = vld [vmem:[%s16995_s0 + $0x1b3] sm:$0x40]   ;;  %6109 = vrot.lane.b32.xlu1 %v6108_v9, %s9083_s3  ;;  %v8813_v40 = vld [vmem:[%s16995_s0 + $0x164] sm:$0x20]   ;;  %v6170_v17 = vsel %vm467_vm4, %v8822_v29, %v6166_v3  ;;  %v6131_v19 = vsel %vm463_vm3, %v8812_v41, %v6127_v33  ;;  %v4921_v9 = vpop.permute.xlu1 %4920  }
 0x2b3   :  { %v8824_v12 = vld [vmem:[%s16995_s0 + $0x1f2] sm:$0x80]   ;;  %v8814_v60 = vld [vmem:[%s16995_s0 + $0x1a3] sm:$0x40]   ;;  %6074 = vrot.lane.b32.xlu0 %v6073_v5, %s9083_s3  ;;  %v6174_v6 = vsel %vm471_vm5, %v8823_v45, %v6170_v17  ;;  %v6135_v32 = vsel %vm467_vm4, %v8813_v40, %v6131_v19  ;;  %8502 = vst.msk [vmem:[%s16996_s1 + $0x1f8] sm:$0xff] %vm2718_vm9, %v4921_v9   ;;  %v4886_v17 = vpop.permute.xlu0 %4885  }
 0x2b4   :  { %v8815_v21 = vld [vmem:[%s16995_s0 + $0x1e2] sm:$0x80]   ;;  %v8835_v1 = vld [vmem:[%s16995_s0 + $0x219] sm:$0x1]   ;;  %v6178_v39 = vsel %vm475_vm6, %v8824_v12, %v6174_v6  ;;  %v6139_v10 = vsel %vm471_vm5, %v8814_v60, %v6135_v32  ;;  %8493 = vst.msk [vmem:[%s16996_s1 + $0x1d8] sm:$0xff] %vm2718_vm9, %v4886_v17  }
 0x2b5   :  { %v8836_v13 = vld [vmem:[%s16995_s0 + $0x258] sm:$0x2]   ;;  %v8826_v61 = vld [vmem:[%s16995_s0 + $0x209] sm:$0x1]   ;;  %v6143_v4 = vsel %vm475_vm6, %v8815_v21, %v6139_v10 }
 0x2b6   :  { %v6224_v42 = vsel %vm451_vm0, %v8836_v13, %v8835_v1  ;;  %v8837_v30 = vld [vmem:[%s16995_s0 + $0x297] sm:$0x4]   ;;  %6179 = vrot.lane.b32.xlu1 %v6178_v39, %s9083_s3  ;;  %v8827_v31 = vld [vmem:[%s16995_s0 + $0x248] sm:$0x2]  }
 0x2b7   :  { %v8838_v56 = vld [vmem:[%s16995_s0 + $0x2d6] sm:$0x8]   ;;  %v6228_v63 = vsel %vm455_vm1, %v8837_v30, %v6224_v42  ;;  %v8828_v52 = vld [vmem:[%s16995_s0 + $0x287] sm:$0x4]   ;;  %v6189_v35 = vsel %vm451_vm0, %v8827_v31, %v8826_v61  ;;  %6144 = vrot.lane.b32.xlu0 %v6143_v4, %s9083_s3 }
 0x2b8   :  { %v8839_v14 = vld [vmem:[%s16995_s0 + $0x315] sm:$0x10]   ;;  %v6232_v59 = vsel %vm459_vm2, %v8838_v56, %v6228_v63  ;;  %v8829_v16 = vld [vmem:[%s16995_s0 + $0x2c6] sm:$0x8]   ;;  %v6193_v48 = vsel %vm455_vm1, %v8828_v52, %v6189_v35 }
 0x2b9   :  { %v8840_v49 = vld [vmem:[%s16995_s0 + $0x354] sm:$0x20]   ;;  %v6236_v57 = vsel %vm463_vm3, %v8839_v14, %v6232_v59  ;;  %v8830_v44 = vld [vmem:[%s16995_s0 + $0x305] sm:$0x10]   ;;  %v6197_v55 = vsel %vm459_vm2, %v8829_v16, %v6193_v48 }
 0x2ba   :  { %v8841_v28 = vld [vmem:[%s16995_s0 + $0x393] sm:$0x40]   ;;  %v8831_v37 = vld [vmem:[%s16995_s0 + $0x344] sm:$0x20]   ;;  %v6240_v15 = vsel %vm467_vm4, %v8840_v49, %v6236_v57  ;;  %v6201_v24 = vsel %vm463_vm3, %v8830_v44, %v6197_v55 }
 0x2bb   :  { %v8842_v11 = vld [vmem:[%s16995_s0 + $0x3d2] sm:$0x80]   ;;  %v8832_v8 = vld [vmem:[%s16995_s0 + $0x383] sm:$0x40]   ;;  %v6244_v51 = vsel %vm471_vm5, %v8841_v28, %v6240_v15  ;;  %v6205_v18 = vsel %vm467_vm4, %v8831_v37, %v6201_v24 }
 0x2bc   :  { %v8833_v43 = vld [vmem:[%s16995_s0 + $0x3c2] sm:$0x80]   ;;  %v8853_v20 = vld [vmem:[%s16995_s0 + $0x239] sm:$0x1]   ;;  %v6248_v46 = vsel %vm475_vm6, %v8842_v11, %v6244_v51  ;;  %v6209_v7 = vsel %vm471_vm5, %v8832_v8, %v6205_v18  ;;  %v16028_v18 = vpop.permute.xlu0 %4955  }
 0x2bd   :  { %v8854_v26 = vld [vmem:[%s16995_s0 + $0x278] sm:$0x2]   ;;  %6249 = vrot.lane.b32.xlu1 %v6248_v46, %s9083_s3  ;;  %v8844_v12 = vld [vmem:[%s16995_s0 + $0x229] sm:$0x1]   ;;  %v6213_v3 = vsel %vm475_vm6, %v8833_v43, %v6209_v7  ;;  %4958 = vst.msk [vmem:[%s16996_s1] sm:$0xff] %vm4957_vm10, %v16028_v18  }
 0x2be   :  { %v8855_v53 = vld [vmem:[%s16995_s0 + $0x2b7] sm:$0x4]   ;;  %v6294_v22 = vsel %vm451_vm0, %v8854_v26, %v8853_v20  ;;  %v8845_v54 = vld [vmem:[%s16995_s0 + $0x268] sm:$0x2]   ;;  %6214 = vrot.lane.b32.xlu0 %v6213_v3, %s9083_s3  ;;  %v16002_v20 = vpop.permute.xlu1 %4989   ;;  %v9035_v18 = vld [vmem:[%s16995_s0 + $0x4bb] sm:$0x4]  }
 0x2bf   :  { %v8856_v36 = vld [vmem:[%s16995_s0 + $0x2f6] sm:$0x8]   ;;  %v6298_v34 = vsel %vm455_vm1, %v8855_v53, %v6294_v22  ;;  %v6259_v38 = vsel %vm451_vm0, %v8845_v54, %v8844_v12  ;;  %v8846_v2 = vld [vmem:[%s16995_s0 + $0x2a7] sm:$0x4]   ;;  %8519 = vst.msk [vmem:[%s16996_s1 + $0x20] sm:$0xff] %vm4957_vm10, %v16002_v20  }
 0x2c0   :  { %v8857_v25 = vld [vmem:[%s16995_s0 + $0x335] sm:$0x10]   ;;  %v6302_v27 = vsel %vm459_vm2, %v8856_v36, %v6298_v34  ;;  %v8847_v50 = vld [vmem:[%s16995_s0 + $0x2e6] sm:$0x8]   ;;  %v6263_v41 = vsel %vm455_vm1, %v8846_v2, %v6259_v38 }
 0x2c1   :  { %v8858_v58 = vld [vmem:[%s16995_s0 + $0x374] sm:$0x20]   ;;  %v8848_v5 = vld [vmem:[%s16995_s0 + $0x325] sm:$0x10]   ;;  %v6306_v23 = vsel %vm463_vm3, %v8857_v25, %v6302_v27  ;;  %v6267_v21 = vsel %vm459_vm2, %v8847_v50, %v6263_v41 }
 0x2c2   :  { %v8859_v29 = vld [vmem:[%s16995_s0 + $0x3b3] sm:$0x40]   ;;  %v8849_v40 = vld [vmem:[%s16995_s0 + $0x364] sm:$0x20]   ;;  %v6310_v0 = vsel %vm467_vm4, %v8858_v58, %v6306_v23  ;;  %v6271_v42 = vsel %vm463_vm3, %v8848_v5, %v6267_v21 }
 0x2c3   :  { %v8860_v45 = vld [vmem:[%s16995_s0 + $0x3f2] sm:$0x80]   ;;  %v8850_v60 = vld [vmem:[%s16995_s0 + $0x3a3] sm:$0x40]   ;;  %v6314_v33 = vsel %vm471_vm5, %v8859_v29, %v6310_v0  ;;  %v6275_v63 = vsel %vm467_vm4, %v8849_v40, %v6271_v42 }
 0x2c4   :  { %v8851_v47 = vld [vmem:[%s16995_s0 + $0x3e2] sm:$0x80]   ;;  %v8871_v1 = vld [vmem:[%s16995_s0 + $0x419] sm:$0x1]   ;;  %v6318_v19 = vsel %vm475_vm6, %v8860_v45, %v6314_v33  ;;  %v6279_v32 = vsel %vm471_vm5, %v8850_v60, %v6275_v63 }
 0x2c5   :  { %v8872_v13 = vld [vmem:[%s16995_s0 + $0x458] sm:$0x2]   ;;  %v8862_v62 = vld [vmem:[%s16995_s0 + $0x409] sm:$0x1]   ;;  %6319 = vrot.lane.b32.xlu1 %v6318_v19, %s9083_s3  ;;  %v6283_v10 = vsel %vm475_vm6, %v8851_v47, %v6279_v32 }
 0x2c6   :  { %v8873_v6 = vld [vmem:[%s16995_s0 + $0x497] sm:$0x4]   ;;  %v6364_v30 = vsel %vm451_vm0, %v8872_v13, %v8871_v1  ;;  %v8863_v61 = vld [vmem:[%s16995_s0 + $0x448] sm:$0x2]   ;;  %6284 = vrot.lane.b32.xlu0 %v6283_v10, %s9083_s3 }
 0x2c7   :  { %v8874_v56 = vld [vmem:[%s16995_s0 + $0x4d6] sm:$0x8]   ;;  %v6368_v49 = vsel %vm455_vm1, %v8873_v6, %v6364_v30  ;;  %v8864_v31 = vld [vmem:[%s16995_s0 + $0x487] sm:$0x4]   ;;  %v6329_v35 = vsel %vm451_vm0, %v8863_v61, %v8862_v62  ;;  %v16102_v62 = vpop.permute.xlu1 %5059  }
 0x2c8   :  { %v8875_v14 = vld [vmem:[%s16995_s0 + $0x515] sm:$0x10]   ;;  %v6372_v59 = vsel %vm459_vm2, %v8874_v56, %v6368_v49  ;;  %v8865_v52 = vld [vmem:[%s16995_s0 + $0x4c6] sm:$0x8]   ;;  %v6333_v15 = vsel %vm455_vm1, %v8864_v31, %v6329_v35  ;;  %8537 = vst.msk [vmem:[%s16996_s1 + $0x60] sm:$0xff] %vm4957_vm10, %v16102_v62  }
 0x2c9   :  { %v8876_v39 = vld [vmem:[%s16995_s0 + $0x554] sm:$0x20]   ;;  %v6376_v57 = vsel %vm463_vm3, %v8875_v14, %v6372_v59  ;;  %v8866_v16 = vld [vmem:[%s16995_s0 + $0x505] sm:$0x10]   ;;  %v6337_v55 = vsel %vm459_vm2, %v8865_v52, %v6333_v15  ;;  %v16128_v15 = vpop.permute.xlu0 %5024  }
 0x2ca   :  { %v8877_v28 = vld [vmem:[%s16995_s0 + $0x593] sm:$0x40]   ;;  %v8867_v44 = vld [vmem:[%s16995_s0 + $0x544] sm:$0x20]   ;;  %v6380_v4 = vsel %vm467_vm4, %v8876_v39, %v6376_v57  ;;  %v6341_v22 = vsel %vm463_vm3, %v8866_v16, %v6337_v55  ;;  %8528 = vst.msk [vmem:[%s16996_s1 + $0x40] sm:$0xff] %vm4957_vm10, %v16128_v15  }
 0x2cb   :  { %v8878_v11 = vld [vmem:[%s16995_s0 + $0x5d2] sm:$0x80]   ;;  %v8868_v37 = vld [vmem:[%s16995_s0 + $0x583] sm:$0x40]   ;;  %v6384_v51 = vsel %vm471_vm5, %v8877_v28, %v6380_v4  ;;  %v6345_v34 = vsel %vm467_vm4, %v8867_v44, %v6341_v22 }
 0x2cc   :  { %v8869_v48 = vld [vmem:[%s16995_s0 + $0x5c2] sm:$0x80]   ;;  %v8889_v8 = vld [vmem:[%s16995_s0 + $0x439] sm:$0x1]   ;;  %v6388_v24 = vsel %vm475_vm6, %v8878_v11, %v6384_v51  ;;  %v6349_v27 = vsel %vm471_vm5, %v8868_v37, %v6345_v34 }
 0x2cd   :  { %v8890_v43 = vld [vmem:[%s16995_s0 + $0x478] sm:$0x2]   ;;  %6389 = vrot.lane.b32.xlu1 %v6388_v24, %s9083_s3  ;;  %v8880_v12 = vld [vmem:[%s16995_s0 + $0x429] sm:$0x1]   ;;  %v6353_v23 = vsel %vm475_vm6, %v8869_v48, %v6349_v27 }
 0x2ce   :  { %v6434_v26 = vsel %vm451_vm0, %v8890_v43, %v8889_v8  ;;  %v8891_v53 = vld [vmem:[%s16995_s0 + $0x4b7] sm:$0x4]   ;;  %v8881_v54 = vld [vmem:[%s16995_s0 + $0x468] sm:$0x2]   ;;  %6354 = vrot.lane.b32.xlu0 %v6353_v23, %s9083_s3 }
 0x2cf   :  { %v8892_v36 = vld [vmem:[%s16995_s0 + $0x4f6] sm:$0x8]   ;;  %v6438_v25 = vsel %vm455_vm1, %v8891_v53, %v6434_v26  ;;  %v8882_v7 = vld [vmem:[%s16995_s0 + $0x4a7] sm:$0x4]   ;;  %v6399_v2 = vsel %vm451_vm0, %v8881_v54, %v8880_v12 }
 0x2d0   :  { %v8893_v46 = vld [vmem:[%s16995_s0 + $0x535] sm:$0x10]   ;;  %v6442_v45 = vsel %vm459_vm2, %v8892_v36, %v6438_v25  ;;  %v8883_v50 = vld [vmem:[%s16995_s0 + $0x4e6] sm:$0x8]   ;;  %v6403_v40 = vsel %vm455_vm1, %v8882_v7, %v6399_v2 }
 0x2d1   :  { %v8894_v58 = vld [vmem:[%s16995_s0 + $0x574] sm:$0x20]   ;;  %v6446_v38 = vsel %vm463_vm3, %v8893_v46, %v6442_v45  ;;  %v8884_v5 = vld [vmem:[%s16995_s0 + $0x525] sm:$0x10]   ;;  %v6407_v21 = vsel %vm459_vm2, %v8883_v50, %v6403_v40 }
 0x2d2   :  { %v8895_v29 = vld [vmem:[%s16995_s0 + $0x5b3] sm:$0x40]   ;;  %v8885_v3 = vld [vmem:[%s16995_s0 + $0x564] sm:$0x20]   ;;  %v6450_v41 = vsel %vm467_vm4, %v8894_v58, %v6446_v38  ;;  %v6411_v42 = vsel %vm463_vm3, %v8884_v5, %v6407_v21  ;;  %v16202_v21 = vpop.permute.xlu1 %5129  }
 0x2d3   :  { %v8896_v9 = vld [vmem:[%s16995_s0 + $0x5f2] sm:$0x80]   ;;  %v8886_v60 = vld [vmem:[%s16995_s0 + $0x5a3] sm:$0x40]   ;;  %v6454_v0 = vsel %vm471_vm5, %v8895_v29, %v6450_v41  ;;  %v6415_v19 = vsel %vm467_vm4, %v8885_v3, %v6411_v42  ;;  %v8946_v42 = vld [vmem:[%s16995_s0 + $0xda] sm:$0x8]  }
 0x2d4   :  { %v8887_v47 = vld [vmem:[%s16995_s0 + $0x5e2] sm:$0x80]   ;;  %v8907_v17 = vld [vmem:[%s16995_s0 + $0x619] sm:$0x1]   ;;  %v6458_v33 = vsel %vm475_vm6, %v8896_v9, %v6454_v0  ;;  %v6419_v32 = vsel %vm471_vm5, %v8886_v60, %v6415_v19  ;;  %v8944_v0 = vld [vmem:[%s16995_s0 + $0x5c] sm:$0x2]  }
 0x2d5   :  { %v8908_v1 = vld [vmem:[%s16995_s0 + $0x658] sm:$0x2]   ;;  %6459 = vrot.lane.b32.xlu1 %v6458_v33, %s9083_s3  ;;  %v8898_v28 = vld [vmem:[%s16995_s0 + $0x609] sm:$0x1]   ;;  %v6423_v57 = vsel %vm475_vm6, %v8887_v47, %v6419_v32  ;;  %v8945_v33 = vld [vmem:[%s16995_s0 + $0x9b] sm:$0x4]  }
 0x2d6   :  { %v8909_v13 = vld [vmem:[%s16995_s0 + $0x697] sm:$0x4]   ;;  %v6504_v30 = vsel %vm451_vm0, %v8908_v1, %v8907_v17  ;;  %v8899_v11 = vld [vmem:[%s16995_s0 + $0x648] sm:$0x2]   ;;  %6424 = vrot.lane.b32.xlu0 %v6423_v57, %s9083_s3  ;;  %v8943_v17 = vld [vmem:[%s16995_s0 + $0x1d] sm:$0x1]  }
 0x2d7   :  { %v8910_v6 = vld [vmem:[%s16995_s0 + $0x6d6] sm:$0x8]   ;;  %v6508_v63 = vsel %vm455_vm1, %v8909_v13, %v6504_v30  ;;  %v6469_v61 = vsel %vm451_vm0, %v8899_v11, %v8898_v28  ;;  %v8900_v31 = vld [vmem:[%s16995_s0 + $0x687] sm:$0x4]   ;;  %v8947_v30 = vld [vmem:[%s16995_s0 + $0x119] sm:$0x10]   ;;  %v16228_v28 = vpop.permute.xlu0 %5094  }
 0x2d8   :  { %v8911_v56 = vld [vmem:[%s16995_s0 + $0x715] sm:$0x10]   ;;  %v6512_v59 = vsel %vm459_vm2, %v8910_v6, %v6508_v63  ;;  %v8901_v52 = vld [vmem:[%s16995_s0 + $0x6c6] sm:$0x8]   ;;  %v6473_v16 = vsel %vm455_vm1, %v8900_v31, %v6469_v61  ;;  %v6644_v6 = vsel %vm451_vm0, %v8944_v0, %v8943_v17  ;;  %v8948_v19 = vld [vmem:[%s16995_s0 + $0x158] sm:$0x20]  }
 0x2d9   :  { %v8912_v14 = vld [vmem:[%s16995_s0 + $0x754] sm:$0x20]   ;;  %v8902_v10 = vld [vmem:[%s16995_s0 + $0x705] sm:$0x10]   ;;  %v6516_v35 = vsel %vm463_vm3, %v8911_v56, %v6512_v59  ;;  %v6477_v8 = vsel %vm459_vm2, %v8901_v52, %v6473_v16  ;;  %v8949_v63 = vld [vmem:[%s16995_s0 + $0x197] sm:$0x40]  }
 0x2da   :  { %v8913_v39 = vld [vmem:[%s16995_s0 + $0x793] sm:$0x40]   ;;  %v8903_v44 = vld [vmem:[%s16995_s0 + $0x744] sm:$0x20]   ;;  %v6520_v48 = vsel %vm467_vm4, %v8912_v14, %v6516_v35  ;;  %v6481_v53 = vsel %vm463_vm3, %v8902_v10, %v6477_v8  ;;  %v8934_v59 = vld [vmem:[%s16995_s0 + $0xd] sm:$0x1]  }
 0x2db   :  { %v8914_v49 = vld [vmem:[%s16995_s0 + $0x7d2] sm:$0x80]   ;;  %v8904_v37 = vld [vmem:[%s16995_s0 + $0x783] sm:$0x40]   ;;  %v6524_v26 = vsel %vm471_vm5, %v8913_v39, %v6520_v48  ;;  %v6485_v58 = vsel %vm467_vm4, %v8903_v44, %v6481_v53  ;;  %v6648_v39 = vsel %vm455_vm1, %v8945_v33, %v6644_v6  ;;  %v8935_v61 = vld [vmem:[%s16995_s0 + $0x4c] sm:$0x2]  }
 0x2dc   :  { %v8905_v4 = vld [vmem:[%s16995_s0 + $0x7c2] sm:$0x80]   ;;  %v8925_v43 = vld [vmem:[%s16995_s0 + $0x639] sm:$0x1]   ;;  %v6528_v25 = vsel %vm475_vm6, %v8914_v49, %v6524_v26  ;;  %v6489_v12 = vsel %vm471_vm5, %v8904_v37, %v6485_v58  ;;  %v8950_v49 = vld [vmem:[%s16995_s0 + $0x1d6] sm:$0x80]   ;;  %v6652_v32 = vsel %vm459_vm2, %v8946_v42, %v6648_v39  ;;  %v6609_v57 = vsel %vm451_vm0, %v8935_v61, %v8934_v59 }
 0x2dd   :  { %v8926_v51 = vld [vmem:[%s16995_s0 + $0x678] sm:$0x2]   ;;  %v8916_v45 = vld [vmem:[%s16995_s0 + $0x629] sm:$0x1]   ;;  %6529 = vrot.lane.b32.xlu1 %v6528_v25, %s9083_s3  ;;  %v6493_v2 = vsel %vm475_vm6, %v8905_v4, %v6489_v12  ;;  %v8936_v31 = vld [vmem:[%s16995_s0 + $0x8b] sm:$0x4]   ;;  %v6656_v10 = vsel %vm463_vm3, %v8947_v30, %v6652_v32 }
 0x2de   :  { %v8927_v55 = vld [vmem:[%s16995_s0 + $0x6b7] sm:$0x4]   ;;  %v6574_v36 = vsel %vm451_vm0, %v8926_v51, %v8925_v43  ;;  %v8917_v7 = vld [vmem:[%s16995_s0 + $0x668] sm:$0x2]   ;;  %6494 = vrot.lane.b32.xlu0 %v6493_v2, %s9083_s3  ;;  %v8937_v35 = vld [vmem:[%s16995_s0 + $0xca] sm:$0x8]   ;;  %v6660_v4 = vsel %vm467_vm4, %v8948_v19, %v6656_v10  ;;  %v6613_v48 = vsel %vm455_vm1, %v8936_v31, %v6609_v57 }
 0x2df   :  { %v8928_v46 = vld [vmem:[%s16995_s0 + $0x6f6] sm:$0x8]   ;;  %v6578_v29 = vsel %vm455_vm1, %v8927_v55, %v6574_v36  ;;  %v8918_v27 = vld [vmem:[%s16995_s0 + $0x6a7] sm:$0x4]   ;;  %v6539_v5 = vsel %vm451_vm0, %v8917_v7, %v8916_v45  ;;  %v8938_v16 = vld [vmem:[%s16995_s0 + $0x109] sm:$0x10]   ;;  %v6664_v55 = vsel %vm471_vm5, %v8949_v63, %v6660_v4  ;;  %v6617_v26 = vsel %vm459_vm2, %v8937_v35, %v6613_v48 }
 0x2e0   :  { %v8929_v24 = vld [vmem:[%s16995_s0 + $0x735] sm:$0x10]   ;;  %v6582_v54 = vsel %vm459_vm2, %v8928_v46, %v6578_v29  ;;  %v8919_v38 = vld [vmem:[%s16995_s0 + $0x6e6] sm:$0x8]   ;;  %v6543_v60 = vsel %vm455_vm1, %v8918_v27, %v6539_v5  ;;  %v8939_v44 = vld [vmem:[%s16995_s0 + $0x148] sm:$0x20]   ;;  %v16302_v27 = vpop.permute.xlu1 %5199  }
 0x2e1   :  { %v8930_v22 = vld [vmem:[%s16995_s0 + $0x774] sm:$0x20]   ;;  %v6586_v50 = vsel %vm463_vm3, %v8929_v24, %v6582_v54  ;;  %v8920_v3 = vld [vmem:[%s16995_s0 + $0x725] sm:$0x10]   ;;  %v6547_v13 = vsel %vm459_vm2, %v8919_v38, %v6543_v60  ;;  %v8940_v8 = vld [vmem:[%s16995_s0 + $0x187] sm:$0x40]   ;;  %v6668_v24 = vsel %vm475_vm6, %v8950_v49, %v6664_v55 }
 0x2e2   :  { %v8931_v9 = vld [vmem:[%s16995_s0 + $0x7b3] sm:$0x40]   ;;  %v8921_v23 = vld [vmem:[%s16995_s0 + $0x764] sm:$0x20]   ;;  %v6590_v40 = vsel %vm467_vm4, %v8930_v22, %v6586_v50  ;;  %v6551_v14 = vsel %vm463_vm3, %v8920_v3, %v6547_v13  ;;  %v8941_v43 = vld [vmem:[%s16995_s0 + $0x1c6] sm:$0x80]   ;;  %v6621_v22 = vsel %vm463_vm3, %v8938_v16, %v6617_v26 }
 0x2e3   :  { %v8932_v34 = vld [vmem:[%s16995_s0 + $0x7f2] sm:$0x80]   ;;  %v8922_v41 = vld [vmem:[%s16995_s0 + $0x7a3] sm:$0x40]   ;;  %v6594_v1 = vsel %vm471_vm5, %v8931_v9, %v6590_v40  ;;  %v6555_v11 = vsel %vm467_vm4, %v8921_v23, %v6551_v14  ;;  %v8961_v51 = vld [vmem:[%s16995_s0 + $0x3d] sm:$0x1]  }
 0x2e4   :  { %v8923_v47 = vld [vmem:[%s16995_s0 + $0x7e2] sm:$0x80]   ;;  %v6598_v56 = vsel %vm475_vm6, %v8932_v34, %v6594_v1  ;;  %v6559_v52 = vsel %vm471_vm5, %v8922_v41, %v6555_v11  ;;  %v8962_v53 = vld [vmem:[%s16995_s0 + $0x7c] sm:$0x2]   ;;  %v6625_v34 = vsel %vm467_vm4, %v8939_v44, %v6621_v22  ;;  %v8952_v54 = vld [vmem:[%s16995_s0 + $0x2d] sm:$0x1]   ;;  %v16328_v1 = vpop.permute.xlu0 %5164  }
 0x2e5   :  { %6599 = vrot.lane.b32.xlu1 %v6598_v56, %s9083_s3  ;;  %v6563_v37 = vsel %vm475_vm6, %v8923_v47, %v6559_v52  ;;  %v8963_v36 = vld [vmem:[%s16995_s0 + $0xbb] sm:$0x4]   ;;  %v6714_v25 = vsel %vm451_vm0, %v8962_v53, %v8961_v51  ;;  %v8953_v7 = vld [vmem:[%s16995_s0 + $0x6c] sm:$0x2]   ;;  %v6629_v38 = vsel %vm471_vm5, %v8940_v8, %v6625_v34  ;;  %8555 = vst.msk [vmem:[%s16996_s1 + $0xa0] sm:$0xff] %vm4957_vm10, %v16202_v21  }
 0x2e6   :  { %6564 = vrot.lane.b32.xlu0 %v6563_v37, %s9083_s3  ;;  %v8964_v46 = vld [vmem:[%s16995_s0 + $0xfa] sm:$0x8]   ;;  %v6718_v45 = vsel %vm455_vm1, %v8963_v36, %v6714_v25  ;;  %v6679_v50 = vsel %vm451_vm0, %v8953_v7, %v8952_v54  ;;  %v8954_v5 = vld [vmem:[%s16995_s0 + $0xab] sm:$0x4]   ;;  %v6633_v41 = vsel %vm475_vm6, %v8941_v43, %v6629_v38  ;;  %8546 = vst.msk [vmem:[%s16996_s1 + $0x80] sm:$0xff] %vm4957_vm10, %v16228_v28  }
 0x2e7   :  { %v8965_v58 = vld [vmem:[%s16995_s0 + $0x139] sm:$0x10]   ;;  %v6722_v2 = vsel %vm459_vm2, %v8964_v46, %v6718_v45  ;;  %v8955_v3 = vld [vmem:[%s16995_s0 + $0xea] sm:$0x8]   ;;  %v6683_v60 = vsel %vm455_vm1, %v8954_v5, %v6679_v50  ;;  %8573 = vst.msk [vmem:[%s16996_s1 + $0xe0] sm:$0xff] %vm4957_vm10, %v16302_v27   ;;  %8564 = vst.msk [vmem:[%s16996_s1 + $0xc0] sm:$0xff] %vm4957_vm10, %v16328_v1  }
 0x2e8   :  { %v8966_v29 = vld [vmem:[%s16995_s0 + $0x178] sm:$0x20]   ;;  %v8956_v23 = vld [vmem:[%s16995_s0 + $0x129] sm:$0x10]   ;;  %v6726_v40 = vsel %vm463_vm3, %v8965_v58, %v6722_v2  ;;  %v6687_v6 = vsel %vm459_vm2, %v8955_v3, %v6683_v60  ;;  %v16428_v50 = vpop.permute.xlu0 %5234  }
 0x2e9   :  { %v8967_v9 = vld [vmem:[%s16995_s0 + $0x1b7] sm:$0x40]   ;;  %6669 = vrot.lane.b32.xlu1 %v6668_v24, %s9083_s3  ;;  %v8957_v47 = vld [vmem:[%s16995_s0 + $0x168] sm:$0x20]   ;;  %v6730_v13 = vsel %vm467_vm4, %v8966_v29, %v6726_v40  ;;  %v6691_v14 = vsel %vm463_vm3, %v8956_v23, %v6687_v6  ;;  %v16402_v24 = vpop.permute.xlu1 %5269   ;;  %8582 = vst.msk [vmem:[%s16996_s1 + $0x100] sm:$0xff] %vm4957_vm10, %v16428_v50  }
 0x2ea   :  { %v8968_v12 = vld [vmem:[%s16995_s0 + $0x1f6] sm:$0x80]   ;;  %v8958_v17 = vld [vmem:[%s16995_s0 + $0x1a7] sm:$0x40]   ;;  %6634 = vrot.lane.b32.xlu0 %v6633_v41, %s9083_s3  ;;  %v6734_v56 = vsel %vm471_vm5, %v8967_v9, %v6730_v13  ;;  %v6695_v32 = vsel %vm467_vm4, %v8957_v47, %v6691_v14  ;;  %8591 = vst.msk [vmem:[%s16996_s1 + $0x120] sm:$0xff] %vm4957_vm10, %v16402_v24  }
 0x2eb   :  { %v8959_v0 = vld [vmem:[%s16995_s0 + $0x1e6] sm:$0x80]   ;;  %v8979_v33 = vld [vmem:[%s16995_s0 + $0x21d] sm:$0x1]   ;;  %v6738_v11 = vsel %vm475_vm6, %v8968_v12, %v6734_v56  ;;  %v6699_v10 = vsel %vm471_vm5, %v8958_v17, %v6695_v32 }
 0x2ec   :  { %v8980_v42 = vld [vmem:[%s16995_s0 + $0x25c] sm:$0x2]   ;;  %v8970_v52 = vld [vmem:[%s16995_s0 + $0x20d] sm:$0x1]   ;;  %v6703_v37 = vsel %vm475_vm6, %v8959_v0, %v6699_v10 }
 0x2ed   :  { %v8981_v30 = vld [vmem:[%s16995_s0 + $0x29b] sm:$0x4]   ;;  %v6784_v39 = vsel %vm451_vm0, %v8980_v42, %v8979_v33  ;;  %6739 = vrot.lane.b32.xlu1 %v6738_v11, %s9083_s3  ;;  %v8971_v35 = vld [vmem:[%s16995_s0 + $0x24c] sm:$0x2]  }
 0x2ee   :  { %v8982_v19 = vld [vmem:[%s16995_s0 + $0x2da] sm:$0x8]   ;;  %v6788_v59 = vsel %vm455_vm1, %v8981_v30, %v6784_v39  ;;  %v8972_v16 = vld [vmem:[%s16995_s0 + $0x28b] sm:$0x4]   ;;  %v6749_v48 = vsel %vm451_vm0, %v8971_v35, %v8970_v52  ;;  %6704 = vrot.lane.b32.xlu0 %v6703_v37, %s9083_s3 }
 0x2ef   :  { %v8983_v63 = vld [vmem:[%s16995_s0 + $0x319] sm:$0x10]   ;;  %v6792_v57 = vsel %vm459_vm2, %v8982_v19, %v6788_v59  ;;  %v8973_v44 = vld [vmem:[%s16995_s0 + $0x2ca] sm:$0x8]   ;;  %v6753_v26 = vsel %vm455_vm1, %v8972_v16, %v6749_v48  ;;  %v5340_v19 = vpop.permute.xlu1 %5339  }
 0x2f0   :  { %v8984_v49 = vld [vmem:[%s16995_s0 + $0x358] sm:$0x20]   ;;  %v6796_v4 = vsel %vm463_vm3, %v8983_v63, %v6792_v57  ;;  %v8974_v8 = vld [vmem:[%s16995_s0 + $0x309] sm:$0x10]   ;;  %v6757_v25 = vsel %vm459_vm2, %v8973_v44, %v6753_v26  ;;  %8609 = vst.msk [vmem:[%s16996_s1 + $0x160] sm:$0xff] %vm4957_vm10, %v5340_v19  }
 0x2f1   :  { %v8985_v61 = vld [vmem:[%s16995_s0 + $0x397] sm:$0x40]   ;;  %v8975_v43 = vld [vmem:[%s16995_s0 + $0x348] sm:$0x20]   ;;  %v6800_v55 = vsel %vm467_vm4, %v8984_v49, %v6796_v4  ;;  %v6761_v12 = vsel %vm463_vm3, %v8974_v8, %v6757_v25  ;;  %v5305_v8 = vpop.permute.xlu0 %5304  }
 0x2f2   :  { %v8986_v31 = vld [vmem:[%s16995_s0 + $0x3d6] sm:$0x80]   ;;  %v8976_v51 = vld [vmem:[%s16995_s0 + $0x387] sm:$0x40]   ;;  %v6804_v22 = vsel %vm471_vm5, %v8985_v61, %v6800_v55  ;;  %v6765_v5 = vsel %vm467_vm4, %v8975_v43, %v6761_v12  ;;  %8600 = vst.msk [vmem:[%s16996_s1 + $0x140] sm:$0xff] %vm4957_vm10, %v5305_v8  }
 0x2f3   :  { %v8977_v53 = vld [vmem:[%s16995_s0 + $0x3c6] sm:$0x80]   ;;  %v8997_v36 = vld [vmem:[%s16995_s0 + $0x23d] sm:$0x1]   ;;  %v6808_v45 = vsel %vm475_vm6, %v8986_v31, %v6804_v22  ;;  %v6769_v60 = vsel %vm471_vm5, %v8976_v51, %v6765_v5 }
 0x2f4   :  { %v8998_v46 = vld [vmem:[%s16995_s0 + $0x27c] sm:$0x2]   ;;  %6809 = vrot.lane.b32.xlu1 %v6808_v45, %s9083_s3  ;;  %v8988_v23 = vld [vmem:[%s16995_s0 + $0x22d] sm:$0x1]   ;;  %v6773_v33 = vsel %vm475_vm6, %v8977_v53, %v6769_v60 }
 0x2f5   :  { %v6854_v58 = vsel %vm451_vm0, %v8998_v46, %v8997_v36  ;;  %v8999_v29 = vld [vmem:[%s16995_s0 + $0x2bb] sm:$0x4]   ;;  %v8989_v41 = vld [vmem:[%s16995_s0 + $0x26c] sm:$0x2]   ;;  %6774 = vrot.lane.b32.xlu0 %v6773_v33, %s9083_s3  ;;  %v5375_v1 = vpop.permute.xlu0 %5374  }
 0x2f6   :  { %v9000_v9 = vld [vmem:[%s16995_s0 + $0x2fa] sm:$0x8]   ;;  %v6858_v54 = vsel %vm455_vm1, %v8999_v29, %v6854_v58  ;;  %v8990_v40 = vld [vmem:[%s16995_s0 + $0x2ab] sm:$0x4]   ;;  %v6819_v17 = vsel %vm451_vm0, %v8989_v41, %v8988_v23  ;;  %8618 = vst.msk [vmem:[%s16996_s1 + $0x180] sm:$0xff] %vm4957_vm10, %v5375_v1  }
 0x2f7   :  { %v9001_v34 = vld [vmem:[%s16995_s0 + $0x339] sm:$0x10]   ;;  %v6862_v3 = vsel %vm459_vm2, %v9000_v9, %v6858_v54  ;;  %v8991_v0 = vld [vmem:[%s16995_s0 + $0x2ea] sm:$0x8]   ;;  %v6823_v30 = vsel %vm455_vm1, %v8990_v40, %v6819_v17 }
 0x2f8   :  { %v9002_v7 = vld [vmem:[%s16995_s0 + $0x378] sm:$0x20]   ;;  %v6866_v47 = vsel %vm463_vm3, %v9001_v34, %v6862_v3  ;;  %v8992_v13 = vld [vmem:[%s16995_s0 + $0x329] sm:$0x10]   ;;  %v6827_v49 = vsel %vm459_vm2, %v8991_v0, %v6823_v30  ;;  %v5410_v34 = vpop.permute.xlu1 %5409  }
 0x2f9   :  { %v9003_v38 = vld [vmem:[%s16995_s0 + $0x3b7] sm:$0x40]   ;;  %v8993_v6 = vld [vmem:[%s16995_s0 + $0x368] sm:$0x20]   ;;  %v6870_v42 = vsel %vm467_vm4, %v9002_v7, %v6866_v47  ;;  %v6831_v31 = vsel %vm463_vm3, %v8992_v13, %v6827_v49  ;;  %8627 = vst.msk [vmem:[%s16996_s1 + $0x1a0] sm:$0xff] %vm4957_vm10, %v5410_v34  }
 0x2fa   :  { %v9004_v2 = vld [vmem:[%s16995_s0 + $0x3f6] sm:$0x80]   ;;  %v8994_v56 = vld [vmem:[%s16995_s0 + $0x3a7] sm:$0x40]   ;;  %v6874_v63 = vsel %vm471_vm5, %v9003_v38, %v6870_v42  ;;  %v6835_v16 = vsel %vm467_vm4, %v8993_v6, %v6831_v31 }
 0x2fb   :  { %v8995_v14 = vld [vmem:[%s16995_s0 + $0x3e6] sm:$0x80]   ;;  %v9015_v39 = vld [vmem:[%s16995_s0 + $0x41d] sm:$0x1]   ;;  %v6878_v61 = vsel %vm475_vm6, %v9004_v2, %v6874_v63  ;;  %v6839_v43 = vsel %vm471_vm5, %v8994_v56, %v6835_v16 }
 0x2fc   :  { %v9016_v11 = vld [vmem:[%s16995_s0 + $0x45c] sm:$0x2]   ;;  %6879 = vrot.lane.b32.xlu1 %v6878_v61, %s9083_s3  ;;  %v9006_v4 = vld [vmem:[%s16995_s0 + $0x40d] sm:$0x1]   ;;  %v6843_v46 = vsel %vm475_vm6, %v8995_v14, %v6839_v43 }
 0x2fd   :  { %v9017_v32 = vld [vmem:[%s16995_s0 + $0x49b] sm:$0x4]   ;;  %v6924_v52 = vsel %vm451_vm0, %v9016_v11, %v9015_v39  ;;  %v9007_v48 = vld [vmem:[%s16995_s0 + $0x44c] sm:$0x2]   ;;  %6844 = vrot.lane.b32.xlu0 %v6843_v46, %s9083_s3  ;;  %v5480_v39 = vpop.permute.xlu1 %5479  }
 0x2fe   :  { %v9018_v59 = vld [vmem:[%s16995_s0 + $0x4da] sm:$0x8]   ;;  %v6928_v44 = vsel %vm455_vm1, %v9017_v32, %v6924_v52  ;;  %v6889_v55 = vsel %vm451_vm0, %v9007_v48, %v9006_v4  ;;  %v9008_v26 = vld [vmem:[%s16995_s0 + $0x48b] sm:$0x4]   ;;  %8645 = vst.msk [vmem:[%s16996_s1 + $0x1e0] sm:$0xff] %vm4957_vm10, %v5480_v39  }
 0x2ff   :  { %v9019_v10 = vld [vmem:[%s16995_s0 + $0x519] sm:$0x10]   ;;  %v6932_v51 = vsel %vm459_vm2, %v9018_v59, %v6928_v44  ;;  %v9009_v53 = vld [vmem:[%s16995_s0 + $0x4ca] sm:$0x8]   ;;  %v6893_v25 = vsel %vm455_vm1, %v9008_v26, %v6889_v55 }
 0x300   :  { %v9020_v57 = vld [vmem:[%s16995_s0 + $0x558] sm:$0x20]   ;;  %v9010_v36 = vld [vmem:[%s16995_s0 + $0x509] sm:$0x10]   ;;  %v6936_v22 = vsel %vm463_vm3, %v9019_v10, %v6932_v51  ;;  %v6897_v12 = vsel %vm459_vm2, %v9009_v53, %v6893_v25 }
 0x301   :  { %v9021_v35 = vld [vmem:[%s16995_s0 + $0x597] sm:$0x40]   ;;  %v9011_v58 = vld [vmem:[%s16995_s0 + $0x548] sm:$0x20]   ;;  %v6940_v45 = vsel %vm467_vm4, %v9020_v57, %v6936_v22  ;;  %v6901_v2 = vsel %vm463_vm3, %v9010_v36, %v6897_v12 }
 0x302   :  { %v9022_v37 = vld [vmem:[%s16995_s0 + $0x5d6] sm:$0x80]   ;;  %v9012_v29 = vld [vmem:[%s16995_s0 + $0x587] sm:$0x40]   ;;  %v6944_v38 = vsel %vm471_vm5, %v9021_v35, %v6940_v45  ;;  %v6905_v15 = vsel %vm467_vm4, %v9011_v58, %v6901_v2  ;;  %v5445_v35 = vpop.permute.xlu0 %5444  }
 0x303   :  { %v9013_v9 = vld [vmem:[%s16995_s0 + $0x5c6] sm:$0x80]   ;;  %v9033_v54 = vld [vmem:[%s16995_s0 + $0x43d] sm:$0x1]   ;;  %v6948_v62 = vsel %vm475_vm6, %v9022_v37, %v6944_v38  ;;  %v6909_v24 = vsel %vm471_vm5, %v9012_v29, %v6905_v15  ;;  %8636 = vst.msk [vmem:[%s16996_s1 + $0x1c0] sm:$0xff] %vm4957_vm10, %v5445_v35  }
 0x304   :  { %v9034_v7 = vld [vmem:[%s16995_s0 + $0x47c] sm:$0x2]   ;;  %6949 = vrot.lane.b32.xlu1 %v6948_v62, %s9083_s3  ;;  %v9024_v23 = vld [vmem:[%s16995_s0 + $0x42d] sm:$0x1]   ;;  %v6913_v60 = vsel %vm475_vm6, %v9013_v9, %v6909_v24  ;;  %v5550_v9 = vpop.permute.xlu1 %5549  }
 0x305   :  { %v6994_v20 = vsel %vm451_vm0, %v9034_v7, %v9033_v54  ;;  %v9036_v5 = vld [vmem:[%s16995_s0 + $0x4fa] sm:$0x8]   ;;  %v9025_v41 = vld [vmem:[%s16995_s0 + $0x46c] sm:$0x2]   ;;  %6914 = vrot.lane.b32.xlu0 %v6913_v60, %s9083_s3  ;;  %8663 = vst.msk [vmem:[%s16996_s1 + $0x28] sm:$0xff] %vm4957_vm10, %v5550_v9  }
 0x306   :  { %v9037_v3 = vld [vmem:[%s16995_s0 + $0x539] sm:$0x10]   ;;  %v6998_v21 = vsel %vm455_vm1, %v9035_v18, %v6994_v20  ;;  %v9026_v40 = vld [vmem:[%s16995_s0 + $0x4ab] sm:$0x4]   ;;  %v6959_v0 = vsel %vm451_vm0, %v9025_v41, %v9024_v23  ;;  %v5515_v24 = vpop.permute.xlu0 %5514  }
 0x307   :  { %v9038_v28 = vld [vmem:[%s16995_s0 + $0x578] sm:$0x20]   ;;  %v7002_v50 = vsel %vm459_vm2, %v9036_v5, %v6998_v21  ;;  %v9027_v13 = vld [vmem:[%s16995_s0 + $0x4ea] sm:$0x8]   ;;  %v6963_v42 = vsel %vm455_vm1, %v9026_v40, %v6959_v0  ;;  %8654 = vst.msk [vmem:[%s16996_s1 + $0x8] sm:$0xff] %vm4957_vm10, %v5515_v24  }
 0x308   :  { %v9039_v27 = vld [vmem:[%s16995_s0 + $0x5b7] sm:$0x40]   ;;  %v7006_v47 = vsel %vm463_vm3, %v9037_v3, %v7002_v50  ;;  %v9028_v6 = vld [vmem:[%s16995_s0 + $0x529] sm:$0x10]   ;;  %v6967_v63 = vsel %vm459_vm2, %v9027_v13, %v6963_v42 }
 0x309   :  { %v9040_v17 = vld [vmem:[%s16995_s0 + $0x5f6] sm:$0x80]   ;;  %v7010_v33 = vsel %vm467_vm4, %v9038_v28, %v7006_v47  ;;  %v9029_v30 = vld [vmem:[%s16995_s0 + $0x568] sm:$0x20]   ;;  %v6971_v61 = vsel %vm463_vm3, %v9028_v6, %v6967_v63 }
 0x30a   :  { %v9030_v56 = vld [vmem:[%s16995_s0 + $0x5a7] sm:$0x40]   ;;  %v9051_v14 = vld [vmem:[%s16995_s0 + $0x61d] sm:$0x1]   ;;  %v7014_v19 = vsel %vm471_vm5, %v9039_v27, %v7010_v33  ;;  %v6975_v16 = vsel %vm467_vm4, %v9029_v30, %v6971_v61  ;;  %v5620_v33 = vpop.permute.xlu1 %5619  }
 0x30b   :  { %v9052_v49 = vld [vmem:[%s16995_s0 + $0x65c] sm:$0x2]   ;;  %v7018_v59 = vsel %vm475_vm6, %v9040_v17, %v7014_v19  ;;  %v9031_v31 = vld [vmem:[%s16995_s0 + $0x5e6] sm:$0x80]   ;;  %v6979_v8 = vsel %vm471_vm5, %v9030_v56, %v6975_v16  ;;  %8681 = vst.msk [vmem:[%s16996_s1 + $0x68] sm:$0xff] %vm4957_vm10, %v5620_v33  }
 0x30c   :  { %v9053_v11 = vld [vmem:[%s16995_s0 + $0x69b] sm:$0x4]   ;;  %v7064_v52 = vsel %vm451_vm0, %v9052_v49, %v9051_v14  ;;  %7019 = vrot.lane.b32.xlu1 %v7018_v59, %s9083_s3  ;;  %v9042_v4 = vld [vmem:[%s16995_s0 + $0x60d] sm:$0x1]   ;;  %v6983_v36 = vsel %vm475_vm6, %v9031_v31, %v6979_v8 }
 0x30d   :  { %v9054_v32 = vld [vmem:[%s16995_s0 + $0x6da] sm:$0x8]   ;;  %v7068_v44 = vsel %vm455_vm1, %v9053_v11, %v7064_v52  ;;  %v9043_v48 = vld [vmem:[%s16995_s0 + $0x64c] sm:$0x2]   ;;  %6984 = vrot.lane.b32.xlu0 %v6983_v36, %s9083_s3 }
 0x30e   :  { %v9055_v10 = vld [vmem:[%s16995_s0 + $0x719] sm:$0x10]   ;;  %v7072_v43 = vsel %vm459_vm2, %v9054_v32, %v7068_v44  ;;  %v7029_v51 = vsel %vm451_vm0, %v9043_v48, %v9042_v4  ;;  %v9044_v55 = vld [vmem:[%s16995_s0 + $0x68b] sm:$0x4]   ;;  %v5585_v32 = vpop.permute.xlu0 %5584   ;;  %v5690_v52 = vpop.permute.xlu1 %5689  }
 0x30f   :  { %v9056_v57 = vld [vmem:[%s16995_s0 + $0x758] sm:$0x20]   ;;  %v9045_v26 = vld [vmem:[%s16995_s0 + $0x6ca] sm:$0x8]   ;;  %v7076_v46 = vsel %vm463_vm3, %v9055_v10, %v7072_v43  ;;  %v7033_v25 = vsel %vm455_vm1, %v9044_v55, %v7029_v51  ;;  %8672 = vst.msk [vmem:[%s16996_s1 + $0x48] sm:$0xff] %vm4957_vm10, %v5585_v32   ;;  %8699 = vst.msk [vmem:[%s16996_s1 + $0xa8] sm:$0xff] %vm4957_vm10, %v5690_v52  }
 0x310   :  { %v9057_v37 = vld [vmem:[%s16995_s0 + $0x797] sm:$0x40]   ;;  %v9046_v53 = vld [vmem:[%s16995_s0 + $0x709] sm:$0x10]   ;;  %v7080_v34 = vsel %vm467_vm4, %v9056_v57, %v7076_v46  ;;  %v7037_v45 = vsel %vm459_vm2, %v9045_v26, %v7033_v25 }
 0x311   :  { %v9058_v22 = vld [vmem:[%s16995_s0 + $0x7d6] sm:$0x80]   ;;  %v9047_v58 = vld [vmem:[%s16995_s0 + $0x748] sm:$0x20]   ;;  %v7084_v38 = vsel %vm471_vm5, %v9057_v37, %v7080_v34  ;;  %v7041_v2 = vsel %vm463_vm3, %v9046_v53, %v7037_v45 }
 0x312   :  { %v9048_v29 = vld [vmem:[%s16995_s0 + $0x787] sm:$0x40]   ;;  %v9069_v12 = vld [vmem:[%s16995_s0 + $0x63d] sm:$0x1]   ;;  %v7088_v62 = vsel %vm475_vm6, %v9058_v22, %v7084_v38  ;;  %v7045_v15 = vsel %vm467_vm4, %v9047_v58, %v7041_v2  ;;  %v5655_v10 = vpop.permute.xlu0 %5654   ;;  %v5760_v57 = vpop.permute.xlu1 %5759  }
 0x313   :  { %v9070_v54 = vld [vmem:[%s16995_s0 + $0x67c] sm:$0x2]   ;;  %v9049_v20 = vld [vmem:[%s16995_s0 + $0x7c6] sm:$0x80]   ;;  %7089 = vrot.lane.b32.xlu1 %v7088_v62, %s9083_s3  ;;  %v7049_v50 = vsel %vm471_vm5, %v9048_v29, %v7045_v15  ;;  %8690 = vst.msk [vmem:[%s16996_s1 + $0x88] sm:$0xff] %vm4957_vm10, %v5655_v10  }
 0x314   :  { %v9071_v7 = vld [vmem:[%s16995_s0 + $0x6bb] sm:$0x4]   ;;  %v7134_v18 = vsel %vm451_vm0, %v9070_v54, %v9069_v12  ;;  %v9060_v1 = vld [vmem:[%s16995_s0 + $0x62d] sm:$0x1]   ;;  %v7053_v47 = vsel %vm475_vm6, %v9049_v20, %v7049_v50  ;;  %8717 = vst.msk [vmem:[%s16996_s1 + $0xe8] sm:$0xff] %vm4957_vm10, %v5760_v57  }
 0x315   :  { %v9072_v5 = vld [vmem:[%s16995_s0 + $0x6fa] sm:$0x8]   ;;  %v7138_v21 = vsel %vm455_vm1, %v9071_v7, %v7134_v18  ;;  %v9061_v41 = vld [vmem:[%s16995_s0 + $0x66c] sm:$0x2]   ;;  %7054 = vrot.lane.b32.xlu0 %v7053_v47, %s9083_s3 }
 0x316   :  { %v9073_v3 = vld [vmem:[%s16995_s0 + $0x739] sm:$0x10]   ;;  %v7142_v23 = vsel %vm459_vm2, %v9072_v5, %v7138_v21  ;;  %v9062_v40 = vld [vmem:[%s16995_s0 + $0x6ab] sm:$0x4]   ;;  %v7099_v13 = vsel %vm451_vm0, %v9061_v41, %v9060_v1  ;;  %v5725_v35 = vpop.permute.xlu0 %5724   ;;  %v5830_v16 = vpop.permute.xlu1 %5829  }
 0x317   :  { %v9074_v28 = vld [vmem:[%s16995_s0 + $0x778] sm:$0x20]   ;;  %v9063_v60 = vld [vmem:[%s16995_s0 + $0x6ea] sm:$0x8]   ;;  %v7146_v17 = vsel %vm463_vm3, %v9073_v3, %v7142_v23  ;;  %v7103_v30 = vsel %vm455_vm1, %v9062_v40, %v7099_v13  ;;  %8708 = vst.msk [vmem:[%s16996_s1 + $0xc8] sm:$0xff] %vm4957_vm10, %v5725_v35   ;;  %8735 = vst.msk [vmem:[%s16996_s1 + $0x128] sm:$0xff] %vm4957_vm10, %v5830_v16  }
 0x318   :  { %v9075_v27 = vld [vmem:[%s16995_s0 + $0x7b7] sm:$0x40]   ;;  %v9064_v6 = vld [vmem:[%s16995_s0 + $0x729] sm:$0x10]   ;;  %v7150_v42 = vsel %vm467_vm4, %v9074_v28, %v7146_v17  ;;  %v7107_v39 = vsel %vm459_vm2, %v9063_v60, %v7103_v30 }
 0x319   :  { %v9076_v0 = vld [vmem:[%s16995_s0 + $0x7f6] sm:$0x80]   ;;  %v9065_v56 = vld [vmem:[%s16995_s0 + $0x768] sm:$0x20]   ;;  %v7154_v14 = vsel %vm471_vm5, %v9075_v27, %v7150_v42  ;;  %v7111_v49 = vsel %vm463_vm3, %v9064_v6, %v7107_v39 }
 0x31a   :  { %v9066_v19 = vld [vmem:[%s16995_s0 + $0x7a7] sm:$0x40]   ;;  %v7158_v63 = vsel %vm475_vm6, %v9076_v0, %v7154_v14  ;;  %v7115_v59 = vsel %vm467_vm4, %v9065_v56, %v7111_v49  ;;  %v5795_v44 = vpop.permute.xlu0 %5794   ;;  %v5900_v37 = vpop.permute.xlu1 %5899  }
 0x31b   :  { %v9067_v11 = vld [vmem:[%s16995_s0 + $0x7e6] sm:$0x80]   ;;  %7159 = vrot.lane.b32.xlu1 %v7158_v63, %s9083_s3  ;;  %v7119_v61 = vsel %vm471_vm5, %v9066_v19, %v7115_v59  ;;  %8726 = vst.msk [vmem:[%s16996_s1 + $0x108] sm:$0xff] %vm4957_vm10, %v5795_v44   ;;  %8753 = vst.msk [vmem:[%s16996_s1 + $0x168] sm:$0xff] %vm4957_vm10, %v5900_v37  }
 0x31c   :  { %v7123_v31 = vsel %vm475_vm6, %v9067_v11, %v7119_v61 }
 0x31d   :  { %7124 = vrot.lane.b32.xlu0 %v7123_v31, %s9083_s3 }
 0x31e   :  { %v5865_v4 = vpop.permute.xlu0 %5864   ;;  %v5970_v48 = vpop.permute.xlu1 %5969  }
 0x31f   :  { %8744 = vst.msk [vmem:[%s16996_s1 + $0x148] sm:$0xff] %vm4957_vm10, %v5865_v4   ;;  %8771 = vst.msk [vmem:[%s16996_s1 + $0x1a8] sm:$0xff] %vm4957_vm10, %v5970_v48  }
 0x322   :  { %v5935_v8 = vpop.permute.xlu0 %5934   ;;  %v6040_v43 = vpop.permute.xlu1 %6039  }
 0x323   :  { %8762 = vst.msk [vmem:[%s16996_s1 + $0x188] sm:$0xff] %vm4957_vm10, %v5935_v8   ;;  %8789 = vst.msk [vmem:[%s16996_s1 + $0x1e8] sm:$0xff] %vm4957_vm10, %v6040_v43  }
 0x326   :  { %v6005_v51 = vpop.permute.xlu0 %6004   ;;  %v6110_v55 = vpop.permute.xlu1 %6109  }
 0x327   :  { %8780 = vst.msk [vmem:[%s16996_s1 + $0x1c8] sm:$0xff] %vm4957_vm10, %v6005_v51   ;;  %8807 = vst.msk [vmem:[%s16996_s1 + $0x30] sm:$0xff] %vm4957_vm10, %v6110_v55  }
 0x32a   :  { %v6075_v26 = vpop.permute.xlu0 %6074   ;;  %v6180_v53 = vpop.permute.xlu1 %6179  }
 0x32b   :  { %8798 = vst.msk [vmem:[%s16996_s1 + $0x10] sm:$0xff] %vm4957_vm10, %v6075_v26   ;;  %8825 = vst.msk [vmem:[%s16996_s1 + $0x70] sm:$0xff] %vm4957_vm10, %v6180_v53  }
 0x32e   :  { %v6145_v36 = vpop.permute.xlu0 %6144  }
 0x32f   :  { %8816 = vst.msk [vmem:[%s16996_s1 + $0x50] sm:$0xff] %vm4957_vm10, %v6145_v36   ;;  %v6250_v46 = vpop.permute.xlu1 %6249  }
 0x330   :  { %8843 = vst.msk [vmem:[%s16996_s1 + $0xb0] sm:$0xff] %vm4957_vm10, %v6250_v46  }
 0x332   :  { %v6215_v22 = vpop.permute.xlu0 %6214  }
 0x333   :  { %8834 = vst.msk [vmem:[%s16996_s1 + $0x90] sm:$0xff] %vm4957_vm10, %v6215_v22  }
 0x337   :  { %v6320_v25 = vpop.permute.xlu1 %6319  }
 0x338   :  { %8861 = vst.msk [vmem:[%s16996_s1 + $0xf0] sm:$0xff] %vm4957_vm10, %v6320_v25   ;;  %v6285_v58 = vpop.permute.xlu0 %6284  }
 0x339   :  { %8852 = vst.msk [vmem:[%s16996_s1 + $0xd0] sm:$0xff] %vm4957_vm10, %v6285_v58  }
 0x33f   :  { %v6390_v29 = vpop.permute.xlu1 %6389  }
 0x340   :  { %8879 = vst.msk [vmem:[%s16996_s1 + $0x130] sm:$0xff] %vm4957_vm10, %v6390_v29   ;;  %v6355_v9 = vpop.permute.xlu0 %6354  }
 0x341   :  { %8870 = vst.msk [vmem:[%s16996_s1 + $0x110] sm:$0xff] %vm4957_vm10, %v6355_v9  }
 0x347   :  { %v6460_v34 = vpop.permute.xlu1 %6459  }
 0x348   :  { %8897 = vst.msk [vmem:[%s16996_s1 + $0x170] sm:$0xff] %vm4957_vm10, %v6460_v34   ;;  %v6425_v45 = vpop.permute.xlu0 %6424  }
 0x349   :  { %8888 = vst.msk [vmem:[%s16996_s1 + $0x150] sm:$0xff] %vm4957_vm10, %v6425_v45  }
 0x34f   :  { %v6530_v12 = vpop.permute.xlu1 %6529  }
 0x350   :  { %8915 = vst.msk [vmem:[%s16996_s1 + $0x1b0] sm:$0xff] %vm4957_vm10, %v6530_v12   ;;  %v6495_v54 = vpop.permute.xlu0 %6494  }
 0x351   :  { %8906 = vst.msk [vmem:[%s16996_s1 + $0x190] sm:$0xff] %vm4957_vm10, %v6495_v54  }
 0x357   :  { %v6600_v7 = vpop.permute.xlu1 %6599  }
 0x358   :  { %8933 = vst.msk [vmem:[%s16996_s1 + $0x1f0] sm:$0xff] %vm4957_vm10, %v6600_v7   ;;  %v6565_v38 = vpop.permute.xlu0 %6564  }
 0x359   :  { %8924 = vst.msk [vmem:[%s16996_s1 + $0x1d0] sm:$0xff] %vm4957_vm10, %v6565_v38  }
 0x35b   :  { %v6670_v2 = vpop.permute.xlu1 %6669  }
 0x35c   :  { %8951 = vst.msk [vmem:[%s16996_s1 + $0x38] sm:$0xff] %vm4957_vm10, %v6670_v2   ;;  %v6635_v20 = vpop.permute.xlu0 %6634  }
 0x35d   :  { %8942 = vst.msk [vmem:[%s16996_s1 + $0x18] sm:$0xff] %vm4957_vm10, %v6635_v20  }
 0x35f   :  { %v6740_v18 = vpop.permute.xlu1 %6739  }
 0x360   :  { %8969 = vst.msk [vmem:[%s16996_s1 + $0x78] sm:$0xff] %vm4957_vm10, %v6740_v18   ;;  %v6705_v5 = vpop.permute.xlu0 %6704  }
 0x361   :  { %8960 = vst.msk [vmem:[%s16996_s1 + $0x58] sm:$0xff] %vm4957_vm10, %v6705_v5  }
 0x366   :  { %v6810_v3 = vpop.permute.xlu1 %6809  }
 0x367   :  { %8987 = vst.msk [vmem:[%s16996_s1 + $0xb8] sm:$0xff] %vm4957_vm10, %v6810_v3   ;;  %v6775_v62 = vpop.permute.xlu0 %6774  }
 0x368   :  { %8978 = vst.msk [vmem:[%s16996_s1 + $0x98] sm:$0xff] %vm4957_vm10, %v6775_v62  }
 0x36e   :  { %v6880_v15 = vpop.permute.xlu1 %6879  }
 0x36f   :  { %9005 = vst.msk [vmem:[%s16996_s1 + $0xf8] sm:$0xff] %vm4957_vm10, %v6880_v15   ;;  %v6845_v21 = vpop.permute.xlu0 %6844  }
 0x370   :  { %8996 = vst.msk [vmem:[%s16996_s1 + $0xd8] sm:$0xff] %vm4957_vm10, %v6845_v21  }
 0x376   :  { %v6950_v28 = vpop.permute.xlu1 %6949  }
 0x377   :  { %9023 = vst.msk [vmem:[%s16996_s1 + $0x138] sm:$0xff] %vm4957_vm10, %v6950_v28   ;;  %v6915_v27 = vpop.permute.xlu0 %6914  }
 0x378   :  { %9014 = vst.msk [vmem:[%s16996_s1 + $0x118] sm:$0xff] %vm4957_vm10, %v6915_v27  }
 0x37e   :  { %v7020_v1 = vpop.permute.xlu1 %7019  }
 0x37f   :  { %9041 = vst.msk [vmem:[%s16996_s1 + $0x178] sm:$0xff] %vm4957_vm10, %v7020_v1   ;;  %v6985_v24 = vpop.permute.xlu0 %6984  }
 0x380   :  { %9032 = vst.msk [vmem:[%s16996_s1 + $0x158] sm:$0xff] %vm4957_vm10, %v6985_v24  }
 0x385   :  { %v7090_v50 = vpop.permute.xlu1 %7089  }
 0x386   :  { %9059 = vst.msk [vmem:[%s16996_s1 + $0x1b8] sm:$0xff] %vm4957_vm10, %v7090_v50  }
 0x387   :  { %v7055_v23 = vpop.permute.xlu0 %7054  }
 0x388   :  { %9050 = vst.msk [vmem:[%s16996_s1 + $0x198] sm:$0xff] %vm4957_vm10, %v7055_v23  }
 0x38d   :  { %v7160_v41 = vpop.permute.xlu1 %7159  }
 0x38e   :  { %9077 = vst.msk [vmem:[%s16996_s1 + $0x1f8] sm:$0xff] %vm4957_vm10, %v7160_v41  }
 0x38f   :  { %v7125_v40 = vpop.permute.xlu0 %7124  }
 0x390   :  { %9068 = vst.msk [vmem:[%s16996_s1 + $0x1d8] sm:$0xff] %vm4957_vm10, %v7125_v40  }

// kernel: att_decoder.1
= control target key start
LH: loop header
LB: loop body
LE: loop exit
PB: predicated region body
PF: predicated region fallthrough
CT: control target
= control target key end

     0   :  { %18 = vsyncpa [#allocation8], 0  ;;  %s5712_s0 = inlined_call_operand.vmem [shape: f32[1,2048], index: 0, kind: input, shape index: {}]   ;;  %s5713_s1 = inlined_call_operand.vmem [shape: f32[16,32], index: 1, kind: input, shape index: {}]   ;;  %s5714_s2 = inlined_call_operand.vmem [shape: f32[1,32], index: 2, kind: input, shape index: {}]   ;;  %s5715_s3 = inlined_call_operand.vmem [shape: f32[64,208], index: 3, kind: input, shape index: {}]   ;;  %s5716_s4 = inlined_call_operand.vmem [shape: f32[1,208], index: 4, kind: input, shape index: {}]   ;;  %s5717_s5 = inlined_call_operand.vmem [shape: f32[32,2064], index: 5, kind: input, shape index: {}]   ;;  %s5718_s6 = inlined_call_operand.vmem [shape: f32[64,2048], index: 6, kind: input, shape index: {}]   ;;  %s5719_s7 = inlined_call_operand.vmem [shape: f32[2048,64], index: 7, kind: input, shape index: {}]   ;;  %s5720_s8 = inlined_call_operand.vmem [shape: f32[64,16], index: 8, kind: input, shape index: {}]   ;;  %s5721_s9 = inlined_call_operand.vmem [shape: f32[1,16], index: 9, kind: input, shape index: {}]   ;;  %s5722_s10 = inlined_call_operand.vmem [shape: f32[200,64], index: 10, kind: output, shape index: {0}]   ;;  %s5723_s11 = inlined_call_operand.vmem [shape: s32[200], index: 11, kind: output, shape index: {1}]   ;;  %s5724_s12 = inlined_call_operand.hbm [shape: s32[1], index: 12, kind: output, shape index: {2}]  }
   0x1   :  { %19 = vsyncpa [#allocation7], 0  ;;  %vm40_vm0 = vcmask 523264   ;;  %vm66_vm1 = vcmask 516096   ;;  %v3857_v0 = vmov 0.0   ;;  %s3858_s17 = smov 0  }
   0x2   :  { %41 = vst.msk [vmem:[%s5722_s10] sm:$0xff] %vm40_vm0, %v3857_v0  ;;  %42 = vst.msk [vmem:[%s5722_s10 + $0x8] sm:$0xff] %vm40_vm0, %v3857_v0  ;;  %69 = sst [smem:[#allocation9]] %s3858_s17  ;;  %v2876_v1 = vld [vmem:[%s5714_s2] ss:$0 sm:$0xff]  ;;  %s3859_s22 = smov 32  }
   0x3   :  { %43 = vst.msk [vmem:[%s5722_s10 + $0x10] sm:$0xff] %vm40_vm0, %v3857_v0  ;;  %44 = vst.msk [vmem:[%s5722_s10 + $0x18] sm:$0xff] %vm40_vm0, %v3857_v0  ;;  %v72_v2 = vld [vmem:[%s5713_s1 + $0x1] sm:$0x1]  ;;  %71 = sst [smem:[#allocation5]] %s3858_s17  ;;  %81 = vrot.lane.b32.xlu0 %v2876_v1, %s3859_s22  ;;  %vm73_vm2 = vcmask 253952  }
   0x4   :  { %45 = vst.msk [vmem:[%s5722_s10 + $0x20] sm:$0xff] %vm40_vm0, %v3857_v0  ;;  %46 = vst.msk [vmem:[%s5722_s10 + $0x28] sm:$0xff] %vm40_vm0, %v3857_v0  ;;  %vm84_vm3 = vcmask 516352   ;;  %s4043_s23 = smov 0  }
   0x5   :  { %47 = vst.msk [vmem:[%s5722_s10 + $0x30] sm:$0xff] %vm40_vm0, %v3857_v0  ;;  %48 = vst.msk [vmem:[%s5722_s10 + $0x38] sm:$0xff] %vm40_vm0, %v3857_v0 }
   0x6   :  { %49 = vst.msk [vmem:[%s5722_s10 + $0x40] sm:$0xff] %vm40_vm0, %v3857_v0  ;;  %50 = vst.msk [vmem:[%s5722_s10 + $0x48] sm:$0xff] %vm40_vm0, %v3857_v0 }
   0x7   :  { %51 = vst.msk [vmem:[%s5722_s10 + $0x50] sm:$0xff] %vm40_vm0, %v3857_v0  ;;  %52 = vst.msk [vmem:[%s5722_s10 + $0x58] sm:$0xff] %vm40_vm0, %v3857_v0 }
   0x8   :  { %53 = vst.msk [vmem:[%s5722_s10 + $0x60] sm:$0xff] %vm40_vm0, %v3857_v0  ;;  %54 = vst.msk [vmem:[%s5722_s10 + $0x68] sm:$0xff] %vm40_vm0, %v3857_v0 }
   0x9   :  { %55 = vst.msk [vmem:[%s5722_s10 + $0x70] sm:$0xff] %vm40_vm0, %v3857_v0  ;;  %56 = vst.msk [vmem:[%s5722_s10 + $0x78] sm:$0xff] %vm40_vm0, %v3857_v0 }
   0xa   :  { %57 = vst.msk [vmem:[%s5722_s10 + $0x80] sm:$0xff] %vm40_vm0, %v3857_v0  ;;  %58 = vst.msk [vmem:[%s5722_s10 + $0x88] sm:$0xff] %vm40_vm0, %v3857_v0 }
   0xb   :  { %59 = vst.msk [vmem:[%s5722_s10 + $0x90] sm:$0xff] %vm40_vm0, %v3857_v0  ;;  %60 = vst.msk [vmem:[%s5722_s10 + $0x98] sm:$0xff] %vm40_vm0, %v3857_v0 }
   0xc   :  { %61 = vst.msk [vmem:[%s5722_s10 + $0xa0] sm:$0xff] %vm40_vm0, %v3857_v0  ;;  %62 = vst.msk [vmem:[%s5722_s10 + $0xa8] sm:$0xff] %vm40_vm0, %v3857_v0 }
   0xd   :  { %63 = vst.msk [vmem:[%s5722_s10 + $0xb0] sm:$0xff] %vm40_vm0, %v3857_v0  ;;  %64 = vst.msk [vmem:[%s5722_s10 + $0xb8] sm:$0xff] %vm40_vm0, %v3857_v0 }
   0xe   :  { %65 = vst.msk [vmem:[%s5722_s10 + $0xc0] sm:$0xff] %vm40_vm0, %v3857_v0 }
   0xf   :  { %67 = vst.msk [vmem:[#allocation3] sm:$0x1] %vm66_vm1, %v3857_v0 }
  0x10   :  { %74 = vst.msk [vmem:[#allocation2] sm:$0x1] %vm73_vm2, %v72_v2 }
  0x75   :  { %v82_v3 = vpop.permute.xlu0 %81 }
  0x76   :  { %85 = vst.msk [vmem:[#allocation2] sm:$0x1] %vm84_vm3, %v82_v3 }
  0x77 LB: > { %s92_s2 = sld [smem:[#allocation5]]  ;;  %s3855_s23 = sphi %s4043_s23, %s91_s23  }
  0x7d   : > { %p2877_p0 = scmp.ne.s32.totalorder %s92_s2, 0 }
  0x7e   : > { %v99_v4 = vld [vmem:[%s5715_s3 + $0x8] sm:$0xff] (!%p2877_p0)  ;;  %v101_v5 = vld [vmem:[%s5715_s3 + $0x18] sm:$0xff] (!%p2877_p0)  ;;  %v98_v6 = vld [vmem:[%s5715_s3] sm:$0xff] (!%p2877_p0)  ;;  %v3860_v11 = vmov (!%p2877_p0), 0.0   ;;  %v116_v30 = vlaneseq (!%p2877_p0)  ;;  %s3861_s22 = smov (!%p2877_p0), 32   ;;  %s3862_s2 = smov (!%p2877_p0), 96  }
  0x7f   : > { %96 = sbr.rel (%p2877_p0) target bundleno = 2631 (0xa47), region = 52  ;;  %v3236_v7 = vpack.c.bf16 (!%p2877_p0), %v101_v5, %v99_v4  ;;  %v100_v8 = vld [vmem:[%s5715_s3 + $0x10] sm:$0xff] (!%p2877_p0)  ;;  %v103_v9 = vld [vmem:[%s5715_s3 + $0x28] sm:$0xff] (!%p2877_p0)  ;;  %v105_v10 = vld [vmem:[%s5715_s3 + $0x38] sm:$0xff] (!%p2877_p0)  ;;  %193 = vmatprep.mubr.f32.mxu0 (!%p2877_p0), %v3860_v11  ;;  %379 = vmatprep.mubr.f32.mxu1 (!%p2877_p0), %v3860_v11  ;;  %s3863_s24 = smov (!%p2877_p0), 64   ;;  %vm312_vm4 = vcmask (!%p2877_p0), 261120  }
  0x80   : > { %v3238_v12 = vpack.c.bf16 (!%p2877_p0), %v100_v8, %v98_v6  ;;  %v3240_v13 = vpack.c.bf16 (!%p2877_p0), %v105_v10, %v103_v9  ;;  %v102_v14 = vld [vmem:[%s5715_s3 + $0x20] sm:$0xff] (!%p2877_p0)  ;;  %v104_v15 = vld [vmem:[%s5715_s3 + $0x30] sm:$0xff] (!%p2877_p0)  ;;  %v107_v16 = vld [vmem:[%s5715_s3 + $0x48] sm:$0xff] (!%p2877_p0)  ;;  %v4104_v31 = vshrl.u32 (!%p2877_p0), %v116_v30, 7  ;;  %vm3865_vm5 = vmmov (!%p2877_p0), 0  }
  0x81   : > { %3237 = vmatprep.subr.bf16.mxu0 (!%p2877_p0), %v3236_v7  ;;  %v109_v17 = vld [vmem:[%s5715_s3 + $0x58] sm:$0xff] (!%p2877_p0)  ;;  %v3242_v18 = vpack.c.bf16 (!%p2877_p0), %v104_v15, %v102_v14  ;;  %v106_v20 = vld [vmem:[%s5715_s3 + $0x40] sm:$0xff] (!%p2877_p0)  ;;  %v108_v21 = vld [vmem:[%s5715_s3 + $0x50] sm:$0xff] (!%p2877_p0)  ;;  %vm2714_vm6 = vcmask (!%p2877_p0), 647680   ;;  %vm2737_vm9 = vcmask (!%p2877_p0), 0   ;;  %vm2744_vm10 = vcmask (!%p2877_p0), 130048  }
  0x82   : > { %3239 = vmatpush1.bf16.msra.mxu0 (!%p2877_p0), %v3238_v12  ;;  %v3244_v19 = vpack.c.bf16 (!%p2877_p0), %v109_v17, %v107_v16  ;;  %v111_v22 = vld [vmem:[%s5715_s3 + $0x68] sm:$0xff] (!%p2877_p0)  ;;  %v113_v23 = vld [vmem:[%s5715_s3 + $0x78] sm:$0xff] (!%p2877_p0)  ;;  %v3246_v24 = vpack.c.bf16 (!%p2877_p0), %v108_v21, %v106_v20  ;;  %v110_v26 = vld [vmem:[%s5715_s3 + $0x60] sm:$0xff] (!%p2877_p0)  ;;  %v4107_v32 = vsub.s32 (!%p2877_p0), 0, %v4104_v31  ;;  %v4114_v35 = vsub.s32 (!%p2877_p0), 1, %v4104_v31 }
  0x83   : > { %3241 = vmatprep.subr.bf16.mxu0 (!%p2877_p0), %v3240_v13  ;;  %v3248_v25 = vpack.c.bf16 (!%p2877_p0), %v113_v23, %v111_v22  ;;  %v112_v27 = vld [vmem:[%s5715_s3 + $0x70] sm:$0xff] (!%p2877_p0)  ;;  %v4098_v29 = vld [vmem:[#allocation2] sm:$0x1] (!%p2877_p0)  ;;  %v242_v51 = vld [vmem:[%s5717_s5 + $0x8] sm:$0xff] (!%p2877_p0) }
  0x84   : > { %v3250_v28 = vpack.c.bf16 (!%p2877_p0), %v112_v27, %v110_v26  ;;  %v114_v33 = vld [vmem:[%s5716_s4] sm:$0x3] (!%p2877_p0)  ;;  %v259_v52 = vld [vmem:[%s5717_s5 + $0x90] sm:$0xff] (!%p2877_p0)  ;;  %v246_v53 = vld [vmem:[%s5717_s5 + $0x28] sm:$0xff] (!%p2877_p0) }
  0x85   : > { %v119_v34 = vrot.slane (!%p2877_p0), %v114_v33, %v4107_v32  ;;  %v123_v38 = vrot.slane (!%p2877_p0), %v114_v33, %v4114_v35  ;;  %v3252_v54 = vpack.c.bf16 (!%p2877_p0), %v259_v52, %v242_v51  ;;  %v263_v55 = vld [vmem:[%s5717_s5 + $0xb0] sm:$0xff] (!%p2877_p0)  ;;  %v241_v56 = vld [vmem:[%s5717_s5] sm:$0xff] (!%p2877_p0)  ;;  %v258_v57 = vld [vmem:[%s5717_s5 + $0x88] sm:$0xff] (!%p2877_p0) }
  0x86   : > { %3243 = vmatpush1.bf16.msra.mxu0 %v3242_v18  ;;  %v3268_v58 = vpack.c.bf16 %v263_v55, %v246_v53  ;;  %v3254_v59 = vpack.c.bf16 %v258_v57, %v241_v56  ;;  %v245_v60 = vld [vmem:[%s5717_s5 + $0x20] sm:$0xff]  ;;  %v262_v61 = vld [vmem:[%s5717_s5 + $0xa8] sm:$0xff]  ;;  %v276_v62 = vld [vmem:[%s5717_s5 + $0x118] sm:$0xff] }
  0x87   : > { %3245 = vmatprep.subr.bf16.mxu0 %v3244_v19  ;;  %3253 = vmatprep.subr.bf16.mxu1 %v3252_v54  ;;  %v3270_v63 = vpack.c.bf16 %v262_v61, %v245_v60  ;;  %v293_v0 = vld [vmem:[%s5717_s5 + $0x1a0] sm:$0xff]  ;;  %v280_v1 = vld [vmem:[%s5717_s5 + $0x138] sm:$0xff]  ;;  %v275_v5 = vld [vmem:[%s5717_s5 + $0x110] sm:$0xff] }
  0x88   : > { %v297_v2 = vld [vmem:[%s5717_s5 + $0x1c0] sm:$0xff]  ;;  %3255 = vmatpush1.bf16.msra.mxu1 %v3254_v59  ;;  %v3256_v3 = vpack.c.bf16 %v293_v0, %v276_v62  ;;  %v292_v6 = vld [vmem:[%s5717_s5 + $0x198] sm:$0xff]  ;;  %v279_v7 = vld [vmem:[%s5717_s5 + $0x130] sm:$0xff] }
  0x89   : > { %v3272_v4 = vpack.c.bf16 %v297_v2, %v280_v1  ;;  %v3258_v8 = vpack.c.bf16 %v292_v6, %v275_v5  ;;  %v296_v9 = vld [vmem:[%s5717_s5 + $0x1b8] sm:$0xff]  ;;  %v261_v12 = vld [vmem:[%s5717_s5 + $0xa0] sm:$0xff]  ;;  %v250_v15 = vld [vmem:[%s5717_s5 + $0x48] sm:$0xff] }
  0x8a   : > { %3247 = vmatpush1.bf16.msra.mxu0 %v3246_v24  ;;  %v244_v10 = vld [vmem:[%s5717_s5 + $0x18] sm:$0xff]  ;;  %3257 = vmatprep.subr.bf16.mxu1 %v3256_v3  ;;  %v3274_v13 = vpack.c.bf16 %v296_v9, %v279_v7  ;;  %v267_v16 = vld [vmem:[%s5717_s5 + $0xd0] sm:$0xff]  ;;  %v265_v53 = vld [vmem:[%s5717_s5 + $0xc0] sm:$0xff] }
  0x8b   : > { %3249 = vmatprep.subr.bf16.mxu0 %v3248_v25  ;;  %v3260_v14 = vpack.c.bf16 %v261_v12, %v244_v10  ;;  %v3284_v17 = vpack.c.bf16 %v267_v16, %v250_v15  ;;  %v248_v51 = vld [vmem:[%s5717_s5 + $0x38] sm:$0xff]  ;;  %v254_v54 = vld [vmem:[%s5717_s5 + $0x68] sm:$0xff]  ;;  %v271_v55 = vld [vmem:[%s5717_s5 + $0xf0] sm:$0xff] }
  0x8c   : > { %3259 = vmatpush1.bf16.msra.mxu1 %v3258_v8  ;;  %v264_v59 = vld [vmem:[%s5717_s5 + $0xb8] sm:$0xff]  ;;  %v3276_v60 = vpack.c.bf16 %v265_v53, %v248_v51  ;;  %v3300_v61 = vpack.c.bf16 %v271_v55, %v254_v54  ;;  %v253_v62 = vld [vmem:[%s5717_s5 + $0x60] sm:$0xff]  ;;  %v282_v0 = vld [vmem:[%s5717_s5 + $0x148] sm:$0xff] }
  0x8d   : > { %3261 = vmatprep.subr.bf16.mxu1 %v3260_v14  ;;  %v299_v1 = vld [vmem:[%s5717_s5 + $0x1d0] sm:$0xff]  ;;  %v288_v2 = vld [vmem:[%s5717_s5 + $0x178] sm:$0xff]  ;;  %v305_v3 = vld [vmem:[%s5717_s5 + $0x200] sm:$0xff] }
  0x8e   : > { %3251 = vmatpush1.bf16.msra.mxu0 %v3250_v28  ;;  %v281_v6 = vld [vmem:[%s5717_s5 + $0x140] sm:$0xff]  ;;  %v3280_v7 = vpack.c.bf16 %v299_v1, %v282_v0  ;;  %v3304_v8 = vpack.c.bf16 %v305_v3, %v288_v2  ;;  %v298_v9 = vld [vmem:[%s5717_s5 + $0x1c8] sm:$0xff]  ;;  %v287_v10 = vld [vmem:[%s5717_s5 + $0x170] sm:$0xff] }
  0x8f   : > { %3269 = vmatprep.subr.bf16.mxu0 %v3268_v58  ;;  %v247_v58 = vld [vmem:[%s5717_s5 + $0x30] sm:$0xff]  ;;  %v304_v12 = vld [vmem:[%s5717_s5 + $0x1f8] sm:$0xff]  ;;  %v269_v14 = vld [vmem:[%s5717_s5 + $0xe0] sm:$0xff]  ;;  %v3282_v15 = vpack.c.bf16 %v298_v9, %v281_v6 }
  0x90   : > { %v3306_v16 = vpack.c.bf16 %v304_v12, %v287_v10  ;;  %v991_v51 = vld [vmem:[%s5718_s6 + $0x128] sm:$0xff]  ;;  %v1038_v9 = vld [vmem:[%s5718_s6 + $0x2a0] sm:$0xff] }
  0x91   : > { %2878 = vmatmul.mubr.msk.f32.vlgmr.msra.gmra.mrb[0].mxu0 %vm40_vm0, %v4098_v29  ;;  %v1007_v53 = vld [vmem:[%s5718_s6 + $0x1a8] sm:$0xff] }
  0x92   : > { %521 = vmatprep.mubr.f32.mxu0 %v3860_v11  ;;  %3271 = vmatpush1.bf16.msra.mxu0 %v3270_v63  ;;  %v270_v63 = vld [vmem:[%s5717_s5 + $0xe8] sm:$0xff] }
  0x93   : > { %3273 = vmatprep.subr.bf16.mxu0 %v3272_v4  ;;  %v3278_v4 = vpack.c.bf16 %v264_v59, %v247_v58  ;;  %v3302_v5 = vpack.c.bf16 %v270_v63, %v253_v62  ;;  %v3358_v59 = vpack.c.bf16 %v1007_v53, %v991_v51  ;;  %v955_v62 = vld [vmem:[%s5718_s6 + $0x8] sm:$0xff]  ;;  %v994_v51 = vld [vmem:[%s5718_s6 + $0x140] sm:$0xff] }
  0x94   : > { %v971_v63 = vld [vmem:[%s5718_s6 + $0x88] sm:$0xff]  ;;  %v1010_v53 = vld [vmem:[%s5718_s6 + $0x1c0] sm:$0xff] }
  0x95   : > { %v1023_v0 = vld [vmem:[%s5718_s6 + $0x228] sm:$0xff]  ;;  %v3322_v6 = vpack.c.bf16 %v971_v63, %v955_v62 }
  0x96   : > { %3275 = vmatpush1.bf16.msra.mxu0 %v3274_v13  ;;  %v252_v13 = vld [vmem:[%s5717_s5 + $0x58] sm:$0xff]  ;;  %v1039_v1 = vld [vmem:[%s5718_s6 + $0x2a8] sm:$0xff] }
  0x97   : > { %3285 = vmatprep.subr.bf16.mxu0 %v3284_v17  ;;  %v251_v17 = vld [vmem:[%s5717_s5 + $0x50] sm:$0xff]  ;;  %v987_v10 = vld [vmem:[%s5718_s6 + $0x108] sm:$0xff] }
  0x98   : > { %v1003_v12 = vld [vmem:[%s5718_s6 + $0x188] sm:$0xff] }
 0x164   : > { %v195_v36 = vpop.f32.mrb[0].mxu0 }
 0x165   : > { %v4116_v37 = vadd.f32 %v195_v36, %v119_v34  ;;  %v197_v39 = vpop.f32.mrb[1].mxu0  ;;  %v243_v34 = vld [vmem:[%s5717_s5 + $0x10] sm:$0xff]  ;;  %v260_v36 = vld [vmem:[%s5717_s5 + $0x98] sm:$0xff] }
 0x166   : > { %v4120_v40 = vadd.f32 %v197_v39, %v123_v38  ;;  %v278_v38 = vld [vmem:[%s5717_s5 + $0x128] sm:$0xff]  ;;  %v295_v39 = vld [vmem:[%s5717_s5 + $0x1b0] sm:$0xff] }
 0x167   : > { %201 = vrot.lane.b32.xlu0 %v4116_v37, %s3861_s22 }
 0x16b   : > { %222 = vrot.lane.b32.xlu0 %v4120_v40, %s3862_s2 }
 0x1d9   : > { %v202_v41 = vpop.permute.xlu0 %201 }
 0x1da   : > { %v204_v42 = vadd.f32 %v202_v41, %v4116_v37  ;;  %v284_v41 = vld [vmem:[%s5717_s5 + $0x158] sm:$0xff] }
 0x1dc   : > { %v2879_v43 = vmul.f32 -1.442695, %v204_v42  ;;  %v301_v42 = vld [vmem:[%s5717_s5 + $0x1e0] sm:$0xff] }
 0x1dd   : > { %v223_v47 = vpop.permute.xlu0 %222 }
 0x1de   : > { %3776 = vpow2.f32 %v2879_v43  ;;  %v3262_v43 = vpack.c.bf16 %v260_v36, %v243_v34  ;;  %v291_v34 = vld [vmem:[%s5717_s5 + $0x190] sm:$0xff]  ;;  %v308_v36 = vld [vmem:[%s5717_s5 + $0x218] sm:$0xff] }
 0x1e8   : > { %v3777_v44 = vpop.eup %3776 }
 0x1e9   : > { %v208_v45 = vadd.f32 1.0, %v3777_v44 }
 0x1eb   : > { %3778 = vrcp.f32 %v208_v45  ;;  %v277_v45 = vld [vmem:[%s5717_s5 + $0x120] sm:$0xff] }
 0x1f5   : > { %v3779_v46 = vpop.eup %3778 }
 0x1f6   : > { %v225_v48 = vmul.f32 %v3779_v46, %v223_v47  ;;  %v294_v46 = vld [vmem:[%s5717_s5 + $0x1a8] sm:$0xff]  ;;  %v3264_v47 = vpack.c.bf16 %v295_v39, %v278_v38 }
 0x1f7   : > { %v3266_v56 = vpack.c.bf16 %v294_v46, %v277_v45  ;;  %v959_v38 = vld [vmem:[%s5718_s6 + $0x28] sm:$0xff] }
 0x1f8   : > { %227 = vrot.lane.b32.xlu1 %v225_v48, %s3863_s24  ;;  %v3288_v48 = vpack.c.bf16 %v301_v42, %v284_v41  ;;  %v975_v39 = vld [vmem:[%s5718_s6 + $0xa8] sm:$0xff]  ;;  %v3320_v42 = vpack.c.bf16 %v308_v36, %v291_v34  ;;  %v1018_v34 = vld [vmem:[%s5718_s6 + $0x200] sm:$0xff] }
 0x1f9   : > { %v3354_v46 = vpack.c.bf16 %v975_v39, %v959_v38  ;;  %v1034_v36 = vld [vmem:[%s5718_s6 + $0x280] sm:$0xff]  ;;  %v1051_v39 = vld [vmem:[%s5718_s6 + $0x308] sm:$0xff] }
 0x1fa   : > { %v978_v38 = vld [vmem:[%s5718_s6 + $0xc0] sm:$0xff] }
 0x1fc   : > { %212 = vrot.lane.b32.xlu1 %v4120_v40, %s3861_s22 }
 0x26a   : > { %v228_v49 = vpop.permute.xlu1 %227 }
 0x26b   : > { %v230_v50 = vadd.f32 %v228_v49, %v4116_v37  ;;  %v283_v49 = vld [vmem:[%s5717_s5 + $0x150] sm:$0xff] }
 0x26d   : > { %3780 = vtanh.f32 %v230_v50  ;;  %v300_v50 = vld [vmem:[%s5717_s5 + $0x1d8] sm:$0xff] }
 0x26e   : > { %v213_v19 = vpop.permute.xlu1 %212  ;;  %v3290_v57 = vpack.c.bf16 %v300_v50, %v283_v49  ;;  %v290_v49 = vld [vmem:[%s5717_s5 + $0x188] sm:$0xff]  ;;  %v307_v50 = vld [vmem:[%s5717_s5 + $0x210] sm:$0xff] }
 0x26f   : > { %v215_v20 = vadd.f32 %v213_v19, %v4116_v37  ;;  %v249_v37 = vld [vmem:[%s5717_s5 + $0x40] sm:$0xff]  ;;  %v268_v19 = vld [vmem:[%s5717_s5 + $0xd8] sm:$0xff]  ;;  %v3312_v58 = vpack.c.bf16 %v307_v50, %v290_v49 }
 0x271   : > { %v2880_v21 = vmul.f32 -1.442695, %v215_v20  ;;  %v257_v20 = vld [vmem:[%s5717_s5 + $0x80] sm:$0xff] }
 0x273   : > { %3782 = vpow2.f32 %v2880_v21  ;;  %v274_v21 = vld [vmem:[%s5717_s5 + $0x108] sm:$0xff] }
 0x277   : > { %v3781_v18 = vpop.eup %3780 }
 0x278   : > { %234 = vrot.lane.b32.xlu0 %v3781_v18, %s3862_s2  ;;  %v3292_v18 = vpack.c.bf16 %v269_v14, %v252_v13  ;;  %v1055_v13 = vld [vmem:[%s5718_s6 + $0x328] sm:$0xff] }
 0x279   : > { %v1071_v14 = vld [vmem:[%s5718_s6 + $0x3a8] sm:$0xff] }
 0x27d   : > { %v3783_v22 = vpop.eup %3782 }
 0x27e   : > { %v219_v23 = vadd.f32 1.0, %v3783_v22  ;;  %v286_v22 = vld [vmem:[%s5717_s5 + $0x168] sm:$0xff] }
 0x280   : > { %3784 = vrcp.f32 %v219_v23  ;;  %v303_v23 = vld [vmem:[%s5717_s5 + $0x1f0] sm:$0xff] }
 0x28a   : > { %v3785_v24 = vpop.eup %3784 }
 0x28b   : > { %v232_v25 = vsub.f32 1.0, %v3785_v24  ;;  %v238_v28 = vmul.f32 %v3785_v24, %v4098_v29  ;;  %v266_v29 = vld [vmem:[%s5717_s5 + $0xc8] sm:$0xff]  ;;  %v3294_v24 = vpack.c.bf16 %v268_v19, %v251_v17  ;;  %v986_v17 = vld [vmem:[%s5718_s6 + $0x100] sm:$0xff]  ;;  %v3326_v19 = vpack.c.bf16 %v1003_v12, %v987_v10 }
 0x28c   : > { %v3286_v44 = vpack.c.bf16 %v266_v29, %v249_v37  ;;  %v256_v37 = vld [vmem:[%s5717_s5 + $0x78] sm:$0xff]  ;;  %v273_v29 = vld [vmem:[%s5717_s5 + $0x100] sm:$0xff] }
 0x28d   : > { %v3308_v45 = vpack.c.bf16 %v273_v29, %v256_v37 }
 0x2ea   : > { %v235_v26 = vpop.permute.xlu0 %234 }
 0x2eb   : > { %v237_v27 = vmul.f32 %v235_v26, %v232_v25  ;;  %v3317_v25 = vpack.c.bf16 %v274_v21, %v257_v20  ;;  %v285_v26 = vld [vmem:[%s5717_s5 + $0x160] sm:$0xff]  ;;  %v3366_v20 = vpack.c.bf16 %v1071_v14, %v1055_v13 }
 0x2ec   : > { %v1054_v21 = vld [vmem:[%s5718_s6 + $0x320] sm:$0xff] }
 0x2ed   : > { %v239_v33 = vadd.f32 %v238_v28, %v237_v27  ;;  %v302_v27 = vld [vmem:[%s5717_s5 + $0x1e8] sm:$0xff]  ;;  %v3864_v28 = vmov 0.0|0.0   ;;  %v1058_v13 = vld [vmem:[%s5718_s6 + $0x340] sm:$0xff] }
 0x2ee   : > { %v3298_v41 = vpack.c.bf16 %v302_v27, %v285_v26  ;;  %v979_v26 = vld [vmem:[%s5718_s6 + $0xc8] sm:$0xff]  ;;  %v1074_v14 = vld [vmem:[%s5718_s6 + $0x3c0] sm:$0xff] }
 0x2ef   : > { %240 = vst.msk [vmem:[#allocation2] sm:$0x1] %vm84_vm3, %v239_v33  ;;  %310 = vrot.lane.b32.xlu1 %v239_v33, %s3862_s2  ;;  %v3296_v33 = vpack.c.bf16 %v303_v23, %v286_v22  ;;  %v1070_v22 = vld [vmem:[%s5718_s6 + $0x3a0] sm:$0xff]  ;;  %v1019_v23 = vld [vmem:[%s5718_s6 + $0x208] sm:$0xff] }
 0x361   : > { %v4232_v52 = vpop.permute.xlu1 %310 }
 0x362   : > { %2881 = vmatmul.mubr.msk.f32.vlgmr.msra.gmra.mrb[0].mxu1 %vm312_vm4, %v4232_v52  ;;  %2883 = vmatmul.mubr.msk.f32.vlgmr.msra.gmra.mrb[2].mxu0 %vm312_vm4, %v4232_v52 }
 0x363   : > { %3263 = vmatpush1.bf16.msra.mxu1 %v3262_v43  ;;  %3287 = vmatpush1.bf16.msra.mxu0 %v3286_v44  ;;  %v255_v43 = vld [vmem:[%s5717_s5 + $0x70] sm:$0xff]  ;;  %v272_v44 = vld [vmem:[%s5717_s5 + $0xf8] sm:$0xff] }
 0x364   : > { %3265 = vmatprep.subr.bf16.mxu1 %v3264_v47  ;;  %3289 = vmatprep.subr.bf16.mxu0 %v3288_v48  ;;  %v958_v47 = vld [vmem:[%s5718_s6 + $0x20] sm:$0xff]  ;;  %v3310_v54 = vpack.c.bf16 %v272_v44, %v255_v43  ;;  %v1011_v43 = vld [vmem:[%s5718_s6 + $0x1c8] sm:$0xff] }
 0x365   : > { %450 = vmatprep.mubr.f32.mxu1 %v3860_v11  ;;  %663 = vmatprep.mubr.f32.mxu0 %v3860_v11  ;;  %v974_v48 = vld [vmem:[%s5718_s6 + $0xa0] sm:$0xff] }
 0x366   : > { %v3356_v55 = vpack.c.bf16 %v974_v48, %v958_v47  ;;  %v4477_v44 = vld [vmem:[#allocation3] sm:$0x1] }
 0x367   : > { %3267 = vmatpush1.bf16.msra.mxu1 %v3266_v56  ;;  %3291 = vmatpush1.bf16.msra.mxu0 %v3290_v57  ;;  %v289_v56 = vld [vmem:[%s5717_s5 + $0x180] sm:$0xff]  ;;  %v306_v57 = vld [vmem:[%s5717_s5 + $0x208] sm:$0xff] }
 0x368   : > { %3277 = vmatprep.subr.bf16.mxu1 %v3276_v60  ;;  %3301 = vmatprep.subr.bf16.mxu0 %v3300_v61  ;;  %v990_v60 = vld [vmem:[%s5718_s6 + $0x120] sm:$0xff]  ;;  %v3314_v2 = vpack.c.bf16 %v306_v57, %v289_v56  ;;  %v1027_v56 = vld [vmem:[%s5718_s6 + $0x248] sm:$0xff] }
 0x369   : > { %v1006_v61 = vld [vmem:[%s5718_s6 + $0x1a0] sm:$0xff]  ;;  %v1043_v57 = vld [vmem:[%s5718_s6 + $0x2c8] sm:$0xff] }
 0x36a   : > { %2882 = vmatmul.mubr.msk.f32.vlgmr.msra.gmra.mrb[2].mxu1 %vm312_vm4, %v4232_v52  ;;  %2885 = vmatmul.mubr.msk.f32.vlgmr.msra.gmra.mrb[4].mxu0 %vm312_vm4, %v4232_v52  ;;  %v3360_v3 = vpack.c.bf16 %v1006_v61, %v990_v60  ;;  %v1050_v47 = vld [vmem:[%s5718_s6 + $0x300] sm:$0xff]  ;;  %v956_v60 = vld [vmem:[%s5718_s6 + $0x10] sm:$0xff]  ;;  %v3394_v63 = vpack.c.bf16 %v1043_v57, %v1027_v56 }
 0x36b   : > { %3279 = vmatpush1.bf16.msra.mxu1 %v3278_v4  ;;  %3303 = vmatpush1.bf16.msra.mxu0 %v3302_v5  ;;  %v954_v4 = vld [vmem:[%s5718_s6] sm:$0xff]  ;;  %v972_v61 = vld [vmem:[%s5718_s6 + $0x90] sm:$0xff] }
 0x36c   : > { %3281 = vmatprep.subr.bf16.mxu1 %v3280_v7  ;;  %3305 = vmatprep.subr.bf16.mxu0 %v3304_v8  ;;  %v970_v5 = vld [vmem:[%s5718_s6 + $0x80] sm:$0xff]  ;;  %v3362_v7 = vpack.c.bf16 %v1039_v1, %v1023_v0 }
 0x36d   : > { %592 = vmatprep.mubr.f32.mxu1 %v3860_v11  ;;  %805 = vmatprep.mubr.f32.mxu0 %v3860_v11  ;;  %v1022_v8 = vld [vmem:[%s5718_s6 + $0x220] sm:$0xff] }
 0x36e   : > { %v1066_v48 = vld [vmem:[%s5718_s6 + $0x380] sm:$0xff] }
 0x36f   : > { %3283 = vmatpush1.bf16.msra.mxu1 %v3282_v15  ;;  %3307 = vmatpush1.bf16.msra.mxu0 %v3306_v16  ;;  %v3324_v15 = vpack.c.bf16 %v970_v5, %v954_v4  ;;  %v3364_v16 = vpack.c.bf16 %v1038_v9, %v1022_v8  ;;  %v1026_v0 = vld [vmem:[%s5718_s6 + $0x240] sm:$0xff]  ;;  %v1059_v4 = vld [vmem:[%s5718_s6 + $0x348] sm:$0xff]  ;;  %v988_v8 = vld [vmem:[%s5718_s6 + $0x110] sm:$0xff] }
 0x370   : > { %3293 = vmatprep.subr.bf16.mxu1 %v3292_v18  ;;  %3316 = vmatprep.subr.bf16.mxu0 %v3864_v28  ;;  %v1002_v18 = vld [vmem:[%s5718_s6 + $0x180] sm:$0xff]  ;;  %v1075_v5 = vld [vmem:[%s5718_s6 + $0x3c8] sm:$0xff]  ;;  %v1004_v9 = vld [vmem:[%s5718_s6 + $0x190] sm:$0xff] }
 0x371   : > { %v3328_v27 = vpack.c.bf16 %v1002_v18, %v986_v17  ;;  %v1042_v1 = vld [vmem:[%s5718_s6 + $0x2c0] sm:$0xff]  ;;  %v3398_v12 = vpack.c.bf16 %v1075_v5, %v1059_v4  ;;  %v967_v17 = vld [vmem:[%s5718_s6 + $0x68] sm:$0xff] }
 0x372   : > { %2884 = vmatmul.mubr.msk.f32.vlgmr.msra.gmra.mrb[4].mxu1 %vm312_vm4, %v4232_v52  ;;  %2887 = vmatmul.mubr.msk.f32.vlgmr.msra.gmra.mrb[6].mxu0 %vm312_vm4, %v4232_v52  ;;  %v983_v18 = vld [vmem:[%s5718_s6 + $0xe8] sm:$0xff]  ;;  %v1030_v56 = vld [vmem:[%s5718_s6 + $0x260] sm:$0xff] }
 0x373   : > { %3295 = vmatpush1.bf16.msra.mxu1 %v3294_v24  ;;  %3318 = vmatpush3.bf16.msra.mxu0 %v3317_v25  ;;  %v1035_v24 = vld [vmem:[%s5718_s6 + $0x288] sm:$0xff]  ;;  %v1046_v57 = vld [vmem:[%s5718_s6 + $0x2e0] sm:$0xff] }
 0x374   : > { %3297 = vmatprep.subr.bf16.mxu1 %v3296_v33  ;;  %3319 = vmatprep.subr.bf16.mxu0 %v3864_v28  ;;  %v963_v25 = vld [vmem:[%s5718_s6 + $0x48] sm:$0xff]  ;;  %v3368_v33 = vpack.c.bf16 %v1070_v22, %v1054_v21  ;;  %v3330_v37 = vpack.c.bf16 %v1035_v24, %v1019_v23  ;;  %v1020_v21 = vld [vmem:[%s5718_s6 + $0x210] sm:$0xff]  ;;  %v3418_v24 = vpack.c.bf16 %v983_v18, %v967_v17  ;;  %v1062_v4 = vld [vmem:[%s5718_s6 + $0x360] sm:$0xff] }
 0x375   : > { %734 = vmatprep.mubr.f32.mxu1 %v3860_v11  ;;  %3207 = vmatprep.mubr.msk.f32.mxu0 %vm3865_vm5, %v3860_v11  ;;  %v3386_v29 = vpack.c.bf16 %v979_v26, %v963_v25  ;;  %v1036_v22 = vld [vmem:[%s5718_s6 + $0x290] sm:$0xff]  ;;  %v966_v25 = vld [vmem:[%s5718_s6 + $0x60] sm:$0xff] }
 0x376   : > { %v982_v26 = vld [vmem:[%s5718_s6 + $0xe0] sm:$0xff]  ;;  %v1056_v18 = vld [vmem:[%s5718_s6 + $0x330] sm:$0xff] }
 0x377   : > { %3299 = vmatpush1.bf16.msra.mxu1 %v3298_v41  ;;  %3321 = vmatpush3.bf16.msra.mxu0 %v3320_v42  ;;  %v1067_v41 = vld [vmem:[%s5718_s6 + $0x388] sm:$0xff]  ;;  %v1078_v5 = vld [vmem:[%s5718_s6 + $0x3e0] sm:$0xff] }
 0x378   : > { %3309 = vmatprep.subr.bf16.mxu1 %v3308_v45  ;;  %3355 = vmatprep.subr.bf16.mxu0 %v3354_v46  ;;  %v995_v42 = vld [vmem:[%s5718_s6 + $0x148] sm:$0xff]  ;;  %v3332_v45 = vpack.c.bf16 %v1034_v36, %v1018_v34  ;;  %v3334_v49 = vpack.c.bf16 %v1067_v41, %v1051_v39 }
 0x379   : > { %v3390_v50 = vpack.c.bf16 %v1011_v43, %v995_v42  ;;  %v999_v34 = vld [vmem:[%s5718_s6 + $0x168] sm:$0xff]  ;;  %v998_v42 = vld [vmem:[%s5718_s6 + $0x160] sm:$0xff] }
 0x37a   : > { %2886 = vmatmul.mubr.msk.f32.vlgmr.msra.gmra.mrb[6].mxu1 %vm312_vm4, %v4232_v52  ;;  %3208 = vmatmul.mubr.msk.f32.vlgmr.msra.gmra.mrb[8].mxu0 %vm312_vm4, %v4232_v52  ;;  %v1015_v36 = vld [vmem:[%s5718_s6 + $0x1e8] sm:$0xff]  ;;  %v1014_v43 = vld [vmem:[%s5718_s6 + $0x1e0] sm:$0xff] }
 0x37b   : > { %3311 = vmatpush1.bf16.msra.mxu1 %v3310_v54  ;;  %3357 = vmatpush1.bf16.msra.mxu0 %v3356_v55  ;;  %v957_v54 = vld [vmem:[%s5718_s6 + $0x18] sm:$0xff]  ;;  %v3422_v41 = vpack.c.bf16 %v1015_v36, %v999_v34  ;;  %v996_v36 = vld [vmem:[%s5718_s6 + $0x150] sm:$0xff] }
 0x37c   : > { %3313 = vmatprep.subr.bf16.mxu1 %v3312_v58  ;;  %3359 = vmatprep.subr.bf16.mxu0 %v3358_v59  ;;  %v973_v55 = vld [vmem:[%s5718_s6 + $0x98] sm:$0xff]  ;;  %v3336_v58 = vpack.c.bf16 %v1066_v48, %v1050_v47  ;;  %v3392_v59 = vpack.c.bf16 %v1010_v53, %v994_v51  ;;  %v1031_v47 = vld [vmem:[%s5718_s6 + $0x268] sm:$0xff]  ;;  %v960_v51 = vld [vmem:[%s5718_s6 + $0x30] sm:$0xff] }
 0x37d   : > { %876 = vmatprep.mubr.f32.mxu1 %v3860_v11  ;;  %1291 = vmatprep.mubr.f32.mxu0 %v3860_v11  ;;  %v3338_v62 = vpack.c.bf16 %v973_v55, %v957_v54  ;;  %v1047_v48 = vld [vmem:[%s5718_s6 + $0x2e8] sm:$0xff]  ;;  %v976_v53 = vld [vmem:[%s5718_s6 + $0xb0] sm:$0xff] }
 0x37e   : > { %v3426_v55 = vpack.c.bf16 %v1047_v48, %v1031_v47  ;;  %v1060_v48 = vld [vmem:[%s5718_s6 + $0x350] sm:$0xff] }
 0x37f   : > { %3315 = vmatpush1.bf16.msra.mxu1 %v3314_v2  ;;  %3361 = vmatpush1.bf16.msra.mxu0 %v3360_v3  ;;  %v989_v2 = vld [vmem:[%s5718_s6 + $0x118] sm:$0xff] }
 0x380   : > { %3323 = vmatprep.subr.bf16.mxu1 %v3322_v6  ;;  %3363 = vmatprep.subr.bf16.mxu0 %v3362_v7  ;;  %v1005_v3 = vld [vmem:[%s5718_s6 + $0x198] sm:$0xff]  ;;  %v3340_v6 = vpack.c.bf16 %v972_v61, %v956_v60  ;;  %v3396_v7 = vpack.c.bf16 %v1042_v1, %v1026_v0  ;;  %v1063_v60 = vld [vmem:[%s5718_s6 + $0x368] sm:$0xff]  ;;  %v992_v0 = vld [vmem:[%s5718_s6 + $0x130] sm:$0xff] }
 0x381   : > { %v3342_v10 = vpack.c.bf16 %v1005_v3, %v989_v2  ;;  %v1079_v61 = vld [vmem:[%s5718_s6 + $0x3e8] sm:$0xff]  ;;  %v1008_v3 = vld [vmem:[%s5718_s6 + $0x1b0] sm:$0xff] }
 0x382   : > { %2888 = vmatmul.mubr.msk.f32.vlgmr.msra.gmra.mrb[8].mxu1 %vm312_vm4, %v4232_v52  ;;  %v962_v52 = vld [vmem:[%s5718_s6 + $0x40] sm:$0xff]  ;;  %v3430_v2 = vpack.c.bf16 %v1079_v61, %v1063_v60  ;;  %v1000_v61 = vld [vmem:[%s5718_s6 + $0x170] sm:$0xff] }
 0x383   : > { %3325 = vmatpush1.bf16.msra.mxu1 %v3324_v15  ;;  %3365 = vmatpush1.bf16.msra.mxu0 %v3364_v16  ;;  %v3388_v46 = vpack.c.bf16 %v978_v38, %v962_v52  ;;  %v1021_v15 = vld [vmem:[%s5718_s6 + $0x218] sm:$0xff]  ;;  %v1052_v52 = vld [vmem:[%s5718_s6 + $0x310] sm:$0xff] }
 0x384   : > { %3327 = vmatprep.subr.bf16.mxu1 %v3326_v19  ;;  %3367 = vmatprep.subr.bf16.mxu0 %v3366_v20  ;;  %v1037_v16 = vld [vmem:[%s5718_s6 + $0x298] sm:$0xff]  ;;  %v3344_v19 = vpack.c.bf16 %v1004_v9, %v988_v8  ;;  %v3400_v20 = vpack.c.bf16 %v1074_v14, %v1058_v13  ;;  %v1068_v38 = vld [vmem:[%s5718_s6 + $0x390] sm:$0xff]  ;;  %v3376_v8 = vpack.c.bf16 %v1008_v3, %v992_v0 }
 0x385   : > { %1149 = vmatprep.mubr.f32.mxu1 %v3860_v11  ;;  %v3346_v23 = vpack.c.bf16 %v1037_v16, %v1021_v15  ;;  %v3432_v9 = vpack.c.bf16 %v1078_v5, %v1062_v4  ;;  %v1040_v13 = vld [vmem:[%s5718_s6 + $0x2b0] sm:$0xff]  ;;  %v1057_v14 = vld [vmem:[%s5718_s6 + $0x338] sm:$0xff] }
 0x386   : > { %v1073_v15 = vld [vmem:[%s5718_s6 + $0x3b8] sm:$0xff]  ;;  %v1032_v3 = vld [vmem:[%s5718_s6 + $0x270] sm:$0xff] }
 0x387   : > { %3329 = vmatpush1.bf16.msra.mxu1 %v3328_v27  ;;  %3369 = vmatpush1.bf16.msra.mxu0 %v3368_v33  ;;  %v1053_v27 = vld [vmem:[%s5718_s6 + $0x318] sm:$0xff]  ;;  %v3382_v17 = vpack.c.bf16 %v1073_v15, %v1057_v14  ;;  %v1048_v4 = vld [vmem:[%s5718_s6 + $0x2f0] sm:$0xff]  ;;  %v1802_v14 = vld [vmem:[%s5719_s7 + $0x88] sm:$0xff] }
 0x388   : > { %3331 = vmatprep.subr.bf16.mxu1 %v3330_v37  ;;  %3387 = vmatprep.subr.bf16.mxu0 %v3386_v29  ;;  %v1069_v33 = vld [vmem:[%s5718_s6 + $0x398] sm:$0xff]  ;;  %v3348_v37 = vpack.c.bf16 %v1036_v22, %v1020_v21  ;;  %v3420_v29 = vpack.c.bf16 %v982_v26, %v966_v25  ;;  %v980_v25 = vld [vmem:[%s5718_s6 + $0xd0] sm:$0xff]  ;;  %v1785_v15 = vld [vmem:[%s5719_s7] sm:$0xff] }
 0x389   : > { %v3350_v39 = vpack.c.bf16 %v1069_v33, %v1053_v27  ;;  %v981_v21 = vld [vmem:[%s5718_s6 + $0xd8] sm:$0xff] }
 0x38a   : > { %2892 = vmatmul.mubr.msk.f32.vlgmr.msra.gmra.mrb[2].mxu0 %vm40_vm0, %v4477_v44  ;;  %v997_v26 = vld [vmem:[%s5718_s6 + $0x158] sm:$0xff] }
 0x38b   : > { %3333 = vmatpush1.bf16.msra.mxu1 %v3332_v45  ;;  %3389 = vmatpush1.bf16.msra.mxu0 %v3388_v46  ;;  %v961_v45 = vld [vmem:[%s5718_s6 + $0x38] sm:$0xff] }
 0x38c   : > { %3335 = vmatprep.subr.bf16.mxu1 %v3334_v49  ;;  %3391 = vmatprep.subr.bf16.mxu0 %v3390_v50  ;;  %v977_v46 = vld [vmem:[%s5718_s6 + $0xb8] sm:$0xff]  ;;  %v3352_v49 = vpack.c.bf16 %v1068_v38, %v1052_v52  ;;  %v3424_v50 = vpack.c.bf16 %v1014_v43, %v998_v42  ;;  %v1044_v42 = vld [vmem:[%s5718_s6 + $0x2d0] sm:$0xff] }
 0x38d   : > { %1433 = vmatprep.mubr.f32.mxu0 %v3860_v11  ;;  %v3370_v54 = vpack.c.bf16 %v977_v46, %v961_v45  ;;  %v1013_v27 = vld [vmem:[%s5718_s6 + $0x1d8] sm:$0xff] }
 0x38e   : > { %v3406_v34 = vpack.c.bf16 %v1013_v27, %v997_v26  ;;  %v1045_v52 = vld [vmem:[%s5718_s6 + $0x2d8] sm:$0xff] }
 0x38f   : > { %3337 = vmatpush1.bf16.msra.mxu1 %v3336_v58  ;;  %3393 = vmatpush1.bf16.msra.mxu0 %v3392_v59  ;;  %v993_v58 = vld [vmem:[%s5718_s6 + $0x138] sm:$0xff] }
 0x390   : > { %3339 = vmatprep.subr.bf16.mxu1 %v3338_v62  ;;  %3395 = vmatprep.subr.bf16.mxu0 %v3394_v63  ;;  %v1009_v59 = vld [vmem:[%s5718_s6 + $0x1b8] sm:$0xff]  ;;  %v3372_v62 = vpack.c.bf16 %v976_v53, %v960_v51  ;;  %v3428_v63 = vpack.c.bf16 %v1046_v57, %v1030_v56  ;;  %v984_v56 = vld [vmem:[%s5718_s6 + $0xf0] sm:$0xff] }
 0x391   : > { %v3374_v1 = vpack.c.bf16 %v1009_v59, %v993_v58  ;;  %v1061_v43 = vld [vmem:[%s5718_s6 + $0x358] sm:$0xff] }
 0x392   : > { %2890 = vmatmul.mubr.msk.f32.vlgmr.msra.gmra.mrb[0].mxu1 %vm40_vm0, %v4477_v44  ;;  %v1077_v45 = vld [vmem:[%s5718_s6 + $0x3d8] sm:$0xff] }
 0x393   : > { %3341 = vmatpush1.bf16.msra.mxu1 %v3340_v6  ;;  %3397 = vmatpush1.bf16.msra.mxu0 %v3396_v7  ;;  %v1025_v6 = vld [vmem:[%s5718_s6 + $0x238] sm:$0xff]  ;;  %v3414_v47 = vpack.c.bf16 %v1077_v45, %v1061_v43  ;;  %v1833_v43 = vld [vmem:[%s5719_s7 + $0x180] sm:$0xff] }
 0x394   : > { %3343 = vmatprep.subr.bf16.mxu1 %v3342_v10  ;;  %3399 = vmatprep.subr.bf16.mxu0 %v3398_v12  ;;  %v1041_v7 = vld [vmem:[%s5718_s6 + $0x2b8] sm:$0xff]  ;;  %v1024_v12 = vld [vmem:[%s5718_s6 + $0x230] sm:$0xff] }
 0x395   : > { %1220 = vmatprep.mubr.f32.mxu1 %v3860_v11  ;;  %v3378_v10 = vpack.c.bf16 %v1041_v7, %v1025_v6  ;;  %v3380_v16 = vpack.c.bf16 %v1040_v13, %v1024_v12  ;;  %v985_v51 = vld [vmem:[%s5718_s6 + $0xf8] sm:$0xff]  ;;  %v3444_v7 = vpack.c.bf16 %v1048_v4, %v1032_v3  ;;  %v1801_v13 = vld [vmem:[%s5719_s7 + $0x80] sm:$0xff]  ;;  %v1814_v4 = vld [vmem:[%s5719_s7 + $0xe8] sm:$0xff] }
 0x396   : > { %v1001_v57 = vld [vmem:[%s5718_s6 + $0x178] sm:$0xff]  ;;  %v1813_v3 = vld [vmem:[%s5719_s7 + $0xe0] sm:$0xff] }
 0x397   : > { %3345 = vmatpush1.bf16.msra.mxu1 %v3344_v19  ;;  %3401 = vmatpush1.bf16.msra.mxu0 %v3400_v20  ;;  %v1072_v19 = vld [vmem:[%s5718_s6 + $0x3b0] sm:$0xff]  ;;  %v965_v20 = vld [vmem:[%s5718_s6 + $0x58] sm:$0xff] }
 0x398   : > { %3347 = vmatprep.subr.bf16.mxu1 %v3346_v23  ;;  %3419 = vmatprep.subr.bf16.mxu0 %v3418_v24  ;;  %v3384_v22 = vpack.c.bf16 %v1072_v19, %v1056_v18  ;;  %v3402_v23 = vpack.c.bf16 %v981_v21, %v965_v20  ;;  %v964_v24 = vld [vmem:[%s5718_s6 + $0x50] sm:$0xff]  ;;  %v1017_v58 = vld [vmem:[%s5718_s6 + $0x1f8] sm:$0xff] }
 0x399   : > { %v3404_v33 = vpack.c.bf16 %v980_v25, %v964_v24  ;;  %v3438_v60 = vpack.c.bf16 %v1017_v58, %v1001_v57  ;;  %v1049_v0 = vld [vmem:[%s5718_s6 + $0x2f8] sm:$0xff]  ;;  %v1803_v18 = vld [vmem:[%s5719_s7 + $0x90] sm:$0xff]  ;;  %v1805_v24 = vld [vmem:[%s5719_s7 + $0xa0] sm:$0xff] }
 0x39a   : > { %2894 = vmatmul.mubr.msk.f32.vlgmr.msra.gmra.mrb[4].mxu0 %vm40_vm0, %v4477_v44  ;;  %v1065_v5 = vld [vmem:[%s5718_s6 + $0x378] sm:$0xff]  ;;  %v1806_v25 = vld [vmem:[%s5719_s7 + $0xa8] sm:$0xff]  ;;  %v1835_v57 = vld [vmem:[%s5719_s7 + $0x190] sm:$0xff] }
 0x39b   : > { %3349 = vmatpush1.bf16.msra.mxu1 %v3348_v37  ;;  %3421 = vmatpush1.bf16.msra.mxu0 %v3420_v29  ;;  %v1012_v37 = vld [vmem:[%s5718_s6 + $0x1d0] sm:$0xff]  ;;  %v1029_v29 = vld [vmem:[%s5718_s6 + $0x258] sm:$0xff]  ;;  %v3458_v27 = vpack.c.bf16 %v1806_v25, %v1805_v24 }
 0x39c   : > { %3351 = vmatprep.subr.bf16.mxu1 %v3350_v39  ;;  %3423 = vmatprep.subr.bf16.mxu0 %v3422_v41  ;;  %v3408_v38 = vpack.c.bf16 %v1012_v37, %v996_v36  ;;  %v3410_v39 = vpack.c.bf16 %v1045_v52, %v1029_v29  ;;  %v1028_v41 = vld [vmem:[%s5718_s6 + $0x250] sm:$0xff]  ;;  %v1081_v6 = vld [vmem:[%s5718_s6 + $0x3f8] sm:$0xff] }
 0x39d   : > { %1575 = vmatprep.mubr.f32.mxu0 %v3860_v11  ;;  %v3412_v46 = vpack.c.bf16 %v1044_v42, %v1028_v41  ;;  %v1804_v19 = vld [vmem:[%s5719_s7 + $0x98] sm:$0xff]  ;;  %v1791_v52 = vld [vmem:[%s5719_s7 + $0x30] sm:$0xff]  ;;  %v1809_v41 = vld [vmem:[%s5719_s7 + $0xc0] sm:$0xff] }
 0x39e   : > { %v3454_v21 = vpack.c.bf16 %v1804_v19, %v1803_v18  ;;  %v1808_v37 = vld [vmem:[%s5719_s7 + $0xb8] sm:$0xff]  ;;  %v1810_v42 = vld [vmem:[%s5719_s7 + $0xc8] sm:$0xff]  ;;  %v1839_v18 = vld [vmem:[%s5719_s7 + $0x1b0] sm:$0xff] }
 0x39f   : > { %3353 = vmatpush1.bf16.msra.mxu1 %v3352_v49  ;;  %3425 = vmatpush1.bf16.msra.mxu0 %v3424_v50  ;;  %v1076_v49 = vld [vmem:[%s5718_s6 + $0x3d0] sm:$0xff]  ;;  %v969_v50 = vld [vmem:[%s5718_s6 + $0x78] sm:$0xff]  ;;  %v3466_v45 = vpack.c.bf16 %v1810_v42, %v1809_v41 }
 0x3a0   : > { %3371 = vmatprep.subr.bf16.mxu1 %v3370_v54  ;;  %3427 = vmatprep.subr.bf16.mxu0 %v3426_v55  ;;  %v3416_v53 = vpack.c.bf16 %v1076_v49, %v1060_v48  ;;  %v3434_v54 = vpack.c.bf16 %v985_v51, %v969_v50  ;;  %v968_v55 = vld [vmem:[%s5718_s6 + $0x70] sm:$0xff]  ;;  %v1794_v48 = vld [vmem:[%s5719_s7 + $0x48] sm:$0xff]  ;;  %v1817_v51 = vld [vmem:[%s5719_s7 + $0x100] sm:$0xff] }
 0x3a1   : > { %v3436_v59 = vpack.c.bf16 %v984_v56, %v968_v55  ;;  %v1811_v55 = vld [vmem:[%s5719_s7 + $0xd0] sm:$0xff]  ;;  %v1812_v56 = vld [vmem:[%s5719_s7 + $0xd8] sm:$0xff] }
 0x3a2   : > { %2891 = vmatmul.mubr.msk.f32.vlgmr.msra.gmra.mrb[2].mxu1 %vm40_vm0, %v4477_v44  ;;  %v3470_v58 = vpack.c.bf16 %v1812_v56, %v1811_v55  ;;  %v1823_v25 = vld [vmem:[%s5719_s7 + $0x130] sm:$0xff]  ;;  %v1844_v42 = vld [vmem:[%s5719_s7 + $0x1d8] sm:$0xff] }
 0x3a3   : > { %3373 = vmatpush1.bf16.msra.mxu1 %v3372_v62  ;;  %3429 = vmatpush1.bf16.msra.mxu0 %v3428_v63  ;;  %v1016_v62 = vld [vmem:[%s5718_s6 + $0x1f0] sm:$0xff]  ;;  %v1033_v63 = vld [vmem:[%s5718_s6 + $0x278] sm:$0xff] }
 0x3a4   : > { %3375 = vmatprep.subr.bf16.mxu1 %v3374_v1  ;;  %3431 = vmatprep.subr.bf16.mxu0 %v3430_v2  ;;  %v3440_v1 = vpack.c.bf16 %v1016_v62, %v1000_v61  ;;  %v3442_v2 = vpack.c.bf16 %v1049_v0, %v1033_v63  ;;  %v1796_v61 = vld [vmem:[%s5719_s7 + $0x58] sm:$0xff]  ;;  %v1819_v0 = vld [vmem:[%s5719_s7 + $0x110] sm:$0xff] }
 0x3a5   : > { %1362 = vmatprep.mubr.f32.mxu1 %v3860_v11  ;;  %v1843_v41 = vld [vmem:[%s5719_s7 + $0x1d0] sm:$0xff]  ;;  %v1848_v56 = vld [vmem:[%s5719_s7 + $0x1f8] sm:$0xff] }
 0x3a6   : > { %v1847_v55 = vld [vmem:[%s5719_s7 + $0x1f0] sm:$0xff] }
 0x3a7   : > { %3377 = vmatpush1.bf16.msra.mxu1 %v3376_v8  ;;  %3433 = vmatpush1.bf16.msra.mxu0 %v3432_v9  ;;  %v3446_v8 = vpack.c.bf16 %v1081_v6, %v1065_v5  ;;  %v1064_v9 = vld [vmem:[%s5718_s6 + $0x370] sm:$0xff]  ;;  %v1837_v5 = vld [vmem:[%s5719_s7 + $0x1a0] sm:$0xff]  ;;  %v3474_v6 = vpack.c.bf16 %v1814_v4, %v1813_v3 }
 0x3a8   : > { %3379 = vmatprep.subr.bf16.mxu1 %v3378_v10  ;;  %v1080_v10 = vld [vmem:[%s5718_s6 + $0x3f0] sm:$0xff] }
 0x3a9   : > { %v3448_v12 = vpack.c.bf16 %v1080_v10, %v1064_v9  ;;  %v1798_v9 = vld [vmem:[%s5719_s7 + $0x68] sm:$0xff] }
 0x3aa   : > { %2896 = vmatmul.mubr.msk.f32.vlgmr.msra.gmra.mrb[6].mxu0 %vm40_vm0, %v4477_v44 }
 0x3ab   : > { %3381 = vmatpush1.bf16.msra.mxu1 %v3380_v16  ;;  %v3450_v16 = vpack.c.bf16 %v1802_v14, %v1801_v13  ;;  %v1821_v13 = vld [vmem:[%s5719_s7 + $0x120] sm:$0xff]  ;;  %v1822_v14 = vld [vmem:[%s5719_s7 + $0x128] sm:$0xff] }
 0x3ac   : > { %3383 = vmatprep.subr.bf16.mxu1 %v3382_v17  ;;  %v1786_v17 = vld [vmem:[%s5719_s7 + $0x8] sm:$0xff] }
 0x3ad   : > { %v3452_v20 = vpack.c.bf16 %v1786_v17, %v1785_v15  ;;  %3451 = vmatprep.subr.bf16.mxu0 %v3450_v16  ;;  %v3492_v15 = vpack.c.bf16 %v1822_v14, %v1821_v13  ;;  %v1815_v16 = vld [vmem:[%s5719_s7 + $0xf0] sm:$0xff]  ;;  %v1816_v17 = vld [vmem:[%s5719_s7 + $0xf8] sm:$0xff] }
 0x3ae   : > { %v3478_v19 = vpack.c.bf16 %v1816_v17, %v1815_v16 }
 0x3af   : > { %3385 = vmatpush1.bf16.msra.mxu1 %v3384_v22  ;;  %v1787_v22 = vld [vmem:[%s5719_s7 + $0x10] sm:$0xff]  ;;  %3453 = vmatpush3.bf16.msra.mxu0 %v3452_v20  ;;  %v1840_v20 = vld [vmem:[%s5719_s7 + $0x1b8] sm:$0xff] }
 0x3b0   : > { %3403 = vmatprep.subr.bf16.mxu1 %v3402_v23  ;;  %v1788_v23 = vld [vmem:[%s5719_s7 + $0x18] sm:$0xff]  ;;  %3455 = vmatprep.subr.bf16.mxu0 %v3454_v21  ;;  %v1799_v21 = vld [vmem:[%s5719_s7 + $0x70] sm:$0xff] }
 0x3b1   : > { %v3456_v26 = vpack.c.bf16 %v1788_v23, %v1787_v22  ;;  %v1800_v22 = vld [vmem:[%s5719_s7 + $0x78] sm:$0xff]  ;;  %v3494_v23 = vpack.c.bf16 %v1840_v20, %v1839_v18  ;;  %v1667_v20 = vsub.s32 2, %v4104_v31 }
 0x3b2   : > { %2893 = vmatmul.mubr.msk.f32.vlgmr.msra.gmra.mrb[4].mxu1 %vm40_vm0, %v4477_v44  ;;  %v3480_v24 = vpack.c.bf16 %v1800_v22, %v1799_v21  ;;  %v1849_v21 = vld [vmem:[%s5719_s7 + $0x200] sm:$0xff]  ;;  %v1850_v22 = vld [vmem:[%s5719_s7 + $0x208] sm:$0xff] }
 0x3b3   : > { %3405 = vmatpush1.bf16.msra.mxu1 %v3404_v33  ;;  %1504 = vmatprep.mubr.f32.mxu1 %v3860_v11  ;;  %v1789_v33 = vld [vmem:[%s5719_s7 + $0x20] sm:$0xff] }
 0x3b4   : > { %3407 = vmatprep.subr.bf16.mxu1 %v3406_v34  ;;  %3457 = vmatpush3.bf16.msra.mxu0 %v3456_v26  ;;  %v1790_v34 = vld [vmem:[%s5719_s7 + $0x28] sm:$0xff]  ;;  %v1824_v26 = vld [vmem:[%s5719_s7 + $0x138] sm:$0xff] }
 0x3b5   : > { %3459 = vmatprep.subr.bf16.mxu0 %v3458_v27  ;;  %v3460_v36 = vpack.c.bf16 %v1790_v34, %v1789_v33  ;;  %v3496_v27 = vpack.c.bf16 %v1824_v26, %v1823_v25  ;;  %v1841_v33 = vld [vmem:[%s5719_s7 + $0x1c0] sm:$0xff]  ;;  %v1842_v34 = vld [vmem:[%s5719_s7 + $0x1c8] sm:$0xff]  ;;  %v1868_v25 = vld [vmem:[%s5719_s7 + $0x298] sm:$0xff] }
 0x3b7   : > { %3409 = vmatpush1.bf16.msra.mxu1 %v3408_v38  ;;  %v1792_v38 = vld [vmem:[%s5719_s7 + $0x38] sm:$0xff] }
 0x3b8   : > { %3411 = vmatprep.subr.bf16.mxu1 %v3410_v39  ;;  %3461 = vmatpush3.bf16.msra.mxu0 %v3460_v36  ;;  %v3464_v39 = vpack.c.bf16 %v1792_v38, %v1791_v52  ;;  %v1865_v36 = vld [vmem:[%s5719_s7 + $0x280] sm:$0xff]  ;;  %v1826_v52 = vld [vmem:[%s5719_s7 + $0x148] sm:$0xff] }
 0x3bb   : > { %3413 = vmatpush1.bf16.msra.mxu1 %v3412_v46  ;;  %v1834_v46 = vld [vmem:[%s5719_s7 + $0x188] sm:$0xff] }
 0x3bc   : > { %3415 = vmatprep.subr.bf16.mxu1 %v3414_v47  ;;  %v1793_v47 = vld [vmem:[%s5719_s7 + $0x40] sm:$0xff]  ;;  %v3482_v49 = vpack.c.bf16 %v1834_v46, %v1833_v43  ;;  %v3502_v43 = vpack.c.bf16 %v1844_v42, %v1843_v41  ;;  %v1828_v46 = vld [vmem:[%s5719_s7 + $0x158] sm:$0xff] }
 0x3bd   : > { %v3468_v50 = vpack.c.bf16 %v1794_v48, %v1793_v47  ;;  %v1845_v48 = vld [vmem:[%s5719_s7 + $0x1e0] sm:$0xff] }
 0x3bf   : > { %3417 = vmatpush1.bf16.msra.mxu1 %v3416_v53  ;;  %v1818_v53 = vld [vmem:[%s5719_s7 + $0x108] sm:$0xff] }
 0x3c0   : > { %3435 = vmatprep.subr.bf16.mxu1 %v3434_v54  ;;  %v3484_v54 = vpack.c.bf16 %v1818_v53, %v1817_v51  ;;  %v1829_v51 = vld [vmem:[%s5719_s7 + $0x160] sm:$0xff]  ;;  %v1830_v53 = vld [vmem:[%s5719_s7 + $0x168] sm:$0xff] }
 0x3c2   : > { %2895 = vmatmul.mubr.msk.f32.vlgmr.msra.gmra.mrb[6].mxu1 %vm40_vm0, %v4477_v44 }
 0x3c3   : > { %3437 = vmatpush1.bf16.msra.mxu1 %v3436_v59  ;;  %1646 = vmatprep.mubr.f32.mxu1 %v3860_v11  ;;  %v1836_v59 = vld [vmem:[%s5719_s7 + $0x198] sm:$0xff] }
 0x3c4   : > { %3439 = vmatprep.subr.bf16.mxu1 %v3438_v60  ;;  %v1795_v60 = vld [vmem:[%s5719_s7 + $0x50] sm:$0xff]  ;;  %v3486_v62 = vpack.c.bf16 %v1836_v59, %v1835_v57  ;;  %v3510_v57 = vpack.c.bf16 %v1848_v56, %v1847_v55  ;;  %v1832_v59 = vld [vmem:[%s5719_s7 + $0x178] sm:$0xff] }
 0x3c5   : > { %v3472_v63 = vpack.c.bf16 %v1796_v61, %v1795_v60  ;;  %v1897_v61 = vld [vmem:[%s5719_s7 + $0x380] sm:$0xff] }
 0x3c7   : > { %3441 = vmatpush1.bf16.msra.mxu1 %v3440_v1  ;;  %v1820_v1 = vld [vmem:[%s5719_s7 + $0x118] sm:$0xff] }
 0x3c8   : > { %3443 = vmatprep.subr.bf16.mxu1 %v3442_v2  ;;  %v3488_v2 = vpack.c.bf16 %v1820_v1, %v1819_v0  ;;  %v1683_v0 = vsub.s32 6, %v4104_v31  ;;  %v4985_v1 = vld [vmem:[%s5712_s0 + $0x8] sm:$0xff] }
 0x3cb   : > { %3445 = vmatpush1.bf16.msra.mxu1 %v3444_v7  ;;  %v1838_v7 = vld [vmem:[%s5719_s7 + $0x1a8] sm:$0xff] }
 0x3cc   : > { %3447 = vmatprep.subr.bf16.mxu1 %v3446_v8  ;;  %v1797_v8 = vld [vmem:[%s5719_s7 + $0x60] sm:$0xff]  ;;  %v3490_v10 = vpack.c.bf16 %v1838_v7, %v1837_v5  ;;  %v1679_v7 = vsub.s32 5, %v4104_v31 }
 0x3ce   : > { %v1712_v56 = vrot.slane %v4985_v1, %v1679_v7 }
 0x3cf   : > { %3449 = vmatpush1.bf16.msra.mxu1 %v3448_v12  ;;  %v3476_v12 = vpack.c.bf16 %v1798_v9, %v1797_v8  ;;  %v4999_v8 = vld [vmem:[%s5712_s0] sm:$0xff] }
 0x3d0   : > { %3483 = vmatprep.subr.bf16.mxu1 %v3482_v49  ;;  %v1846_v49 = vld [vmem:[%s5719_s7 + $0x1e8] sm:$0xff]  ;;  %v1660_v9 = vrot.slane %v4999_v8, %v4107_v32  ;;  %v1668_v26 = vrot.slane %v4999_v8, %v1667_v20 }
 0x3d2   : > { %2897 = vmatmul.mubr.msk.f32.vlgmr.msra.gmra.mrb[8].mxu1 %vm40_vm0, %v4477_v44  ;;  %v1807_v44 = vld [vmem:[%s5719_s7 + $0xb0] sm:$0xff] }
 0x3d3   : > { %v3462_v29 = vpack.c.bf16 %v1808_v37, %v1807_v44  ;;  %3485 = vmatpush3.bf16.msra.mxu1 %v3484_v54  ;;  %v3498_v44 = vpack.c.bf16 %v1842_v34, %v1841_v33  ;;  %v1866_v37 = vld [vmem:[%s5719_s7 + $0x288] sm:$0xff]  ;;  %v3508_v54 = vpack.c.bf16 %v1830_v53, %v1829_v51  ;;  %v1871_v51 = vld [vmem:[%s5719_s7 + $0x2b0] sm:$0xff]  ;;  %v1872_v53 = vld [vmem:[%s5719_s7 + $0x2b8] sm:$0xff] }
 0x3d4   : > { %3487 = vmatprep.subr.bf16.mxu1 %v3486_v62  ;;  %v3514_v38 = vpack.c.bf16 %v1866_v37, %v1865_v36  ;;  %v1898_v62 = vld [vmem:[%s5719_s7 + $0x388] sm:$0xff]  ;;  %v1852_v37 = vld [vmem:[%s5719_s7 + $0x218] sm:$0xff] }
 0x3d5   : > { %3463 = vmatprep.subr.bf16.mxu0 %v3462_v29  ;;  %v1825_v29 = vld [vmem:[%s5719_s7 + $0x140] sm:$0xff] }
 0x3d6   : > { %3465 = vmatpush3.bf16.msra.mxu0 %v3464_v39  ;;  %v3500_v39 = vpack.c.bf16 %v1826_v52, %v1825_v29  ;;  %v1869_v52 = vld [vmem:[%s5719_s7 + $0x2a0] sm:$0xff] }
 0x3d7   : > { %3467 = vmatprep.subr.bf16.mxu0 %v3466_v45  ;;  %3489 = vmatpush3.bf16.msra.mxu1 %v3488_v2  ;;  %v1827_v45 = vld [vmem:[%s5719_s7 + $0x150] sm:$0xff]  ;;  %v4990_v2 = vrot.slane %v4985_v1, %v1683_v0 }
 0x3d8   : > { %3491 = vmatprep.subr.bf16.mxu1 %v3490_v10  ;;  %v3504_v47 = vpack.c.bf16 %v1828_v46, %v1827_v45  ;;  %v1680_v10 = vrot.slane %v4999_v8, %v1679_v7  ;;  %v1858_v7 = vld [vmem:[%s5719_s7 + $0x248] sm:$0xff] }
 0x3da   : > { %3469 = vmatpush3.bf16.msra.mxu0 %v3468_v50  ;;  %v3506_v50 = vpack.c.bf16 %v1846_v49, %v1845_v48  ;;  %v1853_v48 = vld [vmem:[%s5719_s7 + $0x220] sm:$0xff]  ;;  %v1854_v49 = vld [vmem:[%s5719_s7 + $0x228] sm:$0xff] }
 0x3db   : > { %3471 = vmatprep.subr.bf16.mxu0 %v3470_v58  ;;  %3493 = vmatpush3.bf16.msra.mxu1 %v3492_v15  ;;  %v1831_v58 = vld [vmem:[%s5719_s7 + $0x170] sm:$0xff]  ;;  %v3524_v55 = vpack.c.bf16 %v1854_v49, %v1853_v48  ;;  %v1861_v49 = vld [vmem:[%s5719_s7 + $0x260] sm:$0xff] }
 0x3dc   : > { %3495 = vmatprep.subr.bf16.mxu1 %v3494_v23  ;;  %v3512_v60 = vpack.c.bf16 %v1832_v59, %v1831_v58  ;;  %v1671_v23 = vsub.s32 3, %v4104_v31  ;;  %v1855_v58 = vld [vmem:[%s5719_s7 + $0x230] sm:$0xff]  ;;  %v1856_v59 = vld [vmem:[%s5719_s7 + $0x238] sm:$0xff] }
 0x3de   : > { %3473 = vmatpush3.bf16.msra.mxu0 %v3472_v63  ;;  %v3546_v63 = vpack.c.bf16 %v1898_v62, %v1897_v61  ;;  %v1672_v34 = vrot.slane %v4999_v8, %v1671_v23  ;;  %v1874_v61 = vld [vmem:[%s5719_s7 + $0x2c8] sm:$0xff] }
 0x3df   : > { %3475 = vmatprep.subr.bf16.mxu0 %v3474_v6  ;;  %3497 = vmatpush3.bf16.msra.mxu1 %v3496_v27  ;;  %v3516_v27 = vpack.c.bf16 %v1850_v22, %v1849_v21  ;;  %v1900_v21 = vld [vmem:[%s5719_s7 + $0x398] sm:$0xff] }
 0x3e0   : > { %3499 = vmatprep.subr.bf16.mxu1 %v3498_v44  ;;  %v1851_v44 = vld [vmem:[%s5719_s7 + $0x210] sm:$0xff] }
 0x3e1   : > { %v3520_v45 = vpack.c.bf16 %v1852_v37, %v1851_v44  ;;  %v1883_v37 = vld [vmem:[%s5719_s7 + $0x310] sm:$0xff] }
 0x3e2   : > { %3477 = vmatpush3.bf16.msra.mxu0 %v3476_v12  ;;  %v1664_v12 = vrot.slane %v4999_v8, %v4114_v35 }
 0x3e3   : > { %3479 = vmatprep.subr.bf16.mxu0 %v3478_v19  ;;  %3501 = vmatpush3.bf16.msra.mxu1 %v3500_v39 }
 0x3e4   : > { %3503 = vmatprep.subr.bf16.mxu1 %v3502_v43 }
 0x3e6   : > { %3481 = vmatpush3.bf16.msra.mxu0 %v3480_v24  ;;  %v1867_v24 = vld [vmem:[%s5719_s7 + $0x290] sm:$0xff] }
 0x3e7   : > { %3515 = vmatprep.subr.bf16.mxu0 %v3514_v38  ;;  %3505 = vmatpush3.bf16.msra.mxu1 %v3504_v47  ;;  %v3518_v36 = vpack.c.bf16 %v1868_v25, %v1867_v24  ;;  %v1870_v38 = vld [vmem:[%s5719_s7 + $0x2a8] sm:$0xff] }
 0x3e8   : > { %3507 = vmatprep.subr.bf16.mxu1 %v3506_v50  ;;  %v3522_v47 = vpack.c.bf16 %v1870_v38, %v1869_v52  ;;  %v1675_v50 = vsub.s32 4, %v4104_v31  ;;  %v1877_v52 = vld [vmem:[%s5719_s7 + $0x2e0] sm:$0xff] }
 0x3ea   : > { %v1676_v22 = vrot.slane %v4999_v8, %v1675_v50 }
 0x3eb   : > { %3509 = vmatpush3.bf16.msra.mxu1 %v3508_v54  ;;  %v1708_v54 = vrot.slane %v4985_v1, %v1675_v50  ;;  %v1862_v50 = vld [vmem:[%s5719_s7 + $0x268] sm:$0xff] }
 0x3ec   : > { %3511 = vmatprep.subr.bf16.mxu1 %v3510_v57  ;;  %v3526_v57 = vpack.c.bf16 %v1872_v53, %v1871_v51 }
 0x3ef   : > { %3513 = vmatpush3.bf16.msra.mxu1 %v3512_v60  ;;  %v1873_v60 = vld [vmem:[%s5719_s7 + $0x2c0] sm:$0xff] }
 0x3f0   : > { %3547 = vmatprep.subr.bf16.mxu1 %v3546_v63 }
 0x44d   : > { %v949_v3 = vpop.f32.mrb[8].mxu0 }
 0x44e   : > { %2693 = vrot.lane.b32.xlu1 %v949_v3, %s3863_s24  ;;  %v3209_v4 = vpop.f32.mrb[9].mxu0 }
 0x44f   : > { %v3528_v4 = vpack.c.bf16 %v1856_v59, %v1855_v58  ;;  %v1880_v58 = vld [vmem:[%s5719_s7 + $0x2f8] sm:$0xff]  ;;  %v1903_v59 = vld [vmem:[%s5719_s7 + $0x3b0] sm:$0xff] }
 0x45d   : > { %v4993_v5 = vpop.f32.mrb[2].mxu0 }
 0x45e   : > { %v1295_v6 = vpop.f32.mrb[3].mxu0 }
 0x45f   : > { %v3726_v16 = vadd.f32 %v1680_v10, %v1295_v6  ;;  %v1857_v6 = vld [vmem:[%s5719_s7 + $0x240] sm:$0xff]  ;;  %v3530_v10 = vpack.c.bf16 %v1874_v61, %v1873_v60  ;;  %v1904_v60 = vld [vmem:[%s5719_s7 + $0x3b8] sm:$0xff]  ;;  %v3540_v61 = vpack.c.bf16 %v1862_v50, %v1861_v49  ;;  %v1934_v50 = vld [vmem:[%s5719_s7 + $0x4a8] sm:$0xff] }
 0x460   : > { %v3532_v24 = vpack.c.bf16 %v1858_v7, %v1857_v6  ;;  %v3558_v6 = vpack.c.bf16 %v1904_v60, %v1903_v59  ;;  %v1887_v7 = vld [vmem:[%s5719_s7 + $0x330] sm:$0xff]  ;;  %v1933_v49 = vld [vmem:[%s5719_s7 + $0x4a0] sm:$0xff]  ;;  %v1894_v59 = vld [vmem:[%s5719_s7 + $0x368] sm:$0xff] }
 0x465   : > { %v1151_v13 = vpop.f32.mrb[0].mxu1 }
 0x466   : > { %v3721_v14 = vadd.f32 %v1660_v9, %v1151_v13  ;;  %v1153_v15 = vpop.f32.mrb[1].mxu1  ;;  %v1882_v13 = vld [vmem:[%s5719_s7 + $0x308] sm:$0xff] }
 0x467   : > { %v3722_v17 = vadd.f32 %v1664_v12, %v1153_v15  ;;  %v1881_v12 = vld [vmem:[%s5719_s7 + $0x300] sm:$0xff]  ;;  %v1875_v15 = vld [vmem:[%s5719_s7 + $0x2d0] sm:$0xff] }
 0x468   : > { %v3548_v25 = vpack.c.bf16 %v1882_v13, %v1881_v12  ;;  %v1905_v12 = vld [vmem:[%s5719_s7 + $0x3c0] sm:$0xff]  ;;  %v1906_v13 = vld [vmem:[%s5719_s7 + $0x3c8] sm:$0xff] }
 0x469   : > { %3786 = vtanh.f32 %v3722_v17  ;;  %v1899_v17 = vld [vmem:[%s5719_s7 + $0x390] sm:$0xff] }
 0x46a   : > { %3788 = vtanh.f32 %v3721_v14  ;;  %v1687_v14 = vsub.s32 7, %v4104_v31  ;;  %v3550_v44 = vpack.c.bf16 %v1900_v21, %v1899_v17 }
 0x46b   : > { %3790 = vtanh.f32 %v3726_v16  ;;  %v1876_v16 = vld [vmem:[%s5719_s7 + $0x2d8] sm:$0xff] }
 0x46d   : > { %v5006_v18 = vpop.f32.mrb[4].mxu0 }
 0x46e   : > { %v5008_v19 = vpop.f32.mrb[5].mxu0 }
 0x473   : > { %v3787_v33 = vpop.eup %3786 }
 0x474   : > { %v3789_v29 = vpop.eup %3788  ;;  %2105 = vmatprep.mubr.f32.mxu0 %v3787_v33 }
 0x475   : > { %v3791_v39 = vpop.eup %3790  ;;  %v1222_v41 = vpop.f32.mrb[2].mxu1  ;;  %2106 = vmatmul.mubr.f32.vlgmr.msra.gmra.mrb[10].mxu0 %v3789_v29  ;;  %v1884_v29 = vld [vmem:[%s5719_s7 + $0x318] sm:$0xff] }
 0x476   : > { %v3723_v42 = vadd.f32 %v1668_v26, %v1222_v41  ;;  %3517 = vmatpush3.bf16.msra.mxu0 %v3516_v27  ;;  %v1224_v43 = vpop.f32.mrb[3].mxu1  ;;  %2245 = vmatprep.mubr.f32.mxu0 %v3791_v39  ;;  %v1859_v26 = vld [vmem:[%s5719_s7 + $0x250] sm:$0xff]  ;;  %v1860_v27 = vld [vmem:[%s5719_s7 + $0x258] sm:$0xff]  ;;  %v1696_v39 = vrot.slane %v4985_v1, %v4114_v35  ;;  %v1878_v41 = vld [vmem:[%s5719_s7 + $0x2e8] sm:$0xff]  ;;  %v3552_v48 = vpack.c.bf16 %v1884_v29, %v1883_v37 }
 0x477   : > { %v3724_v46 = vadd.f32 %v1672_v34, %v1224_v43  ;;  %3519 = vmatprep.subr.bf16.mxu0 %v3518_v36  ;;  %v1688_v34 = vrot.slane %v4999_v8, %v1687_v14  ;;  %v3534_v36 = vpack.c.bf16 %v1876_v16, %v1875_v15  ;;  %v1902_v43 = vld [vmem:[%s5719_s7 + $0x3a8] sm:$0xff]  ;;  %v3538_v53 = vpack.c.bf16 %v1878_v41, %v1877_v52  ;;  %v1929_v15 = vld [vmem:[%s5719_s7 + $0x480] sm:$0xff]  ;;  %v1931_v37 = vld [vmem:[%s5719_s7 + $0x490] sm:$0xff] }
 0x478   : > { %v1930_v16 = vld [vmem:[%s5719_s7 + $0x488] sm:$0xff]  ;;  %v1932_v29 = vld [vmem:[%s5719_s7 + $0x498] sm:$0xff]  ;;  %v1700_v52 = vrot.slane %v4985_v1, %v1667_v20  ;;  %v1915_v20 = vld [vmem:[%s5719_s7 + $0x410] sm:$0xff] }
 0x479   : > { %3792 = vtanh.f32 %v3724_v46  ;;  %v3725_v46 = vadd.f32 %v1676_v22, %v4993_v5  ;;  %v1885_v5 = vld [vmem:[%s5719_s7 + $0x320] sm:$0xff] }
 0x47a   : > { %3794 = vtanh.f32 %v3723_v42  ;;  %3521 = vmatpush3.bf16.msra.mxu0 %v3520_v45  ;;  %v1901_v42 = vld [vmem:[%s5719_s7 + $0x3a0] sm:$0xff] }
 0x47b   : > { %3523 = vmatprep.subr.bf16.mxu0 %v3522_v47  ;;  %v3536_v47 = vpack.c.bf16 %v1860_v27, %v1859_v26  ;;  %v1889_v22 = vld [vmem:[%s5719_s7 + $0x340] sm:$0xff]  ;;  %v1890_v26 = vld [vmem:[%s5719_s7 + $0x348] sm:$0xff] }
 0x47c   : > { %v1913_v27 = vld [vmem:[%s5719_s7 + $0x400] sm:$0xff] }
 0x47d   : > { %v1577_v62 = vpop.f32.mrb[6].mxu0 }
 0x47e   : > { %v5069_v63 = vadd.f32 %v1708_v54, %v1577_v62  ;;  %3525 = vmatpush3.bf16.msra.mxu0 %v3524_v55  ;;  %v1579_v3 = vpop.f32.mrb[7].mxu0  ;;  %v3554_v54 = vpack.c.bf16 %v1902_v43, %v1901_v42  ;;  %v1886_v55 = vld [vmem:[%s5719_s7 + $0x328] sm:$0xff]  ;;  %v1704_v42 = vrot.slane %v4985_v1, %v1671_v23 }
 0x47f   : > { %v5077_v9 = vadd.f32 %v1712_v56, %v1579_v3  ;;  %3527 = vmatprep.subr.bf16.mxu0 %v3526_v57  ;;  %v1879_v56 = vld [vmem:[%s5719_s7 + $0x2f0] sm:$0xff]  ;;  %v3730_v57 = vadd.f32 %v1696_v39, %v5008_v19  ;;  %v3556_v62 = vpack.c.bf16 %v1886_v55, %v1885_v5  ;;  %v1864_v3 = vld [vmem:[%s5719_s7 + $0x278] sm:$0xff]  ;;  %v1910_v23 = vld [vmem:[%s5719_s7 + $0x3e8] sm:$0xff] }
 0x480   : > { %v1863_v19 = vld [vmem:[%s5719_s7 + $0x270] sm:$0xff] }
 0x481   : > { %v3544_v17 = vpack.c.bf16 %v1864_v3, %v1863_v19  ;;  %v1918_v19 = vld [vmem:[%s5719_s7 + $0x428] sm:$0xff]  ;;  %v1911_v3 = vld [vmem:[%s5719_s7 + $0x3f0] sm:$0xff] }
 0x482   : > { %3529 = vmatpush3.bf16.msra.mxu0 %v3528_v4  ;;  %v3542_v4 = vpack.c.bf16 %v1880_v58, %v1879_v56  ;;  %v1893_v58 = vld [vmem:[%s5719_s7 + $0x360] sm:$0xff] }
 0x483   : > { %v3793_v33 = vpop.eup %3792  ;;  %3531 = vmatprep.subr.bf16.mxu0 %v3530_v10  ;;  %v1888_v10 = vld [vmem:[%s5719_s7 + $0x338] sm:$0xff] }
 0x484   : > { %v3795_v38 = vpop.eup %3794  ;;  %2175 = vmatprep.mubr.f32.mxu1 %v3793_v33  ;;  %v3560_v21 = vpack.c.bf16 %v1888_v10, %v1887_v7  ;;  %v1914_v33 = vld [vmem:[%s5719_s7 + $0x408] sm:$0xff]  ;;  %v1936_v7 = vld [vmem:[%s5719_s7 + $0x4b8] sm:$0xff]  ;;  %v3572_v10 = vpack.c.bf16 %v1894_v59, %v1893_v58 }
 0x485   : > { %v5128_v45 = vpop.f32.mrb[4].mxu1  ;;  %2176 = vmatmul.mubr.f32.vlgmr.msra.gmra.mrb[10].mxu1 %v3795_v38  ;;  %v3564_v38 = vpack.c.bf16 %v1890_v26, %v1889_v22  ;;  %v3580_v39 = vpack.c.bf16 %v1914_v33, %v1913_v27  ;;  %v1920_v22 = vld [vmem:[%s5719_s7 + $0x438] sm:$0xff]  ;;  %v1961_v26 = vld [vmem:[%s5719_s7 + $0x580] sm:$0xff]  ;;  %v1962_v27 = vld [vmem:[%s5719_s7 + $0x588] sm:$0xff] }
 0x486   : > { %3533 = vmatpush3.bf16.msra.mxu0 %v3532_v24  ;;  %3549 = vmatpush3.bf16.msra.mxu1 %v3548_v25  ;;  %v1366_v35 = vpop.f32.mrb[5].mxu1  ;;  %v3562_v24 = vpack.c.bf16 %v1906_v13, %v1905_v12  ;;  %v3578_v25 = vpack.c.bf16 %v1930_v16, %v1929_v15  ;;  %v1895_v13 = vld [vmem:[%s5719_s7 + $0x370] sm:$0xff]  ;;  %v1896_v15 = vld [vmem:[%s5719_s7 + $0x378] sm:$0xff] }
 0x487   : > { %v3728_v51 = vadd.f32 %v1688_v34, %v1366_v35  ;;  %3535 = vmatprep.subr.bf16.mxu0 %v3534_v36  ;;  %3551 = vmatprep.subr.bf16.mxu1 %v3550_v44  ;;  %v1907_v34 = vld [vmem:[%s5719_s7 + $0x3d0] sm:$0xff]  ;;  %v1908_v36 = vld [vmem:[%s5719_s7 + $0x3d8] sm:$0xff]  ;;  %v1684_v44 = vrot.slane %v4999_v8, %v1683_v0  ;;  %v1909_v35 = vld [vmem:[%s5719_s7 + $0x3e0] sm:$0xff]  ;;  %v3576_v33 = vpack.c.bf16 %v1896_v15, %v1895_v13 }
 0x488   : > { %v1891_v0 = vld [vmem:[%s5719_s7 + $0x350] sm:$0xff]  ;;  %v1892_v8 = vld [vmem:[%s5719_s7 + $0x358] sm:$0xff]  ;;  %v3566_v43 = vpack.c.bf16 %v1908_v36, %v1907_v34  ;;  %v3570_v60 = vpack.c.bf16 %v1910_v23, %v1909_v35  ;;  %v1921_v36 = vld [vmem:[%s5719_s7 + $0x440] sm:$0xff] }
 0x489   : > { %3796 = vtanh.f32 %v3728_v51  ;;  %v3727_v51 = vadd.f32 %v1684_v44, %v5128_v45  ;;  %v3568_v56 = vpack.c.bf16 %v1892_v8, %v1891_v0  ;;  %v1940_v0 = vld [vmem:[%s5719_s7 + $0x4d8] sm:$0xff]  ;;  %v1963_v8 = vld [vmem:[%s5719_s7 + $0x590] sm:$0xff] }
 0x48a   : > { %3798 = vtanh.f32 %v3725_v46  ;;  %3537 = vmatpush3.bf16.msra.mxu0 %v3536_v47  ;;  %3553 = vmatpush3.bf16.msra.mxu1 %v3552_v48  ;;  %v1916_v46 = vld [vmem:[%s5719_s7 + $0x418] sm:$0xff]  ;;  %v3582_v48 = vpack.c.bf16 %v1932_v29, %v1931_v37  ;;  %v3610_v37 = vpack.c.bf16 %v1962_v27, %v1961_v26  ;;  %v1922_v29 = vld [vmem:[%s5719_s7 + $0x448] sm:$0xff]  ;;  %v1927_v15 = vld [vmem:[%s5719_s7 + $0x470] sm:$0xff] }
 0x48b   : > { %3539 = vmatprep.subr.bf16.mxu0 %v3538_v53  ;;  %3555 = vmatprep.subr.bf16.mxu1 %v3554_v54  ;;  %3800 = vtanh.f32 %v3730_v57  ;;  %v3584_v57 = vpack.c.bf16 %v1916_v46, %v1915_v20  ;;  %v1923_v46 = vld [vmem:[%s5719_s7 + $0x450] sm:$0xff]  ;;  %v1924_v35 = vld [vmem:[%s5719_s7 + $0x458] sm:$0xff]  ;;  %v1970_v26 = vld [vmem:[%s5719_s7 + $0x5c8] sm:$0xff] }
 0x48c   : > { %3802 = vtanh.f32 %v3727_v51  ;;  %v1948_v23 = vld [vmem:[%s5719_s7 + $0x518] sm:$0xff]  ;;  %v1993_v27 = vld [vmem:[%s5719_s7 + $0x680] sm:$0xff] }
 0x48e   : > { %3541 = vmatpush3.bf16.msra.mxu0 %v3540_v61  ;;  %3557 = vmatpush3.bf16.msra.mxu1 %v3556_v62  ;;  %v3586_v61 = vpack.c.bf16 %v1934_v50, %v1933_v49  ;;  %v1917_v62 = vld [vmem:[%s5719_s7 + $0x420] sm:$0xff] }
 0x48f   : > { %3543 = vmatprep.subr.bf16.mxu0 %v3542_v4  ;;  %3559 = vmatprep.subr.bf16.mxu1 %v3558_v6  ;;  %v1912_v4 = vld [vmem:[%s5719_s7 + $0x3f8] sm:$0xff]  ;;  %v1935_v6 = vld [vmem:[%s5719_s7 + $0x4b0] sm:$0xff]  ;;  %v3588_v12 = vpack.c.bf16 %v1918_v19, %v1917_v62  ;;  %v1941_v49 = vld [vmem:[%s5719_s7 + $0x4e0] sm:$0xff] }
 0x490   : > { %v3574_v16 = vpack.c.bf16 %v1912_v4, %v1911_v3  ;;  %v1926_v62 = vld [vmem:[%s5719_s7 + $0x468] sm:$0xff]  ;;  %v1943_v4 = vld [vmem:[%s5719_s7 + $0x4f0] sm:$0xff] }
 0x491   : > { %v1950_v3 = vld [vmem:[%s5719_s7 + $0x528] sm:$0xff] }
 0x492   : > { %3545 = vmatpush3.bf16.msra.mxu0 %v3544_v17  ;;  %3561 = vmatpush3.bf16.msra.mxu1 %v3560_v21  ;;  %v3590_v17 = vpack.c.bf16 %v1936_v7, %v1935_v6  ;;  %v1919_v21 = vld [vmem:[%s5719_s7 + $0x430] sm:$0xff]  ;;  %v1944_v6 = vld [vmem:[%s5719_s7 + $0x4f8] sm:$0xff] }
 0x493   : > { %v3797_v41 = vpop.eup %3796  ;;  %3563 = vmatprep.subr.bf16.mxu1 %v3562_v24  ;;  %3579 = vmatprep.subr.bf16.mxu0 %v3578_v25  ;;  %v1937_v24 = vld [vmem:[%s5719_s7 + $0x4c0] sm:$0xff]  ;;  %v1938_v25 = vld [vmem:[%s5719_s7 + $0x4c8] sm:$0xff]  ;;  %v3592_v34 = vpack.c.bf16 %v1920_v22, %v1919_v21  ;;  %v1967_v7 = vld [vmem:[%s5719_s7 + $0x5b0] sm:$0xff] }
 0x494   : > { %v3799_v47 = vpop.eup %3798  ;;  %2315 = vmatprep.mubr.f32.mxu1 %v3797_v41  ;;  %v3594_v44 = vpack.c.bf16 %v1938_v25, %v1937_v24  ;;  %v1964_v41 = vld [vmem:[%s5719_s7 + $0x598] sm:$0xff]  ;;  %v1951_v22 = vld [vmem:[%s5719_s7 + $0x530] sm:$0xff]  ;;  %v1969_v25 = vld [vmem:[%s5719_s7 + $0x5c0] sm:$0xff] }
 0x495   : > { %2246 = vmatmul.mubr.f32.vlgmr.msra.gmra.mrb[12].mxu0 %v3799_v47  ;;  %v1506_v53 = vpop.f32.mrb[6].mxu1  ;;  %v3801_v54 = vpop.eup %3800  ;;  %v3614_v51 = vpack.c.bf16 %v1964_v41, %v1963_v8  ;;  %v1952_v24 = vld [vmem:[%s5719_s7 + $0x538] sm:$0xff]  ;;  %v1995_v8 = vld [vmem:[%s5719_s7 + $0x690] sm:$0xff] }
 0x496   : > { %v5238_v5 = vadd.f32 %v1700_v52, %v1506_v53  ;;  %3565 = vmatpush3.bf16.msra.mxu1 %v3564_v38  ;;  %3581 = vmatpush3.bf16.msra.mxu0 %v3580_v39  ;;  %v1508_v55 = vpop.f32.mrb[7].mxu1  ;;  %v1945_v52 = vld [vmem:[%s5719_s7 + $0x500] sm:$0xff]  ;;  %v1946_v38 = vld [vmem:[%s5719_s7 + $0x508] sm:$0xff]  ;;  %v1939_v39 = vld [vmem:[%s5719_s7 + $0x4d0] sm:$0xff]  ;;  %v3803_v47 = vpop.eup %3802 }
 0x497   : > { %2385 = vmatprep.mubr.f32.mxu0 %v3801_v54  ;;  %v3732_v45 = vadd.f32 %v1704_v42, %v1508_v55  ;;  %3567 = vmatprep.subr.bf16.mxu1 %v3566_v43  ;;  %v1692_v42 = vrot.slane %v4985_v1, %v4107_v32  ;;  %v3596_v43 = vpack.c.bf16 %v1922_v29, %v1921_v36  ;;  %v1947_v32 = vld [vmem:[%s5719_s7 + $0x510] sm:$0xff]  ;;  %v1942_v53 = vld [vmem:[%s5719_s7 + $0x4e8] sm:$0xff]  ;;  %v1965_v54 = vld [vmem:[%s5719_s7 + $0x5a0] sm:$0xff] }
 0x498   : > { %3583 = vmatprep.subr.bf16.mxu0 %v3582_v48  ;;  %v3612_v20 = vpack.c.bf16 %v1946_v38, %v1945_v52  ;;  %v3598_v48 = vpack.c.bf16 %v1940_v0, %v1939_v39  ;;  %v1966_v55 = vld [vmem:[%s5719_s7 + $0x5a8] sm:$0xff]  ;;  %v3602_v19 = vpack.c.bf16 %v1942_v53, %v1941_v49  ;;  %v3624_v36 = vpack.c.bf16 %v1952_v24, %v1951_v22  ;;  %v1977_v52 = vld [vmem:[%s5719_s7 + $0x600] sm:$0xff]  ;;  %v1971_v39 = vld [vmem:[%s5719_s7 + $0x5d0] sm:$0xff] }
 0x499   : > { %3804 = vtanh.f32 %v3732_v45  ;;  %v3729_v58 = vadd.f32 %v1692_v42, %v5006_v18  ;;  %v3618_v18 = vpack.c.bf16 %v1966_v55, %v1965_v54  ;;  %v1954_v29 = vld [vmem:[%s5719_s7 + $0x548] sm:$0xff]  ;;  %v1972_v0 = vld [vmem:[%s5719_s7 + $0x5d8] sm:$0xff]  ;;  %v1720_v49 = vrot.slane %v4985_v1, %v1687_v14  ;;  %v1997_v53 = vld [vmem:[%s5719_s7 + $0x6a0] sm:$0xff] }
 0x49a   : > { %3569 = vmatpush3.bf16.msra.mxu1 %v3568_v56  ;;  %3585 = vmatpush3.bf16.msra.mxu0 %v3584_v57  ;;  %v3600_v57 = vpack.c.bf16 %v1924_v35, %v1923_v46  ;;  %v1978_v38 = vld [vmem:[%s5719_s7 + $0x608] sm:$0xff]  ;;  %v1996_v41 = vld [vmem:[%s5719_s7 + $0x698] sm:$0xff]  ;;  %v3630_v35 = vpack.c.bf16 %v1972_v0, %v1971_v39  ;;  %v1957_v1 = vld [vmem:[%s5719_s7 + $0x560] sm:$0xff] }
 0x49b   : > { %3571 = vmatprep.subr.bf16.mxu1 %v3570_v60  ;;  %3587 = vmatprep.subr.bf16.mxu0 %v3586_v61  ;;  %v3616_v60 = vpack.c.bf16 %v1948_v23, %v1947_v32  ;;  %v1925_v61 = vld [vmem:[%s5719_s7 + $0x460] sm:$0xff]  ;;  %3806 = vtanh.f32 %v3729_v58  ;;  %v1956_v46 = vld [vmem:[%s5719_s7 + $0x558] sm:$0xff]  ;;  %v1998_v54 = vld [vmem:[%s5719_s7 + $0x6a8] sm:$0xff] }
 0x49c   : > { %3808 = vtanh.f32 %v5077_v9  ;;  %v1953_v9 = vld [vmem:[%s5719_s7 + $0x540] sm:$0xff]  ;;  %v1958_v14 = vld [vmem:[%s5719_s7 + $0x568] sm:$0xff]  ;;  %v3650_v58 = vpack.c.bf16 %v1998_v54, %v1997_v53  ;;  %v1987_v39 = vld [vmem:[%s5719_s7 + $0x650] sm:$0xff] }
 0x49d   : > { %v3628_v42 = vpack.c.bf16 %v1954_v29, %v1953_v9  ;;  %v1973_v32 = vld [vmem:[%s5719_s7 + $0x5e0] sm:$0xff]  ;;  %3810 = vtanh.f32 %v5238_v5  ;;  %v1983_v5 = vld [vmem:[%s5719_s7 + $0x630] sm:$0xff]  ;;  %v2028_v29 = vld [vmem:[%s5719_s7 + $0x798] sm:$0xff] }
 0x49e   : > { %3573 = vmatpush3.bf16.msra.mxu1 %v3572_v10  ;;  %3589 = vmatpush3.bf16.msra.mxu0 %v3588_v12  ;;  %v1968_v10 = vld [vmem:[%s5719_s7 + $0x5b8] sm:$0xff]  ;;  %v3604_v12 = vpack.c.bf16 %v1926_v62, %v1925_v61  ;;  %v1982_v61 = vld [vmem:[%s5719_s7 + $0x628] sm:$0xff]  ;;  %v1975_v62 = vld [vmem:[%s5719_s7 + $0x5f0] sm:$0xff] }
 0x49f   : > { %3575 = vmatprep.subr.bf16.mxu1 %v3574_v16  ;;  %3591 = vmatprep.subr.bf16.mxu0 %v3590_v17  ;;  %v1928_v16 = vld [vmem:[%s5719_s7 + $0x478] sm:$0xff]  ;;  %v3606_v17 = vpack.c.bf16 %v1944_v6, %v1943_v4  ;;  %v3622_v21 = vpack.c.bf16 %v1968_v10, %v1967_v7  ;;  %v3636_v4 = vpack.c.bf16 %v1958_v14, %v1957_v1  ;;  %v2003_v9 = vld [vmem:[%s5719_s7 + $0x6d0] sm:$0xff] }
 0x4a0   : > { %v1960_v7 = vld [vmem:[%s5719_s7 + $0x578] sm:$0xff]  ;;  %v2031_v14 = vld [vmem:[%s5719_s7 + $0x7b0] sm:$0xff] }
 0x4a1   : > { %v1988_v0 = vld [vmem:[%s5719_s7 + $0x658] sm:$0xff] }
 0x4a2   : > { %3577 = vmatpush3.bf16.msra.mxu1 %v3576_v33  ;;  %3593 = vmatpush3.bf16.msra.mxu0 %v3592_v34  ;;  %v1994_v33 = vld [vmem:[%s5719_s7 + $0x688] sm:$0xff]  ;;  %v3608_v34 = vpack.c.bf16 %v1928_v16, %v1927_v15  ;;  %v2001_v15 = vld [vmem:[%s5719_s7 + $0x6c0] sm:$0xff]  ;;  %v2008_v1 = vld [vmem:[%s5719_s7 + $0x6f8] sm:$0xff] }
 0x4a3   : > { %3595 = vmatprep.subr.bf16.mxu0 %v3594_v44  ;;  %3611 = vmatprep.subr.bf16.mxu1 %v3610_v37  ;;  %v3805_v50 = vpop.eup %3804  ;;  %v3626_v44 = vpack.c.bf16 %v1970_v26, %v1969_v25  ;;  %v3642_v37 = vpack.c.bf16 %v1994_v33, %v1993_v27  ;;  %v2002_v16 = vld [vmem:[%s5719_s7 + $0x6c8] sm:$0xff]  ;;  %v1985_v25 = vld [vmem:[%s5719_s7 + $0x640] sm:$0xff] }
 0x4a4   : > { %v3658_v26 = vpack.c.bf16 %v2002_v16, %v2001_v15  ;;  %v1986_v33 = vld [vmem:[%s5719_s7 + $0x648] sm:$0xff] }
 0x4a5   : > { %2316 = vmatmul.mubr.f32.vlgmr.msra.gmra.mrb[12].mxu1 %v3803_v47  ;;  %v1648_v56 = vpop.f32.mrb[8].mxu1  ;;  %v1979_v47 = vld [vmem:[%s5719_s7 + $0x610] sm:$0xff]  ;;  %v3807_v23 = vpop.eup %3806 }
 0x4a6   : > { %v5340_v59 = vadd.f32 %v4990_v2, %v1648_v56  ;;  %3597 = vmatpush3.bf16.msra.mxu0 %v3596_v43  ;;  %3613 = vmatpush3.bf16.msra.mxu1 %v3612_v20  ;;  %v5342_v45 = vpop.f32.mrb[9].mxu1  ;;  %v1949_v2 = vld [vmem:[%s5719_s7 + $0x520] sm:$0xff]  ;;  %v3644_v43 = vpack.c.bf16 %v1978_v38, %v1977_v52  ;;  %v1955_v20 = vld [vmem:[%s5719_s7 + $0x550] sm:$0xff]  ;;  %v3809_v55 = vpop.eup %3808  ;;  %v3660_v52 = vpack.c.bf16 %v1986_v33, %v1985_v25  ;;  %v2038_v25 = vld [vmem:[%s5719_s7 + $0x7e8] sm:$0xff] }
 0x4a7   : > { %2455 = vmatprep.mubr.f32.mxu1 %v3805_v50  ;;  %3599 = vmatprep.subr.bf16.mxu0 %v3598_v48  ;;  %v3620_v13 = vpack.c.bf16 %v1950_v3, %v1949_v2  ;;  %v1980_v48 = vld [vmem:[%s5719_s7 + $0x618] sm:$0xff]  ;;  %v3646_v50 = vpack.c.bf16 %v1996_v41, %v1995_v8  ;;  %v3632_v31 = vpack.c.bf16 %v1956_v46, %v1955_v20  ;;  %v1999_v2 = vld [vmem:[%s5719_s7 + $0x6b0] sm:$0xff]  ;;  %v3811_v20 = vpop.eup %3810  ;;  %v2021_v33 = vld [vmem:[%s5719_s7 + $0x760] sm:$0xff] }
 0x4a8   : > { %3615 = vmatprep.subr.bf16.mxu1 %v3614_v51  ;;  %v1974_v51 = vld [vmem:[%s5719_s7 + $0x5e8] sm:$0xff]  ;;  %v3648_v56 = vpack.c.bf16 %v1980_v48, %v1979_v47  ;;  %v2000_v3 = vld [vmem:[%s5719_s7 + $0x6b8] sm:$0xff]  ;;  %v2011_v41 = vld [vmem:[%s5719_s7 + $0x710] sm:$0xff] }
 0x4a9   : > { %v2029_v47 = vld [vmem:[%s5719_s7 + $0x7a0] sm:$0xff]  ;;  %v2030_v48 = vld [vmem:[%s5719_s7 + $0x7a8] sm:$0xff] }
 0x4aa   : > { %3601 = vmatpush3.bf16.msra.mxu0 %v3600_v57  ;;  %3617 = vmatpush3.bf16.msra.mxu1 %v3616_v60  ;;  %v3634_v57 = vpack.c.bf16 %v1974_v51, %v1973_v32  ;;  %v1981_v60 = vld [vmem:[%s5719_s7 + $0x620] sm:$0xff]  ;;  %v1990_v51 = vld [vmem:[%s5719_s7 + $0x668] sm:$0xff]  ;;  %v3682_v54 = vpack.c.bf16 %v2030_v48, %v2029_v47 }
 0x4ab   : > { %3603 = vmatprep.subr.bf16.mxu0 %v3602_v19  ;;  %3619 = vmatprep.subr.bf16.mxu1 %v3618_v18  ;;  %v3736_v19 = vadd.f32 %v1720_v49, %v5342_v45  ;;  %v1976_v18 = vld [vmem:[%s5719_s7 + $0x5f8] sm:$0xff]  ;;  %v3652_v6 = vpack.c.bf16 %v1982_v61, %v1981_v60  ;;  %v1959_v45 = vld [vmem:[%s5719_s7 + $0x570] sm:$0xff] }
 0x4ac   : > { %v3638_v10 = vpack.c.bf16 %v1976_v18, %v1975_v62  ;;  %v3640_v22 = vpack.c.bf16 %v1960_v7, %v1959_v45  ;;  %v1991_v61 = vld [vmem:[%s5719_s7 + $0x670] sm:$0xff]  ;;  %v1992_v18 = vld [vmem:[%s5719_s7 + $0x678] sm:$0xff] }
 0x4ad   : > { %3812 = vtanh.f32 %v3736_v19 }
 0x4ae   : > { %3605 = vmatpush3.bf16.msra.mxu0 %v3604_v12  ;;  %3621 = vmatpush3.bf16.msra.mxu1 %v3620_v13  ;;  %v3654_v12 = vpack.c.bf16 %v2000_v3, %v1999_v2  ;;  %v1984_v13 = vld [vmem:[%s5719_s7 + $0x638] sm:$0xff]  ;;  %3814 = vtanh.f32 %v5069_v63  ;;  %v2015_v63 = vld [vmem:[%s5719_s7 + $0x730] sm:$0xff]  ;;  %v2033_v3 = vld [vmem:[%s5719_s7 + $0x7c0] sm:$0xff] }
 0x4af   : > { %3607 = vmatprep.subr.bf16.mxu0 %v3606_v17  ;;  %3623 = vmatprep.subr.bf16.mxu1 %v3622_v21  ;;  %v2025_v17 = vld [vmem:[%s5719_s7 + $0x780] sm:$0xff]  ;;  %v2026_v21 = vld [vmem:[%s5719_s7 + $0x788] sm:$0xff]  ;;  %v3656_v24 = vpack.c.bf16 %v1984_v13, %v1983_v5  ;;  %v2016_v2 = vld [vmem:[%s5719_s7 + $0x738] sm:$0xff]  ;;  %3816 = vtanh.f32 %v5340_v59 }
 0x4b0   : > { %v3674_v27 = vpack.c.bf16 %v2026_v21, %v2025_v17  ;;  %v3688_v45 = vpack.c.bf16 %v2016_v2, %v2015_v63  ;;  %v2035_v5 = vld [vmem:[%s5719_s7 + $0x7d0] sm:$0xff]  ;;  %v2036_v13 = vld [vmem:[%s5719_s7 + $0x7d8] sm:$0xff] }
 0x4b1   : > { %v3694_v16 = vpack.c.bf16 %v2036_v13, %v2035_v5  ;;  %v2019_v17 = vld [vmem:[%s5719_s7 + $0x750] sm:$0xff]  ;;  %v2020_v21 = vld [vmem:[%s5719_s7 + $0x758] sm:$0xff]  ;;  %v2615_v5 = vld [vmem:[%s5720_s8 + $0x20] sm:$0xff] }
 0x4b2   : > { %3609 = vmatpush3.bf16.msra.mxu0 %v3608_v34  ;;  %3625 = vmatpush3.bf16.msra.mxu1 %v3624_v36  ;;  %v2009_v34 = vld [vmem:[%s5719_s7 + $0x700] sm:$0xff]  ;;  %v2010_v36 = vld [vmem:[%s5719_s7 + $0x708] sm:$0xff] }
 0x4b3   : > { %3627 = vmatprep.subr.bf16.mxu1 %v3626_v44  ;;  %3643 = vmatprep.subr.bf16.mxu0 %v3642_v37  ;;  %v2004_v44 = vld [vmem:[%s5719_s7 + $0x6d8] sm:$0xff]  ;;  %v2027_v37 = vld [vmem:[%s5719_s7 + $0x790] sm:$0xff]  ;;  %v3676_v38 = vpack.c.bf16 %v2010_v36, %v2009_v34  ;;  %v2022_v34 = vld [vmem:[%s5719_s7 + $0x768] sm:$0xff] }
 0x4b4   : > { %v3662_v8 = vpack.c.bf16 %v2004_v44, %v2003_v9  ;;  %v3678_v46 = vpack.c.bf16 %v2028_v29, %v2027_v37  ;;  %v2039_v36 = vld [vmem:[%s5719_s7 + $0x7f0] sm:$0xff]  ;;  %v2040_v9 = vld [vmem:[%s5719_s7 + $0x7f8] sm:$0xff]  ;;  %v3700_v44 = vpack.c.bf16 %v2022_v34, %v2021_v33  ;;  %v3822_v33 = vld [vmem:[#allocation3] sm:$0x1] }
 0x4b5   : > { %2386 = vmatmul.mubr.f32.vlgmr.msra.gmra.mrb[14].mxu0 %v3807_v23  ;;  %v3664_v23 = vpack.c.bf16 %v1988_v0, %v1987_v39  ;;  %v3702_v37 = vpack.c.bf16 %v2040_v9, %v2039_v36  ;;  %v2023_v29 = vld [vmem:[%s5719_s7 + $0x770] sm:$0xff]  ;;  %v2713_v36 = vand.u32 127, %v116_v30 }
 0x4b6   : > { %3629 = vmatpush3.bf16.msra.mxu1 %v3628_v42  ;;  %3645 = vmatpush3.bf16.msra.mxu0 %v3644_v43  ;;  %v2012_v42 = vld [vmem:[%s5719_s7 + $0x718] sm:$0xff]  ;;  %v2005_v43 = vld [vmem:[%s5719_s7 + $0x6e0] sm:$0xff] }
 0x4b7   : > { %2525 = vmatprep.mubr.f32.mxu0 %v3809_v55  ;;  %3631 = vmatprep.subr.bf16.mxu1 %v3630_v35  ;;  %v2006_v35 = vld [vmem:[%s5719_s7 + $0x6e8] sm:$0xff]  ;;  %v3813_v32 = vpop.eup %3812  ;;  %v3680_v49 = vpack.c.bf16 %v2012_v42, %v2011_v41  ;;  %v2013_v55 = vld [vmem:[%s5719_s7 + $0x720] sm:$0xff] }
 0x4b8   : > { %3647 = vmatprep.subr.bf16.mxu0 %v3646_v50  ;;  %v1989_v50 = vld [vmem:[%s5719_s7 + $0x660] sm:$0xff]  ;;  %v3666_v53 = vpack.c.bf16 %v2006_v35, %v2005_v43 }
 0x4ba   : > { %3633 = vmatpush3.bf16.msra.mxu1 %v3632_v31  ;;  %3649 = vmatpush3.bf16.msra.mxu0 %v3648_v56  ;;  %v2014_v31 = vld [vmem:[%s5719_s7 + $0x728] sm:$0xff]  ;;  %v2007_v56 = vld [vmem:[%s5719_s7 + $0x6f0] sm:$0xff] }
 0x4bb   : > { %3635 = vmatprep.subr.bf16.mxu1 %v3634_v57  ;;  %3651 = vmatprep.subr.bf16.mxu0 %v3650_v58  ;;  %v2032_v57 = vld [vmem:[%s5719_s7 + $0x7b8] sm:$0xff]  ;;  %v3668_v58 = vpack.c.bf16 %v1990_v51, %v1989_v50  ;;  %v3684_v60 = vpack.c.bf16 %v2014_v31, %v2013_v55  ;;  %v3670_v62 = vpack.c.bf16 %v2008_v1, %v2007_v56 }
 0x4bc   : > { %v3686_v19 = vpack.c.bf16 %v2032_v57, %v2031_v14 }
 0x4be   : > { %3637 = vmatpush3.bf16.msra.mxu1 %v3636_v4  ;;  %3653 = vmatpush3.bf16.msra.mxu0 %v3652_v6  ;;  %v2034_v4 = vld [vmem:[%s5719_s7 + $0x7c8] sm:$0xff]  ;;  %v3672_v6 = vpack.c.bf16 %v1992_v18, %v1991_v61 }
 0x4bf   : > { %3639 = vmatprep.subr.bf16.mxu1 %v3638_v10  ;;  %3655 = vmatprep.subr.bf16.mxu0 %v3654_v12  ;;  %v3690_v7 = vpack.c.bf16 %v2034_v4, %v2033_v3  ;;  %v2017_v10 = vld [vmem:[%s5719_s7 + $0x740] sm:$0xff]  ;;  %v2018_v12 = vld [vmem:[%s5719_s7 + $0x748] sm:$0xff] }
 0x4c0   : > { %v3692_v15 = vpack.c.bf16 %v2018_v12, %v2017_v10  ;;  %v2613_v10 = vld [vmem:[%s5720_s8 + $0x10] sm:$0xff]  ;;  %v2614_v12 = vld [vmem:[%s5720_s8 + $0x18] sm:$0xff] }
 0x4c1   : > { %v3710_v13 = vpack.c.bf16 %v2614_v12, %v2613_v10 }
 0x4c2   : > { %3641 = vmatpush3.bf16.msra.mxu1 %v3640_v22  ;;  %3657 = vmatpush3.bf16.msra.mxu0 %v3656_v24  ;;  %v3815_v22 = vpop.eup %3814  ;;  %v2037_v24 = vld [vmem:[%s5719_s7 + $0x7e0] sm:$0xff] }
 0x4c3   : > { %3659 = vmatprep.subr.bf16.mxu0 %v3658_v26  ;;  %3675 = vmatprep.subr.bf16.mxu1 %v3674_v27  ;;  %v3696_v26 = vpack.c.bf16 %v2020_v21, %v2019_v17  ;;  %v3698_v27 = vpack.c.bf16 %v2038_v25, %v2037_v24  ;;  %v3817_v39 = vpop.eup %3816  ;;  %v2617_v17 = vld [vmem:[%s5720_s8 + $0x30] sm:$0xff]  ;;  %v2618_v21 = vld [vmem:[%s5720_s8 + $0x38] sm:$0xff] }
 0x4c5   : > { %2456 = vmatmul.mubr.f32.vlgmr.msra.gmra.mrb[14].mxu1 %v3811_v20 }
 0x4c6   : > { %3661 = vmatpush3.bf16.msra.mxu0 %v3660_v52  ;;  %3677 = vmatpush3.bf16.msra.mxu1 %v3676_v38  ;;  %v2024_v52 = vld [vmem:[%s5719_s7 + $0x778] sm:$0xff] }
 0x4c7   : > { %2595 = vmatprep.mubr.f32.mxu1 %v3813_v32  ;;  %3663 = vmatprep.subr.bf16.mxu0 %v3662_v8  ;;  %v3704_v38 = vpack.c.bf16 %v2024_v52, %v2023_v29 }
 0x4c8   : > { %3679 = vmatprep.subr.bf16.mxu1 %v3678_v46 }
 0x4ca   : > { %3665 = vmatpush3.bf16.msra.mxu0 %v3664_v23  ;;  %3681 = vmatpush3.bf16.msra.mxu1 %v3680_v49 }
 0x4cb   : > { %3667 = vmatprep.subr.bf16.mxu0 %v3666_v53  ;;  %3683 = vmatprep.subr.bf16.mxu1 %v3682_v54 }
 0x4ce   : > { %3669 = vmatpush3.bf16.msra.mxu0 %v3668_v58  ;;  %3685 = vmatpush3.bf16.msra.mxu1 %v3684_v60 }
 0x4cf   : > { %3671 = vmatprep.subr.bf16.mxu0 %v3670_v62  ;;  %3687 = vmatprep.subr.bf16.mxu1 %v3686_v19 }
 0x4d2   : > { %3673 = vmatpush3.bf16.msra.mxu0 %v3672_v6  ;;  %3689 = vmatpush3.bf16.msra.mxu1 %v3688_v45  ;;  %v2611_v6 = vld [vmem:[%s5720_s8] sm:$0xff]  ;;  %v2612_v45 = vld [vmem:[%s5720_s8 + $0x8] sm:$0xff] }
 0x4d3   : > { %3691 = vmatprep.subr.bf16.mxu1 %v3690_v7  ;;  %3706 = vmatprep.subr.bf16.mxu0 %v3864_v28  ;;  %v3707_v7 = vpack.c.bf16 %v2612_v45, %v2611_v6 }
 0x4d5   : > { %2526 = vmatmul.mubr.f32.vlgmr.msra.gmra.mrb[16].mxu0 %v3815_v22  ;;  %v3716_v22 = vpack.c.bf16 %v2618_v21, %v2617_v17 }
 0x4d6   : > { %3693 = vmatpush3.bf16.msra.mxu1 %v3692_v15  ;;  %3226 = vmatprep.mubr.msk.f32.mxu0 %vm3865_vm5, %v3860_v11  ;;  %v2616_v15 = vld [vmem:[%s5720_s8 + $0x28] sm:$0xff] }
 0x4d7   : > { %3695 = vmatprep.subr.bf16.mxu1 %v3694_v16  ;;  %3708 = vmatpush3.bf16.msra.mxu0 %v3707_v7  ;;  %v3713_v16 = vpack.c.bf16 %v2616_v15, %v2615_v5 }
 0x4d8   : > { %3709 = vmatprep.subr.bf16.mxu0 %v3864_v28 }
 0x4da   : > { %3697 = vmatpush3.bf16.msra.mxu1 %v3696_v26 }
 0x4db   : > { %3699 = vmatprep.subr.bf16.mxu1 %v3698_v27  ;;  %3711 = vmatpush3.bf16.msra.mxu0 %v3710_v13 }
 0x4dc   : > { %3712 = vmatprep.subr.bf16.mxu0 %v3864_v28 }
 0x4de   : > { %3701 = vmatpush3.bf16.msra.mxu1 %v3700_v44  ;;  %v2899_v44 = vld [vmem:[%s5721_s9] ss:$0 sm:$0xff] }
 0x4df   : > { %3703 = vmatprep.subr.bf16.mxu1 %v3702_v37  ;;  %3714 = vmatpush3.bf16.msra.mxu0 %v3713_v16  ;;  %v2694_v37 = vpop.permute.xlu1 %2693 }
 0x4e0   : > { %3715 = vmatprep.subr.bf16.mxu0 %v3864_v28  ;;  %v2696_v52 = vadd.f32 %v2694_v37, %v4120_v40  ;;  %v2742_v40 = vld [vmem:[%s5713_s1] sm:$0xff] }
 0x4e2   : > { %3705 = vmatpush3.bf16.msra.mxu1 %v3704_v38 }
 0x4e3   : > { %3717 = vmatpush3.bf16.msra.mxu0 %v3716_v22 }
 0x4e4   : > { %3718 = vmatprep.subr.bf16.mxu0 %v3864_v28 }
 0x4e5   : > { %2596 = vmatmul.mubr.f32.vlgmr.msra.gmra.mrb[16].mxu1 %v3817_v39 }
 0x548   : > { %v2939_v0 = vpop.f32.mrb[10].mxu0 }
 0x549   : > { %v2940_v59 = vpop.f32.mrb[11].mxu0 }
 0x54a   : > { %v2941_v8 = vadd.f32 %v2940_v59, %v2939_v0 }
 0x558   : > { %v2974_v41 = vpop.f32.mrb[10].mxu1 }
 0x559   : > { %v2975_v42 = vpop.f32.mrb[11].mxu1 }
 0x55a   : > { %v2976_v43 = vadd.f32 %v2975_v42, %v2974_v41 }
 0x55c   : > { %v2178_v20 = vadd.f32 %v2976_v43, %v2941_v8 }
 0x568   : > { %v3009_v46 = vpop.f32.mrb[12].mxu0 }
 0x569   : > { %v3010_v35 = vpop.f32.mrb[13].mxu0 }
 0x56a   : > { %v3011_v47 = vadd.f32 %v3010_v35, %v3009_v46 }
 0x56c   : > { %v2248_v48 = vadd.f32 %v3011_v47, %v2178_v20 }
 0x578   : > { %v3044_v32 = vpop.f32.mrb[12].mxu1 }
 0x579   : > { %v3045_v23 = vpop.f32.mrb[13].mxu1 }
 0x57a   : > { %v3046_v49 = vadd.f32 %v3045_v23, %v3044_v32  ;;  %v2743_v32 = vld [vmem:[%s5713_s1 + $0x8] sm:$0xff] }
 0x57b   : > { %v3719_v23 = vpack.c.bf16 %v2743_v32, %v2742_v40 }
 0x57c   : > { %v2318_v50 = vadd.f32 %v3046_v49, %v2248_v48 }
 0x588   : > { %v3079_v51 = vpop.f32.mrb[14].mxu0 }
 0x589   : > { %v3080_v53 = vpop.f32.mrb[15].mxu0 }
 0x58a   : > { %v3081_v54 = vadd.f32 %v3080_v53, %v3079_v51 }
 0x58c   : > { %v2388_v55 = vadd.f32 %v3081_v54, %v2318_v50 }
 0x598   : > { %v3114_v31 = vpop.f32.mrb[14].mxu1 }
 0x599   : > { %v3115_v56 = vpop.f32.mrb[15].mxu1 }
 0x59a   : > { %v3116_v1 = vadd.f32 %v3115_v56, %v3114_v31 }
 0x59c   : > { %v2458_v14 = vadd.f32 %v3116_v1, %v2388_v55 }
 0x5a8   : > { %v3149_v57 = vpop.f32.mrb[16].mxu0 }
 0x5a9   : > { %v3150_v58 = vpop.f32.mrb[17].mxu0 }
 0x5aa   : > { %v3151_v60 = vadd.f32 %v3150_v58, %v3149_v57 }
 0x5ac   : > { %v2528_v61 = vadd.f32 %v3151_v60, %v2458_v14 }
 0x5b8   : > { %v3184_v62 = vpop.f32.mrb[16].mxu1 }
 0x5b9   : > { %v3185_v19 = vpop.f32.mrb[17].mxu1 }
 0x5ba   : > { %v3186_v18 = vadd.f32 %v3185_v19, %v3184_v62 }
 0x5bc   : > { %v2598_v63 = vadd.f32 %v3186_v18, %v2528_v61 }
 0x5be   : > { %v2601_v2 = vmul.f32 1.442695, %v2598_v63 }
 0x5c0   : > { %3818 = vpow2.f32 %v2601_v2 }
 0x5ca   : > { %v3819_v3 = vpop.eup %3818 }
 0x5cb   : > { %v2603_v4 = vsel %vm66_vm1, %v3819_v3, 0.0 }
 0x5cc   : > { %2604 = vadd.xlane.f32.xlu0 %v2603_v4 }
 0x5e2   : > { %2719 = vrot.lane.b32.xlu0 %v2713_v36, %s3863_s24 }
 0x659   : > { %v2605_v24 = vpop.xlane.xlu0 %2604 }
 0x65a   : > { %v2606_v25 = vadd.f32 1e-10, %v2605_v24 }
 0x65c   : > { %3820 = vrcp.f32 %v2606_v25 }
 0x65d   : > { %v2720_v59 = vpop.permute.xlu0 %2719 }
 0x666   : > { %v3821_v26 = vpop.eup %3820 }
 0x667   : > { %v2608_v27 = vmul.f32 %v3821_v26, %v3819_v3 }
 0x669   : > { %v2609_v34 = vadd.f32 %v3822_v33, %v2608_v27  ;;  %3227 = vmatmul.mubr.msk.f32.vlgmr.msra.gmra.mrb[18].mxu0 %vm40_vm0, %v2608_v27 }
 0x66a   : > { %3233 = vmatprep.mubr.msk.f32.mxu0 %vm3865_vm5, %v3860_v11  ;;  %3720 = vmatpush3.bf16.msra.mxu0 %v3719_v23 }
 0x66b   : > { %2610 = vst.msk [vmem:[#allocation3] sm:$0x1] %vm66_vm1, %v2609_v34 }
 0x73c   : > { %v2688_v9 = vpop.f32.mrb[18].mxu0 }
 0x73d   : > { %2698 = vrot.lane.b32.xlu1 %v2688_v9, %s3863_s24  ;;  %v3228_v28 = vpop.f32.mrb[19].mxu0 }
 0x741   : > { %2708 = vrot.lane.b32.xlu1 %v2899_v44, %s3863_s24 }
 0x7af   : > { %v2699_v29 = vpop.permute.xlu1 %2698 }
 0x7b0   : > { %v2701_v38 = vadd.f32 %v2699_v29, %v2696_v52 }
 0x7b3   : > { %v2709_v39 = vpop.permute.xlu1 %2708 }
 0x7b4   : > { %v2711_v30 = vadd.f32 %v2709_v39, %v2701_v38 }
 0x7b6   : > { %v2715_v0 = vsel %vm2714_vm6, %v2711_v30, -inf }
 0x7b7   : > { %2716 = vmax.xlane.f32.xlu1 %v2715_v0 }
 0x844   : > { %v2717_v8 = vpop.xlane.xlu1 %2716 }
 0x845   : > { %vm2718_vm7 = vcmp.eq.f32.partialorder %v2711_v30, %v2717_v8 }
 0x846   : > { %v2721_v41 = vsel %vm2718_vm7, %v2720_v59, 16 }
 0x847   : > { %v2722_v42 = vsel %vm2714_vm6, %v2721_v41, 2147483647 }
 0x848   : > { %v2724_v43 = vshra.s32 %v2722_v42, 16  ;;  %v2723_v46 = vand.u32 65535, %v2722_v42 }
 0x84a   : > { %v2726_v20 = vcvt.s32.f32 %v2724_v43  ;;  %v2725_v47 = vcvt.s32.f32 %v2723_v46 }
 0x84c   : > { %2727 = vmin.xlane.f32.xlu1 %v2726_v20 }
 0x8d9   : > { %v2728_v35 = vpop.xlane.xlu1 %2727 }
 0x8da   : > { %vm2729_vm8 = vcmp.eq.f32.partialorder %v2726_v20, %v2728_v35  ;;  %v2734_v49 = vcvt.f32.s32 %v2728_v35 }
 0x8db   : > { %v2730_v48 = vsel %vm2729_vm8, %v2725_v47, inf }
 0x8dc   : > { %2731 = vmin.xlane.f32.xlu1 %v2730_v48  ;;  %v2735_v51 = vshll.u32 %v2734_v49, 16 }
 0x969   : > { %v2732_v50 = vpop.xlane.xlu1 %2731 }
 0x96a   : > { %v2733_v53 = vcvt.f32.s32 %v2732_v50 }
 0x96c   : > { %v2736_v54 = vadd.s32 %v2735_v51, %v2733_v53 }
 0x96e   : > { %2738 = vst.msk [vmem:[#allocation4] sm:$0x1] %vm2737_vm9, %v2736_v54  ;;  %vm2739_vm11 = vcmp.eq.s32.totalorder %v2713_v36, %v2736_v54 }
 0x96f   : > { %v2900_v55 = vsel %vm2739_vm11, 1.0, %v3860_v11 }
 0x970   : > { %3234 = vmatmul.mubr.msk.f32.vlgmr.msra.gmra.mrb[20].mxu0 %vm2744_vm10, %v2900_v55 }
 0x975   : > { %v2819_v31 = vld [vmem:[#allocation4] sm:$0x1] }
 0x976   : > { %3753 = vpush %v2819_v31 }
 0x9a7   : > { %s3754_s20 = spop %3753 }
 0x9a8   : > { %p2821_p1 = scmp.ne.s32.totalorder %s3754_s20, 0  ;;  %p2822_p2 = scmp.lt.s32.totalorder %s3754_s20, 16 }
 0x9aa   : > { %p5679_p3 = pnand %p2822_p2, %p2821_p1 }
 0x9ab   : > { %s2827_s26 = scalar_lea.vmem (!%p5679_p3), %s5722_s10, %s3855_s23  ;;  %s2829_s2 = scalar_lea.smem (!%p5679_p3), [#allocation6], %s3855_s23 }
 0x9ac   : > { %2828 = vst.msk [vmem:[%s2827_s26] sm:$0x1] (!%p5679_p3), %vm66_vm1, %v2608_v27  ;;  %2830 = sst [smem:[%s2829_s2]] (!%p5679_p3), %s3754_s20 }
 0x9ad   : > { %s2831_s27 = sld [smem:[#allocation9]] (!%p5679_p3) }
 0x9b3   : > { %s2832_s28 = sadd.s32 (!%p5679_p3), 1, %s2831_s27 }
 0x9b4   : > { %2833 = sst [smem:[#allocation9]] (!%p5679_p3), %s2832_s28 }
 0xa3e   : > { %2826 = sbr.rel (%p5679_p3) target bundleno = 2629 (0xa45), region = 56 }
 0xa43   : > { %v2814_v56 = vpop.f32.mrb[20].mxu0 }
 0xa44   : > { %2818 = vst.msk [vmem:[#allocation2] sm:$0x1] %vm73_vm2, %v2814_v56  ;;  %v3235_v1 = vpop.f32.mrb[21].mxu0 }
 0xa45 PF: > { %s3866_s29 = smov 1  }
 0xa46   : > { %3755 = sst [smem:[#allocation5]] (%p5679_p3), %s3866_s29 }
 0xa47 PF: > { %s91_s23 = sadd.s32 1, %s3855_s23  }
 0xa48   : > { %p88_p4 = scmp.ge.s32.totalorder %s91_s23, 200  }
 0xa49   :  { %s2846_s14 = sshll.u32 (%p88_p4), %s5723_s11, 4  ;;  %s2847_s14 = int_to_ptr.vmem [resolvable:$true] %s2846_s14 }
 0xa4a   :  { %90 = sbr.rel (!%p88_p4) target bundleno = 119 (0x77), region = 99  ;;  %s3823_s15 = scalar_lea.vmem (%p88_p4), %s2847_s14, 32 }
 0xa4b   :  { %p3824_p5 = scmp.ne.s32.totalorder (%p88_p4), %s2847_s14, %s3823_s15  ;;  %p3828_p6 = scmp.lt.s32.totalorder (%p88_p4), %s2847_s14, %s2847_s14 }
 0xa4c   :  { %p3829_p7 = scmp.lt.s32.totalorder (%p88_p4), %s3823_s15, %s3823_s15 }
 0xa4e   :  { %p3830_p8 = por (%p88_p4), %p3829_p7, %p3828_p6 }
 0xa50   :  { %p3831_p9 = pnand (%p88_p4), %p3830_p8, %p3824_p5 }
 0xa52   :  { %3834 = shalt.err (!%p3831_p9)
}
 0xa53   :  { %s3867_s16 = smov [#allocation6]   ;;  %s3835_s18 = scalar_lea.hbm %s5724_s12, 16 }
 0xa54   :  { %2849 = dma.smem_to_vmem %s3867_s16, 32, %s2847_s14, [#allocation8]  }
 0xa55   :  { %p3836_p10 = scmp.ne.s32.totalorder %s5724_s12, %s3835_s18  ;;  %p3839_p11 = scmp.lt.u32.totalorder %s3835_s18, %s5724_s12 }
 0xa57   :  { %p3841_p12 = pnand %p3839_p11, %p3836_p10 }
 0xa59   :  { %3844 = shalt.err (!%p3841_p12)
}
 0xa5a   :  { %s3868_s3 = smov [#allocation9]  }
 0xa5b   :  { %2857 = dma.smem_to_hbm %s3868_s3, 16, %s5724_s12, [#allocation7]  }
 0xa5c   :  { %3849 = dma.done.wait [#allocation8], 32  }
 0xa5d   :  { %3850 = vsyncadd [#allocation8], 4294967264 }
 0xa5e   :  { %3851 = dma.done.wait [#allocation7], 16  }
 0xa5f   :  { %3852 = vsyncadd [#allocation7], 4294967280 }
 0xa60   :  { %2866 = sfence }
 0xa61   :  { %2867 = vsyncpa [#allocation7], 1 }
 0xa62   :  { %2868 = vsyncpa [#allocation8], 1 }

</bundles_post_ra>
